<compile_context>
chip_gen: v6e
topology: v6e:2x2x1
jax: 0.10.0
libtpu: 0.0.40
codegen_flags: <defaults>
</compile_context>

<pallas_src>
import functools

import jax
import jax.numpy as jnp
from jax import lax
from jax.experimental import pallas as pl
from jax.experimental.pallas import tpu as pltpu


# --------------------------------------------------------------------------- #
# Pallas kernel: one time-chunk of the 3-layer LSTM + projection
# --------------------------------------------------------------------------- #
def decoder_lstm_kernel(x_ref, wih0_ref, b0_ref, whh0_ref,
                        w1_ref, b1_ref, w2_ref, b2_ref,
                        wproj_ref, bproj_ref,
                        out_ref,
                        h_ref, c_ref, xg0_ref, h2buf_ref):
    """PyTorch gate order (i, f, g, o); fused b_ih + b_hh biases.

    Ref shapes (all f32):
      x_ref    : (T_TILE*B, D_in)   streamed block, time-major rows
      wih0_ref : (D_in, 4H)   b0_ref : (1, 4H)   whh0_ref : (H, 4H)
      w1_ref   : (2H, 4H)     b1_ref : (1, 4H)   (layer 1, [W_ih; W_hh] fused)
      w2_ref   : (2H, 4H)     b2_ref : (1, 4H)   (layer 2)
      wproj_ref: (H, F_pad)   bproj_ref: (1, F_pad)
      out_ref  : (T_TILE*B, F_pad)  streamed block
      h_ref, c_ref : (3, B, H)      persistent recurrent state (scratch)
      xg0_ref  : (T_TILE*B, 4H)     hoisted layer-0 input gates (scratch)
      h2buf_ref: (T_TILE*B, H)      buffered top-layer hidden states (scratch)
    """
    _, B, H = h_ref.shape
    T_TILE = x_ref.shape[0] // B
    G = 4 * H
    f32 = jnp.float32

    # Zero the recurrent state at the start of the sequence.
    @pl.when(pl.program_id(0) == 0)
    def _():
        h_ref[...] = jnp.zeros_like(h_ref)
        c_ref[...] = jnp.zeros_like(c_ref)

    # Hoisted layer-0 input projection for the whole chunk: one tall matmul.
    xg0_ref[...] = (jnp.dot(x_ref[...], wih0_ref[...],
                            preferred_element_type=f32) + b0_ref[...])

    # Hoisted bias broadcasts (JAX does not CSE broadcast_in_dim inside loops).
    b1 = jnp.broadcast_to(b1_ref[...], (B, G))
    b2 = jnp.broadcast_to(b2_ref[...], (B, G))

    def gates_to_hc(gates, c_prev):
        i = jax.nn.sigmoid(gates[:, 0 * H:1 * H])
        f = jax.nn.sigmoid(gates[:, 1 * H:2 * H])
        g = jnp.tanh(gates[:, 2 * H:3 * H])
        o = jax.nn.sigmoid(gates[:, 3 * H:4 * H])
        c_new = f * c_prev + i * g
        h_new = o * jnp.tanh(c_new)
        return h_new, c_new

    def step(t, carry):
        h0, c0, h1, c1, h2, c2 = carry
        row = pl.multiple_of(t * B, B)          # sublane-aligned row offset

        # layer 0: input gates precomputed, one recurrent matmul on the path
        g0 = xg0_ref[pl.ds(row, B), :] + jnp.dot(
            h0, whh0_ref[...], preferred_element_type=f32)
        h0, c0 = gates_to_hc(g0, c0)

        # layers 1 & 2: fused [h_below, h_prev] @ [W_ih; W_hh] — one matmul each
        g1 = jnp.dot(jnp.concatenate([h0, h1], axis=-1), w1_ref[...],
                     preferred_element_type=f32) + b1
        h1, c1 = gates_to_hc(g1, c1)

        g2 = jnp.dot(jnp.concatenate([h1, h2], axis=-1), w2_ref[...],
                     preferred_element_type=f32) + b2
        h2, c2 = gates_to_hc(g2, c2)

        h2buf_ref[pl.ds(row, B), :] = h2        # off the serial critical path
        return (h0, c0, h1, c1, h2, c2)

    carry0 = (h_ref[0], c_ref[0], h_ref[1], c_ref[1], h_ref[2], c_ref[2])
    h0, c0, h1, c1, h2, c2 = lax.fori_loop(0, T_TILE, step, carry0, unroll=True)

    # Spill recurrent state back to persistent scratch once per chunk.
    h_ref[0] = h0; c_ref[0] = c0
    h_ref[1] = h1; c_ref[1] = c1
    h_ref[2] = h2; c_ref[2] = c2

    # Output projection: single batched matmul per chunk, lane-dense stores.
    out_ref[...] = (jnp.dot(h2buf_ref[...], wproj_ref[...],
                            preferred_element_type=f32)
                    + bproj_ref[...]).astype(out_ref.dtype)


# --------------------------------------------------------------------------- #
# Wrapper
# --------------------------------------------------------------------------- #
def _round_up(x, m):
    return ((x + m - 1) // m) * m


@functools.partial(jax.jit, static_argnames=("dim_freq", "t_tile"))
def decoder_forward(x, params, *, dim_freq, t_tile=8):
    """x: (B, T, dim_neck + dim_emb)  ->  (B, T, dim_freq)."""
    B, T, D_in = x.shape
    H = params["whh0"].shape[0]
    F_pad = params["wproj"].shape[1]

    B_pad = _round_up(max(B, 8), 8)        # 8-sublane batch padding
    T_pad = _round_up(T, t_tile)
    rows_per_chunk = t_tile * B_pad

    x_tm = jnp.transpose(x, (1, 0, 2)).astype(jnp.float32)          # (T, B, D)
    x_tm = jnp.pad(x_tm, ((0, T_pad - T), (0, B_pad - B), (0, 0)))
    x_2d = x_tm.reshape(T_pad * B_pad, D_in)                        # time-major rows

    grid = (T_pad // t_tile,)
    resident = pl.BlockSpec(memory_space=pltpu.MemorySpace.VMEM)    # whole-array weights

    out_2d = pl.pallas_call(
        decoder_lstm_kernel,
        out_shape=jax.ShapeDtypeStruct((T_pad * B_pad, F_pad), jnp.float32),
        grid=grid,
        in_specs=[
            pl.BlockSpec((rows_per_chunk, D_in), lambda i: (i, 0)),  # x (streamed)
            resident, resident, resident,                            # wih0, b0, whh0
            resident, resident, resident, resident,                  # w1, b1, w2, b2
            resident, resident,                                      # wproj, bproj
        ],
        out_specs=pl.BlockSpec((rows_per_chunk, F_pad), lambda i: (i, 0)),
        scratch_shapes=[
            pltpu.VMEM((3, B_pad, H), jnp.float32),                  # h state
            pltpu.VMEM((3, B_pad, H), jnp.float32),                  # c state
            pltpu.VMEM((rows_per_chunk, 4 * H), jnp.float32),        # layer-0 gates
            pltpu.VMEM((rows_per_chunk, H), jnp.float32),            # top-layer h buf
        ],
        compiler_params=pltpu.CompilerParams(
            dimension_semantics=("arbitrary",)),                     # serial in time
    )(x_2d,
      params["wih0"], params["b0"], params["whh0"],
      params["w1"], params["b1"], params["w2"], params["b2"],
      params["wproj"], params["bproj"])

    out = out_2d.reshape(T_pad, B_pad, F_pad)[:T, :B, :dim_freq]
    return jnp.transpose(out, (1, 0, 2))                             # (B, T, F)


# --------------------------------------------------------------------------- #
# Deterministic parameter init (PyTorch-style shapes, uniform(-1/sqrt(H), ...))
# --------------------------------------------------------------------------- #
def init_params(key, d_in, hidden, d_freq, f_pad):
    k = 1.0 / jnp.sqrt(hidden)
    keys = jax.random.split(key, 16)
    u = lambda kk, shape: jax.random.uniform(kk, shape, jnp.float32, -k, k)

    # PyTorch-layout weights: weight_ih_l{l} (4H, in_l), weight_hh_l{l} (4H, H)
    torch_params = []
    in_dims = [d_in, hidden, hidden]
    for l in range(3):
        torch_params.append(dict(
            w_ih=u(keys[4 * l + 0], (4 * hidden, in_dims[l])),
            w_hh=u(keys[4 * l + 1], (4 * hidden, hidden)),
            b_ih=u(keys[4 * l + 2], (4 * hidden,)),
            b_hh=u(keys[4 * l + 3], (4 * hidden,)),
        ))
    w_proj = u(keys[12], (d_freq, hidden))   # LinearNorm weight (out, in)
    b_proj = u(keys[13], (d_freq,))

    def fused(l):
        # [W_ih; W_hh] pre-transposed so gates = [x_or_h_below, h_prev] @ W
        return jnp.concatenate([torch_params[l]["w_ih"].T,
                                torch_params[l]["w_hh"].T], axis=0)

    # Pad the projection to a lane-dense width (F -> f_pad) with zeros.
    wproj_pad = jnp.zeros((hidden, f_pad), jnp.float32).at[:, :d_freq].set(w_proj.T)
    bproj_pad = jnp.zeros((1, f_pad), jnp.float32).at[0, :d_freq].set(b_proj)

    kparams = dict(
        wih0=torch_params[0]["w_ih"].T,                                     # (D_in, 4H)
        b0=(torch_params[0]["b_ih"] + torch_params[0]["b_hh"])[None, :],    # (1, 4H)
        whh0=torch_params[0]["w_hh"].T,                                     # (H, 4H)
        w1=fused(1),                                                        # (2H, 4H)
        b1=(torch_params[1]["b_ih"] + torch_params[1]["b_hh"])[None, :],
        w2=fused(2),                                                        # (2H, 4H)
        b2=(torch_params[2]["b_ih"] + torch_params[2]["b_hh"])[None, :],
        wproj=wproj_pad,                                                    # (H, F_pad)
        bproj=bproj_pad,                                                    # (1, F_pad)
    )
    return torch_params, kparams


# --------------------------------------------------------------------------- #
# Pure-JAX reference (mirrors torch.nn.LSTM + Linear) for verification
# --------------------------------------------------------------------------- #
def decoder_reference(x, torch_params, kparams, dim_freq):
    def lstm_layer(inp, p):
        B, T, _ = inp.shape
        H = p["w_hh"].shape[1]

        def cell(carry, x_t):
            h, c = carry
            gates = x_t @ p["w_ih"].T + p["b_ih"] + h @ p["w_hh"].T + p["b_hh"]
            i, f, g, o = jnp.split(gates, 4, axis=-1)
            i, f, o = jax.nn.sigmoid(i), jax.nn.sigmoid(f), jax.nn.sigmoid(o)
            g = jnp.tanh(g)
            c = f * c + i * g
            h = o * jnp.tanh(c)
            return (h, c), h

        init = (jnp.zeros((B, H)), jnp.zeros((B, H)))
        _, ys = lax.scan(cell, init, jnp.transpose(inp, (1, 0, 2)))
        return jnp.transpose(ys, (1, 0, 2))

    h = x
    for p in torch_params:
        h = lstm_layer(h, p)
    y = h @ kparams["wproj"] + kparams["bproj"]     # padded cols are zero
    return y[:, :, :dim_freq]


# --------------------------------------------------------------------------- #
if __name__ == "__main__":
    # Small hparams consistent with the module's forward:
    #   dim_neck_sea=8, dim_spk=8 -> LSTM input 16; dim_freq_sp=80; hidden=128
    B, T = 2, 16
    dim_neck, dim_emb, dim_freq, hidden = 8, 8, 80, 128
    d_in = dim_neck + dim_emb
    f_pad = _round_up(dim_freq, 128)   # lane-dense projection width

    key = jax.random.PRNGKey(0)
    kx, kp = jax.random.split(key)
    x = jax.random.normal(kx, (B, T, d_in), jnp.float32)

    torch_params, kparams = init_params(kp, d_in, hidden, dim_freq, f_pad)

    y = decoder_forward(x, kparams, dim_freq=dim_freq, t_tile=8)
    y = jax.block_until_ready(y)

    y_ref = decoder_reference(x, torch_params, kparams, dim_freq)
    assert y.shape == (B, T, dim_freq), y.shape
    err = float(jnp.max(jnp.abs(y - y_ref)))
    assert err < 1e-3, f"mismatch vs reference, max abs err = {err}"

    print("KERNEL_OK")
</pallas_src>

<mosaic_0001>
module attributes {stable_mosaic.version = 11 : i64} {
  func.func @decoder_lstm_kernel(%arg0: i32, %arg1: memref<64x16xf32, #tpu.memory_space<vmem>>, %arg2: memref<16x512xf32, #tpu.memory_space<vmem>>, %arg3: memref<1x512xf32, #tpu.memory_space<vmem>>, %arg4: memref<128x512xf32, #tpu.memory_space<vmem>>, %arg5: memref<256x512xf32, #tpu.memory_space<vmem>>, %arg6: memref<1x512xf32, #tpu.memory_space<vmem>>, %arg7: memref<256x512xf32, #tpu.memory_space<vmem>>, %arg8: memref<1x512xf32, #tpu.memory_space<vmem>>, %arg9: memref<128x128xf32, #tpu.memory_space<vmem>>, %arg10: memref<1x128xf32, #tpu.memory_space<vmem>>, %arg11: memref<64x128xf32, #tpu.memory_space<vmem>>, %arg12: memref<3x8x128xf32, #tpu.memory_space<vmem>>, %arg13: memref<3x8x128xf32, #tpu.memory_space<vmem>>, %arg14: memref<64x512xf32, #tpu.memory_space<vmem>>, %arg15: memref<64x128xf32, #tpu.memory_space<vmem>>) attributes {dimension_semantics = [#tpu.dimension_semantics<arbitrary>], iteration_bounds = array<i64: 2>, scalar_prefetch = 0 : i64, scratch_operands = 4 : i64, tpu.core_type = #tpu.core_type<tc>, window_params = [{transform_indices = @transform_0, window_bounds = array<i64: 64, 16>}, {pipeline_mode = #tpu.pipeline_mode<synchronous>, transform_indices = @transform_1, window_bounds = array<i64: 16, 512>}, {pipeline_mode = #tpu.pipeline_mode<synchronous>, transform_indices = @transform_2, window_bounds = array<i64: 1, 512>}, {pipeline_mode = #tpu.pipeline_mode<synchronous>, transform_indices = @transform_3, window_bounds = array<i64: 128, 512>}, {pipeline_mode = #tpu.pipeline_mode<synchronous>, transform_indices = @transform_4, window_bounds = array<i64: 256, 512>}, {pipeline_mode = #tpu.pipeline_mode<synchronous>, transform_indices = @transform_5, window_bounds = array<i64: 1, 512>}, {pipeline_mode = #tpu.pipeline_mode<synchronous>, transform_indices = @transform_6, window_bounds = array<i64: 256, 512>}, {pipeline_mode = #tpu.pipeline_mode<synchronous>, transform_indices = @transform_7, window_bounds = array<i64: 1, 512>}, {pipeline_mode = #tpu.pipeline_mode<synchronous>, transform_indices = @transform_8, window_bounds = array<i64: 128, 128>}, {pipeline_mode = #tpu.pipeline_mode<synchronous>, transform_indices = @transform_9, window_bounds = array<i64: 1, 128>}, {transform_indices = @transform_10, window_bounds = array<i64: 64, 128>}]} {
    %c0_i32 = arith.constant 0 : i32
    %0 = arith.cmpi eq, %arg0, %c0_i32 : i32
    %1 = arith.extui %0 : i1 to i32
    %c0_i32_0 = arith.constant 0 : i32
    %2 = arith.cmpi ne, %1, %c0_i32_0 : i32
    scf.if %2 {
      %cst_224 = arith.constant 0.000000e+00 : f32
      %789 = vector.broadcast %cst_224 : f32 to vector<3x8x128xf32>
      %c0_225 = arith.constant 0 : index
      %c0_226 = arith.constant 0 : index
      %c0_227 = arith.constant 0 : index
      %790 = vector.load %arg12[%c0_225, %c0_226, %c0_227] : memref<3x8x128xf32, #tpu.memory_space<vmem>>, vector<3x8x128xf32>
      tpu.vector_store %arg12[%c0_225, %c0_226, %c0_227], %789 {strides = array<i32>} : memref<3x8x128xf32, #tpu.memory_space<vmem>>, vector<3x8x128xf32>,
      %cst_228 = arith.constant 0.000000e+00 : f32
      %791 = vector.broadcast %cst_228 : f32 to vector<3x8x128xf32>
      %c0_229 = arith.constant 0 : index
      %c0_230 = arith.constant 0 : index
      %c0_231 = arith.constant 0 : index
      %792 = vector.load %arg13[%c0_229, %c0_230, %c0_231] : memref<3x8x128xf32, #tpu.memory_space<vmem>>, vector<3x8x128xf32>
      tpu.vector_store %arg13[%c0_229, %c0_230, %c0_231], %791 {strides = array<i32>} : memref<3x8x128xf32, #tpu.memory_space<vmem>>, vector<3x8x128xf32>,
    } else {
    }
    %c0 = arith.constant 0 : index
    %c0_1 = arith.constant 0 : index
    %3 = vector.load %arg1[%c0, %c0_1] : memref<64x16xf32, #tpu.memory_space<vmem>>, vector<64x16xf32>
    %c0_2 = arith.constant 0 : index
    %c0_3 = arith.constant 0 : index
    %4 = vector.load %arg2[%c0_2, %c0_3] : memref<16x512xf32, #tpu.memory_space<vmem>>, vector<16x512xf32>
    %cst = arith.constant dense<0.000000e+00> : vector<64x512xf32>
    %5 = tpu.matmul %3, %4, %cst {dimension_numbers = #tpu.dot_dimension_numbers<[1], [0], [0], [1], [0, 0, 1, 1], [], []>} : vector<64x16xf32>, vector<16x512xf32>, vector<64x512xf32> -> vector<64x512xf32>
    %c0_4 = arith.constant 0 : index
    %c0_5 = arith.constant 0 : index
    %6 = vector.load %arg3[%c0_4, %c0_5] : memref<1x512xf32, #tpu.memory_space<vmem>>, vector<1x512xf32>
    %7 = vector.broadcast %6 : vector<1x512xf32> to vector<64x512xf32>
    %8 = arith.addf %5, %7 : vector<64x512xf32>
    %c0_6 = arith.constant 0 : index
    %c0_7 = arith.constant 0 : index
    %9 = vector.load %arg14[%c0_6, %c0_7] : memref<64x512xf32, #tpu.memory_space<vmem>>, vector<64x512xf32>
    tpu.vector_store %arg14[%c0_6, %c0_7], %8 {strides = array<i32>} : memref<64x512xf32, #tpu.memory_space<vmem>>, vector<64x512xf32>,
    %c0_8 = arith.constant 0 : index
    %c0_9 = arith.constant 0 : index
    %10 = vector.load %arg6[%c0_8, %c0_9] : memref<1x512xf32, #tpu.memory_space<vmem>>, vector<1x512xf32>
    %11 = vector.shape_cast %10 : vector<1x512xf32> to vector<1x512xf32>
    %12 = vector.broadcast %11 : vector<1x512xf32> to vector<8x512xf32>
    %c0_10 = arith.constant 0 : index
    %c0_11 = arith.constant 0 : index
    %13 = vector.load %arg8[%c0_10, %c0_11] : memref<1x512xf32, #tpu.memory_space<vmem>>, vector<1x512xf32>
    %14 = vector.shape_cast %13 : vector<1x512xf32> to vector<1x512xf32>
    %15 = vector.broadcast %14 : vector<1x512xf32> to vector<8x512xf32>
    %c0_12 = arith.constant 0 : index
    %c0_13 = arith.constant 0 : index
    %c0_14 = arith.constant 0 : index
    %16 = vector.load %arg12[%c0_12, %c0_13, %c0_14] : memref<3x8x128xf32, #tpu.memory_space<vmem>>, vector<1x8x128xf32>
    %17 = vector.shape_cast %16 : vector<1x8x128xf32> to vector<8x128xf32>
    %c0_15 = arith.constant 0 : index
    %c0_16 = arith.constant 0 : index
    %c0_17 = arith.constant 0 : index
    %18 = vector.load %arg13[%c0_15, %c0_16, %c0_17] : memref<3x8x128xf32, #tpu.memory_space<vmem>>, vector<1x8x128xf32>
    %19 = vector.shape_cast %18 : vector<1x8x128xf32> to vector<8x128xf32>
    %c1 = arith.constant 1 : index
    %c0_18 = arith.constant 0 : index
    %c0_19 = arith.constant 0 : index
    %20 = vector.load %arg12[%c1, %c0_18, %c0_19] : memref<3x8x128xf32, #tpu.memory_space<vmem>>, vector<1x8x128xf32>
    %21 = vector.shape_cast %20 : vector<1x8x128xf32> to vector<8x128xf32>
    %c1_20 = arith.constant 1 : index
    %c0_21 = arith.constant 0 : index
    %c0_22 = arith.constant 0 : index
    %22 = vector.load %arg13[%c1_20, %c0_21, %c0_22] : memref<3x8x128xf32, #tpu.memory_space<vmem>>, vector<1x8x128xf32>
    %23 = vector.shape_cast %22 : vector<1x8x128xf32> to vector<8x128xf32>
    %c2 = arith.constant 2 : index
    %c0_23 = arith.constant 0 : index
    %c0_24 = arith.constant 0 : index
    %24 = vector.load %arg12[%c2, %c0_23, %c0_24] : memref<3x8x128xf32, #tpu.memory_space<vmem>>, vector<1x8x128xf32>
    %25 = vector.shape_cast %24 : vector<1x8x128xf32> to vector<8x128xf32>
    %c2_25 = arith.constant 2 : index
    %c0_26 = arith.constant 0 : index
    %c0_27 = arith.constant 0 : index
    %26 = vector.load %arg13[%c2_25, %c0_26, %c0_27] : memref<3x8x128xf32, #tpu.memory_space<vmem>>, vector<1x8x128xf32>
    %27 = vector.shape_cast %26 : vector<1x8x128xf32> to vector<8x128xf32>
    %c0_i32_28 = arith.constant 0 : i32
    %c8_i32 = arith.constant 8 : i32
    %28 = arith.muli %c0_i32_28, %c8_i32 : i32
    %29 = tpu.assume_multiple %28, 8 : i32
    %30 = arith.index_cast %29 : i32 to index
    %c0_29 = arith.constant 0 : index
    %31 = vector.load %arg14[%30, %c0_29] : memref<64x512xf32, #tpu.memory_space<vmem>>, vector<8x512xf32>
    %c0_30 = arith.constant 0 : index
    %c0_31 = arith.constant 0 : index
    %32 = vector.load %arg4[%c0_30, %c0_31] : memref<128x512xf32, #tpu.memory_space<vmem>>, vector<128x512xf32>
    %cst_32 = arith.constant dense<0.000000e+00> : vector<8x512xf32>
    %33 = tpu.matmul %17, %32, %cst_32 {dimension_numbers = #tpu.dot_dimension_numbers<[1], [0], [0], [1], [0, 0, 1, 1], [], []>} : vector<8x128xf32>, vector<128x512xf32>, vector<8x512xf32> -> vector<8x512xf32>
    %34 = arith.addf %31, %33 : vector<8x512xf32>
    %35 = vector.extract_strided_slice %34 {offsets = [0, 0], sizes = [8, 128], strides = [1, 1]} : vector<8x512xf32> to vector<8x128xf32>
    %36 = arith.negf %35 : vector<8x128xf32>
    %37 = math.exp %36 : vector<8x128xf32>
    %cst_33 = arith.constant 1.000000e+00 : f32
    %38 = vector.broadcast %cst_33 : f32 to vector<8x128xf32>
    %39 = arith.addf %38, %37 : vector<8x128xf32>
    %40 = arith.divf %38, %39 : vector<8x128xf32>
    %41 = vector.extract_strided_slice %34 {offsets = [0, 128], sizes = [8, 128], strides = [1, 1]} : vector<8x512xf32> to vector<8x128xf32>
    %42 = arith.negf %41 : vector<8x128xf32>
    %43 = math.exp %42 : vector<8x128xf32>
    %cst_34 = arith.constant 1.000000e+00 : f32
    %44 = vector.broadcast %cst_34 : f32 to vector<8x128xf32>
    %45 = arith.addf %44, %43 : vector<8x128xf32>
    %46 = arith.divf %44, %45 : vector<8x128xf32>
    %47 = vector.extract_strided_slice %34 {offsets = [0, 256], sizes = [8, 128], strides = [1, 1]} : vector<8x512xf32> to vector<8x128xf32>
    %48 = math.tanh %47 : vector<8x128xf32>
    %49 = vector.extract_strided_slice %34 {offsets = [0, 384], sizes = [8, 128], strides = [1, 1]} : vector<8x512xf32> to vector<8x128xf32>
    %50 = arith.negf %49 : vector<8x128xf32>
    %51 = math.exp %50 : vector<8x128xf32>
    %cst_35 = arith.constant 1.000000e+00 : f32
    %52 = vector.broadcast %cst_35 : f32 to vector<8x128xf32>
    %53 = arith.addf %52, %51 : vector<8x128xf32>
    %54 = arith.divf %52, %53 : vector<8x128xf32>
    %55 = arith.mulf %46, %19 : vector<8x128xf32>
    %56 = arith.mulf %40, %48 : vector<8x128xf32>
    %57 = arith.addf %55, %56 : vector<8x128xf32>
    %58 = math.tanh %57 : vector<8x128xf32>
    %59 = arith.mulf %54, %58 : vector<8x128xf32>
    %60 = tpu.concatenate %59, %21 in 1 : vector<8x128xf32>, vector<8x128xf32> -> vector<8x256xf32>
    %c0_36 = arith.constant 0 : index
    %c0_37 = arith.constant 0 : index
    %61 = vector.load %arg5[%c0_36, %c0_37] : memref<256x512xf32, #tpu.memory_space<vmem>>, vector<256x512xf32>
    %cst_38 = arith.constant dense<0.000000e+00> : vector<8x512xf32>
    %62 = tpu.matmul %60, %61, %cst_38 {dimension_numbers = #tpu.dot_dimension_numbers<[1], [0], [0], [1], [0, 0, 1, 1], [], []>} : vector<8x256xf32>, vector<256x512xf32>, vector<8x512xf32> -> vector<8x512xf32>
    %63 = arith.addf %62, %12 : vector<8x512xf32>
    %64 = vector.extract_strided_slice %63 {offsets = [0, 0], sizes = [8, 128], strides = [1, 1]} : vector<8x512xf32> to vector<8x128xf32>
    %65 = arith.negf %64 : vector<8x128xf32>
    %66 = math.exp %65 : vector<8x128xf32>
    %cst_39 = arith.constant 1.000000e+00 : f32
    %67 = vector.broadcast %cst_39 : f32 to vector<8x128xf32>
    %68 = arith.addf %67, %66 : vector<8x128xf32>
    %69 = arith.divf %67, %68 : vector<8x128xf32>
    %70 = vector.extract_strided_slice %63 {offsets = [0, 128], sizes = [8, 128], strides = [1, 1]} : vector<8x512xf32> to vector<8x128xf32>
    %71 = arith.negf %70 : vector<8x128xf32>
    %72 = math.exp %71 : vector<8x128xf32>
    %cst_40 = arith.constant 1.000000e+00 : f32
    %73 = vector.broadcast %cst_40 : f32 to vector<8x128xf32>
    %74 = arith.addf %73, %72 : vector<8x128xf32>
    %75 = arith.divf %73, %74 : vector<8x128xf32>
    %76 = vector.extract_strided_slice %63 {offsets = [0, 256], sizes = [8, 128], strides = [1, 1]} : vector<8x512xf32> to vector<8x128xf32>
    %77 = math.tanh %76 : vector<8x128xf32>
    %78 = vector.extract_strided_slice %63 {offsets = [0, 384], sizes = [8, 128], strides = [1, 1]} : vector<8x512xf32> to vector<8x128xf32>
    %79 = arith.negf %78 : vector<8x128xf32>
    %80 = math.exp %79 : vector<8x128xf32>
    %cst_41 = arith.constant 1.000000e+00 : f32
    %81 = vector.broadcast %cst_41 : f32 to vector<8x128xf32>
    %82 = arith.addf %81, %80 : vector<8x128xf32>
    %83 = arith.divf %81, %82 : vector<8x128xf32>
    %84 = arith.mulf %75, %23 : vector<8x128xf32>
    %85 = arith.mulf %69, %77 : vector<8x128xf32>
    %86 = arith.addf %84, %85 : vector<8x128xf32>
    %87 = math.tanh %86 : vector<8x128xf32>
    %88 = arith.mulf %83, %87 : vector<8x128xf32>
    %89 = tpu.concatenate %88, %25 in 1 : vector<8x128xf32>, vector<8x128xf32> -> vector<8x256xf32>
    %c0_42 = arith.constant 0 : index
    %c0_43 = arith.constant 0 : index
    %90 = vector.load %arg7[%c0_42, %c0_43] : memref<256x512xf32, #tpu.memory_space<vmem>>, vector<256x512xf32>
    %cst_44 = arith.constant dense<0.000000e+00> : vector<8x512xf32>
    %91 = tpu.matmul %89, %90, %cst_44 {dimension_numbers = #tpu.dot_dimension_numbers<[1], [0], [0], [1], [0, 0, 1, 1], [], []>} : vector<8x256xf32>, vector<256x512xf32>, vector<8x512xf32> -> vector<8x512xf32>
    %92 = arith.addf %91, %15 : vector<8x512xf32>
    %93 = vector.extract_strided_slice %92 {offsets = [0, 0], sizes = [8, 128], strides = [1, 1]} : vector<8x512xf32> to vector<8x128xf32>
    %94 = arith.negf %93 : vector<8x128xf32>
    %95 = math.exp %94 : vector<8x128xf32>
    %cst_45 = arith.constant 1.000000e+00 : f32
    %96 = vector.broadcast %cst_45 : f32 to vector<8x128xf32>
    %97 = arith.addf %96, %95 : vector<8x128xf32>
    %98 = arith.divf %96, %97 : vector<8x128xf32>
    %99 = vector.extract_strided_slice %92 {offsets = [0, 128], sizes = [8, 128], strides = [1, 1]} : vector<8x512xf32> to vector<8x128xf32>
    %100 = arith.negf %99 : vector<8x128xf32>
    %101 = math.exp %100 : vector<8x128xf32>
    %cst_46 = arith.constant 1.000000e+00 : f32
    %102 = vector.broadcast %cst_46 : f32 to vector<8x128xf32>
    %103 = arith.addf %102, %101 : vector<8x128xf32>
    %104 = arith.divf %102, %103 : vector<8x128xf32>
    %105 = vector.extract_strided_slice %92 {offsets = [0, 256], sizes = [8, 128], strides = [1, 1]} : vector<8x512xf32> to vector<8x128xf32>
    %106 = math.tanh %105 : vector<8x128xf32>
    %107 = vector.extract_strided_slice %92 {offsets = [0, 384], sizes = [8, 128], strides = [1, 1]} : vector<8x512xf32> to vector<8x128xf32>
    %108 = arith.negf %107 : vector<8x128xf32>
    %109 = math.exp %108 : vector<8x128xf32>
    %cst_47 = arith.constant 1.000000e+00 : f32
    %110 = vector.broadcast %cst_47 : f32 to vector<8x128xf32>
    %111 = arith.addf %110, %109 : vector<8x128xf32>
    %112 = arith.divf %110, %111 : vector<8x128xf32>
    %113 = arith.mulf %104, %27 : vector<8x128xf32>
    %114 = arith.mulf %98, %106 : vector<8x128xf32>
    %115 = arith.addf %113, %114 : vector<8x128xf32>
    %116 = math.tanh %115 : vector<8x128xf32>
    %117 = arith.mulf %112, %116 : vector<8x128xf32>
    %118 = arith.index_cast %29 : i32 to index
    %c0_48 = arith.constant 0 : index
    %119 = vector.load %arg15[%118, %c0_48] : memref<64x128xf32, #tpu.memory_space<vmem>>, vector<8x128xf32>
    tpu.vector_store %arg15[%118, %c0_48], %117 {strides = array<i32>} : memref<64x128xf32, #tpu.memory_space<vmem>>, vector<8x128xf32>,
    %c1_i32 = arith.constant 1 : i32
    %c8_i32_49 = arith.constant 8 : i32
    %120 = arith.muli %c1_i32, %c8_i32_49 : i32
    %121 = tpu.assume_multiple %120, 8 : i32
    %122 = arith.index_cast %121 : i32 to index
    %c0_50 = arith.constant 0 : index
    %123 = vector.load %arg14[%122, %c0_50] : memref<64x512xf32, #tpu.memory_space<vmem>>, vector<8x512xf32>
    %c0_51 = arith.constant 0 : index
    %c0_52 = arith.constant 0 : index
    %124 = vector.load %arg4[%c0_51, %c0_52] : memref<128x512xf32, #tpu.memory_space<vmem>>, vector<128x512xf32>
    %cst_53 = arith.constant dense<0.000000e+00> : vector<8x512xf32>
    %125 = tpu.matmul %59, %124, %cst_53 {dimension_numbers = #tpu.dot_dimension_numbers<[1], [0], [0], [1], [0, 0, 1, 1], [], []>} : vector<8x128xf32>, vector<128x512xf32>, vector<8x512xf32> -> vector<8x512xf32>
    %126 = arith.addf %123, %125 : vector<8x512xf32>
    %127 = vector.extract_strided_slice %126 {offsets = [0, 0], sizes = [8, 128], strides = [1, 1]} : vector<8x512xf32> to vector<8x128xf32>
    %128 = arith.negf %127 : vector<8x128xf32>
    %129 = math.exp %128 : vector<8x128xf32>
    %cst_54 = arith.constant 1.000000e+00 : f32
    %130 = vector.broadcast %cst_54 : f32 to vector<8x128xf32>
    %131 = arith.addf %130, %129 : vector<8x128xf32>
    %132 = arith.divf %130, %131 : vector<8x128xf32>
    %133 = vector.extract_strided_slice %126 {offsets = [0, 128], sizes = [8, 128], strides = [1, 1]} : vector<8x512xf32> to vector<8x128xf32>
    %134 = arith.negf %133 : vector<8x128xf32>
    %135 = math.exp %134 : vector<8x128xf32>
    %cst_55 = arith.constant 1.000000e+00 : f32
    %136 = vector.broadcast %cst_55 : f32 to vector<8x128xf32>
    %137 = arith.addf %136, %135 : vector<8x128xf32>
    %138 = arith.divf %136, %137 : vector<8x128xf32>
    %139 = vector.extract_strided_slice %126 {offsets = [0, 256], sizes = [8, 128], strides = [1, 1]} : vector<8x512xf32> to vector<8x128xf32>
    %140 = math.tanh %139 : vector<8x128xf32>
    %141 = vector.extract_strided_slice %126 {offsets = [0, 384], sizes = [8, 128], strides = [1, 1]} : vector<8x512xf32> to vector<8x128xf32>
    %142 = arith.negf %141 : vector<8x128xf32>
    %143 = math.exp %142 : vector<8x128xf32>
    %cst_56 = arith.constant 1.000000e+00 : f32
    %144 = vector.broadcast %cst_56 : f32 to vector<8x128xf32>
    %145 = arith.addf %144, %143 : vector<8x128xf32>
    %146 = arith.divf %144, %145 : vector<8x128xf32>
    %147 = arith.mulf %138, %57 : vector<8x128xf32>
    %148 = arith.mulf %132, %140 : vector<8x128xf32>
    %149 = arith.addf %147, %148 : vector<8x128xf32>
    %150 = math.tanh %149 : vector<8x128xf32>
    %151 = arith.mulf %146, %150 : vector<8x128xf32>
    %152 = tpu.concatenate %151, %88 in 1 : vector<8x128xf32>, vector<8x128xf32> -> vector<8x256xf32>
    %c0_57 = arith.constant 0 : index
    %c0_58 = arith.constant 0 : index
    %153 = vector.load %arg5[%c0_57, %c0_58] : memref<256x512xf32, #tpu.memory_space<vmem>>, vector<256x512xf32>
    %cst_59 = arith.constant dense<0.000000e+00> : vector<8x512xf32>
    %154 = tpu.matmul %152, %153, %cst_59 {dimension_numbers = #tpu.dot_dimension_numbers<[1], [0], [0], [1], [0, 0, 1, 1], [], []>} : vector<8x256xf32>, vector<256x512xf32>, vector<8x512xf32> -> vector<8x512xf32>
    %155 = arith.addf %154, %12 : vector<8x512xf32>
    %156 = vector.extract_strided_slice %155 {offsets = [0, 0], sizes = [8, 128], strides = [1, 1]} : vector<8x512xf32> to vector<8x128xf32>
    %157 = arith.negf %156 : vector<8x128xf32>
    %158 = math.exp %157 : vector<8x128xf32>
    %cst_60 = arith.constant 1.000000e+00 : f32
    %159 = vector.broadcast %cst_60 : f32 to vector<8x128xf32>
    %160 = arith.addf %159, %158 : vector<8x128xf32>
    %161 = arith.divf %159, %160 : vector<8x128xf32>
    %162 = vector.extract_strided_slice %155 {offsets = [0, 128], sizes = [8, 128], strides = [1, 1]} : vector<8x512xf32> to vector<8x128xf32>
    %163 = arith.negf %162 : vector<8x128xf32>
    %164 = math.exp %163 : vector<8x128xf32>
    %cst_61 = arith.constant 1.000000e+00 : f32
    %165 = vector.broadcast %cst_61 : f32 to vector<8x128xf32>
    %166 = arith.addf %165, %164 : vector<8x128xf32>
    %167 = arith.divf %165, %166 : vector<8x128xf32>
    %168 = vector.extract_strided_slice %155 {offsets = [0, 256], sizes = [8, 128], strides = [1, 1]} : vector<8x512xf32> to vector<8x128xf32>
    %169 = math.tanh %168 : vector<8x128xf32>
    %170 = vector.extract_strided_slice %155 {offsets = [0, 384], sizes = [8, 128], strides = [1, 1]} : vector<8x512xf32> to vector<8x128xf32>
    %171 = arith.negf %170 : vector<8x128xf32>
    %172 = math.exp %171 : vector<8x128xf32>
    %cst_62 = arith.constant 1.000000e+00 : f32
    %173 = vector.broadcast %cst_62 : f32 to vector<8x128xf32>
    %174 = arith.addf %173, %172 : vector<8x128xf32>
    %175 = arith.divf %173, %174 : vector<8x128xf32>
    %176 = arith.mulf %167, %86 : vector<8x128xf32>
    %177 = arith.mulf %161, %169 : vector<8x128xf32>
    %178 = arith.addf %176, %177 : vector<8x128xf32>
    %179 = math.tanh %178 : vector<8x128xf32>
    %180 = arith.mulf %175, %179 : vector<8x128xf32>
    %181 = tpu.concatenate %180, %117 in 1 : vector<8x128xf32>, vector<8x128xf32> -> vector<8x256xf32>
    %c0_63 = arith.constant 0 : index
    %c0_64 = arith.constant 0 : index
    %182 = vector.load %arg7[%c0_63, %c0_64] : memref<256x512xf32, #tpu.memory_space<vmem>>, vector<256x512xf32>
    %cst_65 = arith.constant dense<0.000000e+00> : vector<8x512xf32>
    %183 = tpu.matmul %181, %182, %cst_65 {dimension_numbers = #tpu.dot_dimension_numbers<[1], [0], [0], [1], [0, 0, 1, 1], [], []>} : vector<8x256xf32>, vector<256x512xf32>, vector<8x512xf32> -> vector<8x512xf32>
    %184 = arith.addf %183, %15 : vector<8x512xf32>
    %185 = vector.extract_strided_slice %184 {offsets = [0, 0], sizes = [8, 128], strides = [1, 1]} : vector<8x512xf32> to vector<8x128xf32>
    %186 = arith.negf %185 : vector<8x128xf32>
    %187 = math.exp %186 : vector<8x128xf32>
    %cst_66 = arith.constant 1.000000e+00 : f32
    %188 = vector.broadcast %cst_66 : f32 to vector<8x128xf32>
    %189 = arith.addf %188, %187 : vector<8x128xf32>
    %190 = arith.divf %188, %189 : vector<8x128xf32>
    %191 = vector.extract_strided_slice %184 {offsets = [0, 128], sizes = [8, 128], strides = [1, 1]} : vector<8x512xf32> to vector<8x128xf32>
    %192 = arith.negf %191 : vector<8x128xf32>
    %193 = math.exp %192 : vector<8x128xf32>
    %cst_67 = arith.constant 1.000000e+00 : f32
    %194 = vector.broadcast %cst_67 : f32 to vector<8x128xf32>
    %195 = arith.addf %194, %193 : vector<8x128xf32>
    %196 = arith.divf %194, %195 : vector<8x128xf32>
    %197 = vector.extract_strided_slice %184 {offsets = [0, 256], sizes = [8, 128], strides = [1, 1]} : vector<8x512xf32> to vector<8x128xf32>
    %198 = math.tanh %197 : vector<8x128xf32>
    %199 = vector.extract_strided_slice %184 {offsets = [0, 384], sizes = [8, 128], strides = [1, 1]} : vector<8x512xf32> to vector<8x128xf32>
    %200 = arith.negf %199 : vector<8x128xf32>
    %201 = math.exp %200 : vector<8x128xf32>
    %cst_68 = arith.constant 1.000000e+00 : f32
    %202 = vector.broadcast %cst_68 : f32 to vector<8x128xf32>
    %203 = arith.addf %202, %201 : vector<8x128xf32>
    %204 = arith.divf %202, %203 : vector<8x128xf32>
    %205 = arith.mulf %196, %115 : vector<8x128xf32>
    %206 = arith.mulf %190, %198 : vector<8x128xf32>
    %207 = arith.addf %205, %206 : vector<8x128xf32>
    %208 = math.tanh %207 : vector<8x128xf32>
    %209 = arith.mulf %204, %208 : vector<8x128xf32>
    %210 = arith.index_cast %121 : i32 to index
    %c0_69 = arith.constant 0 : index
    %211 = vector.load %arg15[%210, %c0_69] : memref<64x128xf32, #tpu.memory_space<vmem>>, vector<8x128xf32>
    tpu.vector_store %arg15[%210, %c0_69], %209 {strides = array<i32>} : memref<64x128xf32, #tpu.memory_space<vmem>>, vector<8x128xf32>,
    %c2_i32 = arith.constant 2 : i32
    %c8_i32_70 = arith.constant 8 : i32
    %212 = arith.muli %c2_i32, %c8_i32_70 : i32
    %213 = tpu.assume_multiple %212, 8 : i32
    %214 = arith.index_cast %213 : i32 to index
    %c0_71 = arith.constant 0 : index
    %215 = vector.load %arg14[%214, %c0_71] : memref<64x512xf32, #tpu.memory_space<vmem>>, vector<8x512xf32>
    %c0_72 = arith.constant 0 : index
    %c0_73 = arith.constant 0 : index
    %216 = vector.load %arg4[%c0_72, %c0_73] : memref<128x512xf32, #tpu.memory_space<vmem>>, vector<128x512xf32>
    %cst_74 = arith.constant dense<0.000000e+00> : vector<8x512xf32>
    %217 = tpu.matmul %151, %216, %cst_74 {dimension_numbers = #tpu.dot_dimension_numbers<[1], [0], [0], [1], [0, 0, 1, 1], [], []>} : vector<8x128xf32>, vector<128x512xf32>, vector<8x512xf32> -> vector<8x512xf32>
    %218 = arith.addf %215, %217 : vector<8x512xf32>
    %219 = vector.extract_strided_slice %218 {offsets = [0, 0], sizes = [8, 128], strides = [1, 1]} : vector<8x512xf32> to vector<8x128xf32>
    %220 = arith.negf %219 : vector<8x128xf32>
    %221 = math.exp %220 : vector<8x128xf32>
    %cst_75 = arith.constant 1.000000e+00 : f32
    %222 = vector.broadcast %cst_75 : f32 to vector<8x128xf32>
    %223 = arith.addf %222, %221 : vector<8x128xf32>
    %224 = arith.divf %222, %223 : vector<8x128xf32>
    %225 = vector.extract_strided_slice %218 {offsets = [0, 128], sizes = [8, 128], strides = [1, 1]} : vector<8x512xf32> to vector<8x128xf32>
    %226 = arith.negf %225 : vector<8x128xf32>
    %227 = math.exp %226 : vector<8x128xf32>
    %cst_76 = arith.constant 1.000000e+00 : f32
    %228 = vector.broadcast %cst_76 : f32 to vector<8x128xf32>
    %229 = arith.addf %228, %227 : vector<8x128xf32>
    %230 = arith.divf %228, %229 : vector<8x128xf32>
    %231 = vector.extract_strided_slice %218 {offsets = [0, 256], sizes = [8, 128], strides = [1, 1]} : vector<8x512xf32> to vector<8x128xf32>
    %232 = math.tanh %231 : vector<8x128xf32>
    %233 = vector.extract_strided_slice %218 {offsets = [0, 384], sizes = [8, 128], strides = [1, 1]} : vector<8x512xf32> to vector<8x128xf32>
    %234 = arith.negf %233 : vector<8x128xf32>
    %235 = math.exp %234 : vector<8x128xf32>
    %cst_77 = arith.constant 1.000000e+00 : f32
    %236 = vector.broadcast %cst_77 : f32 to vector<8x128xf32>
    %237 = arith.addf %236, %235 : vector<8x128xf32>
    %238 = arith.divf %236, %237 : vector<8x128xf32>
    %239 = arith.mulf %230, %149 : vector<8x128xf32>
    %240 = arith.mulf %224, %232 : vector<8x128xf32>
    %241 = arith.addf %239, %240 : vector<8x128xf32>
    %242 = math.tanh %241 : vector<8x128xf32>
    %243 = arith.mulf %238, %242 : vector<8x128xf32>
    %244 = tpu.concatenate %243, %180 in 1 : vector<8x128xf32>, vector<8x128xf32> -> vector<8x256xf32>
    %c0_78 = arith.constant 0 : index
    %c0_79 = arith.constant 0 : index
    %245 = vector.load %arg5[%c0_78, %c0_79] : memref<256x512xf32, #tpu.memory_space<vmem>>, vector<256x512xf32>
    %cst_80 = arith.constant dense<0.000000e+00> : vector<8x512xf32>
    %246 = tpu.matmul %244, %245, %cst_80 {dimension_numbers = #tpu.dot_dimension_numbers<[1], [0], [0], [1], [0, 0, 1, 1], [], []>} : vector<8x256xf32>, vector<256x512xf32>, vector<8x512xf32> -> vector<8x512xf32>
    %247 = arith.addf %246, %12 : vector<8x512xf32>
    %248 = vector.extract_strided_slice %247 {offsets = [0, 0], sizes = [8, 128], strides = [1, 1]} : vector<8x512xf32> to vector<8x128xf32>
    %249 = arith.negf %248 : vector<8x128xf32>
    %250 = math.exp %249 : vector<8x128xf32>
    %cst_81 = arith.constant 1.000000e+00 : f32
    %251 = vector.broadcast %cst_81 : f32 to vector<8x128xf32>
    %252 = arith.addf %251, %250 : vector<8x128xf32>
    %253 = arith.divf %251, %252 : vector<8x128xf32>
    %254 = vector.extract_strided_slice %247 {offsets = [0, 128], sizes = [8, 128], strides = [1, 1]} : vector<8x512xf32> to vector<8x128xf32>
    %255 = arith.negf %254 : vector<8x128xf32>
    %256 = math.exp %255 : vector<8x128xf32>
    %cst_82 = arith.constant 1.000000e+00 : f32
    %257 = vector.broadcast %cst_82 : f32 to vector<8x128xf32>
    %258 = arith.addf %257, %256 : vector<8x128xf32>
    %259 = arith.divf %257, %258 : vector<8x128xf32>
    %260 = vector.extract_strided_slice %247 {offsets = [0, 256], sizes = [8, 128], strides = [1, 1]} : vector<8x512xf32> to vector<8x128xf32>
    %261 = math.tanh %260 : vector<8x128xf32>
    %262 = vector.extract_strided_slice %247 {offsets = [0, 384], sizes = [8, 128], strides = [1, 1]} : vector<8x512xf32> to vector<8x128xf32>
    %263 = arith.negf %262 : vector<8x128xf32>
    %264 = math.exp %263 : vector<8x128xf32>
    %cst_83 = arith.constant 1.000000e+00 : f32
    %265 = vector.broadcast %cst_83 : f32 to vector<8x128xf32>
    %266 = arith.addf %265, %264 : vector<8x128xf32>
    %267 = arith.divf %265, %266 : vector<8x128xf32>
    %268 = arith.mulf %259, %178 : vector<8x128xf32>
    %269 = arith.mulf %253, %261 : vector<8x128xf32>
    %270 = arith.addf %268, %269 : vector<8x128xf32>
    %271 = math.tanh %270 : vector<8x128xf32>
    %272 = arith.mulf %267, %271 : vector<8x128xf32>
    %273 = tpu.concatenate %272, %209 in 1 : vector<8x128xf32>, vector<8x128xf32> -> vector<8x256xf32>
    %c0_84 = arith.constant 0 : index
    %c0_85 = arith.constant 0 : index
    %274 = vector.load %arg7[%c0_84, %c0_85] : memref<256x512xf32, #tpu.memory_space<vmem>>, vector<256x512xf32>
    %cst_86 = arith.constant dense<0.000000e+00> : vector<8x512xf32>
    %275 = tpu.matmul %273, %274, %cst_86 {dimension_numbers = #tpu.dot_dimension_numbers<[1], [0], [0], [1], [0, 0, 1, 1], [], []>} : vector<8x256xf32>, vector<256x512xf32>, vector<8x512xf32> -> vector<8x512xf32>
    %276 = arith.addf %275, %15 : vector<8x512xf32>
    %277 = vector.extract_strided_slice %276 {offsets = [0, 0], sizes = [8, 128], strides = [1, 1]} : vector<8x512xf32> to vector<8x128xf32>
    %278 = arith.negf %277 : vector<8x128xf32>
    %279 = math.exp %278 : vector<8x128xf32>
    %cst_87 = arith.constant 1.000000e+00 : f32
    %280 = vector.broadcast %cst_87 : f32 to vector<8x128xf32>
    %281 = arith.addf %280, %279 : vector<8x128xf32>
    %282 = arith.divf %280, %281 : vector<8x128xf32>
    %283 = vector.extract_strided_slice %276 {offsets = [0, 128], sizes = [8, 128], strides = [1, 1]} : vector<8x512xf32> to vector<8x128xf32>
    %284 = arith.negf %283 : vector<8x128xf32>
    %285 = math.exp %284 : vector<8x128xf32>
    %cst_88 = arith.constant 1.000000e+00 : f32
    %286 = vector.broadcast %cst_88 : f32 to vector<8x128xf32>
    %287 = arith.addf %286, %285 : vector<8x128xf32>
    %288 = arith.divf %286, %287 : vector<8x128xf32>
    %289 = vector.extract_strided_slice %276 {offsets = [0, 256], sizes = [8, 128], strides = [1, 1]} : vector<8x512xf32> to vector<8x128xf32>
    %290 = math.tanh %289 : vector<8x128xf32>
    %291 = vector.extract_strided_slice %276 {offsets = [0, 384], sizes = [8, 128], strides = [1, 1]} : vector<8x512xf32> to vector<8x128xf32>
    %292 = arith.negf %291 : vector<8x128xf32>
    %293 = math.exp %292 : vector<8x128xf32>
    %cst_89 = arith.constant 1.000000e+00 : f32
    %294 = vector.broadcast %cst_89 : f32 to vector<8x128xf32>
    %295 = arith.addf %294, %293 : vector<8x128xf32>
    %296 = arith.divf %294, %295 : vector<8x128xf32>
    %297 = arith.mulf %288, %207 : vector<8x128xf32>
    %298 = arith.mulf %282, %290 : vector<8x128xf32>
    %299 = arith.addf %297, %298 : vector<8x128xf32>
    %300 = math.tanh %299 : vector<8x128xf32>
    %301 = arith.mulf %296, %300 : vector<8x128xf32>
    %302 = arith.index_cast %213 : i32 to index
    %c0_90 = arith.constant 0 : index
    %303 = vector.load %arg15[%302, %c0_90] : memref<64x128xf32, #tpu.memory_space<vmem>>, vector<8x128xf32>
    tpu.vector_store %arg15[%302, %c0_90], %301 {strides = array<i32>} : memref<64x128xf32, #tpu.memory_space<vmem>>, vector<8x128xf32>,
    %c3_i32 = arith.constant 3 : i32
    %c8_i32_91 = arith.constant 8 : i32
    %304 = arith.muli %c3_i32, %c8_i32_91 : i32
    %305 = tpu.assume_multiple %304, 8 : i32
    %306 = arith.index_cast %305 : i32 to index
    %c0_92 = arith.constant 0 : index
    %307 = vector.load %arg14[%306, %c0_92] : memref<64x512xf32, #tpu.memory_space<vmem>>, vector<8x512xf32>
    %c0_93 = arith.constant 0 : index
    %c0_94 = arith.constant 0 : index
    %308 = vector.load %arg4[%c0_93, %c0_94] : memref<128x512xf32, #tpu.memory_space<vmem>>, vector<128x512xf32>
    %cst_95 = arith.constant dense<0.000000e+00> : vector<8x512xf32>
    %309 = tpu.matmul %243, %308, %cst_95 {dimension_numbers = #tpu.dot_dimension_numbers<[1], [0], [0], [1], [0, 0, 1, 1], [], []>} : vector<8x128xf32>, vector<128x512xf32>, vector<8x512xf32> -> vector<8x512xf32>
    %310 = arith.addf %307, %309 : vector<8x512xf32>
    %311 = vector.extract_strided_slice %310 {offsets = [0, 0], sizes = [8, 128], strides = [1, 1]} : vector<8x512xf32> to vector<8x128xf32>
    %312 = arith.negf %311 : vector<8x128xf32>
    %313 = math.exp %312 : vector<8x128xf32>
    %cst_96 = arith.constant 1.000000e+00 : f32
    %314 = vector.broadcast %cst_96 : f32 to vector<8x128xf32>
    %315 = arith.addf %314, %313 : vector<8x128xf32>
    %316 = arith.divf %314, %315 : vector<8x128xf32>
    %317 = vector.extract_strided_slice %310 {offsets = [0, 128], sizes = [8, 128], strides = [1, 1]} : vector<8x512xf32> to vector<8x128xf32>
    %318 = arith.negf %317 : vector<8x128xf32>
    %319 = math.exp %318 : vector<8x128xf32>
    %cst_97 = arith.constant 1.000000e+00 : f32
    %320 = vector.broadcast %cst_97 : f32 to vector<8x128xf32>
    %321 = arith.addf %320, %319 : vector<8x128xf32>
    %322 = arith.divf %320, %321 : vector<8x128xf32>
    %323 = vector.extract_strided_slice %310 {offsets = [0, 256], sizes = [8, 128], strides = [1, 1]} : vector<8x512xf32> to vector<8x128xf32>
    %324 = math.tanh %323 : vector<8x128xf32>
    %325 = vector.extract_strided_slice %310 {offsets = [0, 384], sizes = [8, 128], strides = [1, 1]} : vector<8x512xf32> to vector<8x128xf32>
    %326 = arith.negf %325 : vector<8x128xf32>
    %327 = math.exp %326 : vector<8x128xf32>
    %cst_98 = arith.constant 1.000000e+00 : f32
    %328 = vector.broadcast %cst_98 : f32 to vector<8x128xf32>
    %329 = arith.addf %328, %327 : vector<8x128xf32>
    %330 = arith.divf %328, %329 : vector<8x128xf32>
    %331 = arith.mulf %322, %241 : vector<8x128xf32>
    %332 = arith.mulf %316, %324 : vector<8x128xf32>
    %333 = arith.addf %331, %332 : vector<8x128xf32>
    %334 = math.tanh %333 : vector<8x128xf32>
    %335 = arith.mulf %330, %334 : vector<8x128xf32>
    %336 = tpu.concatenate %335, %272 in 1 : vector<8x128xf32>, vector<8x128xf32> -> vector<8x256xf32>
    %c0_99 = arith.constant 0 : index
    %c0_100 = arith.constant 0 : index
    %337 = vector.load %arg5[%c0_99, %c0_100] : memref<256x512xf32, #tpu.memory_space<vmem>>, vector<256x512xf32>
    %cst_101 = arith.constant dense<0.000000e+00> : vector<8x512xf32>
    %338 = tpu.matmul %336, %337, %cst_101 {dimension_numbers = #tpu.dot_dimension_numbers<[1], [0], [0], [1], [0, 0, 1, 1], [], []>} : vector<8x256xf32>, vector<256x512xf32>, vector<8x512xf32> -> vector<8x512xf32>
    %339 = arith.addf %338, %12 : vector<8x512xf32>
    %340 = vector.extract_strided_slice %339 {offsets = [0, 0], sizes = [8, 128], strides = [1, 1]} : vector<8x512xf32> to vector<8x128xf32>
    %341 = arith.negf %340 : vector<8x128xf32>
    %342 = math.exp %341 : vector<8x128xf32>
    %cst_102 = arith.constant 1.000000e+00 : f32
    %343 = vector.broadcast %cst_102 : f32 to vector<8x128xf32>
    %344 = arith.addf %343, %342 : vector<8x128xf32>
    %345 = arith.divf %343, %344 : vector<8x128xf32>
    %346 = vector.extract_strided_slice %339 {offsets = [0, 128], sizes = [8, 128], strides = [1, 1]} : vector<8x512xf32> to vector<8x128xf32>
    %347 = arith.negf %346 : vector<8x128xf32>
    %348 = math.exp %347 : vector<8x128xf32>
    %cst_103 = arith.constant 1.000000e+00 : f32
    %349 = vector.broadcast %cst_103 : f32 to vector<8x128xf32>
    %350 = arith.addf %349, %348 : vector<8x128xf32>
    %351 = arith.divf %349, %350 : vector<8x128xf32>
    %352 = vector.extract_strided_slice %339 {offsets = [0, 256], sizes = [8, 128], strides = [1, 1]} : vector<8x512xf32> to vector<8x128xf32>
    %353 = math.tanh %352 : vector<8x128xf32>
    %354 = vector.extract_strided_slice %339 {offsets = [0, 384], sizes = [8, 128], strides = [1, 1]} : vector<8x512xf32> to vector<8x128xf32>
    %355 = arith.negf %354 : vector<8x128xf32>
    %356 = math.exp %355 : vector<8x128xf32>
    %cst_104 = arith.constant 1.000000e+00 : f32
    %357 = vector.broadcast %cst_104 : f32 to vector<8x128xf32>
    %358 = arith.addf %357, %356 : vector<8x128xf32>
    %359 = arith.divf %357, %358 : vector<8x128xf32>
    %360 = arith.mulf %351, %270 : vector<8x128xf32>
    %361 = arith.mulf %345, %353 : vector<8x128xf32>
    %362 = arith.addf %360, %361 : vector<8x128xf32>
    %363 = math.tanh %362 : vector<8x128xf32>
    %364 = arith.mulf %359, %363 : vector<8x128xf32>
    %365 = tpu.concatenate %364, %301 in 1 : vector<8x128xf32>, vector<8x128xf32> -> vector<8x256xf32>
    %c0_105 = arith.constant 0 : index
    %c0_106 = arith.constant 0 : index
    %366 = vector.load %arg7[%c0_105, %c0_106] : memref<256x512xf32, #tpu.memory_space<vmem>>, vector<256x512xf32>
    %cst_107 = arith.constant dense<0.000000e+00> : vector<8x512xf32>
    %367 = tpu.matmul %365, %366, %cst_107 {dimension_numbers = #tpu.dot_dimension_numbers<[1], [0], [0], [1], [0, 0, 1, 1], [], []>} : vector<8x256xf32>, vector<256x512xf32>, vector<8x512xf32> -> vector<8x512xf32>
    %368 = arith.addf %367, %15 : vector<8x512xf32>
    %369 = vector.extract_strided_slice %368 {offsets = [0, 0], sizes = [8, 128], strides = [1, 1]} : vector<8x512xf32> to vector<8x128xf32>
    %370 = arith.negf %369 : vector<8x128xf32>
    %371 = math.exp %370 : vector<8x128xf32>
    %cst_108 = arith.constant 1.000000e+00 : f32
    %372 = vector.broadcast %cst_108 : f32 to vector<8x128xf32>
    %373 = arith.addf %372, %371 : vector<8x128xf32>
    %374 = arith.divf %372, %373 : vector<8x128xf32>
    %375 = vector.extract_strided_slice %368 {offsets = [0, 128], sizes = [8, 128], strides = [1, 1]} : vector<8x512xf32> to vector<8x128xf32>
    %376 = arith.negf %375 : vector<8x128xf32>
    %377 = math.exp %376 : vector<8x128xf32>
    %cst_109 = arith.constant 1.000000e+00 : f32
    %378 = vector.broadcast %cst_109 : f32 to vector<8x128xf32>
    %379 = arith.addf %378, %377 : vector<8x128xf32>
    %380 = arith.divf %378, %379 : vector<8x128xf32>
    %381 = vector.extract_strided_slice %368 {offsets = [0, 256], sizes = [8, 128], strides = [1, 1]} : vector<8x512xf32> to vector<8x128xf32>
    %382 = math.tanh %381 : vector<8x128xf32>
    %383 = vector.extract_strided_slice %368 {offsets = [0, 384], sizes = [8, 128], strides = [1, 1]} : vector<8x512xf32> to vector<8x128xf32>
    %384 = arith.negf %383 : vector<8x128xf32>
    %385 = math.exp %384 : vector<8x128xf32>
    %cst_110 = arith.constant 1.000000e+00 : f32
    %386 = vector.broadcast %cst_110 : f32 to vector<8x128xf32>
    %387 = arith.addf %386, %385 : vector<8x128xf32>
    %388 = arith.divf %386, %387 : vector<8x128xf32>
    %389 = arith.mulf %380, %299 : vector<8x128xf32>
    %390 = arith.mulf %374, %382 : vector<8x128xf32>
    %391 = arith.addf %389, %390 : vector<8x128xf32>
    %392 = math.tanh %391 : vector<8x128xf32>
    %393 = arith.mulf %388, %392 : vector<8x128xf32>
    %394 = arith.index_cast %305 : i32 to index
    %c0_111 = arith.constant 0 : index
    %395 = vector.load %arg15[%394, %c0_111] : memref<64x128xf32, #tpu.memory_space<vmem>>, vector<8x128xf32>
    tpu.vector_store %arg15[%394, %c0_111], %393 {strides = array<i32>} : memref<64x128xf32, #tpu.memory_space<vmem>>, vector<8x128xf32>,
    %c4_i32 = arith.constant 4 : i32
    %c8_i32_112 = arith.constant 8 : i32
    %396 = arith.muli %c4_i32, %c8_i32_112 : i32
    %397 = tpu.assume_multiple %396, 8 : i32
    %398 = arith.index_cast %397 : i32 to index
    %c0_113 = arith.constant 0 : index
    %399 = vector.load %arg14[%398, %c0_113] : memref<64x512xf32, #tpu.memory_space<vmem>>, vector<8x512xf32>
    %c0_114 = arith.constant 0 : index
    %c0_115 = arith.constant 0 : index
    %400 = vector.load %arg4[%c0_114, %c0_115] : memref<128x512xf32, #tpu.memory_space<vmem>>, vector<128x512xf32>
    %cst_116 = arith.constant dense<0.000000e+00> : vector<8x512xf32>
    %401 = tpu.matmul %335, %400, %cst_116 {dimension_numbers = #tpu.dot_dimension_numbers<[1], [0], [0], [1], [0, 0, 1, 1], [], []>} : vector<8x128xf32>, vector<128x512xf32>, vector<8x512xf32> -> vector<8x512xf32>
    %402 = arith.addf %399, %401 : vector<8x512xf32>
    %403 = vector.extract_strided_slice %402 {offsets = [0, 0], sizes = [8, 128], strides = [1, 1]} : vector<8x512xf32> to vector<8x128xf32>
    %404 = arith.negf %403 : vector<8x128xf32>
    %405 = math.exp %404 : vector<8x128xf32>
    %cst_117 = arith.constant 1.000000e+00 : f32
    %406 = vector.broadcast %cst_117 : f32 to vector<8x128xf32>
    %407 = arith.addf %406, %405 : vector<8x128xf32>
    %408 = arith.divf %406, %407 : vector<8x128xf32>
    %409 = vector.extract_strided_slice %402 {offsets = [0, 128], sizes = [8, 128], strides = [1, 1]} : vector<8x512xf32> to vector<8x128xf32>
    %410 = arith.negf %409 : vector<8x128xf32>
    %411 = math.exp %410 : vector<8x128xf32>
    %cst_118 = arith.constant 1.000000e+00 : f32
    %412 = vector.broadcast %cst_118 : f32 to vector<8x128xf32>
    %413 = arith.addf %412, %411 : vector<8x128xf32>
    %414 = arith.divf %412, %413 : vector<8x128xf32>
    %415 = vector.extract_strided_slice %402 {offsets = [0, 256], sizes = [8, 128], strides = [1, 1]} : vector<8x512xf32> to vector<8x128xf32>
    %416 = math.tanh %415 : vector<8x128xf32>
    %417 = vector.extract_strided_slice %402 {offsets = [0, 384], sizes = [8, 128], strides = [1, 1]} : vector<8x512xf32> to vector<8x128xf32>
    %418 = arith.negf %417 : vector<8x128xf32>
    %419 = math.exp %418 : vector<8x128xf32>
    %cst_119 = arith.constant 1.000000e+00 : f32
    %420 = vector.broadcast %cst_119 : f32 to vector<8x128xf32>
    %421 = arith.addf %420, %419 : vector<8x128xf32>
    %422 = arith.divf %420, %421 : vector<8x128xf32>
    %423 = arith.mulf %414, %333 : vector<8x128xf32>
    %424 = arith.mulf %408, %416 : vector<8x128xf32>
    %425 = arith.addf %423, %424 : vector<8x128xf32>
    %426 = math.tanh %425 : vector<8x128xf32>
    %427 = arith.mulf %422, %426 : vector<8x128xf32>
    %428 = tpu.concatenate %427, %364 in 1 : vector<8x128xf32>, vector<8x128xf32> -> vector<8x256xf32>
    %c0_120 = arith.constant 0 : index
    %c0_121 = arith.constant 0 : index
    %429 = vector.load %arg5[%c0_120, %c0_121] : memref<256x512xf32, #tpu.memory_space<vmem>>, vector<256x512xf32>
    %cst_122 = arith.constant dense<0.000000e+00> : vector<8x512xf32>
    %430 = tpu.matmul %428, %429, %cst_122 {dimension_numbers = #tpu.dot_dimension_numbers<[1], [0], [0], [1], [0, 0, 1, 1], [], []>} : vector<8x256xf32>, vector<256x512xf32>, vector<8x512xf32> -> vector<8x512xf32>
    %431 = arith.addf %430, %12 : vector<8x512xf32>
    %432 = vector.extract_strided_slice %431 {offsets = [0, 0], sizes = [8, 128], strides = [1, 1]} : vector<8x512xf32> to vector<8x128xf32>
    %433 = arith.negf %432 : vector<8x128xf32>
    %434 = math.exp %433 : vector<8x128xf32>
    %cst_123 = arith.constant 1.000000e+00 : f32
    %435 = vector.broadcast %cst_123 : f32 to vector<8x128xf32>
    %436 = arith.addf %435, %434 : vector<8x128xf32>
    %437 = arith.divf %435, %436 : vector<8x128xf32>
    %438 = vector.extract_strided_slice %431 {offsets = [0, 128], sizes = [8, 128], strides = [1, 1]} : vector<8x512xf32> to vector<8x128xf32>
    %439 = arith.negf %438 : vector<8x128xf32>
    %440 = math.exp %439 : vector<8x128xf32>
    %cst_124 = arith.constant 1.000000e+00 : f32
    %441 = vector.broadcast %cst_124 : f32 to vector<8x128xf32>
    %442 = arith.addf %441, %440 : vector<8x128xf32>
    %443 = arith.divf %441, %442 : vector<8x128xf32>
    %444 = vector.extract_strided_slice %431 {offsets = [0, 256], sizes = [8, 128], strides = [1, 1]} : vector<8x512xf32> to vector<8x128xf32>
    %445 = math.tanh %444 : vector<8x128xf32>
    %446 = vector.extract_strided_slice %431 {offsets = [0, 384], sizes = [8, 128], strides = [1, 1]} : vector<8x512xf32> to vector<8x128xf32>
    %447 = arith.negf %446 : vector<8x128xf32>
    %448 = math.exp %447 : vector<8x128xf32>
    %cst_125 = arith.constant 1.000000e+00 : f32
    %449 = vector.broadcast %cst_125 : f32 to vector<8x128xf32>
    %450 = arith.addf %449, %448 : vector<8x128xf32>
    %451 = arith.divf %449, %450 : vector<8x128xf32>
    %452 = arith.mulf %443, %362 : vector<8x128xf32>
    %453 = arith.mulf %437, %445 : vector<8x128xf32>
    %454 = arith.addf %452, %453 : vector<8x128xf32>
    %455 = math.tanh %454 : vector<8x128xf32>
    %456 = arith.mulf %451, %455 : vector<8x128xf32>
    %457 = tpu.concatenate %456, %393 in 1 : vector<8x128xf32>, vector<8x128xf32> -> vector<8x256xf32>
    %c0_126 = arith.constant 0 : index
    %c0_127 = arith.constant 0 : index
    %458 = vector.load %arg7[%c0_126, %c0_127] : memref<256x512xf32, #tpu.memory_space<vmem>>, vector<256x512xf32>
    %cst_128 = arith.constant dense<0.000000e+00> : vector<8x512xf32>
    %459 = tpu.matmul %457, %458, %cst_128 {dimension_numbers = #tpu.dot_dimension_numbers<[1], [0], [0], [1], [0, 0, 1, 1], [], []>} : vector<8x256xf32>, vector<256x512xf32>, vector<8x512xf32> -> vector<8x512xf32>
    %460 = arith.addf %459, %15 : vector<8x512xf32>
    %461 = vector.extract_strided_slice %460 {offsets = [0, 0], sizes = [8, 128], strides = [1, 1]} : vector<8x512xf32> to vector<8x128xf32>
    %462 = arith.negf %461 : vector<8x128xf32>
    %463 = math.exp %462 : vector<8x128xf32>
    %cst_129 = arith.constant 1.000000e+00 : f32
    %464 = vector.broadcast %cst_129 : f32 to vector<8x128xf32>
    %465 = arith.addf %464, %463 : vector<8x128xf32>
    %466 = arith.divf %464, %465 : vector<8x128xf32>
    %467 = vector.extract_strided_slice %460 {offsets = [0, 128], sizes = [8, 128], strides = [1, 1]} : vector<8x512xf32> to vector<8x128xf32>
    %468 = arith.negf %467 : vector<8x128xf32>
    %469 = math.exp %468 : vector<8x128xf32>
    %cst_130 = arith.constant 1.000000e+00 : f32
    %470 = vector.broadcast %cst_130 : f32 to vector<8x128xf32>
    %471 = arith.addf %470, %469 : vector<8x128xf32>
    %472 = arith.divf %470, %471 : vector<8x128xf32>
    %473 = vector.extract_strided_slice %460 {offsets = [0, 256], sizes = [8, 128], strides = [1, 1]} : vector<8x512xf32> to vector<8x128xf32>
    %474 = math.tanh %473 : vector<8x128xf32>
    %475 = vector.extract_strided_slice %460 {offsets = [0, 384], sizes = [8, 128], strides = [1, 1]} : vector<8x512xf32> to vector<8x128xf32>
    %476 = arith.negf %475 : vector<8x128xf32>
    %477 = math.exp %476 : vector<8x128xf32>
    %cst_131 = arith.constant 1.000000e+00 : f32
    %478 = vector.broadcast %cst_131 : f32 to vector<8x128xf32>
    %479 = arith.addf %478, %477 : vector<8x128xf32>
    %480 = arith.divf %478, %479 : vector<8x128xf32>
    %481 = arith.mulf %472, %391 : vector<8x128xf32>
    %482 = arith.mulf %466, %474 : vector<8x128xf32>
    %483 = arith.addf %481, %482 : vector<8x128xf32>
    %484 = math.tanh %483 : vector<8x128xf32>
    %485 = arith.mulf %480, %484 : vector<8x128xf32>
    %486 = arith.index_cast %397 : i32 to index
    %c0_132 = arith.constant 0 : index
    %487 = vector.load %arg15[%486, %c0_132] : memref<64x128xf32, #tpu.memory_space<vmem>>, vector<8x128xf32>
    tpu.vector_store %arg15[%486, %c0_132], %485 {strides = array<i32>} : memref<64x128xf32, #tpu.memory_space<vmem>>, vector<8x128xf32>,
    %c5_i32 = arith.constant 5 : i32
    %c8_i32_133 = arith.constant 8 : i32
    %488 = arith.muli %c5_i32, %c8_i32_133 : i32
    %489 = tpu.assume_multiple %488, 8 : i32
    %490 = arith.index_cast %489 : i32 to index
    %c0_134 = arith.constant 0 : index
    %491 = vector.load %arg14[%490, %c0_134] : memref<64x512xf32, #tpu.memory_space<vmem>>, vector<8x512xf32>
    %c0_135 = arith.constant 0 : index
    %c0_136 = arith.constant 0 : index
    %492 = vector.load %arg4[%c0_135, %c0_136] : memref<128x512xf32, #tpu.memory_space<vmem>>, vector<128x512xf32>
    %cst_137 = arith.constant dense<0.000000e+00> : vector<8x512xf32>
    %493 = tpu.matmul %427, %492, %cst_137 {dimension_numbers = #tpu.dot_dimension_numbers<[1], [0], [0], [1], [0, 0, 1, 1], [], []>} : vector<8x128xf32>, vector<128x512xf32>, vector<8x512xf32> -> vector<8x512xf32>
    %494 = arith.addf %491, %493 : vector<8x512xf32>
    %495 = vector.extract_strided_slice %494 {offsets = [0, 0], sizes = [8, 128], strides = [1, 1]} : vector<8x512xf32> to vector<8x128xf32>
    %496 = arith.negf %495 : vector<8x128xf32>
    %497 = math.exp %496 : vector<8x128xf32>
    %cst_138 = arith.constant 1.000000e+00 : f32
    %498 = vector.broadcast %cst_138 : f32 to vector<8x128xf32>
    %499 = arith.addf %498, %497 : vector<8x128xf32>
    %500 = arith.divf %498, %499 : vector<8x128xf32>
    %501 = vector.extract_strided_slice %494 {offsets = [0, 128], sizes = [8, 128], strides = [1, 1]} : vector<8x512xf32> to vector<8x128xf32>
    %502 = arith.negf %501 : vector<8x128xf32>
    %503 = math.exp %502 : vector<8x128xf32>
    %cst_139 = arith.constant 1.000000e+00 : f32
    %504 = vector.broadcast %cst_139 : f32 to vector<8x128xf32>
    %505 = arith.addf %504, %503 : vector<8x128xf32>
    %506 = arith.divf %504, %505 : vector<8x128xf32>
    %507 = vector.extract_strided_slice %494 {offsets = [0, 256], sizes = [8, 128], strides = [1, 1]} : vector<8x512xf32> to vector<8x128xf32>
    %508 = math.tanh %507 : vector<8x128xf32>
    %509 = vector.extract_strided_slice %494 {offsets = [0, 384], sizes = [8, 128], strides = [1, 1]} : vector<8x512xf32> to vector<8x128xf32>
    %510 = arith.negf %509 : vector<8x128xf32>
    %511 = math.exp %510 : vector<8x128xf32>
    %cst_140 = arith.constant 1.000000e+00 : f32
    %512 = vector.broadcast %cst_140 : f32 to vector<8x128xf32>
    %513 = arith.addf %512, %511 : vector<8x128xf32>
    %514 = arith.divf %512, %513 : vector<8x128xf32>
    %515 = arith.mulf %506, %425 : vector<8x128xf32>
    %516 = arith.mulf %500, %508 : vector<8x128xf32>
    %517 = arith.addf %515, %516 : vector<8x128xf32>
    %518 = math.tanh %517 : vector<8x128xf32>
    %519 = arith.mulf %514, %518 : vector<8x128xf32>
    %520 = tpu.concatenate %519, %456 in 1 : vector<8x128xf32>, vector<8x128xf32> -> vector<8x256xf32>
    %c0_141 = arith.constant 0 : index
    %c0_142 = arith.constant 0 : index
    %521 = vector.load %arg5[%c0_141, %c0_142] : memref<256x512xf32, #tpu.memory_space<vmem>>, vector<256x512xf32>
    %cst_143 = arith.constant dense<0.000000e+00> : vector<8x512xf32>
    %522 = tpu.matmul %520, %521, %cst_143 {dimension_numbers = #tpu.dot_dimension_numbers<[1], [0], [0], [1], [0, 0, 1, 1], [], []>} : vector<8x256xf32>, vector<256x512xf32>, vector<8x512xf32> -> vector<8x512xf32>
    %523 = arith.addf %522, %12 : vector<8x512xf32>
    %524 = vector.extract_strided_slice %523 {offsets = [0, 0], sizes = [8, 128], strides = [1, 1]} : vector<8x512xf32> to vector<8x128xf32>
    %525 = arith.negf %524 : vector<8x128xf32>
    %526 = math.exp %525 : vector<8x128xf32>
    %cst_144 = arith.constant 1.000000e+00 : f32
    %527 = vector.broadcast %cst_144 : f32 to vector<8x128xf32>
    %528 = arith.addf %527, %526 : vector<8x128xf32>
    %529 = arith.divf %527, %528 : vector<8x128xf32>
    %530 = vector.extract_strided_slice %523 {offsets = [0, 128], sizes = [8, 128], strides = [1, 1]} : vector<8x512xf32> to vector<8x128xf32>
    %531 = arith.negf %530 : vector<8x128xf32>
    %532 = math.exp %531 : vector<8x128xf32>
    %cst_145 = arith.constant 1.000000e+00 : f32
    %533 = vector.broadcast %cst_145 : f32 to vector<8x128xf32>
    %534 = arith.addf %533, %532 : vector<8x128xf32>
    %535 = arith.divf %533, %534 : vector<8x128xf32>
    %536 = vector.extract_strided_slice %523 {offsets = [0, 256], sizes = [8, 128], strides = [1, 1]} : vector<8x512xf32> to vector<8x128xf32>
    %537 = math.tanh %536 : vector<8x128xf32>
    %538 = vector.extract_strided_slice %523 {offsets = [0, 384], sizes = [8, 128], strides = [1, 1]} : vector<8x512xf32> to vector<8x128xf32>
    %539 = arith.negf %538 : vector<8x128xf32>
    %540 = math.exp %539 : vector<8x128xf32>
    %cst_146 = arith.constant 1.000000e+00 : f32
    %541 = vector.broadcast %cst_146 : f32 to vector<8x128xf32>
    %542 = arith.addf %541, %540 : vector<8x128xf32>
    %543 = arith.divf %541, %542 : vector<8x128xf32>
    %544 = arith.mulf %535, %454 : vector<8x128xf32>
    %545 = arith.mulf %529, %537 : vector<8x128xf32>
    %546 = arith.addf %544, %545 : vector<8x128xf32>
    %547 = math.tanh %546 : vector<8x128xf32>
    %548 = arith.mulf %543, %547 : vector<8x128xf32>
    %549 = tpu.concatenate %548, %485 in 1 : vector<8x128xf32>, vector<8x128xf32> -> vector<8x256xf32>
    %c0_147 = arith.constant 0 : index
    %c0_148 = arith.constant 0 : index
    %550 = vector.load %arg7[%c0_147, %c0_148] : memref<256x512xf32, #tpu.memory_space<vmem>>, vector<256x512xf32>
    %cst_149 = arith.constant dense<0.000000e+00> : vector<8x512xf32>
    %551 = tpu.matmul %549, %550, %cst_149 {dimension_numbers = #tpu.dot_dimension_numbers<[1], [0], [0], [1], [0, 0, 1, 1], [], []>} : vector<8x256xf32>, vector<256x512xf32>, vector<8x512xf32> -> vector<8x512xf32>
    %552 = arith.addf %551, %15 : vector<8x512xf32>
    %553 = vector.extract_strided_slice %552 {offsets = [0, 0], sizes = [8, 128], strides = [1, 1]} : vector<8x512xf32> to vector<8x128xf32>
    %554 = arith.negf %553 : vector<8x128xf32>
    %555 = math.exp %554 : vector<8x128xf32>
    %cst_150 = arith.constant 1.000000e+00 : f32
    %556 = vector.broadcast %cst_150 : f32 to vector<8x128xf32>
    %557 = arith.addf %556, %555 : vector<8x128xf32>
    %558 = arith.divf %556, %557 : vector<8x128xf32>
    %559 = vector.extract_strided_slice %552 {offsets = [0, 128], sizes = [8, 128], strides = [1, 1]} : vector<8x512xf32> to vector<8x128xf32>
    %560 = arith.negf %559 : vector<8x128xf32>
    %561 = math.exp %560 : vector<8x128xf32>
    %cst_151 = arith.constant 1.000000e+00 : f32
    %562 = vector.broadcast %cst_151 : f32 to vector<8x128xf32>
    %563 = arith.addf %562, %561 : vector<8x128xf32>
    %564 = arith.divf %562, %563 : vector<8x128xf32>
    %565 = vector.extract_strided_slice %552 {offsets = [0, 256], sizes = [8, 128], strides = [1, 1]} : vector<8x512xf32> to vector<8x128xf32>
    %566 = math.tanh %565 : vector<8x128xf32>
    %567 = vector.extract_strided_slice %552 {offsets = [0, 384], sizes = [8, 128], strides = [1, 1]} : vector<8x512xf32> to vector<8x128xf32>
    %568 = arith.negf %567 : vector<8x128xf32>
    %569 = math.exp %568 : vector<8x128xf32>
    %cst_152 = arith.constant 1.000000e+00 : f32
    %570 = vector.broadcast %cst_152 : f32 to vector<8x128xf32>
    %571 = arith.addf %570, %569 : vector<8x128xf32>
    %572 = arith.divf %570, %571 : vector<8x128xf32>
    %573 = arith.mulf %564, %483 : vector<8x128xf32>
    %574 = arith.mulf %558, %566 : vector<8x128xf32>
    %575 = arith.addf %573, %574 : vector<8x128xf32>
    %576 = math.tanh %575 : vector<8x128xf32>
    %577 = arith.mulf %572, %576 : vector<8x128xf32>
    %578 = arith.index_cast %489 : i32 to index
    %c0_153 = arith.constant 0 : index
    %579 = vector.load %arg15[%578, %c0_153] : memref<64x128xf32, #tpu.memory_space<vmem>>, vector<8x128xf32>
    tpu.vector_store %arg15[%578, %c0_153], %577 {strides = array<i32>} : memref<64x128xf32, #tpu.memory_space<vmem>>, vector<8x128xf32>,
    %c6_i32 = arith.constant 6 : i32
    %c8_i32_154 = arith.constant 8 : i32
    %580 = arith.muli %c6_i32, %c8_i32_154 : i32
    %581 = tpu.assume_multiple %580, 8 : i32
    %582 = arith.index_cast %581 : i32 to index
    %c0_155 = arith.constant 0 : index
    %583 = vector.load %arg14[%582, %c0_155] : memref<64x512xf32, #tpu.memory_space<vmem>>, vector<8x512xf32>
    %c0_156 = arith.constant 0 : index
    %c0_157 = arith.constant 0 : index
    %584 = vector.load %arg4[%c0_156, %c0_157] : memref<128x512xf32, #tpu.memory_space<vmem>>, vector<128x512xf32>
    %cst_158 = arith.constant dense<0.000000e+00> : vector<8x512xf32>
    %585 = tpu.matmul %519, %584, %cst_158 {dimension_numbers = #tpu.dot_dimension_numbers<[1], [0], [0], [1], [0, 0, 1, 1], [], []>} : vector<8x128xf32>, vector<128x512xf32>, vector<8x512xf32> -> vector<8x512xf32>
    %586 = arith.addf %583, %585 : vector<8x512xf32>
    %587 = vector.extract_strided_slice %586 {offsets = [0, 0], sizes = [8, 128], strides = [1, 1]} : vector<8x512xf32> to vector<8x128xf32>
    %588 = arith.negf %587 : vector<8x128xf32>
    %589 = math.exp %588 : vector<8x128xf32>
    %cst_159 = arith.constant 1.000000e+00 : f32
    %590 = vector.broadcast %cst_159 : f32 to vector<8x128xf32>
    %591 = arith.addf %590, %589 : vector<8x128xf32>
    %592 = arith.divf %590, %591 : vector<8x128xf32>
    %593 = vector.extract_strided_slice %586 {offsets = [0, 128], sizes = [8, 128], strides = [1, 1]} : vector<8x512xf32> to vector<8x128xf32>
    %594 = arith.negf %593 : vector<8x128xf32>
    %595 = math.exp %594 : vector<8x128xf32>
    %cst_160 = arith.constant 1.000000e+00 : f32
    %596 = vector.broadcast %cst_160 : f32 to vector<8x128xf32>
    %597 = arith.addf %596, %595 : vector<8x128xf32>
    %598 = arith.divf %596, %597 : vector<8x128xf32>
    %599 = vector.extract_strided_slice %586 {offsets = [0, 256], sizes = [8, 128], strides = [1, 1]} : vector<8x512xf32> to vector<8x128xf32>
    %600 = math.tanh %599 : vector<8x128xf32>
    %601 = vector.extract_strided_slice %586 {offsets = [0, 384], sizes = [8, 128], strides = [1, 1]} : vector<8x512xf32> to vector<8x128xf32>
    %602 = arith.negf %601 : vector<8x128xf32>
    %603 = math.exp %602 : vector<8x128xf32>
    %cst_161 = arith.constant 1.000000e+00 : f32
    %604 = vector.broadcast %cst_161 : f32 to vector<8x128xf32>
    %605 = arith.addf %604, %603 : vector<8x128xf32>
    %606 = arith.divf %604, %605 : vector<8x128xf32>
    %607 = arith.mulf %598, %517 : vector<8x128xf32>
    %608 = arith.mulf %592, %600 : vector<8x128xf32>
    %609 = arith.addf %607, %608 : vector<8x128xf32>
    %610 = math.tanh %609 : vector<8x128xf32>
    %611 = arith.mulf %606, %610 : vector<8x128xf32>
    %612 = tpu.concatenate %611, %548 in 1 : vector<8x128xf32>, vector<8x128xf32> -> vector<8x256xf32>
    %c0_162 = arith.constant 0 : index
    %c0_163 = arith.constant 0 : index
    %613 = vector.load %arg5[%c0_162, %c0_163] : memref<256x512xf32, #tpu.memory_space<vmem>>, vector<256x512xf32>
    %cst_164 = arith.constant dense<0.000000e+00> : vector<8x512xf32>
    %614 = tpu.matmul %612, %613, %cst_164 {dimension_numbers = #tpu.dot_dimension_numbers<[1], [0], [0], [1], [0, 0, 1, 1], [], []>} : vector<8x256xf32>, vector<256x512xf32>, vector<8x512xf32> -> vector<8x512xf32>
    %615 = arith.addf %614, %12 : vector<8x512xf32>
    %616 = vector.extract_strided_slice %615 {offsets = [0, 0], sizes = [8, 128], strides = [1, 1]} : vector<8x512xf32> to vector<8x128xf32>
    %617 = arith.negf %616 : vector<8x128xf32>
    %618 = math.exp %617 : vector<8x128xf32>
    %cst_165 = arith.constant 1.000000e+00 : f32
    %619 = vector.broadcast %cst_165 : f32 to vector<8x128xf32>
    %620 = arith.addf %619, %618 : vector<8x128xf32>
    %621 = arith.divf %619, %620 : vector<8x128xf32>
    %622 = vector.extract_strided_slice %615 {offsets = [0, 128], sizes = [8, 128], strides = [1, 1]} : vector<8x512xf32> to vector<8x128xf32>
    %623 = arith.negf %622 : vector<8x128xf32>
    %624 = math.exp %623 : vector<8x128xf32>
    %cst_166 = arith.constant 1.000000e+00 : f32
    %625 = vector.broadcast %cst_166 : f32 to vector<8x128xf32>
    %626 = arith.addf %625, %624 : vector<8x128xf32>
    %627 = arith.divf %625, %626 : vector<8x128xf32>
    %628 = vector.extract_strided_slice %615 {offsets = [0, 256], sizes = [8, 128], strides = [1, 1]} : vector<8x512xf32> to vector<8x128xf32>
    %629 = math.tanh %628 : vector<8x128xf32>
    %630 = vector.extract_strided_slice %615 {offsets = [0, 384], sizes = [8, 128], strides = [1, 1]} : vector<8x512xf32> to vector<8x128xf32>
    %631 = arith.negf %630 : vector<8x128xf32>
    %632 = math.exp %631 : vector<8x128xf32>
    %cst_167 = arith.constant 1.000000e+00 : f32
    %633 = vector.broadcast %cst_167 : f32 to vector<8x128xf32>
    %634 = arith.addf %633, %632 : vector<8x128xf32>
    %635 = arith.divf %633, %634 : vector<8x128xf32>
    %636 = arith.mulf %627, %546 : vector<8x128xf32>
    %637 = arith.mulf %621, %629 : vector<8x128xf32>
    %638 = arith.addf %636, %637 : vector<8x128xf32>
    %639 = math.tanh %638 : vector<8x128xf32>
    %640 = arith.mulf %635, %639 : vector<8x128xf32>
    %641 = tpu.concatenate %640, %577 in 1 : vector<8x128xf32>, vector<8x128xf32> -> vector<8x256xf32>
    %c0_168 = arith.constant 0 : index
    %c0_169 = arith.constant 0 : index
    %642 = vector.load %arg7[%c0_168, %c0_169] : memref<256x512xf32, #tpu.memory_space<vmem>>, vector<256x512xf32>
    %cst_170 = arith.constant dense<0.000000e+00> : vector<8x512xf32>
    %643 = tpu.matmul %641, %642, %cst_170 {dimension_numbers = #tpu.dot_dimension_numbers<[1], [0], [0], [1], [0, 0, 1, 1], [], []>} : vector<8x256xf32>, vector<256x512xf32>, vector<8x512xf32> -> vector<8x512xf32>
    %644 = arith.addf %643, %15 : vector<8x512xf32>
    %645 = vector.extract_strided_slice %644 {offsets = [0, 0], sizes = [8, 128], strides = [1, 1]} : vector<8x512xf32> to vector<8x128xf32>
    %646 = arith.negf %645 : vector<8x128xf32>
    %647 = math.exp %646 : vector<8x128xf32>
    %cst_171 = arith.constant 1.000000e+00 : f32
    %648 = vector.broadcast %cst_171 : f32 to vector<8x128xf32>
    %649 = arith.addf %648, %647 : vector<8x128xf32>
    %650 = arith.divf %648, %649 : vector<8x128xf32>
    %651 = vector.extract_strided_slice %644 {offsets = [0, 128], sizes = [8, 128], strides = [1, 1]} : vector<8x512xf32> to vector<8x128xf32>
    %652 = arith.negf %651 : vector<8x128xf32>
    %653 = math.exp %652 : vector<8x128xf32>
    %cst_172 = arith.constant 1.000000e+00 : f32
    %654 = vector.broadcast %cst_172 : f32 to vector<8x128xf32>
    %655 = arith.addf %654, %653 : vector<8x128xf32>
    %656 = arith.divf %654, %655 : vector<8x128xf32>
    %657 = vector.extract_strided_slice %644 {offsets = [0, 256], sizes = [8, 128], strides = [1, 1]} : vector<8x512xf32> to vector<8x128xf32>
    %658 = math.tanh %657 : vector<8x128xf32>
    %659 = vector.extract_strided_slice %644 {offsets = [0, 384], sizes = [8, 128], strides = [1, 1]} : vector<8x512xf32> to vector<8x128xf32>
    %660 = arith.negf %659 : vector<8x128xf32>
    %661 = math.exp %660 : vector<8x128xf32>
    %cst_173 = arith.constant 1.000000e+00 : f32
    %662 = vector.broadcast %cst_173 : f32 to vector<8x128xf32>
    %663 = arith.addf %662, %661 : vector<8x128xf32>
    %664 = arith.divf %662, %663 : vector<8x128xf32>
    %665 = arith.mulf %656, %575 : vector<8x128xf32>
    %666 = arith.mulf %650, %658 : vector<8x128xf32>
    %667 = arith.addf %665, %666 : vector<8x128xf32>
    %668 = math.tanh %667 : vector<8x128xf32>
    %669 = arith.mulf %664, %668 : vector<8x128xf32>
    %670 = arith.index_cast %581 : i32 to index
    %c0_174 = arith.constant 0 : index
    %671 = vector.load %arg15[%670, %c0_174] : memref<64x128xf32, #tpu.memory_space<vmem>>, vector<8x128xf32>
    tpu.vector_store %arg15[%670, %c0_174], %669 {strides = array<i32>} : memref<64x128xf32, #tpu.memory_space<vmem>>, vector<8x128xf32>,
    %c7_i32 = arith.constant 7 : i32
    %c8_i32_175 = arith.constant 8 : i32
    %672 = arith.muli %c7_i32, %c8_i32_175 : i32
    %673 = tpu.assume_multiple %672, 8 : i32
    %674 = arith.index_cast %673 : i32 to index
    %c0_176 = arith.constant 0 : index
    %675 = vector.load %arg14[%674, %c0_176] : memref<64x512xf32, #tpu.memory_space<vmem>>, vector<8x512xf32>
    %c0_177 = arith.constant 0 : index
    %c0_178 = arith.constant 0 : index
    %676 = vector.load %arg4[%c0_177, %c0_178] : memref<128x512xf32, #tpu.memory_space<vmem>>, vector<128x512xf32>
    %cst_179 = arith.constant dense<0.000000e+00> : vector<8x512xf32>
    %677 = tpu.matmul %611, %676, %cst_179 {dimension_numbers = #tpu.dot_dimension_numbers<[1], [0], [0], [1], [0, 0, 1, 1], [], []>} : vector<8x128xf32>, vector<128x512xf32>, vector<8x512xf32> -> vector<8x512xf32>
    %678 = arith.addf %675, %677 : vector<8x512xf32>
    %679 = vector.extract_strided_slice %678 {offsets = [0, 0], sizes = [8, 128], strides = [1, 1]} : vector<8x512xf32> to vector<8x128xf32>
    %680 = arith.negf %679 : vector<8x128xf32>
    %681 = math.exp %680 : vector<8x128xf32>
    %cst_180 = arith.constant 1.000000e+00 : f32
    %682 = vector.broadcast %cst_180 : f32 to vector<8x128xf32>
    %683 = arith.addf %682, %681 : vector<8x128xf32>
    %684 = arith.divf %682, %683 : vector<8x128xf32>
    %685 = vector.extract_strided_slice %678 {offsets = [0, 128], sizes = [8, 128], strides = [1, 1]} : vector<8x512xf32> to vector<8x128xf32>
    %686 = arith.negf %685 : vector<8x128xf32>
    %687 = math.exp %686 : vector<8x128xf32>
    %cst_181 = arith.constant 1.000000e+00 : f32
    %688 = vector.broadcast %cst_181 : f32 to vector<8x128xf32>
    %689 = arith.addf %688, %687 : vector<8x128xf32>
    %690 = arith.divf %688, %689 : vector<8x128xf32>
    %691 = vector.extract_strided_slice %678 {offsets = [0, 256], sizes = [8, 128], strides = [1, 1]} : vector<8x512xf32> to vector<8x128xf32>
    %692 = math.tanh %691 : vector<8x128xf32>
    %693 = vector.extract_strided_slice %678 {offsets = [0, 384], sizes = [8, 128], strides = [1, 1]} : vector<8x512xf32> to vector<8x128xf32>
    %694 = arith.negf %693 : vector<8x128xf32>
    %695 = math.exp %694 : vector<8x128xf32>
    %cst_182 = arith.constant 1.000000e+00 : f32
    %696 = vector.broadcast %cst_182 : f32 to vector<8x128xf32>
    %697 = arith.addf %696, %695 : vector<8x128xf32>
    %698 = arith.divf %696, %697 : vector<8x128xf32>
    %699 = arith.mulf %690, %609 : vector<8x128xf32>
    %700 = arith.mulf %684, %692 : vector<8x128xf32>
    %701 = arith.addf %699, %700 : vector<8x128xf32>
    %702 = math.tanh %701 : vector<8x128xf32>
    %703 = arith.mulf %698, %702 : vector<8x128xf32>
    %704 = tpu.concatenate %703, %640 in 1 : vector<8x128xf32>, vector<8x128xf32> -> vector<8x256xf32>
    %c0_183 = arith.constant 0 : index
    %c0_184 = arith.constant 0 : index
    %705 = vector.load %arg5[%c0_183, %c0_184] : memref<256x512xf32, #tpu.memory_space<vmem>>, vector<256x512xf32>
    %cst_185 = arith.constant dense<0.000000e+00> : vector<8x512xf32>
    %706 = tpu.matmul %704, %705, %cst_185 {dimension_numbers = #tpu.dot_dimension_numbers<[1], [0], [0], [1], [0, 0, 1, 1], [], []>} : vector<8x256xf32>, vector<256x512xf32>, vector<8x512xf32> -> vector<8x512xf32>
    %707 = arith.addf %706, %12 : vector<8x512xf32>
    %708 = vector.extract_strided_slice %707 {offsets = [0, 0], sizes = [8, 128], strides = [1, 1]} : vector<8x512xf32> to vector<8x128xf32>
    %709 = arith.negf %708 : vector<8x128xf32>
    %710 = math.exp %709 : vector<8x128xf32>
    %cst_186 = arith.constant 1.000000e+00 : f32
    %711 = vector.broadcast %cst_186 : f32 to vector<8x128xf32>
    %712 = arith.addf %711, %710 : vector<8x128xf32>
    %713 = arith.divf %711, %712 : vector<8x128xf32>
    %714 = vector.extract_strided_slice %707 {offsets = [0, 128], sizes = [8, 128], strides = [1, 1]} : vector<8x512xf32> to vector<8x128xf32>
    %715 = arith.negf %714 : vector<8x128xf32>
    %716 = math.exp %715 : vector<8x128xf32>
    %cst_187 = arith.constant 1.000000e+00 : f32
    %717 = vector.broadcast %cst_187 : f32 to vector<8x128xf32>
    %718 = arith.addf %717, %716 : vector<8x128xf32>
    %719 = arith.divf %717, %718 : vector<8x128xf32>
    %720 = vector.extract_strided_slice %707 {offsets = [0, 256], sizes = [8, 128], strides = [1, 1]} : vector<8x512xf32> to vector<8x128xf32>
    %721 = math.tanh %720 : vector<8x128xf32>
    %722 = vector.extract_strided_slice %707 {offsets = [0, 384], sizes = [8, 128], strides = [1, 1]} : vector<8x512xf32> to vector<8x128xf32>
    %723 = arith.negf %722 : vector<8x128xf32>
    %724 = math.exp %723 : vector<8x128xf32>
    %cst_188 = arith.constant 1.000000e+00 : f32
    %725 = vector.broadcast %cst_188 : f32 to vector<8x128xf32>
    %726 = arith.addf %725, %724 : vector<8x128xf32>
    %727 = arith.divf %725, %726 : vector<8x128xf32>
    %728 = arith.mulf %719, %638 : vector<8x128xf32>
    %729 = arith.mulf %713, %721 : vector<8x128xf32>
    %730 = arith.addf %728, %729 : vector<8x128xf32>
    %731 = math.tanh %730 : vector<8x128xf32>
    %732 = arith.mulf %727, %731 : vector<8x128xf32>
    %733 = tpu.concatenate %732, %669 in 1 : vector<8x128xf32>, vector<8x128xf32> -> vector<8x256xf32>
    %c0_189 = arith.constant 0 : index
    %c0_190 = arith.constant 0 : index
    %734 = vector.load %arg7[%c0_189, %c0_190] : memref<256x512xf32, #tpu.memory_space<vmem>>, vector<256x512xf32>
    %cst_191 = arith.constant dense<0.000000e+00> : vector<8x512xf32>
    %735 = tpu.matmul %733, %734, %cst_191 {dimension_numbers = #tpu.dot_dimension_numbers<[1], [0], [0], [1], [0, 0, 1, 1], [], []>} : vector<8x256xf32>, vector<256x512xf32>, vector<8x512xf32> -> vector<8x512xf32>
    %736 = arith.addf %735, %15 : vector<8x512xf32>
    %737 = vector.extract_strided_slice %736 {offsets = [0, 0], sizes = [8, 128], strides = [1, 1]} : vector<8x512xf32> to vector<8x128xf32>
    %738 = arith.negf %737 : vector<8x128xf32>
    %739 = math.exp %738 : vector<8x128xf32>
    %cst_192 = arith.constant 1.000000e+00 : f32
    %740 = vector.broadcast %cst_192 : f32 to vector<8x128xf32>
    %741 = arith.addf %740, %739 : vector<8x128xf32>
    %742 = arith.divf %740, %741 : vector<8x128xf32>
    %743 = vector.extract_strided_slice %736 {offsets = [0, 128], sizes = [8, 128], strides = [1, 1]} : vector<8x512xf32> to vector<8x128xf32>
    %744 = arith.negf %743 : vector<8x128xf32>
    %745 = math.exp %744 : vector<8x128xf32>
    %cst_193 = arith.constant 1.000000e+00 : f32
    %746 = vector.broadcast %cst_193 : f32 to vector<8x128xf32>
    %747 = arith.addf %746, %745 : vector<8x128xf32>
    %748 = arith.divf %746, %747 : vector<8x128xf32>
    %749 = vector.extract_strided_slice %736 {offsets = [0, 256], sizes = [8, 128], strides = [1, 1]} : vector<8x512xf32> to vector<8x128xf32>
    %750 = math.tanh %749 : vector<8x128xf32>
    %751 = vector.extract_strided_slice %736 {offsets = [0, 384], sizes = [8, 128], strides = [1, 1]} : vector<8x512xf32> to vector<8x128xf32>
    %752 = arith.negf %751 : vector<8x128xf32>
    %753 = math.exp %752 : vector<8x128xf32>
    %cst_194 = arith.constant 1.000000e+00 : f32
    %754 = vector.broadcast %cst_194 : f32 to vector<8x128xf32>
    %755 = arith.addf %754, %753 : vector<8x128xf32>
    %756 = arith.divf %754, %755 : vector<8x128xf32>
    %757 = arith.mulf %748, %667 : vector<8x128xf32>
    %758 = arith.mulf %742, %750 : vector<8x128xf32>
    %759 = arith.addf %757, %758 : vector<8x128xf32>
    %760 = math.tanh %759 : vector<8x128xf32>
    %761 = arith.mulf %756, %760 : vector<8x128xf32>
    %762 = arith.index_cast %673 : i32 to index
    %c0_195 = arith.constant 0 : index
    %763 = vector.load %arg15[%762, %c0_195] : memref<64x128xf32, #tpu.memory_space<vmem>>, vector<8x128xf32>
    tpu.vector_store %arg15[%762, %c0_195], %761 {strides = array<i32>} : memref<64x128xf32, #tpu.memory_space<vmem>>, vector<8x128xf32>,
    %c8_i32_196 = arith.constant 8 : i32
    %c0_197 = arith.constant 0 : index
    %c0_198 = arith.constant 0 : index
    %c0_199 = arith.constant 0 : index
    %764 = vector.load %arg12[%c0_197, %c0_198, %c0_199] : memref<3x8x128xf32, #tpu.memory_space<vmem>>, vector<1x8x128xf32>
    %765 = vector.shape_cast %764 : vector<1x8x128xf32> to vector<8x128xf32>
    %766 = vector.shape_cast %703 : vector<8x128xf32> to vector<1x8x128xf32>
    tpu.vector_store %arg12[%c0_197, %c0_198, %c0_199], %766 {strides = array<i32>} : memref<3x8x128xf32, #tpu.memory_space<vmem>>, vector<1x8x128xf32>,
    %c0_200 = arith.constant 0 : index
    %c0_201 = arith.constant 0 : index
    %c0_202 = arith.constant 0 : index
    %767 = vector.load %arg13[%c0_200, %c0_201, %c0_202] : memref<3x8x128xf32, #tpu.memory_space<vmem>>, vector<1x8x128xf32>
    %768 = vector.shape_cast %767 : vector<1x8x128xf32> to vector<8x128xf32>
    %769 = vector.shape_cast %701 : vector<8x128xf32> to vector<1x8x128xf32>
    tpu.vector_store %arg13[%c0_200, %c0_201, %c0_202], %769 {strides = array<i32>} : memref<3x8x128xf32, #tpu.memory_space<vmem>>, vector<1x8x128xf32>,
    %c1_203 = arith.constant 1 : index
    %c0_204 = arith.constant 0 : index
    %c0_205 = arith.constant 0 : index
    %770 = vector.load %arg12[%c1_203, %c0_204, %c0_205] : memref<3x8x128xf32, #tpu.memory_space<vmem>>, vector<1x8x128xf32>
    %771 = vector.shape_cast %770 : vector<1x8x128xf32> to vector<8x128xf32>
    %772 = vector.shape_cast %732 : vector<8x128xf32> to vector<1x8x128xf32>
    tpu.vector_store %arg12[%c1_203, %c0_204, %c0_205], %772 {strides = array<i32>} : memref<3x8x128xf32, #tpu.memory_space<vmem>>, vector<1x8x128xf32>,
    %c1_206 = arith.constant 1 : index
    %c0_207 = arith.constant 0 : index
    %c0_208 = arith.constant 0 : index
    %773 = vector.load %arg13[%c1_206, %c0_207, %c0_208] : memref<3x8x128xf32, #tpu.memory_space<vmem>>, vector<1x8x128xf32>
    %774 = vector.shape_cast %773 : vector<1x8x128xf32> to vector<8x128xf32>
    %775 = vector.shape_cast %730 : vector<8x128xf32> to vector<1x8x128xf32>
    tpu.vector_store %arg13[%c1_206, %c0_207, %c0_208], %775 {strides = array<i32>} : memref<3x8x128xf32, #tpu.memory_space<vmem>>, vector<1x8x128xf32>,
    %c2_209 = arith.constant 2 : index
    %c0_210 = arith.constant 0 : index
    %c0_211 = arith.constant 0 : index
    %776 = vector.load %arg12[%c2_209, %c0_210, %c0_211] : memref<3x8x128xf32, #tpu.memory_space<vmem>>, vector<1x8x128xf32>
    %777 = vector.shape_cast %776 : vector<1x8x128xf32> to vector<8x128xf32>
    %778 = vector.shape_cast %761 : vector<8x128xf32> to vector<1x8x128xf32>
    tpu.vector_store %arg12[%c2_209, %c0_210, %c0_211], %778 {strides = array<i32>} : memref<3x8x128xf32, #tpu.memory_space<vmem>>, vector<1x8x128xf32>,
    %c2_212 = arith.constant 2 : index
    %c0_213 = arith.constant 0 : index
    %c0_214 = arith.constant 0 : index
    %779 = vector.load %arg13[%c2_212, %c0_213, %c0_214] : memref<3x8x128xf32, #tpu.memory_space<vmem>>, vector<1x8x128xf32>
    %780 = vector.shape_cast %779 : vector<1x8x128xf32> to vector<8x128xf32>
    %781 = vector.shape_cast %759 : vector<8x128xf32> to vector<1x8x128xf32>
    tpu.vector_store %arg13[%c2_212, %c0_213, %c0_214], %781 {strides = array<i32>} : memref<3x8x128xf32, #tpu.memory_space<vmem>>, vector<1x8x128xf32>,
    %c0_215 = arith.constant 0 : index
    %c0_216 = arith.constant 0 : index
    %782 = vector.load %arg15[%c0_215, %c0_216] : memref<64x128xf32, #tpu.memory_space<vmem>>, vector<64x128xf32>
    %c0_217 = arith.constant 0 : index
    %c0_218 = arith.constant 0 : index
    %783 = vector.load %arg9[%c0_217, %c0_218] : memref<128x128xf32, #tpu.memory_space<vmem>>, vector<128x128xf32>
    %cst_219 = arith.constant dense<0.000000e+00> : vector<64x128xf32>
    %784 = tpu.matmul %782, %783, %cst_219 {dimension_numbers = #tpu.dot_dimension_numbers<[1], [0], [0], [1], [0, 0, 1, 1], [], []>} : vector<64x128xf32>, vector<128x128xf32>, vector<64x128xf32> -> vector<64x128xf32>
    %c0_220 = arith.constant 0 : index
    %c0_221 = arith.constant 0 : index
    %785 = vector.load %arg10[%c0_220, %c0_221] : memref<1x128xf32, #tpu.memory_space<vmem>>, vector<1x128xf32>
    %786 = vector.broadcast %785 : vector<1x128xf32> to vector<64x128xf32>
    %787 = arith.addf %784, %786 : vector<64x128xf32>
    %c0_222 = arith.constant 0 : index
    %c0_223 = arith.constant 0 : index
    %788 = vector.load %arg11[%c0_222, %c0_223] : memref<64x128xf32, #tpu.memory_space<vmem>>, vector<64x128xf32>
    tpu.vector_store %arg11[%c0_222, %c0_223], %787 {strides = array<i32>} : memref<64x128xf32, #tpu.memory_space<vmem>>, vector<64x128xf32>,
    return
  }
  func.func @transform_0(%arg0: i32) -> (i32, i32) {
    %c0_i32 = arith.constant 0 : i32
    %c0_i32_0 = arith.constant 0 : i32
    return %arg0, %c0_i32 : i32, i32
  }
  func.func @transform_1(%arg0: i32) -> (i32, i32) {
    %c0_i32 = arith.constant 0 : i32
    %c0_i32_0 = arith.constant 0 : i32
    %c0_i32_1 = arith.constant 0 : i32
    return %c0_i32, %c0_i32_0 : i32, i32
  }
  func.func @transform_2(%arg0: i32) -> (i32, i32) {
    %c0_i32 = arith.constant 0 : i32
    %c0_i32_0 = arith.constant 0 : i32
    %c0_i32_1 = arith.constant 0 : i32
    return %c0_i32, %c0_i32_0 : i32, i32
  }
  func.func @transform_3(%arg0: i32) -> (i32, i32) {
    %c0_i32 = arith.constant 0 : i32
    %c0_i32_0 = arith.constant 0 : i32
    %c0_i32_1 = arith.constant 0 : i32
    return %c0_i32, %c0_i32_0 : i32, i32
  }
  func.func @transform_4(%arg0: i32) -> (i32, i32) {
    %c0_i32 = arith.constant 0 : i32
    %c0_i32_0 = arith.constant 0 : i32
    %c0_i32_1 = arith.constant 0 : i32
    return %c0_i32, %c0_i32_0 : i32, i32
  }
  func.func @transform_5(%arg0: i32) -> (i32, i32) {
    %c0_i32 = arith.constant 0 : i32
    %c0_i32_0 = arith.constant 0 : i32
    %c0_i32_1 = arith.constant 0 : i32
    return %c0_i32, %c0_i32_0 : i32, i32
  }
  func.func @transform_6(%arg0: i32) -> (i32, i32) {
    %c0_i32 = arith.constant 0 : i32
    %c0_i32_0 = arith.constant 0 : i32
    %c0_i32_1 = arith.constant 0 : i32
    return %c0_i32, %c0_i32_0 : i32, i32
  }
  func.func @transform_7(%arg0: i32) -> (i32, i32) {
    %c0_i32 = arith.constant 0 : i32
    %c0_i32_0 = arith.constant 0 : i32
    %c0_i32_1 = arith.constant 0 : i32
    return %c0_i32, %c0_i32_0 : i32, i32
  }
  func.func @transform_8(%arg0: i32) -> (i32, i32) {
    %c0_i32 = arith.constant 0 : i32
    %c0_i32_0 = arith.constant 0 : i32
    %c0_i32_1 = arith.constant 0 : i32
    return %c0_i32, %c0_i32_0 : i32, i32
  }
  func.func @transform_9(%arg0: i32) -> (i32, i32) {
    %c0_i32 = arith.constant 0 : i32
    %c0_i32_0 = arith.constant 0 : i32
    %c0_i32_1 = arith.constant 0 : i32
    return %c0_i32, %c0_i32_0 : i32, i32
  }
  func.func @transform_10(%arg0: i32) -> (i32, i32) {
    %c0_i32 = arith.constant 0 : i32
    %c0_i32_0 = arith.constant 0 : i32
    return %arg0, %c0_i32 : i32, i32
  }
}

</mosaic_0001>

<bundles_post_ra>
// kernel: decoder_forward.1
= control target key start
LH: loop header
LB: loop body
LE: loop exit
PB: predicated region body
PF: predicated region fallthrough
CT: control target
= control target key end

     0   :  { %15 = vsyncpa [#allocation7], 0  ;;  %s9123_s0 = inlined_call_operand.vmem [shape: f32[128,16], index: 0, kind: input, shape index: {}]   ;;  %s9124_s1 = inlined_call_operand.vmem [shape: f32[16,512], index: 1, kind: input, shape index: {}]   ;;  %s9125_s2 = inlined_call_operand.vmem [shape: f32[1,512], index: 2, kind: input, shape index: {}]   ;;  %s9126_s3 = inlined_call_operand.hbm [shape: f32[128,512], index: 3, kind: input, shape index: {}]   ;;  %s9127_s4 = inlined_call_operand.hbm [shape: f32[256,512], index: 4, kind: input, shape index: {}]   ;;  %s9128_s5 = inlined_call_operand.vmem [shape: f32[1,512], index: 5, kind: input, shape index: {}]   ;;  %s9129_s6 = inlined_call_operand.hbm [shape: f32[256,512], index: 6, kind: input, shape index: {}]   ;;  %s9130_s7 = inlined_call_operand.vmem [shape: f32[1,512], index: 7, kind: input, shape index: {}]   ;;  %s9131_s8 = inlined_call_operand.vmem [shape: f32[128,128], index: 8, kind: input, shape index: {}]   ;;  %s9132_s9 = inlined_call_operand.vmem [shape: f32[1,128], index: 9, kind: input, shape index: {}]   ;;  %s9133_s10 = inlined_call_operand.vmem [shape: f32[128,128], index: 10, kind: output, shape index: {}]  }
   0x1   :  { %16 = vsyncpa [#allocation9], 0  ;;  %s8441_s13 = smov 0  }
   0x2 LB: > { %s8447_s14 = sadd.s32 4294967295, %s8377_s13   ;;  %p7685_p0 = scmp.ge.s32.totalorder %s8377_s13, 1  ;;  %s8377_s13 = sphi %s8441_s13, %s22_s13  }
   0x3   : > { %p268_p1 = scmp.lt.s32.totalorder %s8377_s13, 3  ;;  %p7880_p3 = scmp.eq.s32.totalorder %s8447_s14, 0 }
   0x4   : > { %s8379_s16 = smov [#allocation8]   ;;  %s8380_s18 = smov [#allocation6]  }
   0x5   : > { %p8453_p4 = pnand %p7685_p0, %p268_p1  ;;  %s299_s17 = sshll.u32 %s8379_s16, 4  ;;  %s300_s17 = int_to_ptr.vmem [resolvable:$true] %s299_s17 }
   0x6   : > { %s286_s19 = sshll.u32 %s8380_s18, 4  ;;  %s8381_s21 = smov [#allocation10]   ;;  %s287_s19 = int_to_ptr.vmem [resolvable:$true] %s286_s19 }
   0x7   : > { %p7870_p5 = pneg %p8453_p4  ;;  %s315_s22 = sshll.u32 %s8381_s21, 4  ;;  %s8465_s22 = int_to_ptr.vmem [resolvable:$true] %s315_s22 }
   0x8   : > { %s8296_s23 = scalar_lea.vmem %s300_s17, 16384  ;;  %p8304_p11 = scmp.lt.s32.totalorder %s300_s17, %s300_s17 }
   0x9   : > { %p8461_p6 = pnand %p7880_p3, %p7870_p5  ;;  %p8297_p8 = scmp.ne.s32.totalorder %s300_s17, %s8296_s23 }
   0xa   : > { %p8305_p12 = scmp.lt.s32.totalorder %s8296_s23, %s8296_s23 }
   0xb   : > { %p8287_p7 = pneg %p8461_p6 }
   0xc   : > { %p8306_p13 = por %p8305_p12, %p8304_p11 }
   0xd   : > { %p8299_p9 = pnand %p8297_p8, %p8287_p7 }
   0xf   : > { %p8300_p10 = pneg %p8299_p9 }
  0x11   : > { %p8307_p0 = pnand %p8306_p13, %p8300_p10 }
  0x13   : > { %8310 = shalt.err (!%p8307_p0)
}
  0x14   : > { %s8382_s24 = smov 512   ;;  %s8383_s25 = smov 32  }
  0x15   : > { %7876 = dma.hbm_to_vmem [thread:$0]  (!%p8461_p6), %s9127_s4, 16384, %s300_s17, [#allocation9], %s8382_s24, %s8382_s24, %s8383_s25  }
  0x16   : > { %s8322_s28 = scalar_lea.vmem %s287_s19, 8192  ;;  %p8330_p9 = scmp.lt.s32.totalorder %s287_s19, %s287_s19 }
  0x17   : > { %p8323_p1 = scmp.ne.s32.totalorder %s287_s19, %s8322_s28  ;;  %p8331_p2 = scmp.lt.s32.totalorder %s8322_s28, %s8322_s28 }
  0x19   : > { %p8325_p5 = pnand %p8323_p1, %p8287_p7  ;;  %p8332_p11 = por %p8331_p2, %p8330_p9 }
  0x1b   : > { %p8326_p8 = pneg %p8325_p5 }
  0x1d   : > { %p8333_p10 = pnand %p8332_p11, %p8326_p8 }
  0x1f   : > { %8336 = shalt.err (!%p8333_p10)
}
  0x20   : > { %7873 = dma.hbm_to_vmem [thread:$0]  (!%p8461_p6), %s9126_s3, 8192, %s287_s19, [#allocation7], %s8382_s24, %s8382_s24, %s8383_s25  }
  0x21   : > { %s8348_s11 = scalar_lea.vmem %s8465_s22, 16384  ;;  %p8356_p2 = scmp.lt.s32.totalorder %s8465_s22, %s8465_s22 }
  0x22   : > { %p8349_p12 = scmp.ne.s32.totalorder %s8465_s22, %s8348_s11  ;;  %p8357_p1 = scmp.lt.s32.totalorder %s8348_s11, %s8348_s11 }
  0x24   : > { %p8351_p13 = pnand %p8349_p12, %p8287_p7  ;;  %p8358_p5 = por %p8357_p1, %p8356_p2 }
  0x26   : > { %p8352_p0 = pneg %p8351_p13 }
  0x28   : > { %p8359_p8 = pnand %p8358_p5, %p8352_p0 }
  0x2a   : > { %8362 = shalt.err (!%p8359_p8)
}
  0x2b   : > { %7879 = dma.hbm_to_vmem [thread:$0]  (!%p8461_p6), %s9129_s6, 16384, %s8465_s22, [#allocation9], %s8382_s24, %s8382_s24, %s8383_s25  }
  0x2c   : > { %349 = sbr.rel (%p8453_p4) target bundleno = 4776 (0x12a8), region = 60 }
  0x31   : > { %8368 = dma.done.wait (%p7880_p3), [#allocation7], 8192  }
  0x32   : > { %8370 = vsyncadd (%p7880_p3), [#allocation7], 4294959104 }
  0x33   : > { %8372 = dma.done.wait (%p7880_p3), [#allocation9], 32768  }
  0x34   : > { %8374 = vsyncadd (%p7880_p3), [#allocation9], 4294934528  ;;  %s7694_s17 = sshll.u32 %s8447_s14, 3  ;;  %p9136_p4 = scmp.ne.s32.totalorder %s8447_s14, 0 }
  0x35   : > { %p396_p7 = scmp.lt.s32.totalorder %s7694_s17, 15 }
  0x36   : > { %410 = sbr.rel (%p9136_p4) target bundleno = 63 (0x3f), region = 76 }
  0x37   : > { %s9138_s17 = smov (!%p396_p7, %s7694_s17), 15 }
  0x38   : > { %s7695_s18 = sshll.u32 %s9138_s17, 3 }
  0x39   : > { %s8512_s20 = scalar_lea.vmem %s9123_s0, %s7695_s18  ;;  %s8517_s23 = scalar_lea.vmem %s9133_s10, %s7695_s18 }
  0x3b   : > { %v8384_v0 = vmov 0.0  }
  0x3c   : > { %411 = vst [vmem:[#allocation2 + $0x10] sm:$0xff] %v8384_v0  ;;  %412 = vst [vmem:[#allocation2] sm:$0xff] %v8384_v0 }
  0x3d   : > { %413 = vst [vmem:[#allocation2 + $0x8] sm:$0xff] %v8384_v0  ;;  %414 = vst [vmem:[#allocation3 + $0x8] sm:$0xff] %v8384_v0 }
  0x3e   : > { %415 = vst [vmem:[#allocation3] sm:$0xff] %v8384_v0  ;;  %416 = vst [vmem:[#allocation3 + $0x10] sm:$0xff] %v8384_v0 }
  0x3f PF: > { %v432_v1 = vld [vmem:[%s9124_s1 + $0x38] sm:$0xff]  ;;  %v431_v2 = vld [vmem:[%s9124_s1 + $0x30] sm:$0xff]  ;;  %v8385_v5 = vmov 0.0   ;;  %v8535_v6 = vld [vmem:[%s8512_s20] sm:$0xff]  ;;  %vm455_vm0 = vcmask 130048  }
  0x40   : > { %v428_v3 = vld [vmem:[%s9124_s1 + $0x18] sm:$0xff]  ;;  %621 = vmatprep.subr.mxu1 %v432_v1  ;;  %v427_v4 = vld [vmem:[%s9124_s1 + $0x10] sm:$0xff]  ;;  %657 = vmatprep.mubr.f32.mxu1 %v8385_v5  ;;  %v8542_v11 = vld [vmem:[%s8512_s20 + $0x8] sm:$0xff] }
  0x41   : > { %622 = vmatpush1.msra.mxu1 %v431_v2  ;;  %v860_v7 = vld [vmem:[#allocation6 + $0x1e8] sm:$0xff]  ;;  %544 = vmatprep.mubr.f32.mxu0 %v8385_v5  ;;  %v859_v8 = vld [vmem:[#allocation6 + $0x1e0] sm:$0xff]  ;;  %v430_v20 = vld [vmem:[%s9124_s1 + $0x28] sm:$0xff] }
  0x42   : > { %623 = vmatprep.subr.mxu1 %v428_v3  ;;  %v856_v9 = vld [vmem:[#allocation6 + $0x1c8] sm:$0xff]  ;;  %v855_v10 = vld [vmem:[#allocation6 + $0x1c0] sm:$0xff]  ;;  %v429_v22 = vld [vmem:[%s9124_s1 + $0x20] sm:$0xff]  ;;  %508 = vmatprep.subr.mxu0 %v430_v20 }
  0x43   : > { %624 = vmatpush1.msra.mxu1 %v427_v4  ;;  %v852_v12 = vld [vmem:[#allocation6 + $0x1a8] sm:$0xff]  ;;  %v851_v13 = vld [vmem:[#allocation6 + $0x1a0] sm:$0xff]  ;;  %509 = vmatpush1.msra.mxu0 %v429_v22  ;;  %v426_v27 = vld [vmem:[%s9124_s1 + $0x8] sm:$0xff] }
  0x44   : > { %7707 = vmatmul.mubr.msk.f32.vlgmr.msra.gmra.mxu1 %vm455_vm0, %v8535_v6  ;;  %863 = vmatprep.subr.mxu1 %v860_v7  ;;  %v848_v14 = vld [vmem:[#allocation6 + $0x188] sm:$0xff]  ;;  %v847_v15 = vld [vmem:[#allocation6 + $0x180] sm:$0xff]  ;;  %v425_v29 = vld [vmem:[%s9124_s1] sm:$0xff] }
  0x45   : > { %864 = vmatpush1.msra.mxu1 %v859_v8  ;;  %663 = vmatprep.mubr.f32.mxu1 %v8385_v5  ;;  %v8548_v16 = vld [vmem:[%s8512_s20 + $0x10] sm:$0xff]  ;;  %v844_v17 = vld [vmem:[#allocation6 + $0x168] sm:$0xff]  ;;  %v8572_v30 = vld [vmem:[%s8512_s20 + $0x20] sm:$0xff] }
  0x46   : > { %865 = vmatprep.subr.mxu1 %v856_v9  ;;  %v843_v18 = vld [vmem:[#allocation6 + $0x160] sm:$0xff]  ;;  %v840_v19 = vld [vmem:[#allocation6 + $0x148] sm:$0xff]  ;;  %510 = vmatprep.subr.mxu0 %v426_v27  ;;  %v8578_v35 = vld [vmem:[%s8512_s20 + $0x28] sm:$0xff] }
  0x47   : > { %866 = vmatpush1.msra.mxu1 %v855_v10  ;;  %v839_v21 = vld [vmem:[#allocation6 + $0x140] sm:$0xff]  ;;  %v8560_v23 = vld [vmem:[%s8512_s20 + $0x18] sm:$0xff]  ;;  %511 = vmatpush1.msra.mxu0 %v425_v29  ;;  %v862_v51 = vld [vmem:[#allocation6 + $0x1f8] sm:$0xff] }
  0x48   : > { %7708 = vmatmul.mubr.msk.f32.gmra.mxu1 %vm455_vm0, %v8542_v11  ;;  %867 = vmatprep.subr.mxu1 %v852_v12  ;;  %v836_v24 = vld [vmem:[#allocation6 + $0x128] sm:$0xff]  ;;  %v835_v25 = vld [vmem:[#allocation6 + $0x120] sm:$0xff]  ;;  %v861_v52 = vld [vmem:[#allocation6 + $0x1f0] sm:$0xff] }
  0x49   : > { %868 = vmatpush1.msra.mxu1 %v851_v13  ;;  %669 = vmatprep.mubr.f32.mxu1 %v8385_v5  ;;  %v832_v26 = vld [vmem:[#allocation6 + $0x108] sm:$0xff]  ;;  %v831_v28 = vld [vmem:[#allocation6 + $0x100] sm:$0xff]  ;;  %v858_v53 = vld [vmem:[#allocation6 + $0x1d8] sm:$0xff] }
  0x4a   : > { %869 = vmatprep.subr.mxu1 %v848_v14  ;;  %v828_v31 = vld [vmem:[#allocation6 + $0xe8] sm:$0xff]  ;;  %v827_v32 = vld [vmem:[#allocation6 + $0xe0] sm:$0xff]  ;;  %7699 = vmatmul.mubr.msk.f32.vlgmr.msra.gmra.mxu0 %vm455_vm0, %v8535_v6  ;;  %v857_v54 = vld [vmem:[#allocation6 + $0x1d0] sm:$0xff] }
  0x4b   : > { %870 = vmatpush1.msra.mxu1 %v847_v15  ;;  %v824_v33 = vld [vmem:[#allocation6 + $0xc8] sm:$0xff]  ;;  %v823_v34 = vld [vmem:[#allocation6 + $0xc0] sm:$0xff]  ;;  %550 = vmatprep.mubr.f32.mxu0 %v8385_v5  ;;  %v854_v55 = vld [vmem:[#allocation6 + $0x1b8] sm:$0xff] }
  0x4c   : > { %7709 = vmatmul.mubr.msk.f32.gmra.mxu1 %vm455_vm0, %v8548_v16  ;;  %871 = vmatprep.subr.mxu1 %v844_v17  ;;  %v820_v36 = vld [vmem:[#allocation6 + $0xa8] sm:$0xff]  ;;  %v819_v37 = vld [vmem:[#allocation6 + $0xa0] sm:$0xff]  ;;  %v853_v56 = vld [vmem:[#allocation6 + $0x1b0] sm:$0xff] }
  0x4d   : > { %872 = vmatpush1.msra.mxu1 %v843_v18  ;;  %675 = vmatprep.mubr.f32.mxu1 %v8385_v5  ;;  %v816_v38 = vld [vmem:[#allocation6 + $0x88] sm:$0xff]  ;;  %v815_v39 = vld [vmem:[#allocation6 + $0x80] sm:$0xff]  ;;  %v850_v57 = vld [vmem:[#allocation6 + $0x198] sm:$0xff] }
  0x4e   : > { %873 = vmatprep.subr.mxu1 %v840_v19  ;;  %v423_v40 = vld [vmem:[%s8512_s20 + $0x30] sm:$0xff]  ;;  %v812_v41 = vld [vmem:[#allocation6 + $0x68] sm:$0xff]  ;;  %7700 = vmatmul.mubr.msk.f32.gmra.mxu0 %vm455_vm0, %v8542_v11  ;;  %v849_v58 = vld [vmem:[#allocation6 + $0x190] sm:$0xff] }
  0x4f   : > { %874 = vmatpush1.msra.mxu1 %v839_v21  ;;  %v811_v42 = vld [vmem:[#allocation6 + $0x60] sm:$0xff]  ;;  %v808_v43 = vld [vmem:[#allocation6 + $0x48] sm:$0xff]  ;;  %556 = vmatprep.mubr.f32.mxu0 %v8385_v5  ;;  %v846_v59 = vld [vmem:[#allocation6 + $0x178] sm:$0xff] }
  0x50   : > { %7710 = vmatmul.mubr.msk.f32.gmra.mxu1 %vm455_vm0, %v8560_v23  ;;  %875 = vmatprep.subr.mxu1 %v836_v24  ;;  %v807_v44 = vld [vmem:[#allocation6 + $0x40] sm:$0xff]  ;;  %v424_v45 = vld [vmem:[%s8512_s20 + $0x38] sm:$0xff]  ;;  %v845_v60 = vld [vmem:[#allocation6 + $0x170] sm:$0xff] }
  0x51   : > { %876 = vmatpush1.msra.mxu1 %v835_v25  ;;  %681 = vmatprep.mubr.f32.mxu1 %v8385_v5  ;;  %v804_v46 = vld [vmem:[#allocation6 + $0x28] sm:$0xff]  ;;  %v803_v47 = vld [vmem:[#allocation6 + $0x20] sm:$0xff]  ;;  %v842_v61 = vld [vmem:[#allocation6 + $0x158] sm:$0xff] }
  0x52   : > { %877 = vmatprep.subr.mxu1 %v832_v26  ;;  %7701 = vmatmul.mubr.msk.f32.gmra.mxu0 %vm455_vm0, %v8548_v16  ;;  %v800_v48 = vld [vmem:[#allocation6 + $0x8] sm:$0xff]  ;;  %v799_v49 = vld [vmem:[#allocation6] sm:$0xff]  ;;  %v841_v62 = vld [vmem:[#allocation6 + $0x150] sm:$0xff] }
  0x53   : > { %878 = vmatpush1.msra.mxu1 %v831_v28  ;;  %562 = vmatprep.mubr.f32.mxu0 %v8385_v5  ;;  %v8598_v50 = vld [vmem:[#allocation2 + $0x10] sm:$0xff]  ;;  %v838_v63 = vld [vmem:[#allocation6 + $0x138] sm:$0xff]  ;;  %v837_v0 = vld [vmem:[#allocation6 + $0x130] sm:$0xff] }
  0x54   : > { %7711 = vmatmul.mubr.msk.f32.gmra.mxu1 %vm455_vm0, %v8572_v30  ;;  %879 = vmatprep.subr.mxu1 %v828_v31  ;;  %v834_v1 = vld [vmem:[#allocation6 + $0x118] sm:$0xff]  ;;  %v833_v2 = vld [vmem:[#allocation6 + $0x110] sm:$0xff]  ;;  %v1094_v20 = vld [vmem:[#allocation8 + $0x1e8] sm:$0xff] }
  0x55   : > { %880 = vmatpush1.msra.mxu1 %v827_v32  ;;  %687 = vmatprep.mubr.f32.mxu1 %v8385_v5  ;;  %v830_v3 = vld [vmem:[#allocation6 + $0xf8] sm:$0xff]  ;;  %v829_v4 = vld [vmem:[#allocation6 + $0xf0] sm:$0xff]  ;;  %v1093_v22 = vld [vmem:[#allocation8 + $0x1e0] sm:$0xff] }
  0x56   : > { %881 = vmatprep.subr.mxu1 %v824_v33  ;;  %7702 = vmatmul.mubr.msk.f32.gmra.mxu0 %vm455_vm0, %v8560_v23  ;;  %v826_v6 = vld [vmem:[#allocation6 + $0xd8] sm:$0xff]  ;;  %v825_v7 = vld [vmem:[#allocation6 + $0xd0] sm:$0xff]  ;;  %v1090_v24 = vld [vmem:[#allocation8 + $0x1c8] sm:$0xff] }
  0x57   : > { %882 = vmatpush1.msra.mxu1 %v823_v34  ;;  %568 = vmatprep.mubr.f32.mxu0 %v8385_v5  ;;  %v822_v8 = vld [vmem:[#allocation6 + $0xb8] sm:$0xff]  ;;  %v821_v9 = vld [vmem:[#allocation6 + $0xb0] sm:$0xff]  ;;  %v1089_v26 = vld [vmem:[#allocation8 + $0x1c0] sm:$0xff] }
  0x58   : > { %7712 = vmatmul.mubr.msk.f32.gmra.mxu1 %vm455_vm0, %v8578_v35  ;;  %883 = vmatprep.subr.mxu1 %v820_v36  ;;  %v818_v10 = vld [vmem:[#allocation6 + $0x98] sm:$0xff]  ;;  %v817_v11 = vld [vmem:[#allocation6 + $0x90] sm:$0xff]  ;;  %v1086_v28 = vld [vmem:[#allocation8 + $0x1a8] sm:$0xff] }
  0x59   : > { %884 = vmatpush1.msra.mxu1 %v819_v37  ;;  %693 = vmatprep.mubr.f32.mxu1 %v8385_v5  ;;  %v814_v12 = vld [vmem:[#allocation6 + $0x78] sm:$0xff]  ;;  %v813_v13 = vld [vmem:[#allocation6 + $0x70] sm:$0xff]  ;;  %v1082_v32 = vld [vmem:[#allocation8 + $0x188] sm:$0xff] }
  0x5a   : > { %885 = vmatprep.subr.mxu1 %v816_v38  ;;  %7703 = vmatmul.mubr.msk.f32.gmra.mxu0 %vm455_vm0, %v8572_v30  ;;  %v810_v14 = vld [vmem:[#allocation6 + $0x58] sm:$0xff]  ;;  %v809_v15 = vld [vmem:[#allocation6 + $0x50] sm:$0xff]  ;;  %v1085_v30 = vld [vmem:[#allocation8 + $0x1a0] sm:$0xff] }
  0x5b   : > { %886 = vmatpush1.msra.mxu1 %v815_v39  ;;  %574 = vmatprep.mubr.f32.mxu0 %v8385_v5  ;;  %v806_v16 = vld [vmem:[#allocation6 + $0x38] sm:$0xff]  ;;  %v805_v17 = vld [vmem:[#allocation6 + $0x30] sm:$0xff]  ;;  %v1081_v34 = vld [vmem:[#allocation8 + $0x180] sm:$0xff] }
  0x5c   : > { %7713 = vmatmul.mubr.msk.f32.gmra.mxu1 %vm455_vm0, %v423_v40  ;;  %887 = vmatprep.subr.mxu1 %v812_v41  ;;  %v802_v18 = vld [vmem:[#allocation6 + $0x18] sm:$0xff]  ;;  %v801_v19 = vld [vmem:[#allocation6 + $0x10] sm:$0xff]  ;;  %v1078_v36 = vld [vmem:[#allocation8 + $0x168] sm:$0xff] }
  0x5d   : > { %888 = vmatpush1.msra.mxu1 %v811_v42  ;;  %699 = vmatprep.mubr.f32.mxu1 %v8385_v5  ;;  %v1096_v21 = vld [vmem:[#allocation8 + $0x1f8] sm:$0xff]  ;;  %v1095_v23 = vld [vmem:[#allocation8 + $0x1f0] sm:$0xff]  ;;  %v1077_v38 = vld [vmem:[#allocation8 + $0x160] sm:$0xff] }
  0x5e   : > { %889 = vmatprep.subr.mxu1 %v808_v43  ;;  %7704 = vmatmul.mubr.msk.f32.gmra.mxu0 %vm455_vm0, %v8578_v35  ;;  %v1092_v25 = vld [vmem:[#allocation8 + $0x1d8] sm:$0xff]  ;;  %v1091_v27 = vld [vmem:[#allocation8 + $0x1d0] sm:$0xff]  ;;  %v1073_v42 = vld [vmem:[#allocation8 + $0x140] sm:$0xff] }
  0x5f   : > { %890 = vmatpush1.msra.mxu1 %v807_v44  ;;  %580 = vmatprep.mubr.f32.mxu0 %v8385_v5  ;;  %v1088_v29 = vld [vmem:[#allocation8 + $0x1b8] sm:$0xff]  ;;  %v1087_v31 = vld [vmem:[#allocation8 + $0x1b0] sm:$0xff]  ;;  %v1070_v44 = vld [vmem:[#allocation8 + $0x128] sm:$0xff] }
  0x60   : > { %7714 = vmatmul.mubr.msk.f32.gmra.mxu1 %vm455_vm0, %v424_v45  ;;  %891 = vmatprep.subr.mxu1 %v804_v46  ;;  %v1084_v33 = vld [vmem:[#allocation8 + $0x198] sm:$0xff]  ;;  %v1083_v35 = vld [vmem:[#allocation8 + $0x190] sm:$0xff]  ;;  %v1069_v46 = vld [vmem:[#allocation8 + $0x120] sm:$0xff] }
  0x61   : > { %892 = vmatpush1.msra.mxu1 %v803_v47  ;;  %927 = vmatprep.mubr.f32.mxu1 %v8385_v5  ;;  %v1080_v37 = vld [vmem:[#allocation8 + $0x178] sm:$0xff]  ;;  %v1079_v39 = vld [vmem:[#allocation8 + $0x170] sm:$0xff] }
  0x62   : > { %893 = vmatprep.subr.mxu1 %v800_v48  ;;  %7705 = vmatmul.mubr.msk.f32.gmra.mxu0 %vm455_vm0, %v423_v40  ;;  %v1074_v40 = vld [vmem:[#allocation8 + $0x148] sm:$0xff]  ;;  %v1076_v41 = vld [vmem:[#allocation8 + $0x158] sm:$0xff]  ;;  %v1075_v43 = vld [vmem:[#allocation8 + $0x150] sm:$0xff] }
  0x63   : > { %894 = vmatpush1.msra.mxu1 %v799_v49  ;;  %586 = vmatprep.mubr.f32.mxu0 %v8385_v5  ;;  %v1071_v47 = vld [vmem:[#allocation8 + $0x130] sm:$0xff]  ;;  %v1066_v48 = vld [vmem:[#allocation8 + $0x108] sm:$0xff]  ;;  %v1068_v49 = vld [vmem:[#allocation8 + $0x118] sm:$0xff] }
  0x64   : > { %928 = vmatmul.mubr.f32.vlgmr.msra.gmra.mxu1 %v8598_v50  ;;  %934 = vmatprep.subr.mxu1 %v862_v51  ;;  %v1067_v51 = vld [vmem:[#allocation8 + $0x110] sm:$0xff] }
  0x65   : > { %935 = vmatpush1.msra.mxu1 %v861_v52  ;;  %998 = vmatprep.mubr.f32.mxu1 %v8385_v5  ;;  %v1062_v52 = vld [vmem:[#allocation8 + $0xe8] sm:$0xff] }
  0x66   : > { %936 = vmatprep.subr.mxu1 %v858_v53  ;;  %7706 = vmatmul.mubr.msk.f32.gmra.mxu0 %vm455_vm0, %v424_v45  ;;  %v1072_v45 = vld [vmem:[#allocation8 + $0x138] sm:$0xff] }
  0x67   : > { %937 = vmatpush1.msra.mxu1 %v857_v54  ;;  %1161 = vmatprep.subr.mxu0 %v1094_v20  ;;  %v1064_v53 = vld [vmem:[#allocation8 + $0xf8] sm:$0xff]  ;;  %v1061_v54 = vld [vmem:[#allocation8 + $0xe0] sm:$0xff]  ;;  %v1035_v20 = vld [vmem:[#allocation8 + $0x10] sm:$0xff] }
  0x68   : > { %938 = vmatprep.subr.mxu1 %v854_v55  ;;  %1162 = vmatpush1.msra.mxu0 %v1093_v22  ;;  %v1063_v55 = vld [vmem:[#allocation8 + $0xf0] sm:$0xff]  ;;  %v1160_v22 = vld [vmem:[#allocation8 + $0x3f8] sm:$0xff] }
  0x69   : > { %939 = vmatpush1.msra.mxu1 %v853_v56  ;;  %1163 = vmatprep.subr.mxu0 %v1090_v24  ;;  %v1058_v56 = vld [vmem:[#allocation8 + $0xc8] sm:$0xff]  ;;  %v1159_v24 = vld [vmem:[#allocation8 + $0x3f0] sm:$0xff] }
  0x6a   : > { %940 = vmatprep.subr.mxu1 %v850_v57  ;;  %1164 = vmatpush1.msra.mxu0 %v1089_v26  ;;  %v1060_v57 = vld [vmem:[#allocation8 + $0xd8] sm:$0xff] }
  0x6b   : > { %941 = vmatpush1.msra.mxu1 %v849_v58  ;;  %1165 = vmatprep.subr.mxu0 %v1086_v28  ;;  %v1057_v58 = vld [vmem:[#allocation8 + $0xc0] sm:$0xff]  ;;  %v1156_v26 = vld [vmem:[#allocation8 + $0x3d8] sm:$0xff]  ;;  %v1155_v28 = vld [vmem:[#allocation8 + $0x3d0] sm:$0xff] }
  0x6c   : > { %942 = vmatprep.subr.mxu1 %v846_v59  ;;  %1166 = vmatpush1.msra.mxu0 %v1085_v30  ;;  %v1059_v59 = vld [vmem:[#allocation8 + $0xd0] sm:$0xff]  ;;  %v1152_v30 = vld [vmem:[#allocation8 + $0x3b8] sm:$0xff] }
  0x6d   : > { %943 = vmatpush1.msra.mxu1 %v845_v60  ;;  %1167 = vmatprep.subr.mxu0 %v1082_v32  ;;  %v1054_v60 = vld [vmem:[#allocation8 + $0xa8] sm:$0xff]  ;;  %v1151_v32 = vld [vmem:[#allocation8 + $0x3b0] sm:$0xff] }
  0x6e   : > { %944 = vmatprep.subr.mxu1 %v842_v61  ;;  %1168 = vmatpush1.msra.mxu0 %v1081_v34  ;;  %v1056_v61 = vld [vmem:[#allocation8 + $0xb8] sm:$0xff] }
  0x6f   : > { %945 = vmatpush1.msra.mxu1 %v841_v62  ;;  %1169 = vmatprep.subr.mxu0 %v1078_v36  ;;  %v1053_v62 = vld [vmem:[#allocation8 + $0xa0] sm:$0xff]  ;;  %v1148_v34 = vld [vmem:[#allocation8 + $0x398] sm:$0xff]  ;;  %v1147_v36 = vld [vmem:[#allocation8 + $0x390] sm:$0xff] }
  0x70   : > { %946 = vmatprep.subr.mxu1 %v838_v63  ;;  %1170 = vmatpush1.msra.mxu0 %v1077_v38  ;;  %v1055_v63 = vld [vmem:[#allocation8 + $0xb0] sm:$0xff]  ;;  %v1144_v38 = vld [vmem:[#allocation8 + $0x378] sm:$0xff] }
  0x71   : > { %947 = vmatpush1.msra.mxu1 %v837_v0  ;;  %1171 = vmatprep.subr.mxu0 %v1074_v40  ;;  %v1050_v0 = vld [vmem:[#allocation8 + $0x88] sm:$0xff]  ;;  %v1143_v40 = vld [vmem:[#allocation8 + $0x370] sm:$0xff] }
  0x72   : > { %948 = vmatprep.subr.mxu1 %v834_v1  ;;  %1172 = vmatpush1.msra.mxu0 %v1073_v42  ;;  %v1052_v1 = vld [vmem:[#allocation8 + $0x98] sm:$0xff] }
  0x73   : > { %949 = vmatpush1.msra.mxu1 %v833_v2  ;;  %1173 = vmatprep.subr.mxu0 %v1070_v44  ;;  %v1049_v2 = vld [vmem:[#allocation8 + $0x80] sm:$0xff]  ;;  %v1140_v42 = vld [vmem:[#allocation8 + $0x358] sm:$0xff]  ;;  %v1139_v44 = vld [vmem:[#allocation8 + $0x350] sm:$0xff] }
  0x74   : > { %950 = vmatprep.subr.mxu1 %v830_v3  ;;  %1174 = vmatpush1.msra.mxu0 %v1069_v46  ;;  %v1051_v3 = vld [vmem:[#allocation8 + $0x90] sm:$0xff]  ;;  %v1136_v46 = vld [vmem:[#allocation8 + $0x338] sm:$0xff] }
  0x75   : > { %951 = vmatpush1.msra.mxu1 %v829_v4  ;;  %1175 = vmatprep.subr.mxu0 %v1066_v48  ;;  %v1046_v4 = vld [vmem:[#allocation8 + $0x68] sm:$0xff]  ;;  %v1135_v48 = vld [vmem:[#allocation8 + $0x330] sm:$0xff] }
  0x76   : > { %952 = vmatprep.subr.mxu1 %v826_v6  ;;  %v1048_v6 = vld [vmem:[#allocation8 + $0x78] sm:$0xff] }
  0x77   : > { %953 = vmatpush1.msra.mxu1 %v825_v7  ;;  %v1045_v7 = vld [vmem:[#allocation8 + $0x60] sm:$0xff] }
  0x78   : > { %954 = vmatprep.subr.mxu1 %v822_v8  ;;  %v1047_v8 = vld [vmem:[#allocation8 + $0x70] sm:$0xff] }
  0x79   : > { %955 = vmatpush1.msra.mxu1 %v821_v9  ;;  %v1042_v9 = vld [vmem:[#allocation8 + $0x48] sm:$0xff] }
  0x7a   : > { %956 = vmatprep.subr.mxu1 %v818_v10  ;;  %v1044_v10 = vld [vmem:[#allocation8 + $0x58] sm:$0xff] }
  0x7b   : > { %957 = vmatpush1.msra.mxu1 %v817_v11  ;;  %v1041_v11 = vld [vmem:[#allocation8 + $0x40] sm:$0xff] }
  0x7c   : > { %958 = vmatprep.subr.mxu1 %v814_v12  ;;  %v1043_v12 = vld [vmem:[#allocation8 + $0x50] sm:$0xff] }
  0x7d   : > { %959 = vmatpush1.msra.mxu1 %v813_v13  ;;  %v1038_v13 = vld [vmem:[#allocation8 + $0x28] sm:$0xff] }
  0x7e   : > { %960 = vmatprep.subr.mxu1 %v810_v14  ;;  %v1040_v14 = vld [vmem:[#allocation8 + $0x38] sm:$0xff] }
  0x7f   : > { %961 = vmatpush1.msra.mxu1 %v809_v15  ;;  %v1037_v15 = vld [vmem:[#allocation8 + $0x20] sm:$0xff] }
  0x80   : > { %962 = vmatprep.subr.mxu1 %v806_v16  ;;  %v1039_v16 = vld [vmem:[#allocation8 + $0x30] sm:$0xff] }
  0x81   : > { %963 = vmatpush1.msra.mxu1 %v805_v17  ;;  %v1034_v17 = vld [vmem:[#allocation8 + $0x8] sm:$0xff] }
  0x82   : > { %964 = vmatprep.subr.mxu1 %v802_v18  ;;  %v1036_v18 = vld [vmem:[#allocation8 + $0x18] sm:$0xff] }
  0x83   : > { %965 = vmatpush1.msra.mxu1 %v801_v19  ;;  %v1033_v19 = vld [vmem:[#allocation8] sm:$0xff] }
  0x84   : > { %999 = vmatmul.mubr.f32.vlgmr.msra.gmra.mxu1 %v8598_v50  ;;  %1232 = vmatprep.subr.mxu1 %v1096_v21  ;;  %v1065_v50 = vld [vmem:[#allocation8 + $0x100] sm:$0xff]  ;;  %v1158_v21 = vld [vmem:[#allocation8 + $0x3e8] sm:$0xff] }
  0x85   : > { %1233 = vmatpush1.msra.mxu1 %v1095_v23  ;;  %1176 = vmatpush1.msra.mxu0 %v1065_v50  ;;  %v1157_v23 = vld [vmem:[#allocation8 + $0x3e0] sm:$0xff]  ;;  %v1132_v50 = vld [vmem:[#allocation8 + $0x318] sm:$0xff] }
  0x86   : > { %1234 = vmatprep.subr.mxu1 %v1092_v25  ;;  %1177 = vmatprep.subr.mxu0 %v1062_v52  ;;  %v1154_v25 = vld [vmem:[#allocation8 + $0x3c8] sm:$0xff]  ;;  %v1131_v52 = vld [vmem:[#allocation8 + $0x310] sm:$0xff] }
  0x87   : > { %1235 = vmatpush1.msra.mxu1 %v1091_v27  ;;  %1178 = vmatpush1.msra.mxu0 %v1061_v54  ;;  %v1153_v27 = vld [vmem:[#allocation8 + $0x3c0] sm:$0xff]  ;;  %v1128_v54 = vld [vmem:[#allocation8 + $0x2f8] sm:$0xff] }
  0x88   : > { %1236 = vmatprep.subr.mxu1 %v1088_v29  ;;  %1179 = vmatprep.subr.mxu0 %v1058_v56  ;;  %v1150_v29 = vld [vmem:[#allocation8 + $0x3a8] sm:$0xff]  ;;  %v1127_v56 = vld [vmem:[#allocation8 + $0x2f0] sm:$0xff] }
  0x89   : > { %1237 = vmatpush1.msra.mxu1 %v1087_v31  ;;  %1180 = vmatpush1.msra.mxu0 %v1057_v58  ;;  %v1149_v31 = vld [vmem:[#allocation8 + $0x3a0] sm:$0xff]  ;;  %v1124_v58 = vld [vmem:[#allocation8 + $0x2d8] sm:$0xff] }
  0x8a   : > { %1238 = vmatprep.subr.mxu1 %v1084_v33  ;;  %1181 = vmatprep.subr.mxu0 %v1054_v60  ;;  %v1146_v33 = vld [vmem:[#allocation8 + $0x388] sm:$0xff]  ;;  %v1123_v60 = vld [vmem:[#allocation8 + $0x2d0] sm:$0xff] }
  0x8b   : > { %1239 = vmatpush1.msra.mxu1 %v1083_v35  ;;  %1182 = vmatpush1.msra.mxu0 %v1053_v62  ;;  %v1145_v35 = vld [vmem:[#allocation8 + $0x380] sm:$0xff]  ;;  %v1120_v62 = vld [vmem:[#allocation8 + $0x2b8] sm:$0xff] }
  0x8c   : > { %1240 = vmatprep.subr.mxu1 %v1080_v37  ;;  %1183 = vmatprep.subr.mxu0 %v1050_v0  ;;  %v1142_v37 = vld [vmem:[#allocation8 + $0x368] sm:$0xff]  ;;  %v1119_v0 = vld [vmem:[#allocation8 + $0x2b0] sm:$0xff] }
  0x8d   : > { %1241 = vmatpush1.msra.mxu1 %v1079_v39  ;;  %1184 = vmatpush1.msra.mxu0 %v1049_v2  ;;  %v1141_v39 = vld [vmem:[#allocation8 + $0x360] sm:$0xff]  ;;  %v1116_v2 = vld [vmem:[#allocation8 + $0x298] sm:$0xff] }
  0x8e   : > { %1242 = vmatprep.subr.mxu1 %v1076_v41  ;;  %1185 = vmatprep.subr.mxu0 %v1046_v4  ;;  %v1138_v41 = vld [vmem:[#allocation8 + $0x348] sm:$0xff]  ;;  %v1115_v4 = vld [vmem:[#allocation8 + $0x290] sm:$0xff] }
  0x8f   : > { %1243 = vmatpush1.msra.mxu1 %v1075_v43  ;;  %1186 = vmatpush1.msra.mxu0 %v1045_v7  ;;  %v1137_v43 = vld [vmem:[#allocation8 + $0x340] sm:$0xff]  ;;  %v1112_v7 = vld [vmem:[#allocation8 + $0x278] sm:$0xff] }
  0x90   : > { %1244 = vmatprep.subr.mxu1 %v1072_v45  ;;  %1187 = vmatprep.subr.mxu0 %v1042_v9  ;;  %v1134_v45 = vld [vmem:[#allocation8 + $0x328] sm:$0xff]  ;;  %v1111_v9 = vld [vmem:[#allocation8 + $0x270] sm:$0xff] }
  0x91   : > { %1245 = vmatpush1.msra.mxu1 %v1071_v47  ;;  %1188 = vmatpush1.msra.mxu0 %v1041_v11  ;;  %v1133_v47 = vld [vmem:[#allocation8 + $0x320] sm:$0xff]  ;;  %v1108_v11 = vld [vmem:[#allocation8 + $0x258] sm:$0xff] }
  0x92   : > { %1246 = vmatprep.subr.mxu1 %v1068_v49  ;;  %1189 = vmatprep.subr.mxu0 %v1038_v13  ;;  %v1130_v49 = vld [vmem:[#allocation8 + $0x308] sm:$0xff]  ;;  %v1107_v13 = vld [vmem:[#allocation8 + $0x250] sm:$0xff] }
  0x93   : > { %1247 = vmatpush1.msra.mxu1 %v1067_v51  ;;  %1190 = vmatpush1.msra.mxu0 %v1037_v15  ;;  %v1129_v51 = vld [vmem:[#allocation8 + $0x300] sm:$0xff]  ;;  %v1104_v15 = vld [vmem:[#allocation8 + $0x238] sm:$0xff] }
  0x94   : > { %1248 = vmatprep.subr.mxu1 %v1064_v53  ;;  %1191 = vmatprep.subr.mxu0 %v1034_v17  ;;  %v1126_v53 = vld [vmem:[#allocation8 + $0x2e8] sm:$0xff]  ;;  %v1103_v17 = vld [vmem:[#allocation8 + $0x230] sm:$0xff] }
  0x95   : > { %1249 = vmatpush1.msra.mxu1 %v1063_v55  ;;  %1192 = vmatpush1.msra.mxu0 %v1033_v19  ;;  %v1125_v55 = vld [vmem:[#allocation8 + $0x2e0] sm:$0xff]  ;;  %v1100_v19 = vld [vmem:[#allocation8 + $0x218] sm:$0xff] }
  0x96   : > { %1250 = vmatprep.subr.mxu1 %v1060_v57  ;;  %1193 = vmatprep.subr.mxu0 %v1158_v21  ;;  %v1122_v57 = vld [vmem:[#allocation8 + $0x2c8] sm:$0xff]  ;;  %v785_v21 = vld [vmem:[#allocation2] sm:$0xff] }
  0x97   : > { %1251 = vmatpush1.msra.mxu1 %v1059_v59  ;;  %1194 = vmatpush2.msra.mxu0 %v1157_v23  ;;  %v1121_v59 = vld [vmem:[#allocation8 + $0x2c0] sm:$0xff]  ;;  %v1388_v23 = vld [vmem:[#allocation10 + $0x1e8] sm:$0xff] }
  0x98   : > { %1252 = vmatprep.subr.mxu1 %v1056_v61  ;;  %1195 = vmatprep.subr.mxu0 %v1154_v25  ;;  %v1118_v61 = vld [vmem:[#allocation8 + $0x2a8] sm:$0xff]  ;;  %v435_v25 = vlaneseq }
  0x99   : > { %1253 = vmatpush1.msra.mxu1 %v1055_v63  ;;  %1196 = vmatpush2.msra.mxu0 %v1153_v27  ;;  %v1117_v63 = vld [vmem:[#allocation8 + $0x2a0] sm:$0xff] }
  0x9a   : > { %1254 = vmatprep.subr.mxu1 %v1052_v1  ;;  %1197 = vmatprep.subr.mxu0 %v1150_v29  ;;  %v1114_v1 = vld [vmem:[#allocation8 + $0x288] sm:$0xff] }
  0x9b   : > { %1255 = vmatpush1.msra.mxu1 %v1051_v3  ;;  %1198 = vmatpush2.msra.mxu0 %v1149_v31  ;;  %v1113_v3 = vld [vmem:[#allocation8 + $0x280] sm:$0xff] }
  0x9c   : > { %1256 = vmatprep.subr.mxu1 %v1048_v6  ;;  %1199 = vmatprep.subr.mxu0 %v1146_v33  ;;  %v1110_v6 = vld [vmem:[#allocation8 + $0x268] sm:$0xff] }
  0x9d   : > { %1257 = vmatpush1.msra.mxu1 %v1047_v8  ;;  %1200 = vmatpush2.msra.mxu0 %v1145_v35  ;;  %v1109_v8 = vld [vmem:[#allocation8 + $0x260] sm:$0xff] }
  0x9e   : > { %1258 = vmatprep.subr.mxu1 %v1044_v10  ;;  %1201 = vmatprep.subr.mxu0 %v1142_v37  ;;  %v1106_v10 = vld [vmem:[#allocation8 + $0x248] sm:$0xff] }
  0x9f   : > { %1259 = vmatpush1.msra.mxu1 %v1043_v12  ;;  %1202 = vmatpush2.msra.mxu0 %v1141_v39  ;;  %v1105_v12 = vld [vmem:[#allocation8 + $0x240] sm:$0xff] }
  0xa0   : > { %1260 = vmatprep.subr.mxu1 %v1040_v14  ;;  %1203 = vmatprep.subr.mxu0 %v1138_v41  ;;  %v1102_v14 = vld [vmem:[#allocation8 + $0x228] sm:$0xff] }
  0xa1   : > { %1261 = vmatpush1.msra.mxu1 %v1039_v16  ;;  %1204 = vmatpush2.msra.mxu0 %v1137_v43  ;;  %v1101_v16 = vld [vmem:[#allocation8 + $0x220] sm:$0xff] }
  0xa2   : > { %1262 = vmatprep.subr.mxu1 %v1036_v18  ;;  %1205 = vmatprep.subr.mxu0 %v1134_v45  ;;  %v1098_v18 = vld [vmem:[#allocation8 + $0x208] sm:$0xff] }
  0xa3   : > { %1263 = vmatpush1.msra.mxu1 %v1035_v20  ;;  %1206 = vmatpush2.msra.mxu0 %v1133_v47  ;;  %v1097_v20 = vld [vmem:[#allocation8 + $0x200] sm:$0xff] }
  0xa4   : > { %1264 = vmatprep.subr.mxu1 %v1160_v22  ;;  %1207 = vmatprep.subr.mxu0 %v1130_v49  ;;  %v1099_v22 = vld [vmem:[#allocation8 + $0x210] sm:$0xff] }
  0xa5   : > { %1265 = vmatpush2.msra.mxu1 %v1159_v24  ;;  %1208 = vmatpush2.msra.mxu0 %v1129_v51  ;;  %v1390_v24 = vld [vmem:[#allocation10 + $0x1f8] sm:$0xff] }
  0xa6   : > { %1266 = vmatprep.subr.mxu1 %v1156_v26  ;;  %1209 = vmatprep.subr.mxu0 %v1126_v53  ;;  %v436_v26 = vshrl.u32 %v435_v25, 7 }
  0xa7   : > { %1267 = vmatpush2.msra.mxu1 %v1155_v28  ;;  %1210 = vmatpush2.msra.mxu0 %v1125_v55  ;;  %v433_v28 = vld [vmem:[%s9125_s2] sm:$0xf] }
  0xa8   : > { %1268 = vmatprep.subr.mxu1 %v1152_v30  ;;  %1211 = vmatprep.subr.mxu0 %v1122_v57  ;;  %v8615_v27 = vsub.s32 2, %v436_v26  ;;  %v8622_v30 = vsub.s32 3, %v436_v26 }
  0xa9   : > { %1269 = vmatpush2.msra.mxu1 %v1151_v32  ;;  %1212 = vmatpush2.msra.mxu0 %v1121_v59 }
  0xaa   : > { %1270 = vmatprep.subr.mxu1 %v1148_v34  ;;  %1213 = vmatprep.subr.mxu0 %v1118_v61  ;;  %v8627_v32 = vrot.slane %v433_v28, %v8615_v27  ;;  %v8630_v34 = vrot.slane %v433_v28, %v8622_v30 }
  0xab   : > { %1271 = vmatpush2.msra.mxu1 %v1147_v36  ;;  %1214 = vmatpush2.msra.mxu0 %v1117_v63 }
  0xac   : > { %1272 = vmatprep.subr.mxu1 %v1144_v38  ;;  %1215 = vmatprep.subr.mxu0 %v1114_v1 }
  0xad   : > { %1273 = vmatpush2.msra.mxu1 %v1143_v40  ;;  %1216 = vmatpush2.msra.mxu0 %v1113_v3 }
  0xae   : > { %1274 = vmatprep.subr.mxu1 %v1140_v42  ;;  %1217 = vmatprep.subr.mxu0 %v1110_v6 }
  0xaf   : > { %1275 = vmatpush2.msra.mxu1 %v1139_v44  ;;  %1218 = vmatpush2.msra.mxu0 %v1109_v8 }
  0xb0   : > { %1276 = vmatprep.subr.mxu1 %v1136_v46  ;;  %1219 = vmatprep.subr.mxu0 %v1106_v10 }
  0xb1   : > { %1277 = vmatpush2.msra.mxu1 %v1135_v48  ;;  %1220 = vmatpush2.msra.mxu0 %v1105_v12  ;;  %v8653_v48 = vsub.s32 0, %v436_v26 }
  0xb2   : > { %1278 = vmatprep.subr.mxu1 %v1132_v50  ;;  %1221 = vmatprep.subr.mxu0 %v1102_v14 }
  0xb3   : > { %1279 = vmatpush2.msra.mxu1 %v1131_v52  ;;  %1222 = vmatpush2.msra.mxu0 %v1101_v16  ;;  %v8658_v52 = vsub.s32 1, %v436_v26 }
  0xb4   : > { %1280 = vmatprep.subr.mxu1 %v1128_v54  ;;  %1223 = vmatprep.subr.mxu0 %v1098_v18 }
  0xb5   : > { %1281 = vmatpush2.msra.mxu1 %v1127_v56  ;;  %1224 = vmatpush2.msra.mxu0 %v1097_v20  ;;  %v438_v56 = vrot.slane %v433_v28, %v8653_v48 }
  0xb6   : > { %1282 = vmatprep.subr.mxu1 %v1124_v58  ;;  %1225 = vmatprep.mubr.f32.mxu0 %v785_v21 }
  0xb7   : > { %1283 = vmatpush2.msra.mxu1 %v1123_v60  ;;  %1296 = vmatprep.mubr.f32.mxu1 %v785_v21  ;;  %v8668_v60 = vrot.slane %v433_v28, %v8658_v52 }
  0xb8   : > { %1284 = vmatprep.subr.mxu1 %v1120_v62  ;;  %1455 = vmatprep.subr.mxu0 %v1388_v23 }
  0xb9   : > { %1285 = vmatpush2.msra.mxu1 %v1119_v0 }
  0xba   : > { %1286 = vmatprep.subr.mxu1 %v1116_v2 }
  0xbb   : > { %1287 = vmatpush2.msra.mxu1 %v1115_v4 }
  0xbc   : > { %1288 = vmatprep.subr.mxu1 %v1112_v7 }
  0xbd   : > { %1289 = vmatpush2.msra.mxu1 %v1111_v9 }
  0xbe   : > { %1290 = vmatprep.subr.mxu1 %v1108_v11 }
  0xbf   : > { %1291 = vmatpush2.msra.mxu1 %v1107_v13 }
  0xc0   : > { %1292 = vmatprep.subr.mxu1 %v1104_v15 }
  0xc1   : > { %1293 = vmatpush2.msra.mxu1 %v1103_v17 }
  0xc2   : > { %1294 = vmatprep.subr.mxu1 %v1100_v19 }
  0xc3   : > { %1295 = vmatpush2.msra.mxu1 %v1099_v22 }
  0xc4   : > { %1526 = vmatprep.subr.mxu1 %v1390_v24 }
 0x104   : > { %v8620_v29 = vpop.f32.mrf.mxu1 }
 0x106   : > { %v8624_v31 = vpop.f32.mrf.mxu1 }
 0x108   : > { %v665_v33 = vpop.f32.mrf.mxu1 }
 0x109   : > { %v8633_v35 = vadd.f32 %v665_v33, %v8627_v32 }
 0x10a   : > { %v667_v36 = vpop.f32.mrf.mxu1  ;;  %v546_v50 = vpop.f32.mrf.mxu0 }
 0x10b   : > { %v8636_v37 = vadd.f32 %v667_v36, %v8630_v34  ;;  %v547_v19 = vadd.f32 %v546_v50, %v438_v56 }
 0x10c   : > { %v671_v38 = vpop.f32.mrf.mxu1  ;;  %v548_v54 = vpop.f32.mrf.mxu0 }
 0x10d   : > { %v8639_v39 = vadd.f32 %v671_v38, %v8627_v32  ;;  %v549_v17 = vadd.f32 %v548_v54, %v8668_v60 }
 0x10e   : > { %v673_v40 = vpop.f32.mrf.mxu1  ;;  %v552_v58 = vpop.f32.mrf.mxu0 }
 0x10f   : > { %v8642_v41 = vadd.f32 %v673_v40, %v8630_v34  ;;  %v8670_v61 = vadd.f32 %v552_v58, %v438_v56 }
 0x110   : > { %v677_v42 = vpop.f32.mrf.mxu1  ;;  %v554_v63 = vpop.f32.mrf.mxu0 }
 0x111   : > { %v8645_v43 = vadd.f32 %v677_v42, %v8627_v32  ;;  %v8676_v1 = vadd.f32 %v554_v63, %v8668_v60 }
 0x112   : > { %v679_v44 = vpop.f32.mrf.mxu1  ;;  %v558_v3 = vpop.f32.mrf.mxu0 }
 0x113   : > { %v8648_v45 = vadd.f32 %v679_v44, %v8630_v34  ;;  %v8681_v6 = vadd.f32 %v558_v3, %v438_v56 }
 0x114   : > { %v683_v46 = vpop.f32.mrf.mxu1  ;;  %v560_v8 = vpop.f32.mrf.mxu0 }
 0x115   : > { %v8651_v47 = vadd.f32 %v683_v46, %v8627_v32  ;;  %v8687_v10 = vadd.f32 %v560_v8, %v8668_v60 }
 0x116   : > { %v685_v49 = vpop.f32.mrf.mxu1  ;;  %v564_v12 = vpop.f32.mrf.mxu0 }
 0x117   : > { %v8656_v51 = vadd.f32 %v685_v49, %v8630_v34  ;;  %v8692_v14 = vadd.f32 %v564_v12, %v438_v56 }
 0x118   : > { %v689_v53 = vpop.f32.mrf.mxu1  ;;  %v566_v16 = vpop.f32.mrf.mxu0 }
 0x119   : > { %v8661_v55 = vadd.f32 %v689_v53, %v8627_v32  ;;  %v8696_v18 = vadd.f32 %v566_v16, %v8668_v60  ;;  %v783_v16 = vld [vmem:[#allocation3 + $0x8] sm:$0xff] }
 0x11a   : > { %v691_v57 = vpop.f32.mrf.mxu1  ;;  %v570_v21 = vpop.f32.mrf.mxu0 }
 0x11b   : > { %v8665_v59 = vadd.f32 %v691_v57, %v8630_v34  ;;  %v8698_v22 = vadd.f32 %v570_v21, %v438_v56 }
 0x11c   : > { %v695_v62 = vpop.f32.mrf.mxu1  ;;  %v572_v23 = vpop.f32.mrf.mxu0 }
 0x11d   : > { %v8673_v0 = vadd.f32 %v695_v62, %v8627_v32  ;;  %v8701_v25 = vadd.f32 %v572_v23, %v8668_v60 }
 0x11e   : > { %v697_v2 = vpop.f32.mrf.mxu1  ;;  %v576_v28 = vpop.f32.mrf.mxu0 }
 0x11f   : > { %v8679_v4 = vadd.f32 %v697_v2, %v8630_v34  ;;  %v8703_v33 = vadd.f32 %v576_v28, %v438_v56  ;;  %v660_v2 = vadd.f32 %v8620_v29, %v8627_v32  ;;  %v1389_v28 = vld [vmem:[#allocation10 + $0x1f0] sm:$0xff] }
 0x120   : > { %v701_v7 = vpop.f32.mrf.mxu1  ;;  %v578_v36 = vpop.f32.mrf.mxu0 }
 0x121   : > { %v8684_v9 = vadd.f32 %v701_v7, %v8627_v32  ;;  %v8706_v40 = vadd.f32 %v578_v36, %v8668_v60  ;;  %v662_v7 = vadd.f32 %v8624_v31, %v8630_v34  ;;  %v1384_v36 = vld [vmem:[#allocation10 + $0x1c8] sm:$0xff] }
 0x122   : > { %v703_v11 = vpop.f32.mrf.mxu1  ;;  %v582_v44 = vpop.f32.mrf.mxu0 }
 0x123   : > { %v8690_v13 = vadd.f32 %v703_v11, %v8630_v34  ;;  %v8708_v46 = vadd.f32 %v582_v44, %v438_v56  ;;  %v1385_v44 = vld [vmem:[#allocation10 + $0x1d0] sm:$0xff] }
 0x124   : > { %v929_v15 = vpop.f32.mrf.mxu1  ;;  %v584_v49 = vpop.f32.mrf.mxu0 }
 0x125   : > { %v1005_v26 = vadd.f32 %v929_v15, %v547_v19  ;;  %v8711_v50 = vadd.f32 %v584_v49, %v8668_v60  ;;  %v1380_v49 = vld [vmem:[#allocation10 + $0x1a8] sm:$0xff] }
 0x126   : > { %v931_v20 = vpop.f32.mrf.mxu1  ;;  %v588_v53 = vpop.f32.mrf.mxu0 }
 0x127   : > { %v1006_v24 = vadd.f32 %v931_v20, %v549_v17  ;;  %v7715_v42 = vmul.f32 -1.442695, %v1005_v26  ;;  %v8713_v54 = vadd.f32 %v588_v53, %v438_v56  ;;  %v1387_v26 = vld [vmem:[#allocation10 + $0x1e0] sm:$0xff]  ;;  %v1382_v53 = vld [vmem:[#allocation10 + $0x1b8] sm:$0xff] }
 0x129   : > { %v7716_v38 = vmul.f32 -1.442695, %v1006_v24 }
 0x12b   : > { %7901 = vpow2.f32 %v7716_v38  ;;  %v1386_v38 = vld [vmem:[#allocation10 + $0x1d8] sm:$0xff] }
 0x12c   : > { %7903 = vpow2.f32 %v7715_v42  ;;  %v1383_v42 = vld [vmem:[#allocation10 + $0x1c0] sm:$0xff] }
 0x138   : > { %v7902_v57 = vpop.eup %7901 }
 0x139   : > { %v7904_v58 = vpop.eup %7903  ;;  %v1018_v62 = vadd.f32 1.0, %v7902_v57  ;;  %v1379_v57 = vld [vmem:[#allocation10 + $0x1a0] sm:$0xff] }
 0x13a   : > { %v1012_v63 = vadd.f32 1.0, %v7904_v58  ;;  %v1381_v58 = vld [vmem:[#allocation10 + $0x1b0] sm:$0xff] }
 0x13b   : > { %7905 = vrcp.f32 %v1018_v62  ;;  %v1376_v62 = vld [vmem:[#allocation10 + $0x188] sm:$0xff] }
 0x13c   : > { %7907 = vrcp.f32 %v1012_v63  ;;  %v1378_v63 = vld [vmem:[#allocation10 + $0x198] sm:$0xff] }
 0x144   : > { %v1000_v3 = vpop.f32.mrf.mxu1 }
 0x145   : > { %v1007_v8 = vadd.f32 %v1000_v3, %v660_v2  ;;  %v1375_v2 = vld [vmem:[#allocation10 + $0x180] sm:$0xff]  ;;  %v1377_v3 = vld [vmem:[#allocation10 + $0x190] sm:$0xff] }
 0x146   : > { %v1002_v11 = vpop.f32.mrf.mxu1 }
 0x147   : > { %7909 = vtanh.f32 %v1007_v8  ;;  %v1008_v12 = vadd.f32 %v1002_v11, %v662_v7  ;;  %v1372_v7 = vld [vmem:[#allocation10 + $0x168] sm:$0xff]  ;;  %v1374_v8 = vld [vmem:[#allocation10 + $0x178] sm:$0xff]  ;;  %v1371_v11 = vld [vmem:[#allocation10 + $0x160] sm:$0xff] }
 0x148   : > { %v7906_v56 = vpop.eup %7905 }
 0x149   : > { %v7717_v15 = vmul.f32 -1.442695, %v1008_v12  ;;  %v7908_v17 = vpop.eup %7907  ;;  %v1028_v20 = vmul.f32 %v7906_v56, %v783_v16  ;;  %v1373_v12 = vld [vmem:[#allocation10 + $0x170] sm:$0xff]  ;;  %v1370_v56 = vld [vmem:[#allocation10 + $0x158] sm:$0xff]  ;;  %v1367_v16 = vld [vmem:[#allocation10 + $0x140] sm:$0xff] }
 0x14b   : > { %7911 = vpow2.f32 %v7717_v15  ;;  %v1368_v15 = vld [vmem:[#allocation10 + $0x148] sm:$0xff] }
 0x154   : > { %v7910_v19 = vpop.eup %7909 }
 0x155   : > { %v1029_v21 = vmul.f32 %v7910_v19, %v7908_v17  ;;  %v1369_v17 = vld [vmem:[#allocation10 + $0x150] sm:$0xff]  ;;  %v1364_v19 = vld [vmem:[#allocation10 + $0x128] sm:$0xff] }
 0x157   : > { %v8719_v23 = vadd.f32 %v1029_v21, %v1028_v20  ;;  %v1366_v20 = vld [vmem:[#allocation10 + $0x138] sm:$0xff]  ;;  %v1363_v21 = vld [vmem:[#allocation10 + $0x120] sm:$0xff] }
 0x158   : > { %v7912_v29 = vpop.eup %7911 }
 0x159   : > { %v1025_v32 = vadd.f32 1.0, %v7912_v29  ;;  %7913 = vtanh.f32 %v8719_v23  ;;  %v1365_v29 = vld [vmem:[#allocation10 + $0x130] sm:$0xff] }
 0x15b   : > { %7915 = vrcp.f32 %v1025_v32  ;;  %v1360_v32 = vld [vmem:[#allocation10 + $0x108] sm:$0xff] }
 0x166   : > { %v7914_v31 = vpop.eup %7913 }
 0x168   : > { %v7916_v34 = vpop.eup %7915 }
 0x169   : > { %v8722_v24 = vmul.f32 %v7916_v34, %v7914_v31  ;;  %v1362_v31 = vld [vmem:[#allocation10 + $0x118] sm:$0xff]  ;;  %v1359_v34 = vld [vmem:[#allocation10 + $0x100] sm:$0xff] }
 0x16b   : > { %1226 = vmatmul.mubr.f32.vlgmr.msra.gmra.mxu0 %v8722_v24  ;;  %1297 = vmatmul.mubr.f32.vlgmr.msra.gmra.mxu1 %v8722_v24 }
 0x16c   : > { %1456 = vmatpush1.msra.mxu0 %v1387_v26  ;;  %1527 = vmatpush1.msra.mxu1 %v1389_v28  ;;  %v1361_v26 = vld [vmem:[#allocation10 + $0x110] sm:$0xff]  ;;  %v1356_v28 = vld [vmem:[#allocation10 + $0xe8] sm:$0xff] }
 0x16d   : > { %1457 = vmatprep.subr.mxu0 %v1384_v36  ;;  %1528 = vmatprep.subr.mxu1 %v1386_v38  ;;  %v1358_v36 = vld [vmem:[#allocation10 + $0xf8] sm:$0xff]  ;;  %v1355_v38 = vld [vmem:[#allocation10 + $0xe0] sm:$0xff] }
 0x16e   : > { %1458 = vmatpush1.msra.mxu0 %v1383_v42  ;;  %1529 = vmatpush1.msra.mxu1 %v1385_v44  ;;  %v1357_v42 = vld [vmem:[#allocation10 + $0xf0] sm:$0xff]  ;;  %v1352_v44 = vld [vmem:[#allocation10 + $0xc8] sm:$0xff] }
 0x16f   : > { %1459 = vmatprep.subr.mxu0 %v1380_v49  ;;  %1530 = vmatprep.subr.mxu1 %v1382_v53  ;;  %v1354_v49 = vld [vmem:[#allocation10 + $0xd8] sm:$0xff]  ;;  %v1351_v53 = vld [vmem:[#allocation10 + $0xc0] sm:$0xff] }
 0x170   : > { %1460 = vmatpush1.msra.mxu0 %v1379_v57  ;;  %1531 = vmatpush1.msra.mxu1 %v1381_v58  ;;  %v1353_v57 = vld [vmem:[#allocation10 + $0xd0] sm:$0xff]  ;;  %v1348_v58 = vld [vmem:[#allocation10 + $0xa8] sm:$0xff] }
 0x171   : > { %1461 = vmatprep.subr.mxu0 %v1376_v62  ;;  %1532 = vmatprep.subr.mxu1 %v1378_v63  ;;  %v1350_v62 = vld [vmem:[#allocation10 + $0xb8] sm:$0xff]  ;;  %v1347_v63 = vld [vmem:[#allocation10 + $0xa0] sm:$0xff] }
 0x172   : > { %1462 = vmatpush1.msra.mxu0 %v1375_v2  ;;  %1533 = vmatpush1.msra.mxu1 %v1377_v3  ;;  %v1349_v2 = vld [vmem:[#allocation10 + $0xb0] sm:$0xff]  ;;  %v1344_v3 = vld [vmem:[#allocation10 + $0x88] sm:$0xff] }
 0x173   : > { %1463 = vmatprep.subr.mxu0 %v1372_v7  ;;  %1534 = vmatprep.subr.mxu1 %v1374_v8  ;;  %v1346_v7 = vld [vmem:[#allocation10 + $0x98] sm:$0xff]  ;;  %v1343_v8 = vld [vmem:[#allocation10 + $0x80] sm:$0xff] }
 0x174   : > { %1464 = vmatpush1.msra.mxu0 %v1371_v11  ;;  %1535 = vmatpush1.msra.mxu1 %v1373_v12  ;;  %v1345_v11 = vld [vmem:[#allocation10 + $0x90] sm:$0xff]  ;;  %v1340_v12 = vld [vmem:[#allocation10 + $0x68] sm:$0xff] }
 0x175   : > { %1465 = vmatprep.subr.mxu0 %v1368_v15  ;;  %1536 = vmatprep.subr.mxu1 %v1370_v56  ;;  %v1342_v15 = vld [vmem:[#allocation10 + $0x78] sm:$0xff]  ;;  %v1339_v56 = vld [vmem:[#allocation10 + $0x60] sm:$0xff] }
 0x176   : > { %1466 = vmatpush1.msra.mxu0 %v1367_v16  ;;  %1537 = vmatpush1.msra.mxu1 %v1369_v17  ;;  %v1341_v16 = vld [vmem:[#allocation10 + $0x70] sm:$0xff]  ;;  %v1336_v17 = vld [vmem:[#allocation10 + $0x48] sm:$0xff] }
 0x177   : > { %1467 = vmatprep.subr.mxu0 %v1364_v19  ;;  %1538 = vmatprep.subr.mxu1 %v1366_v20  ;;  %v1338_v19 = vld [vmem:[#allocation10 + $0x58] sm:$0xff]  ;;  %v1335_v20 = vld [vmem:[#allocation10 + $0x40] sm:$0xff] }
 0x178   : > { %1468 = vmatpush1.msra.mxu0 %v1363_v21  ;;  %1539 = vmatpush1.msra.mxu1 %v1365_v29  ;;  %v1337_v21 = vld [vmem:[#allocation10 + $0x50] sm:$0xff]  ;;  %v1332_v29 = vld [vmem:[#allocation10 + $0x28] sm:$0xff] }
 0x179   : > { %1469 = vmatprep.subr.mxu0 %v1360_v32  ;;  %1540 = vmatprep.subr.mxu1 %v1362_v31  ;;  %v1334_v32 = vld [vmem:[#allocation10 + $0x38] sm:$0xff]  ;;  %v1331_v31 = vld [vmem:[#allocation10 + $0x20] sm:$0xff] }
 0x17a   : > { %1470 = vmatpush1.msra.mxu0 %v1359_v34  ;;  %1541 = vmatpush1.msra.mxu1 %v1361_v26  ;;  %v1333_v34 = vld [vmem:[#allocation10 + $0x30] sm:$0xff]  ;;  %v1328_v26 = vld [vmem:[#allocation10 + $0x8] sm:$0xff] }
 0x17b   : > { %1471 = vmatprep.subr.mxu0 %v1356_v28  ;;  %1542 = vmatprep.subr.mxu1 %v1358_v36  ;;  %v1330_v28 = vld [vmem:[#allocation10 + $0x18] sm:$0xff]  ;;  %v1327_v36 = vld [vmem:[#allocation10] sm:$0xff] }
 0x17c   : > { %1472 = vmatpush1.msra.mxu0 %v1355_v38  ;;  %1543 = vmatpush1.msra.mxu1 %v1357_v42  ;;  %v1329_v38 = vld [vmem:[#allocation10 + $0x10] sm:$0xff]  ;;  %v1452_v42 = vld [vmem:[#allocation10 + $0x3e8] sm:$0xff] }
 0x17d   : > { %1473 = vmatprep.subr.mxu0 %v1352_v44  ;;  %1544 = vmatprep.subr.mxu1 %v1354_v49  ;;  %v1454_v44 = vld [vmem:[#allocation10 + $0x3f8] sm:$0xff]  ;;  %v1451_v49 = vld [vmem:[#allocation10 + $0x3e0] sm:$0xff] }
 0x17e   : > { %1474 = vmatpush1.msra.mxu0 %v1351_v53  ;;  %1545 = vmatpush1.msra.mxu1 %v1353_v57  ;;  %v1453_v53 = vld [vmem:[#allocation10 + $0x3f0] sm:$0xff]  ;;  %v1448_v57 = vld [vmem:[#allocation10 + $0x3c8] sm:$0xff] }
 0x17f   : > { %1475 = vmatprep.subr.mxu0 %v1348_v58  ;;  %1546 = vmatprep.subr.mxu1 %v1350_v62  ;;  %v1450_v58 = vld [vmem:[#allocation10 + $0x3d8] sm:$0xff]  ;;  %v1447_v62 = vld [vmem:[#allocation10 + $0x3c0] sm:$0xff] }
 0x180   : > { %1476 = vmatpush1.msra.mxu0 %v1347_v63  ;;  %1547 = vmatpush1.msra.mxu1 %v1349_v2  ;;  %v1449_v63 = vld [vmem:[#allocation10 + $0x3d0] sm:$0xff]  ;;  %v1444_v2 = vld [vmem:[#allocation10 + $0x3a8] sm:$0xff] }
 0x181   : > { %1477 = vmatprep.subr.mxu0 %v1344_v3  ;;  %1548 = vmatprep.subr.mxu1 %v1346_v7  ;;  %v1446_v3 = vld [vmem:[#allocation10 + $0x3b8] sm:$0xff]  ;;  %v1443_v7 = vld [vmem:[#allocation10 + $0x3a0] sm:$0xff] }
 0x182   : > { %1478 = vmatpush1.msra.mxu0 %v1343_v8  ;;  %1549 = vmatpush1.msra.mxu1 %v1345_v11  ;;  %v1445_v8 = vld [vmem:[#allocation10 + $0x3b0] sm:$0xff]  ;;  %v1440_v11 = vld [vmem:[#allocation10 + $0x388] sm:$0xff] }
 0x183   : > { %1479 = vmatprep.subr.mxu0 %v1340_v12  ;;  %1550 = vmatprep.subr.mxu1 %v1342_v15  ;;  %v1442_v12 = vld [vmem:[#allocation10 + $0x398] sm:$0xff]  ;;  %v1439_v15 = vld [vmem:[#allocation10 + $0x380] sm:$0xff] }
 0x184   : > { %1480 = vmatpush1.msra.mxu0 %v1339_v56  ;;  %1551 = vmatpush1.msra.mxu1 %v1341_v16  ;;  %v1441_v56 = vld [vmem:[#allocation10 + $0x390] sm:$0xff]  ;;  %v1436_v16 = vld [vmem:[#allocation10 + $0x368] sm:$0xff] }
 0x185   : > { %1481 = vmatprep.subr.mxu0 %v1336_v17  ;;  %1552 = vmatprep.subr.mxu1 %v1338_v19  ;;  %v1438_v17 = vld [vmem:[#allocation10 + $0x378] sm:$0xff]  ;;  %v1435_v19 = vld [vmem:[#allocation10 + $0x360] sm:$0xff] }
 0x186   : > { %1482 = vmatpush1.msra.mxu0 %v1335_v20  ;;  %1553 = vmatpush1.msra.mxu1 %v1337_v21  ;;  %v1437_v20 = vld [vmem:[#allocation10 + $0x370] sm:$0xff]  ;;  %v1432_v21 = vld [vmem:[#allocation10 + $0x348] sm:$0xff] }
 0x187   : > { %1483 = vmatprep.subr.mxu0 %v1332_v29  ;;  %1554 = vmatprep.subr.mxu1 %v1334_v32  ;;  %v1434_v29 = vld [vmem:[#allocation10 + $0x358] sm:$0xff]  ;;  %v1431_v32 = vld [vmem:[#allocation10 + $0x340] sm:$0xff] }
 0x188   : > { %1484 = vmatpush1.msra.mxu0 %v1331_v31  ;;  %1555 = vmatpush1.msra.mxu1 %v1333_v34  ;;  %v1433_v31 = vld [vmem:[#allocation10 + $0x350] sm:$0xff]  ;;  %v1428_v34 = vld [vmem:[#allocation10 + $0x328] sm:$0xff] }
 0x189   : > { %1485 = vmatprep.subr.mxu0 %v1328_v26  ;;  %1556 = vmatprep.subr.mxu1 %v1330_v28  ;;  %v1430_v26 = vld [vmem:[#allocation10 + $0x338] sm:$0xff]  ;;  %v1427_v28 = vld [vmem:[#allocation10 + $0x320] sm:$0xff] }
 0x18a   : > { %1486 = vmatpush1.msra.mxu0 %v1327_v36  ;;  %1557 = vmatpush1.msra.mxu1 %v1329_v38  ;;  %v1429_v36 = vld [vmem:[#allocation10 + $0x330] sm:$0xff]  ;;  %v1424_v38 = vld [vmem:[#allocation10 + $0x308] sm:$0xff] }
 0x18b   : > { %1487 = vmatprep.subr.mxu0 %v1452_v42  ;;  %1558 = vmatprep.subr.mxu1 %v1454_v44  ;;  %v1426_v42 = vld [vmem:[#allocation10 + $0x318] sm:$0xff]  ;;  %v1423_v44 = vld [vmem:[#allocation10 + $0x300] sm:$0xff] }
 0x18c   : > { %1488 = vmatpush2.msra.mxu0 %v1451_v49  ;;  %1559 = vmatpush2.msra.mxu1 %v1453_v53  ;;  %v1425_v49 = vld [vmem:[#allocation10 + $0x310] sm:$0xff]  ;;  %v1420_v53 = vld [vmem:[#allocation10 + $0x2e8] sm:$0xff] }
 0x18d   : > { %1489 = vmatprep.subr.mxu0 %v1448_v57  ;;  %1560 = vmatprep.subr.mxu1 %v1450_v58  ;;  %v1422_v57 = vld [vmem:[#allocation10 + $0x2f8] sm:$0xff]  ;;  %v1419_v58 = vld [vmem:[#allocation10 + $0x2e0] sm:$0xff] }
 0x18e   : > { %1490 = vmatpush2.msra.mxu0 %v1447_v62  ;;  %1561 = vmatpush2.msra.mxu1 %v1449_v63  ;;  %v1421_v62 = vld [vmem:[#allocation10 + $0x2f0] sm:$0xff]  ;;  %v1416_v63 = vld [vmem:[#allocation10 + $0x2c8] sm:$0xff] }
 0x18f   : > { %1491 = vmatprep.subr.mxu0 %v1444_v2  ;;  %1562 = vmatprep.subr.mxu1 %v1446_v3  ;;  %v1418_v2 = vld [vmem:[#allocation10 + $0x2d8] sm:$0xff]  ;;  %v1415_v3 = vld [vmem:[#allocation10 + $0x2c0] sm:$0xff] }
 0x190   : > { %1492 = vmatpush2.msra.mxu0 %v1443_v7  ;;  %1563 = vmatpush2.msra.mxu1 %v1445_v8  ;;  %v1417_v7 = vld [vmem:[#allocation10 + $0x2d0] sm:$0xff]  ;;  %v1412_v8 = vld [vmem:[#allocation10 + $0x2a8] sm:$0xff] }
 0x191   : > { %1493 = vmatprep.subr.mxu0 %v1440_v11  ;;  %1564 = vmatprep.subr.mxu1 %v1442_v12  ;;  %v1414_v11 = vld [vmem:[#allocation10 + $0x2b8] sm:$0xff]  ;;  %v1411_v12 = vld [vmem:[#allocation10 + $0x2a0] sm:$0xff] }
 0x192   : > { %1494 = vmatpush2.msra.mxu0 %v1439_v15  ;;  %1565 = vmatpush2.msra.mxu1 %v1441_v56  ;;  %v1413_v15 = vld [vmem:[#allocation10 + $0x2b0] sm:$0xff]  ;;  %v1408_v56 = vld [vmem:[#allocation10 + $0x288] sm:$0xff] }
 0x193   : > { %1495 = vmatprep.subr.mxu0 %v1436_v16  ;;  %1566 = vmatprep.subr.mxu1 %v1438_v17  ;;  %v1410_v16 = vld [vmem:[#allocation10 + $0x298] sm:$0xff]  ;;  %v1407_v17 = vld [vmem:[#allocation10 + $0x280] sm:$0xff] }
 0x194   : > { %1496 = vmatpush2.msra.mxu0 %v1435_v19  ;;  %1567 = vmatpush2.msra.mxu1 %v1437_v20  ;;  %v1409_v19 = vld [vmem:[#allocation10 + $0x290] sm:$0xff]  ;;  %v1404_v20 = vld [vmem:[#allocation10 + $0x268] sm:$0xff] }
 0x195   : > { %1497 = vmatprep.subr.mxu0 %v1432_v21  ;;  %1568 = vmatprep.subr.mxu1 %v1434_v29  ;;  %v1406_v21 = vld [vmem:[#allocation10 + $0x278] sm:$0xff]  ;;  %v1403_v29 = vld [vmem:[#allocation10 + $0x260] sm:$0xff] }
 0x196   : > { %1498 = vmatpush2.msra.mxu0 %v1431_v32  ;;  %1569 = vmatpush2.msra.mxu1 %v1433_v31  ;;  %v1405_v32 = vld [vmem:[#allocation10 + $0x270] sm:$0xff]  ;;  %v1400_v31 = vld [vmem:[#allocation10 + $0x248] sm:$0xff] }
 0x197   : > { %1499 = vmatprep.subr.mxu0 %v1428_v34  ;;  %1570 = vmatprep.subr.mxu1 %v1430_v26  ;;  %v1402_v34 = vld [vmem:[#allocation10 + $0x258] sm:$0xff]  ;;  %v1399_v26 = vld [vmem:[#allocation10 + $0x240] sm:$0xff] }
 0x198   : > { %1500 = vmatpush2.msra.mxu0 %v1427_v28  ;;  %1571 = vmatpush2.msra.mxu1 %v1429_v36  ;;  %v1401_v28 = vld [vmem:[#allocation10 + $0x250] sm:$0xff]  ;;  %v1396_v36 = vld [vmem:[#allocation10 + $0x228] sm:$0xff] }
 0x199   : > { %1501 = vmatprep.subr.mxu0 %v1424_v38  ;;  %1572 = vmatprep.subr.mxu1 %v1426_v42  ;;  %v1398_v38 = vld [vmem:[#allocation10 + $0x238] sm:$0xff]  ;;  %v1395_v42 = vld [vmem:[#allocation10 + $0x220] sm:$0xff] }
 0x19a   : > { %1502 = vmatpush2.msra.mxu0 %v1423_v44  ;;  %1573 = vmatpush2.msra.mxu1 %v1425_v49  ;;  %v1397_v44 = vld [vmem:[#allocation10 + $0x230] sm:$0xff]  ;;  %v1392_v49 = vld [vmem:[#allocation10 + $0x208] sm:$0xff] }
 0x19b   : > { %1503 = vmatprep.subr.mxu0 %v1420_v53  ;;  %1574 = vmatprep.subr.mxu1 %v1422_v57  ;;  %v1394_v53 = vld [vmem:[#allocation10 + $0x218] sm:$0xff]  ;;  %v1391_v57 = vld [vmem:[#allocation10 + $0x200] sm:$0xff] }
 0x19c   : > { %1504 = vmatpush2.msra.mxu0 %v1419_v58  ;;  %1575 = vmatpush2.msra.mxu1 %v1421_v62  ;;  %v1393_v58 = vld [vmem:[#allocation10 + $0x210] sm:$0xff]  ;;  %v789_v62 = vld [vmem:[#allocation2 + $0x8] sm:$0xff] }
 0x19d   : > { %1505 = vmatprep.subr.mxu0 %v1416_v63  ;;  %1576 = vmatprep.subr.mxu1 %v1418_v2  ;;  %v1690_v63 = vld [vmem:[#allocation6 + $0x1e8] sm:$0xff]  ;;  %v1692_v2 = vld [vmem:[#allocation6 + $0x1f8] sm:$0xff] }
 0x19e   : > { %1506 = vmatpush2.msra.mxu0 %v1415_v3  ;;  %1577 = vmatpush2.msra.mxu1 %v1417_v7  ;;  %v738_v3 = vld [vmem:[%s9128_s5] sm:$0xf] }
 0x19f   : > { %1507 = vmatprep.subr.mxu0 %v1412_v8  ;;  %1578 = vmatprep.subr.mxu1 %v1414_v11  ;;  %v8730_v7 = vrot.slane %v738_v3, %v8653_v48  ;;  %v8732_v8 = vpop.f32.mrf.mxu0  ;;  %v8735_v11 = vrot.slane %v738_v3, %v8658_v52 }
 0x1a0   : > { %1508 = vmatpush2.msra.mxu0 %v1411_v12  ;;  %1579 = vmatpush2.msra.mxu1 %v1413_v15 }
 0x1a1   : > { %1509 = vmatprep.subr.mxu0 %v1408_v56  ;;  %1580 = vmatprep.subr.mxu1 %v1410_v16 }
 0x1a2   : > { %1510 = vmatpush2.msra.mxu0 %v1407_v17  ;;  %1581 = vmatpush2.msra.mxu1 %v1409_v19 }
 0x1a3   : > { %1511 = vmatprep.subr.mxu0 %v1404_v20  ;;  %1582 = vmatprep.subr.mxu1 %v1406_v21  ;;  %v8740_v21 = vrot.slane %v738_v3, %v8622_v30 }
 0x1a4   : > { %1512 = vmatpush2.msra.mxu0 %v1403_v29  ;;  %1583 = vmatpush2.msra.mxu1 %v1405_v32 }
 0x1a5   : > { %1513 = vmatprep.subr.mxu0 %v1400_v31  ;;  %1584 = vmatprep.subr.mxu1 %v1402_v34  ;;  %v8744_v31 = vrot.slane %v738_v3, %v8615_v27 }
 0x1a6   : > { %1514 = vmatpush2.msra.mxu0 %v1399_v26  ;;  %1585 = vmatpush2.msra.mxu1 %v1401_v28 }
 0x1a7   : > { %1515 = vmatprep.subr.mxu0 %v1396_v36  ;;  %1586 = vmatprep.subr.mxu1 %v1398_v38 }
 0x1a8   : > { %1516 = vmatpush2.msra.mxu0 %v1395_v42  ;;  %1587 = vmatpush2.msra.mxu1 %v1397_v44 }
 0x1a9   : > { %1517 = vmatprep.subr.mxu0 %v1392_v49  ;;  %1588 = vmatprep.subr.mxu1 %v1394_v53  ;;  %v787_v53 = vld [vmem:[#allocation3] sm:$0xff] }
 0x1aa   : > { %1518 = vmatpush2.msra.mxu0 %v1391_v57  ;;  %1589 = vmatpush2.msra.mxu1 %v1393_v58 }
 0x1ab   : > { %1519 = vmatprep.mubr.f32.mxu0 %v789_v62  ;;  %1590 = vmatprep.mubr.f32.mxu1 %v789_v62 }
 0x1ac   : > { %1693 = vmatprep.subr.mxu0 %v1690_v63  ;;  %1764 = vmatprep.subr.mxu1 %v1692_v2 }
 0x22b   : > { %v1227_v12 = vpop.f32.mrf.mxu0  ;;  %v1298_v19 = vpop.f32.mrf.mxu1 }
 0x22c   : > { %v1228_v15 = vadd.f32 %v1227_v12, %v8730_v7  ;;  %v1299_v28 = vadd.f32 %v1298_v19, %v8744_v31  ;;  %v1686_v19 = vld [vmem:[#allocation6 + $0x1c8] sm:$0xff] }
 0x22d   : > { %v1229_v56 = vpop.f32.mrf.mxu0  ;;  %v1300_v29 = vpop.f32.mrf.mxu1 }
 0x22e   : > { %v7718_v16 = vmul.f32 -1.442695, %v1228_v15  ;;  %v1230_v17 = vadd.f32 %v1229_v56, %v8735_v11  ;;  %v1301_v32 = vadd.f32 %v1300_v29, %v8740_v21  ;;  %v1685_v29 = vld [vmem:[#allocation6 + $0x1c0] sm:$0xff] }
 0x230   : > { %7917 = vpow2.f32 %v7718_v16  ;;  %v7719_v20 = vmul.f32 -1.442695, %v1230_v17  ;;  %v7720_v34 = vmul.f32 -1.442695, %v1301_v32  ;;  %v1689_v16 = vld [vmem:[#allocation6 + $0x1e0] sm:$0xff]  ;;  %v1691_v17 = vld [vmem:[#allocation6 + $0x1f0] sm:$0xff] }
 0x231   : > { %v1687_v32 = vld [vmem:[#allocation6 + $0x1d0] sm:$0xff] }
 0x232   : > { %7919 = vpow2.f32 %v7719_v20  ;;  %v1688_v20 = vld [vmem:[#allocation6 + $0x1d8] sm:$0xff] }
 0x233   : > { %7921 = vpow2.f32 %v7720_v34  ;;  %v1682_v34 = vld [vmem:[#allocation6 + $0x1a8] sm:$0xff] }
 0x23d   : > { %v7918_v26 = vpop.eup %7917 }
 0x23e   : > { %v1306_v36 = vadd.f32 1.0, %v7918_v26  ;;  %v1684_v26 = vld [vmem:[#allocation6 + $0x1b8] sm:$0xff] }
 0x23f   : > { %v7920_v38 = vpop.eup %7919 }
 0x240   : > { %7923 = vrcp.f32 %v1306_v36  ;;  %v1312_v42 = vadd.f32 1.0, %v7920_v38  ;;  %v7922_v44 = vpop.eup %7921  ;;  %v1683_v36 = vld [vmem:[#allocation6 + $0x1b0] sm:$0xff]  ;;  %v1678_v38 = vld [vmem:[#allocation6 + $0x188] sm:$0xff] }
 0x241   : > { %7925 = vtanh.f32 %v1299_v28  ;;  %v1319_v62 = vadd.f32 1.0, %v7922_v44  ;;  %v1681_v28 = vld [vmem:[#allocation6 + $0x1a0] sm:$0xff] }
 0x242   : > { %7927 = vrcp.f32 %v1312_v42  ;;  %v1680_v42 = vld [vmem:[#allocation6 + $0x198] sm:$0xff]  ;;  %v1677_v44 = vld [vmem:[#allocation6 + $0x180] sm:$0xff] }
 0x243   : > { %7929 = vrcp.f32 %v1319_v62  ;;  %v1675_v62 = vld [vmem:[#allocation6 + $0x170] sm:$0xff] }
 0x24d   : > { %v7924_v49 = vpop.eup %7923 }
 0x24e   : > { %v7926_v57 = vpop.eup %7925 }
 0x24f   : > { %v7928_v58 = vpop.eup %7927  ;;  %v1323_v63 = vmul.f32 %v7926_v57, %v7924_v49  ;;  %v1679_v49 = vld [vmem:[#allocation6 + $0x190] sm:$0xff]  ;;  %v1676_v57 = vld [vmem:[#allocation6 + $0x178] sm:$0xff] }
 0x250   : > { %v1322_v2 = vmul.f32 %v7928_v58, %v787_v53  ;;  %v7930_v12 = vpop.eup %7929  ;;  %v1674_v53 = vld [vmem:[#allocation6 + $0x168] sm:$0xff]  ;;  %v1673_v58 = vld [vmem:[#allocation6 + $0x160] sm:$0xff] }
 0x252   : > { %v8747_v3 = vadd.f32 %v1323_v63, %v1322_v2  ;;  %v1670_v63 = vld [vmem:[#allocation6 + $0x148] sm:$0xff]  ;;  %v1672_v2 = vld [vmem:[#allocation6 + $0x158] sm:$0xff] }
 0x254   : > { %7931 = vtanh.f32 %v8747_v3 }
 0x261   : > { %v7932_v15 = vpop.eup %7931 }
 0x262   : > { %v8750_v56 = vmul.f32 %v7932_v15, %v7930_v12  ;;  %v1669_v12 = vld [vmem:[#allocation6 + $0x140] sm:$0xff]  ;;  %v1671_v15 = vld [vmem:[#allocation6 + $0x150] sm:$0xff] }
 0x264   : > { %1520 = vmatmul.mubr.f32.vlgmr.msra.gmra.mxu0 %v8750_v56  ;;  %1591 = vmatmul.mubr.f32.vlgmr.msra.gmra.mxu1 %v8750_v56 }
 0x265   : > { %1694 = vmatpush1.msra.mxu0 %v1689_v16  ;;  %1765 = vmatpush1.msra.mxu1 %v1691_v17  ;;  %v1666_v16 = vld [vmem:[#allocation6 + $0x128] sm:$0xff]  ;;  %v1668_v17 = vld [vmem:[#allocation6 + $0x138] sm:$0xff] }
 0x266   : > { %1695 = vmatprep.subr.mxu0 %v1686_v19  ;;  %1766 = vmatprep.subr.mxu1 %v1688_v20  ;;  %v1665_v19 = vld [vmem:[#allocation6 + $0x120] sm:$0xff]  ;;  %v1667_v20 = vld [vmem:[#allocation6 + $0x130] sm:$0xff] }
 0x267   : > { %1696 = vmatpush1.msra.mxu0 %v1685_v29  ;;  %1767 = vmatpush1.msra.mxu1 %v1687_v32  ;;  %v1662_v29 = vld [vmem:[#allocation6 + $0x108] sm:$0xff]  ;;  %v1664_v32 = vld [vmem:[#allocation6 + $0x118] sm:$0xff] }
 0x268   : > { %1697 = vmatprep.subr.mxu0 %v1682_v34  ;;  %1768 = vmatprep.subr.mxu1 %v1684_v26  ;;  %v1661_v34 = vld [vmem:[#allocation6 + $0x100] sm:$0xff]  ;;  %v1663_v26 = vld [vmem:[#allocation6 + $0x110] sm:$0xff] }
 0x269   : > { %1698 = vmatpush1.msra.mxu0 %v1681_v28  ;;  %1769 = vmatpush1.msra.mxu1 %v1683_v36  ;;  %v1658_v28 = vld [vmem:[#allocation6 + $0xe8] sm:$0xff]  ;;  %v1660_v36 = vld [vmem:[#allocation6 + $0xf8] sm:$0xff] }
 0x26a   : > { %1699 = vmatprep.subr.mxu0 %v1678_v38  ;;  %1770 = vmatprep.subr.mxu1 %v1680_v42  ;;  %v1657_v38 = vld [vmem:[#allocation6 + $0xe0] sm:$0xff]  ;;  %v1659_v42 = vld [vmem:[#allocation6 + $0xf0] sm:$0xff] }
 0x26b   : > { %1700 = vmatpush1.msra.mxu0 %v1677_v44  ;;  %1771 = vmatpush1.msra.mxu1 %v1679_v49  ;;  %v1654_v44 = vld [vmem:[#allocation6 + $0xc8] sm:$0xff]  ;;  %v1656_v49 = vld [vmem:[#allocation6 + $0xd8] sm:$0xff] }
 0x26c   : > { %1701 = vmatprep.subr.mxu0 %v1674_v53  ;;  %1772 = vmatprep.subr.mxu1 %v1676_v57  ;;  %v1653_v53 = vld [vmem:[#allocation6 + $0xc0] sm:$0xff]  ;;  %v1655_v57 = vld [vmem:[#allocation6 + $0xd0] sm:$0xff] }
 0x26d   : > { %1702 = vmatpush1.msra.mxu0 %v1673_v58  ;;  %1773 = vmatpush1.msra.mxu1 %v1675_v62  ;;  %v1650_v58 = vld [vmem:[#allocation6 + $0xa8] sm:$0xff]  ;;  %v1652_v62 = vld [vmem:[#allocation6 + $0xb8] sm:$0xff] }
 0x26e   : > { %1703 = vmatprep.subr.mxu0 %v1670_v63  ;;  %1774 = vmatprep.subr.mxu1 %v1672_v2  ;;  %v1649_v63 = vld [vmem:[#allocation6 + $0xa0] sm:$0xff]  ;;  %v1651_v2 = vld [vmem:[#allocation6 + $0xb0] sm:$0xff] }
 0x26f   : > { %1704 = vmatpush1.msra.mxu0 %v1669_v12  ;;  %1775 = vmatpush1.msra.mxu1 %v1671_v15  ;;  %v1646_v12 = vld [vmem:[#allocation6 + $0x88] sm:$0xff]  ;;  %v1648_v15 = vld [vmem:[#allocation6 + $0x98] sm:$0xff] }
 0x270   : > { %1705 = vmatprep.subr.mxu0 %v1666_v16  ;;  %1776 = vmatprep.subr.mxu1 %v1668_v17  ;;  %v1645_v16 = vld [vmem:[#allocation6 + $0x80] sm:$0xff]  ;;  %v1647_v17 = vld [vmem:[#allocation6 + $0x90] sm:$0xff] }
 0x271   : > { %1706 = vmatpush1.msra.mxu0 %v1665_v19  ;;  %1777 = vmatpush1.msra.mxu1 %v1667_v20  ;;  %v1642_v19 = vld [vmem:[#allocation6 + $0x68] sm:$0xff]  ;;  %v1644_v20 = vld [vmem:[#allocation6 + $0x78] sm:$0xff] }
 0x272   : > { %1707 = vmatprep.subr.mxu0 %v1662_v29  ;;  %1778 = vmatprep.subr.mxu1 %v1664_v32  ;;  %v1641_v29 = vld [vmem:[#allocation6 + $0x60] sm:$0xff]  ;;  %v1643_v32 = vld [vmem:[#allocation6 + $0x70] sm:$0xff] }
 0x273   : > { %1708 = vmatpush1.msra.mxu0 %v1661_v34  ;;  %1779 = vmatpush1.msra.mxu1 %v1663_v26  ;;  %v1638_v34 = vld [vmem:[#allocation6 + $0x48] sm:$0xff]  ;;  %v1640_v26 = vld [vmem:[#allocation6 + $0x58] sm:$0xff] }
 0x274   : > { %1709 = vmatprep.subr.mxu0 %v1658_v28  ;;  %1780 = vmatprep.subr.mxu1 %v1660_v36  ;;  %v1637_v28 = vld [vmem:[#allocation6 + $0x40] sm:$0xff]  ;;  %v1639_v36 = vld [vmem:[#allocation6 + $0x50] sm:$0xff] }
 0x275   : > { %1710 = vmatpush1.msra.mxu0 %v1657_v38  ;;  %1781 = vmatpush1.msra.mxu1 %v1659_v42  ;;  %v1634_v38 = vld [vmem:[#allocation6 + $0x28] sm:$0xff]  ;;  %v1636_v42 = vld [vmem:[#allocation6 + $0x38] sm:$0xff] }
 0x276   : > { %1711 = vmatprep.subr.mxu0 %v1654_v44  ;;  %1782 = vmatprep.subr.mxu1 %v1656_v49  ;;  %v1633_v44 = vld [vmem:[#allocation6 + $0x20] sm:$0xff]  ;;  %v1635_v49 = vld [vmem:[#allocation6 + $0x30] sm:$0xff] }
 0x277   : > { %1712 = vmatpush1.msra.mxu0 %v1653_v53  ;;  %1783 = vmatpush1.msra.mxu1 %v1655_v57  ;;  %v1630_v53 = vld [vmem:[#allocation6 + $0x8] sm:$0xff]  ;;  %v1632_v57 = vld [vmem:[#allocation6 + $0x18] sm:$0xff] }
 0x278   : > { %1713 = vmatprep.subr.mxu0 %v1650_v58  ;;  %1784 = vmatprep.subr.mxu1 %v1652_v62  ;;  %v1629_v58 = vld [vmem:[#allocation6] sm:$0xff]  ;;  %v1631_v62 = vld [vmem:[#allocation6 + $0x10] sm:$0xff] }
 0x279   : > { %1714 = vmatpush1.msra.mxu0 %v1649_v63  ;;  %1785 = vmatpush1.msra.mxu1 %v1651_v2  ;;  %v1924_v63 = vld [vmem:[#allocation8 + $0x1e8] sm:$0xff]  ;;  %v1926_v2 = vld [vmem:[#allocation8 + $0x1f8] sm:$0xff] }
 0x27a   : > { %1715 = vmatprep.subr.mxu0 %v1646_v12  ;;  %1786 = vmatprep.subr.mxu1 %v1648_v15  ;;  %v1923_v12 = vld [vmem:[#allocation8 + $0x1e0] sm:$0xff]  ;;  %v1925_v15 = vld [vmem:[#allocation8 + $0x1f0] sm:$0xff] }
 0x27b   : > { %1716 = vmatpush1.msra.mxu0 %v1645_v16  ;;  %1787 = vmatpush1.msra.mxu1 %v1647_v17  ;;  %v1920_v16 = vld [vmem:[#allocation8 + $0x1c8] sm:$0xff]  ;;  %v1922_v17 = vld [vmem:[#allocation8 + $0x1d8] sm:$0xff] }
 0x27c   : > { %1717 = vmatprep.subr.mxu0 %v1642_v19  ;;  %1788 = vmatprep.subr.mxu1 %v1644_v20  ;;  %v1919_v19 = vld [vmem:[#allocation8 + $0x1c0] sm:$0xff]  ;;  %v1921_v20 = vld [vmem:[#allocation8 + $0x1d0] sm:$0xff] }
 0x27d   : > { %1718 = vmatpush1.msra.mxu0 %v1641_v29  ;;  %1789 = vmatpush1.msra.mxu1 %v1643_v32  ;;  %v1918_v29 = vld [vmem:[#allocation8 + $0x1b8] sm:$0xff]  ;;  %v1917_v32 = vld [vmem:[#allocation8 + $0x1b0] sm:$0xff] }
 0x27e   : > { %1719 = vmatprep.subr.mxu0 %v1638_v34  ;;  %1790 = vmatprep.subr.mxu1 %v1640_v26  ;;  %v1912_v34 = vld [vmem:[#allocation8 + $0x188] sm:$0xff]  ;;  %v1914_v26 = vld [vmem:[#allocation8 + $0x198] sm:$0xff] }
 0x27f   : > { %1720 = vmatpush1.msra.mxu0 %v1637_v28  ;;  %1791 = vmatpush1.msra.mxu1 %v1639_v36  ;;  %v1911_v28 = vld [vmem:[#allocation8 + $0x180] sm:$0xff]  ;;  %v1913_v36 = vld [vmem:[#allocation8 + $0x190] sm:$0xff] }
 0x280   : > { %1721 = vmatprep.subr.mxu0 %v1634_v38  ;;  %1792 = vmatprep.subr.mxu1 %v1636_v42  ;;  %v1908_v38 = vld [vmem:[#allocation8 + $0x168] sm:$0xff]  ;;  %v1910_v42 = vld [vmem:[#allocation8 + $0x178] sm:$0xff] }
 0x281   : > { %1722 = vmatpush1.msra.mxu0 %v1633_v44  ;;  %1793 = vmatpush1.msra.mxu1 %v1635_v49  ;;  %v1907_v44 = vld [vmem:[#allocation8 + $0x160] sm:$0xff]  ;;  %v1909_v49 = vld [vmem:[#allocation8 + $0x170] sm:$0xff] }
 0x282   : > { %1723 = vmatprep.subr.mxu0 %v1630_v53  ;;  %1794 = vmatprep.subr.mxu1 %v1632_v57  ;;  %v1904_v53 = vld [vmem:[#allocation8 + $0x148] sm:$0xff]  ;;  %v1906_v57 = vld [vmem:[#allocation8 + $0x158] sm:$0xff] }
 0x283   : > { %1724 = vmatpush1.msra.mxu0 %v1629_v58  ;;  %1757 = vmatprep.mubr.f32.mxu0 %v8385_v5  ;;  %v1903_v58 = vld [vmem:[#allocation8 + $0x140] sm:$0xff] }
 0x284   : > { %1795 = vmatpush1.msra.mxu1 %v1631_v62  ;;  %1828 = vmatprep.mubr.f32.mxu1 %v8385_v5  ;;  %v1905_v62 = vld [vmem:[#allocation8 + $0x150] sm:$0xff] }
 0x285   : > { %1758 = vmatmul.mubr.f32.vlgmr.msra.gmra.mxu0 %v8722_v24  ;;  %1829 = vmatmul.mubr.f32.vlgmr.msra.gmra.mxu1 %v8722_v24  ;;  %v1916_v24 = vld [vmem:[#allocation8 + $0x1a8] sm:$0xff] }
 0x286   : > { %2055 = vmatprep.mubr.f32.mxu0 %v8750_v56  ;;  %2126 = vmatprep.mubr.f32.mxu1 %v8750_v56  ;;  %v1915_v56 = vld [vmem:[#allocation8 + $0x1a0] sm:$0xff] }
 0x287   : > { %1991 = vmatprep.subr.mxu0 %v1924_v63  ;;  %2062 = vmatprep.subr.mxu1 %v1926_v2  ;;  %v1900_v63 = vld [vmem:[#allocation8 + $0x128] sm:$0xff]  ;;  %v1902_v2 = vld [vmem:[#allocation8 + $0x138] sm:$0xff] }
 0x288   : > { %1992 = vmatpush1.msra.mxu0 %v1923_v12  ;;  %2063 = vmatpush1.msra.mxu1 %v1925_v15  ;;  %v1899_v12 = vld [vmem:[#allocation8 + $0x120] sm:$0xff]  ;;  %v1901_v15 = vld [vmem:[#allocation8 + $0x130] sm:$0xff] }
 0x289   : > { %1993 = vmatprep.subr.mxu0 %v1920_v16  ;;  %2064 = vmatprep.subr.mxu1 %v1922_v17  ;;  %v1896_v16 = vld [vmem:[#allocation8 + $0x108] sm:$0xff]  ;;  %v1898_v17 = vld [vmem:[#allocation8 + $0x118] sm:$0xff] }
 0x28a   : > { %1994 = vmatpush1.msra.mxu0 %v1919_v19  ;;  %2065 = vmatpush1.msra.mxu1 %v1921_v20  ;;  %v1895_v19 = vld [vmem:[#allocation8 + $0x100] sm:$0xff]  ;;  %v1897_v20 = vld [vmem:[#allocation8 + $0x110] sm:$0xff] }
 0x28b   : > { %1995 = vmatprep.subr.mxu0 %v1916_v24  ;;  %2066 = vmatprep.subr.mxu1 %v1918_v29  ;;  %v1892_v24 = vld [vmem:[#allocation8 + $0xe8] sm:$0xff]  ;;  %v1894_v29 = vld [vmem:[#allocation8 + $0xf8] sm:$0xff] }
 0x28c   : > { %1996 = vmatpush1.msra.mxu0 %v1915_v56  ;;  %2067 = vmatpush1.msra.mxu1 %v1917_v32  ;;  %v1891_v56 = vld [vmem:[#allocation8 + $0xe0] sm:$0xff]  ;;  %v1893_v32 = vld [vmem:[#allocation8 + $0xf0] sm:$0xff] }
 0x28d   : > { %1997 = vmatprep.subr.mxu0 %v1912_v34  ;;  %2068 = vmatprep.subr.mxu1 %v1914_v26  ;;  %v1888_v34 = vld [vmem:[#allocation8 + $0xc8] sm:$0xff]  ;;  %v1890_v26 = vld [vmem:[#allocation8 + $0xd8] sm:$0xff] }
 0x28e   : > { %1998 = vmatpush1.msra.mxu0 %v1911_v28  ;;  %2069 = vmatpush1.msra.mxu1 %v1913_v36  ;;  %v1887_v28 = vld [vmem:[#allocation8 + $0xc0] sm:$0xff]  ;;  %v1889_v36 = vld [vmem:[#allocation8 + $0xd0] sm:$0xff] }
 0x28f   : > { %1999 = vmatprep.subr.mxu0 %v1908_v38  ;;  %2070 = vmatprep.subr.mxu1 %v1910_v42  ;;  %v1884_v38 = vld [vmem:[#allocation8 + $0xa8] sm:$0xff]  ;;  %v1886_v42 = vld [vmem:[#allocation8 + $0xb8] sm:$0xff] }
 0x290   : > { %2000 = vmatpush1.msra.mxu0 %v1907_v44  ;;  %2071 = vmatpush1.msra.mxu1 %v1909_v49  ;;  %v1883_v44 = vld [vmem:[#allocation8 + $0xa0] sm:$0xff]  ;;  %v1885_v49 = vld [vmem:[#allocation8 + $0xb0] sm:$0xff] }
 0x291   : > { %2001 = vmatprep.subr.mxu0 %v1904_v53  ;;  %2072 = vmatprep.subr.mxu1 %v1906_v57  ;;  %v1880_v53 = vld [vmem:[#allocation8 + $0x88] sm:$0xff]  ;;  %v1882_v57 = vld [vmem:[#allocation8 + $0x98] sm:$0xff] }
 0x292   : > { %2002 = vmatpush1.msra.mxu0 %v1903_v58  ;;  %2073 = vmatpush1.msra.mxu1 %v1905_v62  ;;  %v1879_v58 = vld [vmem:[#allocation8 + $0x80] sm:$0xff]  ;;  %v1881_v62 = vld [vmem:[#allocation8 + $0x90] sm:$0xff] }
 0x293   : > { %2003 = vmatprep.subr.mxu0 %v1900_v63  ;;  %2074 = vmatprep.subr.mxu1 %v1902_v2  ;;  %v1876_v63 = vld [vmem:[#allocation8 + $0x68] sm:$0xff]  ;;  %v1878_v2 = vld [vmem:[#allocation8 + $0x78] sm:$0xff] }
 0x294   : > { %2004 = vmatpush1.msra.mxu0 %v1899_v12  ;;  %2075 = vmatpush1.msra.mxu1 %v1901_v15  ;;  %v1875_v12 = vld [vmem:[#allocation8 + $0x60] sm:$0xff]  ;;  %v1877_v15 = vld [vmem:[#allocation8 + $0x70] sm:$0xff] }
 0x295   : > { %2005 = vmatprep.subr.mxu0 %v1896_v16  ;;  %2076 = vmatprep.subr.mxu1 %v1898_v17  ;;  %v1872_v16 = vld [vmem:[#allocation8 + $0x48] sm:$0xff]  ;;  %v1874_v17 = vld [vmem:[#allocation8 + $0x58] sm:$0xff] }
 0x296   : > { %2006 = vmatpush1.msra.mxu0 %v1895_v19  ;;  %2077 = vmatpush1.msra.mxu1 %v1897_v20  ;;  %v1871_v19 = vld [vmem:[#allocation8 + $0x40] sm:$0xff]  ;;  %v1873_v20 = vld [vmem:[#allocation8 + $0x50] sm:$0xff] }
 0x297   : > { %2007 = vmatprep.subr.mxu0 %v1892_v24  ;;  %2078 = vmatprep.subr.mxu1 %v1894_v29  ;;  %v1868_v24 = vld [vmem:[#allocation8 + $0x28] sm:$0xff]  ;;  %v1870_v29 = vld [vmem:[#allocation8 + $0x38] sm:$0xff] }
 0x298   : > { %2008 = vmatpush1.msra.mxu0 %v1891_v56  ;;  %2079 = vmatpush1.msra.mxu1 %v1893_v32  ;;  %v1867_v56 = vld [vmem:[#allocation8 + $0x20] sm:$0xff]  ;;  %v1869_v32 = vld [vmem:[#allocation8 + $0x30] sm:$0xff] }
 0x299   : > { %2009 = vmatprep.subr.mxu0 %v1888_v34  ;;  %2080 = vmatprep.subr.mxu1 %v1890_v26  ;;  %v1864_v34 = vld [vmem:[#allocation8 + $0x8] sm:$0xff]  ;;  %v1866_v26 = vld [vmem:[#allocation8 + $0x18] sm:$0xff] }
 0x29a   : > { %2010 = vmatpush1.msra.mxu0 %v1887_v28  ;;  %2081 = vmatpush1.msra.mxu1 %v1889_v36  ;;  %v1863_v28 = vld [vmem:[#allocation8] sm:$0xff]  ;;  %v1865_v36 = vld [vmem:[#allocation8 + $0x10] sm:$0xff] }
 0x29b   : > { %2011 = vmatprep.subr.mxu0 %v1884_v38  ;;  %2082 = vmatprep.subr.mxu1 %v1886_v42  ;;  %v1988_v38 = vld [vmem:[#allocation8 + $0x3e8] sm:$0xff]  ;;  %v1990_v42 = vld [vmem:[#allocation8 + $0x3f8] sm:$0xff] }
 0x29c   : > { %2012 = vmatpush1.msra.mxu0 %v1883_v44  ;;  %2083 = vmatpush1.msra.mxu1 %v1885_v49  ;;  %v1987_v44 = vld [vmem:[#allocation8 + $0x3e0] sm:$0xff]  ;;  %v1989_v49 = vld [vmem:[#allocation8 + $0x3f0] sm:$0xff] }
 0x29d   : > { %2013 = vmatprep.subr.mxu0 %v1880_v53  ;;  %2084 = vmatprep.subr.mxu1 %v1882_v57  ;;  %v1984_v53 = vld [vmem:[#allocation8 + $0x3c8] sm:$0xff]  ;;  %v1986_v57 = vld [vmem:[#allocation8 + $0x3d8] sm:$0xff] }
 0x29e   : > { %2014 = vmatpush1.msra.mxu0 %v1879_v58  ;;  %2085 = vmatpush1.msra.mxu1 %v1881_v62  ;;  %v1983_v58 = vld [vmem:[#allocation8 + $0x3c0] sm:$0xff]  ;;  %v1985_v62 = vld [vmem:[#allocation8 + $0x3d0] sm:$0xff] }
 0x29f   : > { %2015 = vmatprep.subr.mxu0 %v1876_v63  ;;  %2086 = vmatprep.subr.mxu1 %v1878_v2  ;;  %v1980_v63 = vld [vmem:[#allocation8 + $0x3a8] sm:$0xff]  ;;  %v1982_v2 = vld [vmem:[#allocation8 + $0x3b8] sm:$0xff] }
 0x2a0   : > { %2016 = vmatpush1.msra.mxu0 %v1875_v12  ;;  %2087 = vmatpush1.msra.mxu1 %v1877_v15  ;;  %v1979_v12 = vld [vmem:[#allocation8 + $0x3a0] sm:$0xff]  ;;  %v1981_v15 = vld [vmem:[#allocation8 + $0x3b0] sm:$0xff] }
 0x2a1   : > { %2017 = vmatprep.subr.mxu0 %v1872_v16  ;;  %2088 = vmatprep.subr.mxu1 %v1874_v17  ;;  %v1976_v16 = vld [vmem:[#allocation8 + $0x388] sm:$0xff]  ;;  %v1978_v17 = vld [vmem:[#allocation8 + $0x398] sm:$0xff] }
 0x2a2   : > { %2018 = vmatpush1.msra.mxu0 %v1871_v19  ;;  %2089 = vmatpush1.msra.mxu1 %v1873_v20  ;;  %v1975_v19 = vld [vmem:[#allocation8 + $0x380] sm:$0xff]  ;;  %v1977_v20 = vld [vmem:[#allocation8 + $0x390] sm:$0xff] }
 0x2a3   : > { %2019 = vmatprep.subr.mxu0 %v1868_v24  ;;  %2090 = vmatprep.subr.mxu1 %v1870_v29  ;;  %v1972_v24 = vld [vmem:[#allocation8 + $0x368] sm:$0xff]  ;;  %v1974_v29 = vld [vmem:[#allocation8 + $0x378] sm:$0xff] }
 0x2a4   : > { %2020 = vmatpush1.msra.mxu0 %v1867_v56  ;;  %2091 = vmatpush1.msra.mxu1 %v1869_v32  ;;  %v1971_v56 = vld [vmem:[#allocation8 + $0x360] sm:$0xff]  ;;  %v1973_v32 = vld [vmem:[#allocation8 + $0x370] sm:$0xff] }
 0x2a5   : > { %2021 = vmatprep.subr.mxu0 %v1864_v34  ;;  %2092 = vmatprep.subr.mxu1 %v1866_v26  ;;  %v1968_v34 = vld [vmem:[#allocation8 + $0x348] sm:$0xff]  ;;  %v1970_v26 = vld [vmem:[#allocation8 + $0x358] sm:$0xff] }
 0x2a6   : > { %2022 = vmatpush1.msra.mxu0 %v1863_v28  ;;  %2093 = vmatpush1.msra.mxu1 %v1865_v36  ;;  %v1967_v28 = vld [vmem:[#allocation8 + $0x340] sm:$0xff]  ;;  %v1969_v36 = vld [vmem:[#allocation8 + $0x350] sm:$0xff] }
 0x2a7   : > { %2023 = vmatprep.subr.mxu0 %v1988_v38  ;;  %2094 = vmatprep.subr.mxu1 %v1990_v42  ;;  %v1964_v38 = vld [vmem:[#allocation8 + $0x328] sm:$0xff]  ;;  %v1966_v42 = vld [vmem:[#allocation8 + $0x338] sm:$0xff] }
 0x2a8   : > { %2024 = vmatpush2.msra.mxu0 %v1987_v44  ;;  %2095 = vmatpush2.msra.mxu1 %v1989_v49  ;;  %v1963_v44 = vld [vmem:[#allocation8 + $0x320] sm:$0xff]  ;;  %v1965_v49 = vld [vmem:[#allocation8 + $0x330] sm:$0xff] }
 0x2a9   : > { %2025 = vmatprep.subr.mxu0 %v1984_v53  ;;  %2096 = vmatprep.subr.mxu1 %v1986_v57  ;;  %v1960_v53 = vld [vmem:[#allocation8 + $0x308] sm:$0xff]  ;;  %v1962_v57 = vld [vmem:[#allocation8 + $0x318] sm:$0xff] }
 0x2aa   : > { %2026 = vmatpush2.msra.mxu0 %v1983_v58  ;;  %2097 = vmatpush2.msra.mxu1 %v1985_v62  ;;  %v1959_v58 = vld [vmem:[#allocation8 + $0x300] sm:$0xff]  ;;  %v1961_v62 = vld [vmem:[#allocation8 + $0x310] sm:$0xff] }
 0x2ab   : > { %2027 = vmatprep.subr.mxu0 %v1980_v63  ;;  %2098 = vmatprep.subr.mxu1 %v1982_v2  ;;  %v1956_v63 = vld [vmem:[#allocation8 + $0x2e8] sm:$0xff]  ;;  %v1958_v2 = vld [vmem:[#allocation8 + $0x2f8] sm:$0xff] }
 0x2ac   : > { %2028 = vmatpush2.msra.mxu0 %v1979_v12  ;;  %2099 = vmatpush2.msra.mxu1 %v1981_v15  ;;  %v1955_v12 = vld [vmem:[#allocation8 + $0x2e0] sm:$0xff]  ;;  %v1957_v15 = vld [vmem:[#allocation8 + $0x2f0] sm:$0xff] }
 0x2ad   : > { %2029 = vmatprep.subr.mxu0 %v1976_v16  ;;  %2100 = vmatprep.subr.mxu1 %v1978_v17  ;;  %v1952_v16 = vld [vmem:[#allocation8 + $0x2c8] sm:$0xff]  ;;  %v1954_v17 = vld [vmem:[#allocation8 + $0x2d8] sm:$0xff] }
 0x2ae   : > { %2030 = vmatpush2.msra.mxu0 %v1975_v19  ;;  %2101 = vmatpush2.msra.mxu1 %v1977_v20  ;;  %v1951_v19 = vld [vmem:[#allocation8 + $0x2c0] sm:$0xff]  ;;  %v1953_v20 = vld [vmem:[#allocation8 + $0x2d0] sm:$0xff] }
 0x2af   : > { %2031 = vmatprep.subr.mxu0 %v1972_v24  ;;  %2102 = vmatprep.subr.mxu1 %v1974_v29  ;;  %v1948_v24 = vld [vmem:[#allocation8 + $0x2a8] sm:$0xff]  ;;  %v1950_v29 = vld [vmem:[#allocation8 + $0x2b8] sm:$0xff] }
 0x2b0   : > { %2032 = vmatpush2.msra.mxu0 %v1971_v56  ;;  %2103 = vmatpush2.msra.mxu1 %v1973_v32  ;;  %v1947_v56 = vld [vmem:[#allocation8 + $0x2a0] sm:$0xff]  ;;  %v1949_v32 = vld [vmem:[#allocation8 + $0x2b0] sm:$0xff] }
 0x2b1   : > { %2033 = vmatprep.subr.mxu0 %v1968_v34  ;;  %2104 = vmatprep.subr.mxu1 %v1970_v26  ;;  %v1944_v34 = vld [vmem:[#allocation8 + $0x288] sm:$0xff]  ;;  %v1946_v26 = vld [vmem:[#allocation8 + $0x298] sm:$0xff] }
 0x2b2   : > { %2034 = vmatpush2.msra.mxu0 %v1967_v28  ;;  %2105 = vmatpush2.msra.mxu1 %v1969_v36  ;;  %v1943_v28 = vld [vmem:[#allocation8 + $0x280] sm:$0xff]  ;;  %v1945_v36 = vld [vmem:[#allocation8 + $0x290] sm:$0xff] }
 0x2b3   : > { %2035 = vmatprep.subr.mxu0 %v1964_v38  ;;  %2106 = vmatprep.subr.mxu1 %v1966_v42  ;;  %v1940_v38 = vld [vmem:[#allocation8 + $0x268] sm:$0xff]  ;;  %v1942_v42 = vld [vmem:[#allocation8 + $0x278] sm:$0xff] }
 0x2b4   : > { %2036 = vmatpush2.msra.mxu0 %v1963_v44  ;;  %2107 = vmatpush2.msra.mxu1 %v1965_v49  ;;  %v1939_v44 = vld [vmem:[#allocation8 + $0x260] sm:$0xff]  ;;  %v1941_v49 = vld [vmem:[#allocation8 + $0x270] sm:$0xff] }
 0x2b5   : > { %2037 = vmatprep.subr.mxu0 %v1960_v53  ;;  %2108 = vmatprep.subr.mxu1 %v1962_v57  ;;  %v1936_v53 = vld [vmem:[#allocation8 + $0x248] sm:$0xff]  ;;  %v1938_v57 = vld [vmem:[#allocation8 + $0x258] sm:$0xff] }
 0x2b6   : > { %2038 = vmatpush2.msra.mxu0 %v1959_v58  ;;  %2109 = vmatpush2.msra.mxu1 %v1961_v62  ;;  %v1935_v58 = vld [vmem:[#allocation8 + $0x240] sm:$0xff]  ;;  %v1937_v62 = vld [vmem:[#allocation8 + $0x250] sm:$0xff] }
 0x2b7   : > { %2039 = vmatprep.subr.mxu0 %v1956_v63  ;;  %2110 = vmatprep.subr.mxu1 %v1958_v2  ;;  %v1932_v63 = vld [vmem:[#allocation8 + $0x228] sm:$0xff]  ;;  %v1934_v2 = vld [vmem:[#allocation8 + $0x238] sm:$0xff] }
 0x2b8   : > { %2040 = vmatpush2.msra.mxu0 %v1955_v12  ;;  %2111 = vmatpush2.msra.mxu1 %v1957_v15  ;;  %v1931_v12 = vld [vmem:[#allocation8 + $0x220] sm:$0xff]  ;;  %v1933_v15 = vld [vmem:[#allocation8 + $0x230] sm:$0xff] }
 0x2b9   : > { %2041 = vmatprep.subr.mxu0 %v1952_v16  ;;  %2112 = vmatprep.subr.mxu1 %v1954_v17  ;;  %v1928_v16 = vld [vmem:[#allocation8 + $0x208] sm:$0xff]  ;;  %v1930_v17 = vld [vmem:[#allocation8 + $0x218] sm:$0xff] }
 0x2ba   : > { %2042 = vmatpush2.msra.mxu0 %v1951_v19  ;;  %2113 = vmatpush2.msra.mxu1 %v1953_v20  ;;  %v1927_v19 = vld [vmem:[#allocation8 + $0x200] sm:$0xff]  ;;  %v1929_v20 = vld [vmem:[#allocation8 + $0x210] sm:$0xff] }
 0x2bb   : > { %2043 = vmatprep.subr.mxu0 %v1948_v24  ;;  %2114 = vmatprep.subr.mxu1 %v1950_v29  ;;  %v2218_v24 = vld [vmem:[#allocation10 + $0x1e8] sm:$0xff]  ;;  %v2220_v29 = vld [vmem:[#allocation10 + $0x1f8] sm:$0xff] }
 0x2bc   : > { %2044 = vmatpush2.msra.mxu0 %v1947_v56  ;;  %2115 = vmatpush2.msra.mxu1 %v1949_v32  ;;  %v760_v32 = vld [vmem:[%s9130_s7] sm:$0xf] }
 0x2bd   : > { %2045 = vmatprep.subr.mxu0 %v1944_v34  ;;  %2116 = vmatprep.subr.mxu1 %v1946_v26  ;;  %v8764_v34 = vrot.slane %v760_v32, %v8658_v52 }
 0x2be   : > { %2046 = vmatpush2.msra.mxu0 %v1943_v28  ;;  %2117 = vmatpush2.msra.mxu1 %v1945_v36  ;;  %v8767_v28 = vrot.slane %v760_v32, %v8653_v48 }
 0x2bf   : > { %2047 = vmatprep.subr.mxu0 %v1940_v38  ;;  %2118 = vmatprep.subr.mxu1 %v1942_v42 }
 0x2c0   : > { %2048 = vmatpush2.msra.mxu0 %v1939_v44  ;;  %2119 = vmatpush2.msra.mxu1 %v1941_v49 }
 0x2c1   : > { %2049 = vmatprep.subr.mxu0 %v1936_v53  ;;  %2120 = vmatprep.subr.mxu1 %v1938_v57 }
 0x2c2   : > { %2050 = vmatpush2.msra.mxu0 %v1935_v58  ;;  %2121 = vmatpush2.msra.mxu1 %v1937_v62 }
 0x2c3   : > { %2051 = vmatprep.subr.mxu0 %v1932_v63  ;;  %2122 = vmatprep.subr.mxu1 %v1934_v2 }
 0x2c4   : > { %2052 = vmatpush2.msra.mxu0 %v1931_v12  ;;  %2123 = vmatpush2.msra.mxu1 %v1933_v15 }
 0x2c5   : > { %2053 = vmatprep.subr.mxu0 %v1928_v16  ;;  %2124 = vmatprep.subr.mxu1 %v1930_v17  ;;  %v8774_v17 = vrot.slane %v760_v32, %v8615_v27 }
 0x2c6   : > { %2054 = vmatpush2.msra.mxu0 %v1927_v19  ;;  %2125 = vmatpush2.msra.mxu1 %v1929_v20  ;;  %v8777_v19 = vrot.slane %v760_v32, %v8622_v30 }
 0x2c7   : > { %2285 = vmatprep.subr.mxu0 %v2218_v24  ;;  %2356 = vmatprep.subr.mxu1 %v2220_v29 }
 0x324   : > { %v1521_v56 = vpop.f32.mrf.mxu0  ;;  %v1592_v49 = vpop.f32.mrf.mxu1 }
 0x325   : > { %v1522_v38 = vadd.f32 %v1521_v56, %v8767_v28  ;;  %v1593_v29 = vadd.f32 %v1592_v49, %v8774_v17 }
 0x326   : > { %v1523_v26 = vpop.f32.mrf.mxu0  ;;  %v1594_v62 = vpop.f32.mrf.mxu1 }
 0x327   : > { %v1524_v36 = vadd.f32 %v1523_v26, %v8764_v34  ;;  %v7721_v44 = vmul.f32 -1.442695, %v1522_v38 }
 0x329   : > { %v7722_v42 = vmul.f32 -1.442695, %v1524_v36 }
 0x32b   : > { %7933 = vpow2.f32 %v7722_v42  ;;  %v791_v42 = vld [vmem:[#allocation3 + $0x10] sm:$0xff] }
 0x32c   : > { %7935 = vpow2.f32 %v7721_v44 }
 0x338   : > { %v7934_v12 = vpop.eup %7933 }
 0x339   : > { %v7936_v16 = vpop.eup %7935  ;;  %v1606_v20 = vadd.f32 1.0, %v7934_v12 }
 0x33a   : > { %v1600_v24 = vadd.f32 1.0, %v7936_v16 }
 0x345   : > { %v1759_v53 = vpop.f32.mrf.mxu0  ;;  %v1830_v48 = vpop.f32.mrf.mxu1 }
 0x346   : > { %v1835_v57 = vadd.f32 %v1759_v53, %v8670_v61  ;;  %v1837_v56 = vadd.f32 %v1830_v48, %v8633_v35 }
 0x347   : > { %v1761_v58 = vpop.f32.mrf.mxu0  ;;  %v1832_v15 = vpop.f32.mrf.mxu1 }
 0x348   : > { %v7724_v52 = vmul.f32 -1.442695, %v1835_v57  ;;  %v1836_v63 = vadd.f32 %v1761_v58, %v8676_v1  ;;  %v1838_v61 = vadd.f32 %v1832_v15, %v8636_v37  ;;  %v1595_v1 = vadd.f32 %v1594_v62, %v8777_v19 }
 0x34a   : > { %7937 = vpow2.f32 %v7724_v52  ;;  %v7725_v2 = vmul.f32 -1.442695, %v1836_v63  ;;  %v7726_v26 = vmul.f32 -1.442695, %v1838_v61  ;;  %v7723_v27 = vmul.f32 -1.442695, %v1595_v1 }
 0x34c   : > { %7939 = vpow2.f32 %v7725_v2 }
 0x34d   : > { %7941 = vrcp.f32 %v1606_v20 }
 0x34e   : > { %7943 = vrcp.f32 %v1600_v24 }
 0x34f   : > { %7945 = vtanh.f32 %v1593_v29 }
 0x350   : > { %7947 = vtanh.f32 %v1837_v56 }
 0x351   : > { %7949 = vpow2.f32 %v7726_v26 }
 0x357   : > { %v7938_v36 = vpop.eup %7937 }
 0x358   : > { %v1842_v38 = vadd.f32 1.0, %v7938_v36  ;;  %v2217_v36 = vld [vmem:[#allocation10 + $0x1e0] sm:$0xff] }
 0x359   : > { %v7940_v30 = vpop.eup %7939 }
 0x35a   : > { %7951 = vrcp.f32 %v1842_v38  ;;  %v1848_v32 = vadd.f32 1.0, %v7940_v30  ;;  %v7942_v37 = vpop.eup %7941  ;;  %v2216_v38 = vld [vmem:[#allocation10 + $0x1d8] sm:$0xff]  ;;  %v2213_v30 = vld [vmem:[#allocation10 + $0x1c0] sm:$0xff] }
 0x35b   : > { %7953 = vpow2.f32 %v7723_v27  ;;  %v7944_v44 = vpop.eup %7943  ;;  %v1616_v53 = vmul.f32 %v7942_v37, %v791_v42  ;;  %v2219_v27 = vld [vmem:[#allocation10 + $0x1f0] sm:$0xff]  ;;  %v2210_v37 = vld [vmem:[#allocation10 + $0x1a8] sm:$0xff]  ;;  %v2212_v42 = vld [vmem:[#allocation10 + $0x1b8] sm:$0xff] }
 0x35c   : > { %7955 = vrcp.f32 %v1848_v32  ;;  %v7946_v49 = vpop.eup %7945  ;;  %v2215_v32 = vld [vmem:[#allocation10 + $0x1d0] sm:$0xff] }
 0x35d   : > { %v7948_v57 = vpop.eup %7947  ;;  %v1617_v58 = vmul.f32 %v7946_v49, %v7944_v44  ;;  %v2209_v44 = vld [vmem:[#allocation10 + $0x1a0] sm:$0xff]  ;;  %v2211_v49 = vld [vmem:[#allocation10 + $0x1b0] sm:$0xff] }
 0x35e   : > { %v7950_v35 = vpop.eup %7949 }
 0x35f   : > { %v8783_v48 = vadd.f32 %v1617_v58, %v1616_v53  ;;  %v1855_v12 = vadd.f32 1.0, %v7950_v35  ;;  %v2206_v53 = vld [vmem:[#allocation10 + $0x188] sm:$0xff]  ;;  %v2205_v35 = vld [vmem:[#allocation10 + $0x180] sm:$0xff]  ;;  %v2207_v58 = vld [vmem:[#allocation10 + $0x190] sm:$0xff] }
 0x361   : > { %7957 = vtanh.f32 %v8783_v48 }
 0x362   : > { %7959 = vrcp.f32 %v1855_v12  ;;  %v2198_v12 = vld [vmem:[#allocation10 + $0x148] sm:$0xff] }
 0x367   : > { %v7952_v62 = vpop.eup %7951 }
 0x368   : > { %v7954_v52 = vpop.eup %7953  ;;  %v1859_v63 = vmul.f32 %v7952_v62, %v7948_v57  ;;  %v2208_v57 = vld [vmem:[#allocation10 + $0x198] sm:$0xff]  ;;  %v2202_v62 = vld [vmem:[#allocation10 + $0x168] sm:$0xff] }
 0x369   : > { %v7956_v2 = vpop.eup %7955  ;;  %v1613_v16 = vadd.f32 1.0, %v7954_v52  ;;  %v2204_v52 = vld [vmem:[#allocation10 + $0x178] sm:$0xff] }
 0x36a   : > { %v1858_v15 = vmul.f32 %v7956_v2, %v8719_v23  ;;  %v2214_v23 = vld [vmem:[#allocation10 + $0x1c8] sm:$0xff]  ;;  %v2203_v2 = vld [vmem:[#allocation10 + $0x170] sm:$0xff] }
 0x36c   : > { %v8786_v20 = vadd.f32 %v1859_v63, %v1858_v15  ;;  %v2201_v63 = vld [vmem:[#allocation10 + $0x160] sm:$0xff]  ;;  %v2200_v15 = vld [vmem:[#allocation10 + $0x158] sm:$0xff] }
 0x36e   : > { %7961 = vtanh.f32 %v8786_v20  ;;  %v7958_v61 = vpop.eup %7957 }
 0x36f   : > { %7963 = vrcp.f32 %v1613_v16  ;;  %v7960_v24 = vpop.eup %7959  ;;  %v2197_v16 = vld [vmem:[#allocation10 + $0x140] sm:$0xff] }
 0x37b   : > { %v7962_v29 = vpop.eup %7961 }
 0x37c   : > { %v7964_v1 = vpop.eup %7963  ;;  %v8790_v56 = vmul.f32 %v7962_v29, %v7960_v24  ;;  %v2194_v24 = vld [vmem:[#allocation10 + $0x128] sm:$0xff]  ;;  %v2196_v29 = vld [vmem:[#allocation10 + $0x138] sm:$0xff] }
 0x37d   : > { %v8792_v26 = vmul.f32 %v7964_v1, %v7958_v61  ;;  %v2199_v61 = vld [vmem:[#allocation10 + $0x150] sm:$0xff]  ;;  %v2193_v1 = vld [vmem:[#allocation10 + $0x120] sm:$0xff] }
 0x37e   : > { %2056 = vmatmul.mubr.f32.vlgmr.msra.gmra.mxu0 %v8790_v56  ;;  %2127 = vmatmul.mubr.f32.vlgmr.msra.gmra.mxu1 %v8790_v56 }
 0x37f   : > { %2349 = vmatprep.mubr.f32.mxu0 %v8792_v26  ;;  %2420 = vmatprep.mubr.f32.mxu1 %v8792_v26 }
 0x380   : > { %2286 = vmatpush1.msra.mxu0 %v2217_v36  ;;  %2357 = vmatpush1.msra.mxu1 %v2219_v27  ;;  %v2195_v36 = vld [vmem:[#allocation10 + $0x130] sm:$0xff]  ;;  %v2190_v27 = vld [vmem:[#allocation10 + $0x108] sm:$0xff] }
 0x381   : > { %2287 = vmatprep.subr.mxu0 %v2214_v23  ;;  %2358 = vmatprep.subr.mxu1 %v2216_v38  ;;  %v2192_v23 = vld [vmem:[#allocation10 + $0x118] sm:$0xff]  ;;  %v2189_v38 = vld [vmem:[#allocation10 + $0x100] sm:$0xff] }
 0x382   : > { %2288 = vmatpush1.msra.mxu0 %v2213_v30  ;;  %2359 = vmatpush1.msra.mxu1 %v2215_v32  ;;  %v2191_v30 = vld [vmem:[#allocation10 + $0x110] sm:$0xff]  ;;  %v2186_v32 = vld [vmem:[#allocation10 + $0xe8] sm:$0xff] }
 0x383   : > { %2289 = vmatprep.subr.mxu0 %v2210_v37  ;;  %2360 = vmatprep.subr.mxu1 %v2212_v42  ;;  %v2188_v37 = vld [vmem:[#allocation10 + $0xf8] sm:$0xff]  ;;  %v2185_v42 = vld [vmem:[#allocation10 + $0xe0] sm:$0xff] }
 0x384   : > { %2290 = vmatpush1.msra.mxu0 %v2209_v44  ;;  %2361 = vmatpush1.msra.mxu1 %v2211_v49  ;;  %v2187_v44 = vld [vmem:[#allocation10 + $0xf0] sm:$0xff]  ;;  %v2182_v49 = vld [vmem:[#allocation10 + $0xc8] sm:$0xff] }
 0x385   : > { %2291 = vmatprep.subr.mxu0 %v2206_v53  ;;  %2362 = vmatprep.subr.mxu1 %v2208_v57  ;;  %v2184_v53 = vld [vmem:[#allocation10 + $0xd8] sm:$0xff]  ;;  %v2181_v57 = vld [vmem:[#allocation10 + $0xc0] sm:$0xff] }
 0x386   : > { %2292 = vmatpush1.msra.mxu0 %v2205_v35  ;;  %2363 = vmatpush1.msra.mxu1 %v2207_v58  ;;  %v2183_v35 = vld [vmem:[#allocation10 + $0xd0] sm:$0xff]  ;;  %v2178_v58 = vld [vmem:[#allocation10 + $0xa8] sm:$0xff] }
 0x387   : > { %2293 = vmatprep.subr.mxu0 %v2202_v62  ;;  %2364 = vmatprep.subr.mxu1 %v2204_v52  ;;  %v2180_v62 = vld [vmem:[#allocation10 + $0xb8] sm:$0xff]  ;;  %v2177_v52 = vld [vmem:[#allocation10 + $0xa0] sm:$0xff] }
 0x388   : > { %2294 = vmatpush1.msra.mxu0 %v2201_v63  ;;  %2365 = vmatpush1.msra.mxu1 %v2203_v2  ;;  %v2179_v63 = vld [vmem:[#allocation10 + $0xb0] sm:$0xff]  ;;  %v2174_v2 = vld [vmem:[#allocation10 + $0x88] sm:$0xff] }
 0x389   : > { %2295 = vmatprep.subr.mxu0 %v2198_v12  ;;  %2366 = vmatprep.subr.mxu1 %v2200_v15  ;;  %v2176_v12 = vld [vmem:[#allocation10 + $0x98] sm:$0xff]  ;;  %v2173_v15 = vld [vmem:[#allocation10 + $0x80] sm:$0xff] }
 0x38a   : > { %2296 = vmatpush1.msra.mxu0 %v2197_v16  ;;  %2367 = vmatpush1.msra.mxu1 %v2199_v61  ;;  %v2175_v16 = vld [vmem:[#allocation10 + $0x90] sm:$0xff]  ;;  %v2170_v61 = vld [vmem:[#allocation10 + $0x68] sm:$0xff] }
 0x38b   : > { %2297 = vmatprep.subr.mxu0 %v2194_v24  ;;  %2368 = vmatprep.subr.mxu1 %v2196_v29  ;;  %v2172_v24 = vld [vmem:[#allocation10 + $0x78] sm:$0xff]  ;;  %v2169_v29 = vld [vmem:[#allocation10 + $0x60] sm:$0xff] }
 0x38c   : > { %2298 = vmatpush1.msra.mxu0 %v2193_v1  ;;  %2369 = vmatpush1.msra.mxu1 %v2195_v36  ;;  %v2171_v1 = vld [vmem:[#allocation10 + $0x70] sm:$0xff]  ;;  %v2166_v36 = vld [vmem:[#allocation10 + $0x48] sm:$0xff] }
 0x38d   : > { %2299 = vmatprep.subr.mxu0 %v2190_v27  ;;  %2370 = vmatprep.subr.mxu1 %v2192_v23  ;;  %v2168_v27 = vld [vmem:[#allocation10 + $0x58] sm:$0xff]  ;;  %v2165_v23 = vld [vmem:[#allocation10 + $0x40] sm:$0xff] }
 0x38e   : > { %2300 = vmatpush1.msra.mxu0 %v2189_v38  ;;  %2371 = vmatpush1.msra.mxu1 %v2191_v30  ;;  %v2167_v38 = vld [vmem:[#allocation10 + $0x50] sm:$0xff]  ;;  %v2162_v30 = vld [vmem:[#allocation10 + $0x28] sm:$0xff] }
 0x38f   : > { %2301 = vmatprep.subr.mxu0 %v2186_v32  ;;  %2372 = vmatprep.subr.mxu1 %v2188_v37  ;;  %v2164_v32 = vld [vmem:[#allocation10 + $0x38] sm:$0xff]  ;;  %v2161_v37 = vld [vmem:[#allocation10 + $0x20] sm:$0xff] }
 0x390   : > { %2302 = vmatpush1.msra.mxu0 %v2185_v42  ;;  %2373 = vmatpush1.msra.mxu1 %v2187_v44  ;;  %v2163_v42 = vld [vmem:[#allocation10 + $0x30] sm:$0xff]  ;;  %v2158_v44 = vld [vmem:[#allocation10 + $0x8] sm:$0xff] }
 0x391   : > { %2303 = vmatprep.subr.mxu0 %v2182_v49  ;;  %2374 = vmatprep.subr.mxu1 %v2184_v53  ;;  %v2160_v49 = vld [vmem:[#allocation10 + $0x18] sm:$0xff]  ;;  %v2157_v53 = vld [vmem:[#allocation10] sm:$0xff] }
 0x392   : > { %2304 = vmatpush1.msra.mxu0 %v2181_v57  ;;  %2375 = vmatpush1.msra.mxu1 %v2183_v35  ;;  %v2159_v57 = vld [vmem:[#allocation10 + $0x10] sm:$0xff]  ;;  %v2282_v35 = vld [vmem:[#allocation10 + $0x3e8] sm:$0xff] }
 0x393   : > { %2305 = vmatprep.subr.mxu0 %v2178_v58  ;;  %2376 = vmatprep.subr.mxu1 %v2180_v62  ;;  %v2284_v58 = vld [vmem:[#allocation10 + $0x3f8] sm:$0xff]  ;;  %v2281_v62 = vld [vmem:[#allocation10 + $0x3e0] sm:$0xff] }
 0x394   : > { %2306 = vmatpush1.msra.mxu0 %v2177_v52  ;;  %2377 = vmatpush1.msra.mxu1 %v2179_v63  ;;  %v2283_v52 = vld [vmem:[#allocation10 + $0x3f0] sm:$0xff]  ;;  %v2278_v63 = vld [vmem:[#allocation10 + $0x3c8] sm:$0xff] }
 0x395   : > { %2307 = vmatprep.subr.mxu0 %v2174_v2  ;;  %2378 = vmatprep.subr.mxu1 %v2176_v12  ;;  %v2280_v2 = vld [vmem:[#allocation10 + $0x3d8] sm:$0xff]  ;;  %v2277_v12 = vld [vmem:[#allocation10 + $0x3c0] sm:$0xff] }
 0x396   : > { %2308 = vmatpush1.msra.mxu0 %v2173_v15  ;;  %2379 = vmatpush1.msra.mxu1 %v2175_v16  ;;  %v2279_v15 = vld [vmem:[#allocation10 + $0x3d0] sm:$0xff]  ;;  %v2274_v16 = vld [vmem:[#allocation10 + $0x3a8] sm:$0xff] }
 0x397   : > { %2309 = vmatprep.subr.mxu0 %v2170_v61  ;;  %2380 = vmatprep.subr.mxu1 %v2172_v24  ;;  %v2276_v61 = vld [vmem:[#allocation10 + $0x3b8] sm:$0xff]  ;;  %v2273_v24 = vld [vmem:[#allocation10 + $0x3a0] sm:$0xff] }
 0x398   : > { %2310 = vmatpush1.msra.mxu0 %v2169_v29  ;;  %2381 = vmatpush1.msra.mxu1 %v2171_v1  ;;  %v2275_v29 = vld [vmem:[#allocation10 + $0x3b0] sm:$0xff]  ;;  %v2270_v1 = vld [vmem:[#allocation10 + $0x388] sm:$0xff] }
 0x399   : > { %2311 = vmatprep.subr.mxu0 %v2166_v36  ;;  %2382 = vmatprep.subr.mxu1 %v2168_v27  ;;  %v2272_v36 = vld [vmem:[#allocation10 + $0x398] sm:$0xff]  ;;  %v2269_v27 = vld [vmem:[#allocation10 + $0x380] sm:$0xff] }
 0x39a   : > { %2312 = vmatpush1.msra.mxu0 %v2165_v23  ;;  %2383 = vmatpush1.msra.mxu1 %v2167_v38  ;;  %v2271_v23 = vld [vmem:[#allocation10 + $0x390] sm:$0xff]  ;;  %v2266_v38 = vld [vmem:[#allocation10 + $0x368] sm:$0xff] }
 0x39b   : > { %2313 = vmatprep.subr.mxu0 %v2162_v30  ;;  %2384 = vmatprep.subr.mxu1 %v2164_v32  ;;  %v2268_v30 = vld [vmem:[#allocation10 + $0x378] sm:$0xff]  ;;  %v2265_v32 = vld [vmem:[#allocation10 + $0x360] sm:$0xff] }
 0x39c   : > { %2314 = vmatpush1.msra.mxu0 %v2161_v37  ;;  %2385 = vmatpush1.msra.mxu1 %v2163_v42  ;;  %v2267_v37 = vld [vmem:[#allocation10 + $0x370] sm:$0xff]  ;;  %v2262_v42 = vld [vmem:[#allocation10 + $0x348] sm:$0xff] }
 0x39d   : > { %2315 = vmatprep.subr.mxu0 %v2158_v44  ;;  %2386 = vmatprep.subr.mxu1 %v2160_v49  ;;  %v2264_v44 = vld [vmem:[#allocation10 + $0x358] sm:$0xff]  ;;  %v2261_v49 = vld [vmem:[#allocation10 + $0x340] sm:$0xff] }
 0x39e   : > { %2316 = vmatpush1.msra.mxu0 %v2157_v53  ;;  %2387 = vmatpush1.msra.mxu1 %v2159_v57  ;;  %v2263_v53 = vld [vmem:[#allocation10 + $0x350] sm:$0xff]  ;;  %v2258_v57 = vld [vmem:[#allocation10 + $0x328] sm:$0xff] }
 0x39f   : > { %2317 = vmatprep.subr.mxu0 %v2282_v35  ;;  %2388 = vmatprep.subr.mxu1 %v2284_v58  ;;  %v2260_v35 = vld [vmem:[#allocation10 + $0x338] sm:$0xff]  ;;  %v2257_v58 = vld [vmem:[#allocation10 + $0x320] sm:$0xff] }
 0x3a0   : > { %2318 = vmatpush2.msra.mxu0 %v2281_v62  ;;  %2389 = vmatpush2.msra.mxu1 %v2283_v52  ;;  %v2259_v62 = vld [vmem:[#allocation10 + $0x330] sm:$0xff]  ;;  %v2254_v52 = vld [vmem:[#allocation10 + $0x308] sm:$0xff] }
 0x3a1   : > { %2319 = vmatprep.subr.mxu0 %v2278_v63  ;;  %2390 = vmatprep.subr.mxu1 %v2280_v2  ;;  %v2256_v63 = vld [vmem:[#allocation10 + $0x318] sm:$0xff]  ;;  %v2253_v2 = vld [vmem:[#allocation10 + $0x300] sm:$0xff] }
 0x3a2   : > { %2320 = vmatpush2.msra.mxu0 %v2277_v12  ;;  %2391 = vmatpush2.msra.mxu1 %v2279_v15  ;;  %v2255_v12 = vld [vmem:[#allocation10 + $0x310] sm:$0xff]  ;;  %v2250_v15 = vld [vmem:[#allocation10 + $0x2e8] sm:$0xff] }
 0x3a3   : > { %2321 = vmatprep.subr.mxu0 %v2274_v16  ;;  %2392 = vmatprep.subr.mxu1 %v2276_v61  ;;  %v2252_v16 = vld [vmem:[#allocation10 + $0x2f8] sm:$0xff]  ;;  %v2249_v61 = vld [vmem:[#allocation10 + $0x2e0] sm:$0xff] }
 0x3a4   : > { %2322 = vmatpush2.msra.mxu0 %v2273_v24  ;;  %2393 = vmatpush2.msra.mxu1 %v2275_v29  ;;  %v2251_v24 = vld [vmem:[#allocation10 + $0x2f0] sm:$0xff]  ;;  %v2246_v29 = vld [vmem:[#allocation10 + $0x2c8] sm:$0xff] }
 0x3a5   : > { %2323 = vmatprep.subr.mxu0 %v2270_v1  ;;  %2394 = vmatprep.subr.mxu1 %v2272_v36  ;;  %v2248_v1 = vld [vmem:[#allocation10 + $0x2d8] sm:$0xff]  ;;  %v2245_v36 = vld [vmem:[#allocation10 + $0x2c0] sm:$0xff] }
 0x3a6   : > { %2324 = vmatpush2.msra.mxu0 %v2269_v27  ;;  %2395 = vmatpush2.msra.mxu1 %v2271_v23  ;;  %v2247_v27 = vld [vmem:[#allocation10 + $0x2d0] sm:$0xff]  ;;  %v2242_v23 = vld [vmem:[#allocation10 + $0x2a8] sm:$0xff] }
 0x3a7   : > { %2325 = vmatprep.subr.mxu0 %v2266_v38  ;;  %2396 = vmatprep.subr.mxu1 %v2268_v30  ;;  %v2244_v38 = vld [vmem:[#allocation10 + $0x2b8] sm:$0xff]  ;;  %v2241_v30 = vld [vmem:[#allocation10 + $0x2a0] sm:$0xff] }
 0x3a8   : > { %2326 = vmatpush2.msra.mxu0 %v2265_v32  ;;  %2397 = vmatpush2.msra.mxu1 %v2267_v37  ;;  %v2243_v32 = vld [vmem:[#allocation10 + $0x2b0] sm:$0xff]  ;;  %v2238_v37 = vld [vmem:[#allocation10 + $0x288] sm:$0xff] }
 0x3a9   : > { %2327 = vmatprep.subr.mxu0 %v2262_v42  ;;  %2398 = vmatprep.subr.mxu1 %v2264_v44  ;;  %v2240_v42 = vld [vmem:[#allocation10 + $0x298] sm:$0xff]  ;;  %v2237_v44 = vld [vmem:[#allocation10 + $0x280] sm:$0xff] }
 0x3aa   : > { %2328 = vmatpush2.msra.mxu0 %v2261_v49  ;;  %2399 = vmatpush2.msra.mxu1 %v2263_v53  ;;  %v2239_v49 = vld [vmem:[#allocation10 + $0x290] sm:$0xff]  ;;  %v2234_v53 = vld [vmem:[#allocation10 + $0x268] sm:$0xff] }
 0x3ab   : > { %2329 = vmatprep.subr.mxu0 %v2258_v57  ;;  %2400 = vmatprep.subr.mxu1 %v2260_v35  ;;  %v2236_v57 = vld [vmem:[#allocation10 + $0x278] sm:$0xff]  ;;  %v2233_v35 = vld [vmem:[#allocation10 + $0x260] sm:$0xff] }
 0x3ac   : > { %2330 = vmatpush2.msra.mxu0 %v2257_v58  ;;  %2401 = vmatpush2.msra.mxu1 %v2259_v62  ;;  %v2235_v58 = vld [vmem:[#allocation10 + $0x270] sm:$0xff]  ;;  %v2230_v62 = vld [vmem:[#allocation10 + $0x248] sm:$0xff] }
 0x3ad   : > { %2331 = vmatprep.subr.mxu0 %v2254_v52  ;;  %2402 = vmatprep.subr.mxu1 %v2256_v63  ;;  %v2232_v52 = vld [vmem:[#allocation10 + $0x258] sm:$0xff]  ;;  %v2229_v63 = vld [vmem:[#allocation10 + $0x240] sm:$0xff] }
 0x3ae   : > { %2332 = vmatpush2.msra.mxu0 %v2253_v2  ;;  %2403 = vmatpush2.msra.mxu1 %v2255_v12  ;;  %v2231_v2 = vld [vmem:[#allocation10 + $0x250] sm:$0xff]  ;;  %v2226_v12 = vld [vmem:[#allocation10 + $0x228] sm:$0xff] }
 0x3af   : > { %2333 = vmatprep.subr.mxu0 %v2250_v15  ;;  %2404 = vmatprep.subr.mxu1 %v2252_v16  ;;  %v2228_v15 = vld [vmem:[#allocation10 + $0x238] sm:$0xff]  ;;  %v2225_v16 = vld [vmem:[#allocation10 + $0x220] sm:$0xff] }
 0x3b0   : > { %2334 = vmatpush2.msra.mxu0 %v2249_v61  ;;  %2405 = vmatpush2.msra.mxu1 %v2251_v24  ;;  %v2227_v61 = vld [vmem:[#allocation10 + $0x230] sm:$0xff]  ;;  %v2222_v24 = vld [vmem:[#allocation10 + $0x208] sm:$0xff] }
 0x3b1   : > { %2335 = vmatprep.subr.mxu0 %v2246_v29  ;;  %2406 = vmatprep.subr.mxu1 %v2248_v1  ;;  %v2224_v29 = vld [vmem:[#allocation10 + $0x218] sm:$0xff]  ;;  %v2221_v1 = vld [vmem:[#allocation10 + $0x200] sm:$0xff] }
 0x3b2   : > { %2336 = vmatpush2.msra.mxu0 %v2245_v36  ;;  %2407 = vmatpush2.msra.mxu1 %v2247_v27  ;;  %v2223_v36 = vld [vmem:[#allocation10 + $0x210] sm:$0xff]  ;;  %v2521_v27 = vld [vmem:[#allocation6 + $0x1e8] sm:$0xff] }
 0x3b3   : > { %2337 = vmatprep.subr.mxu0 %v2242_v23  ;;  %2408 = vmatprep.subr.mxu1 %v2244_v38  ;;  %v2523_v23 = vld [vmem:[#allocation6 + $0x1f8] sm:$0xff] }
 0x3b4   : > { %2338 = vmatpush2.msra.mxu0 %v2241_v30  ;;  %2409 = vmatpush2.msra.mxu1 %v2243_v32 }
 0x3b5   : > { %2339 = vmatprep.subr.mxu0 %v2238_v37  ;;  %2410 = vmatprep.subr.mxu1 %v2240_v42 }
 0x3b6   : > { %2340 = vmatpush2.msra.mxu0 %v2237_v44  ;;  %2411 = vmatpush2.msra.mxu1 %v2239_v49 }
 0x3b7   : > { %2341 = vmatprep.subr.mxu0 %v2234_v53  ;;  %2412 = vmatprep.subr.mxu1 %v2236_v57 }
 0x3b8   : > { %2342 = vmatpush2.msra.mxu0 %v2233_v35  ;;  %2413 = vmatpush2.msra.mxu1 %v2235_v58 }
 0x3b9   : > { %2343 = vmatprep.subr.mxu0 %v2230_v62  ;;  %2414 = vmatprep.subr.mxu1 %v2232_v52 }
 0x3ba   : > { %2344 = vmatpush2.msra.mxu0 %v2229_v63  ;;  %2415 = vmatpush2.msra.mxu1 %v2231_v2 }
 0x3bb   : > { %2345 = vmatprep.subr.mxu0 %v2226_v12  ;;  %2416 = vmatprep.subr.mxu1 %v2228_v15 }
 0x3bc   : > { %2346 = vmatpush2.msra.mxu0 %v2225_v16  ;;  %2417 = vmatpush2.msra.mxu1 %v2227_v61 }
 0x3bd   : > { %2347 = vmatprep.subr.mxu0 %v2222_v24  ;;  %2418 = vmatprep.subr.mxu1 %v2224_v29 }
 0x3be   : > { %2348 = vmatpush2.msra.mxu0 %v2221_v1  ;;  %2419 = vmatpush2.msra.mxu1 %v2223_v36 }
 0x3bf   : > { %2524 = vmatprep.subr.mxu0 %v2521_v27  ;;  %2595 = vmatprep.subr.mxu1 %v2523_v23 }
 0x43e   : > { %v2057_v38 = vpop.f32.mrf.mxu0  ;;  %v2128_v44 = vpop.f32.mrf.mxu1 }
 0x43f   : > { %v2058_v30 = vadd.f32 %v2057_v38, %v8730_v7  ;;  %v2129_v62 = vadd.f32 %v2128_v44, %v8744_v31  ;;  %v2516_v44 = vld [vmem:[#allocation6 + $0x1c0] sm:$0xff] }
 0x440   : > { %v2059_v32 = vpop.f32.mrf.mxu0  ;;  %v2130_v53 = vpop.f32.mrf.mxu1 }
 0x441   : > { %v7727_v37 = vmul.f32 -1.442695, %v2058_v30  ;;  %v2060_v42 = vadd.f32 %v2059_v32, %v8735_v11  ;;  %v2131_v57 = vadd.f32 %v2130_v53, %v8740_v21  ;;  %v2520_v30 = vld [vmem:[#allocation6 + $0x1e0] sm:$0xff]  ;;  %v2522_v32 = vld [vmem:[#allocation6 + $0x1f0] sm:$0xff]  ;;  %v2515_v53 = vld [vmem:[#allocation6 + $0x1b8] sm:$0xff] }
 0x443   : > { %7965 = vpow2.f32 %v7727_v37  ;;  %v7728_v49 = vmul.f32 -1.442695, %v2060_v42  ;;  %v7729_v35 = vmul.f32 -1.442695, %v2131_v57  ;;  %v2517_v37 = vld [vmem:[#allocation6 + $0x1c8] sm:$0xff]  ;;  %v2519_v42 = vld [vmem:[#allocation6 + $0x1d8] sm:$0xff] }
 0x444   : > { %v2512_v57 = vld [vmem:[#allocation6 + $0x1a0] sm:$0xff] }
 0x445   : > { %7967 = vpow2.f32 %v7728_v49  ;;  %v2518_v49 = vld [vmem:[#allocation6 + $0x1d0] sm:$0xff] }
 0x446   : > { %7969 = vpow2.f32 %v7729_v35  ;;  %v2514_v35 = vld [vmem:[#allocation6 + $0x1b0] sm:$0xff] }
 0x450   : > { %v7966_v58 = vpop.eup %7965 }
 0x451   : > { %v2136_v52 = vadd.f32 1.0, %v7966_v58  ;;  %v2509_v58 = vld [vmem:[#allocation6 + $0x188] sm:$0xff] }
 0x452   : > { %v7968_v63 = vpop.eup %7967 }
 0x453   : > { %7971 = vrcp.f32 %v2136_v52  ;;  %v2142_v2 = vadd.f32 1.0, %v7968_v63  ;;  %v7970_v12 = vpop.eup %7969  ;;  %v2508_v52 = vld [vmem:[#allocation6 + $0x180] sm:$0xff]  ;;  %v2510_v63 = vld [vmem:[#allocation6 + $0x190] sm:$0xff] }
 0x454   : > { %7973 = vtanh.f32 %v2129_v62  ;;  %v2149_v24 = vadd.f32 1.0, %v7970_v12  ;;  %v2511_v62 = vld [vmem:[#allocation6 + $0x198] sm:$0xff] }
 0x455   : > { %7975 = vrcp.f32 %v2142_v2  ;;  %v2505_v2 = vld [vmem:[#allocation6 + $0x168] sm:$0xff]  ;;  %v2507_v12 = vld [vmem:[#allocation6 + $0x178] sm:$0xff] }
 0x456   : > { %7977 = vrcp.f32 %v2149_v24  ;;  %v2503_v24 = vld [vmem:[#allocation6 + $0x158] sm:$0xff] }
 0x460   : > { %v7972_v15 = vpop.eup %7971 }
 0x461   : > { %v7974_v16 = vpop.eup %7973 }
 0x462   : > { %v7976_v61 = vpop.eup %7975  ;;  %v2153_v29 = vmul.f32 %v7974_v16, %v7972_v15  ;;  %v2504_v15 = vld [vmem:[#allocation6 + $0x160] sm:$0xff]  ;;  %v2506_v16 = vld [vmem:[#allocation6 + $0x170] sm:$0xff] }
 0x463   : > { %v2152_v1 = vmul.f32 %v7976_v61, %v8747_v3  ;;  %v7978_v27 = vpop.eup %7977  ;;  %v2513_v3 = vld [vmem:[#allocation6 + $0x1a8] sm:$0xff] }
 0x464   : > { %v2501_v61 = vld [vmem:[#allocation6 + $0x148] sm:$0xff] }
 0x465   : > { %v8803_v36 = vadd.f32 %v2153_v29, %v2152_v1  ;;  %v2500_v29 = vld [vmem:[#allocation6 + $0x140] sm:$0xff]  ;;  %v2502_v1 = vld [vmem:[#allocation6 + $0x150] sm:$0xff] }
 0x467   : > { %7979 = vtanh.f32 %v8803_v36 }
 0x474   : > { %v7980_v23 = vpop.eup %7979 }
 0x475   : > { %v8806_v38 = vmul.f32 %v7980_v23, %v7978_v27  ;;  %v2497_v27 = vld [vmem:[#allocation6 + $0x128] sm:$0xff]  ;;  %v2499_v23 = vld [vmem:[#allocation6 + $0x138] sm:$0xff] }
 0x477   : > { %2350 = vmatmul.mubr.f32.vlgmr.msra.gmra.mxu0 %v8806_v38  ;;  %2421 = vmatmul.mubr.f32.vlgmr.msra.gmra.mxu1 %v8806_v38 }
 0x478   : > { %2525 = vmatpush1.msra.mxu0 %v2520_v30  ;;  %2596 = vmatpush1.msra.mxu1 %v2522_v32  ;;  %v2496_v30 = vld [vmem:[#allocation6 + $0x120] sm:$0xff]  ;;  %v2498_v32 = vld [vmem:[#allocation6 + $0x130] sm:$0xff] }
 0x479   : > { %2526 = vmatprep.subr.mxu0 %v2517_v37  ;;  %2597 = vmatprep.subr.mxu1 %v2519_v42  ;;  %v2493_v37 = vld [vmem:[#allocation6 + $0x108] sm:$0xff]  ;;  %v2495_v42 = vld [vmem:[#allocation6 + $0x118] sm:$0xff] }
 0x47a   : > { %2527 = vmatpush1.msra.mxu0 %v2516_v44  ;;  %2598 = vmatpush1.msra.mxu1 %v2518_v49  ;;  %v2492_v44 = vld [vmem:[#allocation6 + $0x100] sm:$0xff]  ;;  %v2494_v49 = vld [vmem:[#allocation6 + $0x110] sm:$0xff] }
 0x47b   : > { %2528 = vmatprep.subr.mxu0 %v2513_v3  ;;  %2599 = vmatprep.subr.mxu1 %v2515_v53  ;;  %v2489_v3 = vld [vmem:[#allocation6 + $0xe8] sm:$0xff]  ;;  %v2491_v53 = vld [vmem:[#allocation6 + $0xf8] sm:$0xff] }
 0x47c   : > { %2529 = vmatpush1.msra.mxu0 %v2512_v57  ;;  %2600 = vmatpush1.msra.mxu1 %v2514_v35  ;;  %v2488_v57 = vld [vmem:[#allocation6 + $0xe0] sm:$0xff]  ;;  %v2490_v35 = vld [vmem:[#allocation6 + $0xf0] sm:$0xff] }
 0x47d   : > { %2530 = vmatprep.subr.mxu0 %v2509_v58  ;;  %2601 = vmatprep.subr.mxu1 %v2511_v62  ;;  %v2485_v58 = vld [vmem:[#allocation6 + $0xc8] sm:$0xff]  ;;  %v2487_v62 = vld [vmem:[#allocation6 + $0xd8] sm:$0xff] }
 0x47e   : > { %2531 = vmatpush1.msra.mxu0 %v2508_v52  ;;  %2602 = vmatpush1.msra.mxu1 %v2510_v63  ;;  %v2484_v52 = vld [vmem:[#allocation6 + $0xc0] sm:$0xff]  ;;  %v2486_v63 = vld [vmem:[#allocation6 + $0xd0] sm:$0xff] }
 0x47f   : > { %2532 = vmatprep.subr.mxu0 %v2505_v2  ;;  %2603 = vmatprep.subr.mxu1 %v2507_v12  ;;  %v2481_v2 = vld [vmem:[#allocation6 + $0xa8] sm:$0xff]  ;;  %v2483_v12 = vld [vmem:[#allocation6 + $0xb8] sm:$0xff] }
 0x480   : > { %2533 = vmatpush1.msra.mxu0 %v2504_v15  ;;  %2604 = vmatpush1.msra.mxu1 %v2506_v16  ;;  %v2480_v15 = vld [vmem:[#allocation6 + $0xa0] sm:$0xff]  ;;  %v2482_v16 = vld [vmem:[#allocation6 + $0xb0] sm:$0xff] }
 0x481   : > { %2534 = vmatprep.subr.mxu0 %v2501_v61  ;;  %2605 = vmatprep.subr.mxu1 %v2503_v24  ;;  %v2477_v61 = vld [vmem:[#allocation6 + $0x88] sm:$0xff]  ;;  %v2479_v24 = vld [vmem:[#allocation6 + $0x98] sm:$0xff] }
 0x482   : > { %2535 = vmatpush1.msra.mxu0 %v2500_v29  ;;  %2606 = vmatpush1.msra.mxu1 %v2502_v1  ;;  %v2476_v29 = vld [vmem:[#allocation6 + $0x80] sm:$0xff]  ;;  %v2478_v1 = vld [vmem:[#allocation6 + $0x90] sm:$0xff] }
 0x483   : > { %2536 = vmatprep.subr.mxu0 %v2497_v27  ;;  %2607 = vmatprep.subr.mxu1 %v2499_v23  ;;  %v2473_v27 = vld [vmem:[#allocation6 + $0x68] sm:$0xff]  ;;  %v2475_v23 = vld [vmem:[#allocation6 + $0x78] sm:$0xff] }
 0x484   : > { %2537 = vmatpush1.msra.mxu0 %v2496_v30  ;;  %2608 = vmatpush1.msra.mxu1 %v2498_v32  ;;  %v2472_v30 = vld [vmem:[#allocation6 + $0x60] sm:$0xff]  ;;  %v2474_v32 = vld [vmem:[#allocation6 + $0x70] sm:$0xff] }
 0x485   : > { %2538 = vmatprep.subr.mxu0 %v2493_v37  ;;  %2609 = vmatprep.subr.mxu1 %v2495_v42  ;;  %v2469_v37 = vld [vmem:[#allocation6 + $0x48] sm:$0xff]  ;;  %v2471_v42 = vld [vmem:[#allocation6 + $0x58] sm:$0xff] }
 0x486   : > { %2539 = vmatpush1.msra.mxu0 %v2492_v44  ;;  %2610 = vmatpush1.msra.mxu1 %v2494_v49  ;;  %v2468_v44 = vld [vmem:[#allocation6 + $0x40] sm:$0xff]  ;;  %v2470_v49 = vld [vmem:[#allocation6 + $0x50] sm:$0xff] }
 0x487   : > { %2540 = vmatprep.subr.mxu0 %v2489_v3  ;;  %2611 = vmatprep.subr.mxu1 %v2491_v53  ;;  %v2465_v3 = vld [vmem:[#allocation6 + $0x28] sm:$0xff]  ;;  %v2467_v53 = vld [vmem:[#allocation6 + $0x38] sm:$0xff] }
 0x488   : > { %2541 = vmatpush1.msra.mxu0 %v2488_v57  ;;  %2612 = vmatpush1.msra.mxu1 %v2490_v35  ;;  %v2464_v57 = vld [vmem:[#allocation6 + $0x20] sm:$0xff]  ;;  %v2466_v35 = vld [vmem:[#allocation6 + $0x30] sm:$0xff] }
 0x489   : > { %2542 = vmatprep.subr.mxu0 %v2485_v58  ;;  %2613 = vmatprep.subr.mxu1 %v2487_v62  ;;  %v2461_v58 = vld [vmem:[#allocation6 + $0x8] sm:$0xff]  ;;  %v2463_v62 = vld [vmem:[#allocation6 + $0x18] sm:$0xff] }
 0x48a   : > { %2543 = vmatpush1.msra.mxu0 %v2484_v52  ;;  %2614 = vmatpush1.msra.mxu1 %v2486_v63  ;;  %v2460_v52 = vld [vmem:[#allocation6] sm:$0xff]  ;;  %v2462_v63 = vld [vmem:[#allocation6 + $0x10] sm:$0xff] }
 0x48b   : > { %2544 = vmatprep.subr.mxu0 %v2481_v2  ;;  %2615 = vmatprep.subr.mxu1 %v2483_v12  ;;  %v2755_v2 = vld [vmem:[#allocation8 + $0x1e8] sm:$0xff]  ;;  %v2757_v12 = vld [vmem:[#allocation8 + $0x1f8] sm:$0xff] }
 0x48c   : > { %2545 = vmatpush1.msra.mxu0 %v2480_v15  ;;  %2616 = vmatpush1.msra.mxu1 %v2482_v16  ;;  %v2754_v15 = vld [vmem:[#allocation8 + $0x1e0] sm:$0xff]  ;;  %v2756_v16 = vld [vmem:[#allocation8 + $0x1f0] sm:$0xff] }
 0x48d   : > { %2546 = vmatprep.subr.mxu0 %v2477_v61  ;;  %2617 = vmatprep.subr.mxu1 %v2479_v24  ;;  %v2751_v61 = vld [vmem:[#allocation8 + $0x1c8] sm:$0xff]  ;;  %v2753_v24 = vld [vmem:[#allocation8 + $0x1d8] sm:$0xff] }
 0x48e   : > { %2547 = vmatpush1.msra.mxu0 %v2476_v29  ;;  %2618 = vmatpush1.msra.mxu1 %v2478_v1  ;;  %v2750_v29 = vld [vmem:[#allocation8 + $0x1c0] sm:$0xff]  ;;  %v2752_v1 = vld [vmem:[#allocation8 + $0x1d0] sm:$0xff] }
 0x48f   : > { %2548 = vmatprep.subr.mxu0 %v2473_v27  ;;  %2619 = vmatprep.subr.mxu1 %v2475_v23  ;;  %v2749_v27 = vld [vmem:[#allocation8 + $0x1b8] sm:$0xff]  ;;  %v2748_v23 = vld [vmem:[#allocation8 + $0x1b0] sm:$0xff] }
 0x490   : > { %2549 = vmatpush1.msra.mxu0 %v2472_v30  ;;  %2620 = vmatpush1.msra.mxu1 %v2474_v32  ;;  %v2743_v30 = vld [vmem:[#allocation8 + $0x188] sm:$0xff]  ;;  %v2745_v32 = vld [vmem:[#allocation8 + $0x198] sm:$0xff] }
 0x491   : > { %2550 = vmatprep.subr.mxu0 %v2469_v37  ;;  %2621 = vmatprep.subr.mxu1 %v2471_v42  ;;  %v2742_v37 = vld [vmem:[#allocation8 + $0x180] sm:$0xff]  ;;  %v2744_v42 = vld [vmem:[#allocation8 + $0x190] sm:$0xff] }
 0x492   : > { %2551 = vmatpush1.msra.mxu0 %v2468_v44  ;;  %2622 = vmatpush1.msra.mxu1 %v2470_v49  ;;  %v2739_v44 = vld [vmem:[#allocation8 + $0x168] sm:$0xff]  ;;  %v2741_v49 = vld [vmem:[#allocation8 + $0x178] sm:$0xff] }
 0x493   : > { %2552 = vmatprep.subr.mxu0 %v2465_v3  ;;  %2623 = vmatprep.subr.mxu1 %v2467_v53  ;;  %v2738_v3 = vld [vmem:[#allocation8 + $0x160] sm:$0xff]  ;;  %v2740_v53 = vld [vmem:[#allocation8 + $0x170] sm:$0xff] }
 0x494   : > { %2553 = vmatpush1.msra.mxu0 %v2464_v57  ;;  %2624 = vmatpush1.msra.mxu1 %v2466_v35  ;;  %v2735_v57 = vld [vmem:[#allocation8 + $0x148] sm:$0xff]  ;;  %v2737_v35 = vld [vmem:[#allocation8 + $0x158] sm:$0xff] }
 0x495   : > { %2554 = vmatprep.subr.mxu0 %v2461_v58  ;;  %2625 = vmatprep.subr.mxu1 %v2463_v62  ;;  %v2734_v58 = vld [vmem:[#allocation8 + $0x140] sm:$0xff]  ;;  %v2736_v62 = vld [vmem:[#allocation8 + $0x150] sm:$0xff] }
 0x496   : > { %2555 = vmatpush1.msra.mxu0 %v2460_v52  ;;  %2588 = vmatprep.mubr.f32.mxu0 %v8385_v5  ;;  %v2731_v52 = vld [vmem:[#allocation8 + $0x128] sm:$0xff] }
 0x497   : > { %2626 = vmatpush1.msra.mxu1 %v2462_v63  ;;  %2659 = vmatprep.mubr.f32.mxu1 %v8385_v5  ;;  %v2733_v63 = vld [vmem:[#allocation8 + $0x138] sm:$0xff] }
 0x498   : > { %2589 = vmatmul.mubr.f32.vlgmr.msra.gmra.mxu0 %v8790_v56  ;;  %2660 = vmatmul.mubr.f32.vlgmr.msra.gmra.mxu1 %v8790_v56  ;;  %v2747_v56 = vld [vmem:[#allocation8 + $0x1a8] sm:$0xff] }
 0x499   : > { %2886 = vmatprep.mubr.f32.mxu0 %v8806_v38  ;;  %2957 = vmatprep.mubr.f32.mxu1 %v8806_v38  ;;  %v2746_v38 = vld [vmem:[#allocation8 + $0x1a0] sm:$0xff] }
 0x49a   : > { %2822 = vmatprep.subr.mxu0 %v2755_v2  ;;  %2893 = vmatprep.subr.mxu1 %v2757_v12  ;;  %v2730_v2 = vld [vmem:[#allocation8 + $0x120] sm:$0xff]  ;;  %v2732_v12 = vld [vmem:[#allocation8 + $0x130] sm:$0xff] }
 0x49b   : > { %2823 = vmatpush1.msra.mxu0 %v2754_v15  ;;  %2894 = vmatpush1.msra.mxu1 %v2756_v16  ;;  %v2727_v15 = vld [vmem:[#allocation8 + $0x108] sm:$0xff]  ;;  %v2729_v16 = vld [vmem:[#allocation8 + $0x118] sm:$0xff] }
 0x49c   : > { %2824 = vmatprep.subr.mxu0 %v2751_v61  ;;  %2895 = vmatprep.subr.mxu1 %v2753_v24  ;;  %v2726_v61 = vld [vmem:[#allocation8 + $0x100] sm:$0xff]  ;;  %v2728_v24 = vld [vmem:[#allocation8 + $0x110] sm:$0xff] }
 0x49d   : > { %2825 = vmatpush1.msra.mxu0 %v2750_v29  ;;  %2896 = vmatpush1.msra.mxu1 %v2752_v1  ;;  %v2723_v29 = vld [vmem:[#allocation8 + $0xe8] sm:$0xff]  ;;  %v2725_v1 = vld [vmem:[#allocation8 + $0xf8] sm:$0xff] }
 0x49e   : > { %2826 = vmatprep.subr.mxu0 %v2747_v56  ;;  %2897 = vmatprep.subr.mxu1 %v2749_v27  ;;  %v2722_v56 = vld [vmem:[#allocation8 + $0xe0] sm:$0xff]  ;;  %v2724_v27 = vld [vmem:[#allocation8 + $0xf0] sm:$0xff] }
 0x49f   : > { %2827 = vmatpush1.msra.mxu0 %v2746_v38  ;;  %2898 = vmatpush1.msra.mxu1 %v2748_v23  ;;  %v2719_v38 = vld [vmem:[#allocation8 + $0xc8] sm:$0xff]  ;;  %v2721_v23 = vld [vmem:[#allocation8 + $0xd8] sm:$0xff] }
 0x4a0   : > { %2828 = vmatprep.subr.mxu0 %v2743_v30  ;;  %2899 = vmatprep.subr.mxu1 %v2745_v32  ;;  %v2718_v30 = vld [vmem:[#allocation8 + $0xc0] sm:$0xff]  ;;  %v2720_v32 = vld [vmem:[#allocation8 + $0xd0] sm:$0xff] }
 0x4a1   : > { %2829 = vmatpush1.msra.mxu0 %v2742_v37  ;;  %2900 = vmatpush1.msra.mxu1 %v2744_v42  ;;  %v2715_v37 = vld [vmem:[#allocation8 + $0xa8] sm:$0xff]  ;;  %v2717_v42 = vld [vmem:[#allocation8 + $0xb8] sm:$0xff] }
 0x4a2   : > { %2830 = vmatprep.subr.mxu0 %v2739_v44  ;;  %2901 = vmatprep.subr.mxu1 %v2741_v49  ;;  %v2714_v44 = vld [vmem:[#allocation8 + $0xa0] sm:$0xff]  ;;  %v2716_v49 = vld [vmem:[#allocation8 + $0xb0] sm:$0xff] }
 0x4a3   : > { %2831 = vmatpush1.msra.mxu0 %v2738_v3  ;;  %2902 = vmatpush1.msra.mxu1 %v2740_v53  ;;  %v2711_v3 = vld [vmem:[#allocation8 + $0x88] sm:$0xff]  ;;  %v2713_v53 = vld [vmem:[#allocation8 + $0x98] sm:$0xff] }
 0x4a4   : > { %2832 = vmatprep.subr.mxu0 %v2735_v57  ;;  %2903 = vmatprep.subr.mxu1 %v2737_v35  ;;  %v2710_v57 = vld [vmem:[#allocation8 + $0x80] sm:$0xff]  ;;  %v2712_v35 = vld [vmem:[#allocation8 + $0x90] sm:$0xff] }
 0x4a5   : > { %2833 = vmatpush1.msra.mxu0 %v2734_v58  ;;  %2904 = vmatpush1.msra.mxu1 %v2736_v62  ;;  %v2707_v58 = vld [vmem:[#allocation8 + $0x68] sm:$0xff]  ;;  %v2709_v62 = vld [vmem:[#allocation8 + $0x78] sm:$0xff] }
 0x4a6   : > { %2834 = vmatprep.subr.mxu0 %v2731_v52  ;;  %2905 = vmatprep.subr.mxu1 %v2733_v63  ;;  %v2706_v52 = vld [vmem:[#allocation8 + $0x60] sm:$0xff]  ;;  %v2708_v63 = vld [vmem:[#allocation8 + $0x70] sm:$0xff] }
 0x4a7   : > { %2835 = vmatpush1.msra.mxu0 %v2730_v2  ;;  %2906 = vmatpush1.msra.mxu1 %v2732_v12  ;;  %v2703_v2 = vld [vmem:[#allocation8 + $0x48] sm:$0xff]  ;;  %v2705_v12 = vld [vmem:[#allocation8 + $0x58] sm:$0xff] }
 0x4a8   : > { %2836 = vmatprep.subr.mxu0 %v2727_v15  ;;  %2907 = vmatprep.subr.mxu1 %v2729_v16  ;;  %v2702_v15 = vld [vmem:[#allocation8 + $0x40] sm:$0xff]  ;;  %v2704_v16 = vld [vmem:[#allocation8 + $0x50] sm:$0xff] }
 0x4a9   : > { %2837 = vmatpush1.msra.mxu0 %v2726_v61  ;;  %2908 = vmatpush1.msra.mxu1 %v2728_v24  ;;  %v2699_v61 = vld [vmem:[#allocation8 + $0x28] sm:$0xff]  ;;  %v2701_v24 = vld [vmem:[#allocation8 + $0x38] sm:$0xff] }
 0x4aa   : > { %2838 = vmatprep.subr.mxu0 %v2723_v29  ;;  %2909 = vmatprep.subr.mxu1 %v2725_v1  ;;  %v2698_v29 = vld [vmem:[#allocation8 + $0x20] sm:$0xff]  ;;  %v2700_v1 = vld [vmem:[#allocation8 + $0x30] sm:$0xff] }
 0x4ab   : > { %2839 = vmatpush1.msra.mxu0 %v2722_v56  ;;  %2910 = vmatpush1.msra.mxu1 %v2724_v27  ;;  %v2695_v56 = vld [vmem:[#allocation8 + $0x8] sm:$0xff]  ;;  %v2697_v27 = vld [vmem:[#allocation8 + $0x18] sm:$0xff] }
 0x4ac   : > { %2840 = vmatprep.subr.mxu0 %v2719_v38  ;;  %2911 = vmatprep.subr.mxu1 %v2721_v23  ;;  %v2694_v38 = vld [vmem:[#allocation8] sm:$0xff]  ;;  %v2696_v23 = vld [vmem:[#allocation8 + $0x10] sm:$0xff] }
 0x4ad   : > { %2841 = vmatpush1.msra.mxu0 %v2718_v30  ;;  %2912 = vmatpush1.msra.mxu1 %v2720_v32  ;;  %v2819_v30 = vld [vmem:[#allocation8 + $0x3e8] sm:$0xff]  ;;  %v2821_v32 = vld [vmem:[#allocation8 + $0x3f8] sm:$0xff] }
 0x4ae   : > { %2842 = vmatprep.subr.mxu0 %v2715_v37  ;;  %2913 = vmatprep.subr.mxu1 %v2717_v42  ;;  %v2818_v37 = vld [vmem:[#allocation8 + $0x3e0] sm:$0xff]  ;;  %v2820_v42 = vld [vmem:[#allocation8 + $0x3f0] sm:$0xff] }
 0x4af   : > { %2843 = vmatpush1.msra.mxu0 %v2714_v44  ;;  %2914 = vmatpush1.msra.mxu1 %v2716_v49  ;;  %v2815_v44 = vld [vmem:[#allocation8 + $0x3c8] sm:$0xff]  ;;  %v2817_v49 = vld [vmem:[#allocation8 + $0x3d8] sm:$0xff] }
 0x4b0   : > { %2844 = vmatprep.subr.mxu0 %v2711_v3  ;;  %2915 = vmatprep.subr.mxu1 %v2713_v53  ;;  %v2814_v3 = vld [vmem:[#allocation8 + $0x3c0] sm:$0xff]  ;;  %v2816_v53 = vld [vmem:[#allocation8 + $0x3d0] sm:$0xff] }
 0x4b1   : > { %2845 = vmatpush1.msra.mxu0 %v2710_v57  ;;  %2916 = vmatpush1.msra.mxu1 %v2712_v35  ;;  %v2811_v57 = vld [vmem:[#allocation8 + $0x3a8] sm:$0xff]  ;;  %v2813_v35 = vld [vmem:[#allocation8 + $0x3b8] sm:$0xff] }
 0x4b2   : > { %2846 = vmatprep.subr.mxu0 %v2707_v58  ;;  %2917 = vmatprep.subr.mxu1 %v2709_v62  ;;  %v2810_v58 = vld [vmem:[#allocation8 + $0x3a0] sm:$0xff]  ;;  %v2812_v62 = vld [vmem:[#allocation8 + $0x3b0] sm:$0xff] }
 0x4b3   : > { %2847 = vmatpush1.msra.mxu0 %v2706_v52  ;;  %2918 = vmatpush1.msra.mxu1 %v2708_v63  ;;  %v2807_v52 = vld [vmem:[#allocation8 + $0x388] sm:$0xff]  ;;  %v2809_v63 = vld [vmem:[#allocation8 + $0x398] sm:$0xff] }
 0x4b4   : > { %2848 = vmatprep.subr.mxu0 %v2703_v2  ;;  %2919 = vmatprep.subr.mxu1 %v2705_v12  ;;  %v2806_v2 = vld [vmem:[#allocation8 + $0x380] sm:$0xff]  ;;  %v2808_v12 = vld [vmem:[#allocation8 + $0x390] sm:$0xff] }
 0x4b5   : > { %2849 = vmatpush1.msra.mxu0 %v2702_v15  ;;  %2920 = vmatpush1.msra.mxu1 %v2704_v16  ;;  %v2803_v15 = vld [vmem:[#allocation8 + $0x368] sm:$0xff]  ;;  %v2805_v16 = vld [vmem:[#allocation8 + $0x378] sm:$0xff] }
 0x4b6   : > { %2850 = vmatprep.subr.mxu0 %v2699_v61  ;;  %2921 = vmatprep.subr.mxu1 %v2701_v24  ;;  %v2802_v61 = vld [vmem:[#allocation8 + $0x360] sm:$0xff]  ;;  %v2804_v24 = vld [vmem:[#allocation8 + $0x370] sm:$0xff] }
 0x4b7   : > { %2851 = vmatpush1.msra.mxu0 %v2698_v29  ;;  %2922 = vmatpush1.msra.mxu1 %v2700_v1  ;;  %v2799_v29 = vld [vmem:[#allocation8 + $0x348] sm:$0xff]  ;;  %v2801_v1 = vld [vmem:[#allocation8 + $0x358] sm:$0xff] }
 0x4b8   : > { %2852 = vmatprep.subr.mxu0 %v2695_v56  ;;  %2923 = vmatprep.subr.mxu1 %v2697_v27  ;;  %v2798_v56 = vld [vmem:[#allocation8 + $0x340] sm:$0xff]  ;;  %v2800_v27 = vld [vmem:[#allocation8 + $0x350] sm:$0xff] }
 0x4b9   : > { %2853 = vmatpush1.msra.mxu0 %v2694_v38  ;;  %2924 = vmatpush1.msra.mxu1 %v2696_v23  ;;  %v2795_v38 = vld [vmem:[#allocation8 + $0x328] sm:$0xff]  ;;  %v2797_v23 = vld [vmem:[#allocation8 + $0x338] sm:$0xff] }
 0x4ba   : > { %2854 = vmatprep.subr.mxu0 %v2819_v30  ;;  %2925 = vmatprep.subr.mxu1 %v2821_v32  ;;  %v2794_v30 = vld [vmem:[#allocation8 + $0x320] sm:$0xff]  ;;  %v2796_v32 = vld [vmem:[#allocation8 + $0x330] sm:$0xff] }
 0x4bb   : > { %2855 = vmatpush2.msra.mxu0 %v2818_v37  ;;  %2926 = vmatpush2.msra.mxu1 %v2820_v42  ;;  %v2791_v37 = vld [vmem:[#allocation8 + $0x308] sm:$0xff]  ;;  %v2793_v42 = vld [vmem:[#allocation8 + $0x318] sm:$0xff] }
 0x4bc   : > { %2856 = vmatprep.subr.mxu0 %v2815_v44  ;;  %2927 = vmatprep.subr.mxu1 %v2817_v49  ;;  %v2790_v44 = vld [vmem:[#allocation8 + $0x300] sm:$0xff]  ;;  %v2792_v49 = vld [vmem:[#allocation8 + $0x310] sm:$0xff] }
 0x4bd   : > { %2857 = vmatpush2.msra.mxu0 %v2814_v3  ;;  %2928 = vmatpush2.msra.mxu1 %v2816_v53  ;;  %v2787_v3 = vld [vmem:[#allocation8 + $0x2e8] sm:$0xff]  ;;  %v2789_v53 = vld [vmem:[#allocation8 + $0x2f8] sm:$0xff] }
 0x4be   : > { %2858 = vmatprep.subr.mxu0 %v2811_v57  ;;  %2929 = vmatprep.subr.mxu1 %v2813_v35  ;;  %v2786_v57 = vld [vmem:[#allocation8 + $0x2e0] sm:$0xff]  ;;  %v2788_v35 = vld [vmem:[#allocation8 + $0x2f0] sm:$0xff] }
 0x4bf   : > { %2859 = vmatpush2.msra.mxu0 %v2810_v58  ;;  %2930 = vmatpush2.msra.mxu1 %v2812_v62  ;;  %v2783_v58 = vld [vmem:[#allocation8 + $0x2c8] sm:$0xff]  ;;  %v2785_v62 = vld [vmem:[#allocation8 + $0x2d8] sm:$0xff] }
 0x4c0   : > { %2860 = vmatprep.subr.mxu0 %v2807_v52  ;;  %2931 = vmatprep.subr.mxu1 %v2809_v63  ;;  %v2782_v52 = vld [vmem:[#allocation8 + $0x2c0] sm:$0xff]  ;;  %v2784_v63 = vld [vmem:[#allocation8 + $0x2d0] sm:$0xff] }
 0x4c1   : > { %2861 = vmatpush2.msra.mxu0 %v2806_v2  ;;  %2932 = vmatpush2.msra.mxu1 %v2808_v12  ;;  %v2779_v2 = vld [vmem:[#allocation8 + $0x2a8] sm:$0xff]  ;;  %v2781_v12 = vld [vmem:[#allocation8 + $0x2b8] sm:$0xff] }
 0x4c2   : > { %2862 = vmatprep.subr.mxu0 %v2803_v15  ;;  %2933 = vmatprep.subr.mxu1 %v2805_v16  ;;  %v2778_v15 = vld [vmem:[#allocation8 + $0x2a0] sm:$0xff]  ;;  %v2780_v16 = vld [vmem:[#allocation8 + $0x2b0] sm:$0xff] }
 0x4c3   : > { %2863 = vmatpush2.msra.mxu0 %v2802_v61  ;;  %2934 = vmatpush2.msra.mxu1 %v2804_v24  ;;  %v2775_v61 = vld [vmem:[#allocation8 + $0x288] sm:$0xff]  ;;  %v2777_v24 = vld [vmem:[#allocation8 + $0x298] sm:$0xff] }
 0x4c4   : > { %2864 = vmatprep.subr.mxu0 %v2799_v29  ;;  %2935 = vmatprep.subr.mxu1 %v2801_v1  ;;  %v2774_v29 = vld [vmem:[#allocation8 + $0x280] sm:$0xff]  ;;  %v2776_v1 = vld [vmem:[#allocation8 + $0x290] sm:$0xff] }
 0x4c5   : > { %2865 = vmatpush2.msra.mxu0 %v2798_v56  ;;  %2936 = vmatpush2.msra.mxu1 %v2800_v27  ;;  %v2771_v56 = vld [vmem:[#allocation8 + $0x268] sm:$0xff]  ;;  %v2773_v27 = vld [vmem:[#allocation8 + $0x278] sm:$0xff] }
 0x4c6   : > { %2866 = vmatprep.subr.mxu0 %v2795_v38  ;;  %2937 = vmatprep.subr.mxu1 %v2797_v23  ;;  %v2770_v38 = vld [vmem:[#allocation8 + $0x260] sm:$0xff]  ;;  %v2772_v23 = vld [vmem:[#allocation8 + $0x270] sm:$0xff] }
 0x4c7   : > { %2867 = vmatpush2.msra.mxu0 %v2794_v30  ;;  %2938 = vmatpush2.msra.mxu1 %v2796_v32  ;;  %v2767_v30 = vld [vmem:[#allocation8 + $0x248] sm:$0xff]  ;;  %v2769_v32 = vld [vmem:[#allocation8 + $0x258] sm:$0xff] }
 0x4c8   : > { %2868 = vmatprep.subr.mxu0 %v2791_v37  ;;  %2939 = vmatprep.subr.mxu1 %v2793_v42  ;;  %v2766_v37 = vld [vmem:[#allocation8 + $0x240] sm:$0xff]  ;;  %v2768_v42 = vld [vmem:[#allocation8 + $0x250] sm:$0xff] }
 0x4c9   : > { %2869 = vmatpush2.msra.mxu0 %v2790_v44  ;;  %2940 = vmatpush2.msra.mxu1 %v2792_v49  ;;  %v2763_v44 = vld [vmem:[#allocation8 + $0x228] sm:$0xff]  ;;  %v2765_v49 = vld [vmem:[#allocation8 + $0x238] sm:$0xff] }
 0x4ca   : > { %2870 = vmatprep.subr.mxu0 %v2787_v3  ;;  %2941 = vmatprep.subr.mxu1 %v2789_v53  ;;  %v2762_v3 = vld [vmem:[#allocation8 + $0x220] sm:$0xff]  ;;  %v2764_v53 = vld [vmem:[#allocation8 + $0x230] sm:$0xff] }
 0x4cb   : > { %2871 = vmatpush2.msra.mxu0 %v2786_v57  ;;  %2942 = vmatpush2.msra.mxu1 %v2788_v35  ;;  %v2759_v57 = vld [vmem:[#allocation8 + $0x208] sm:$0xff]  ;;  %v2761_v35 = vld [vmem:[#allocation8 + $0x218] sm:$0xff] }
 0x4cc   : > { %2872 = vmatprep.subr.mxu0 %v2783_v58  ;;  %2943 = vmatprep.subr.mxu1 %v2785_v62  ;;  %v2758_v58 = vld [vmem:[#allocation8 + $0x200] sm:$0xff]  ;;  %v2760_v62 = vld [vmem:[#allocation8 + $0x210] sm:$0xff] }
 0x4cd   : > { %2873 = vmatpush2.msra.mxu0 %v2782_v52  ;;  %2944 = vmatpush2.msra.mxu1 %v2784_v63  ;;  %v3049_v52 = vld [vmem:[#allocation10 + $0x1e8] sm:$0xff]  ;;  %v3051_v63 = vld [vmem:[#allocation10 + $0x1f8] sm:$0xff] }
 0x4ce   : > { %2874 = vmatprep.subr.mxu0 %v2779_v2  ;;  %2945 = vmatprep.subr.mxu1 %v2781_v12 }
 0x4cf   : > { %2875 = vmatpush2.msra.mxu0 %v2778_v15  ;;  %2946 = vmatpush2.msra.mxu1 %v2780_v16 }
 0x4d0   : > { %2876 = vmatprep.subr.mxu0 %v2775_v61  ;;  %2947 = vmatprep.subr.mxu1 %v2777_v24 }
 0x4d1   : > { %2877 = vmatpush2.msra.mxu0 %v2774_v29  ;;  %2948 = vmatpush2.msra.mxu1 %v2776_v1 }
 0x4d2   : > { %2878 = vmatprep.subr.mxu0 %v2771_v56  ;;  %2949 = vmatprep.subr.mxu1 %v2773_v27 }
 0x4d3   : > { %2879 = vmatpush2.msra.mxu0 %v2770_v38  ;;  %2950 = vmatpush2.msra.mxu1 %v2772_v23 }
 0x4d4   : > { %2880 = vmatprep.subr.mxu0 %v2767_v30  ;;  %2951 = vmatprep.subr.mxu1 %v2769_v32 }
 0x4d5   : > { %2881 = vmatpush2.msra.mxu0 %v2766_v37  ;;  %2952 = vmatpush2.msra.mxu1 %v2768_v42 }
 0x4d6   : > { %2882 = vmatprep.subr.mxu0 %v2763_v44  ;;  %2953 = vmatprep.subr.mxu1 %v2765_v49 }
 0x4d7   : > { %2883 = vmatpush2.msra.mxu0 %v2762_v3  ;;  %2954 = vmatpush2.msra.mxu1 %v2764_v53 }
 0x4d8   : > { %2884 = vmatprep.subr.mxu0 %v2759_v57  ;;  %2955 = vmatprep.subr.mxu1 %v2761_v35 }
 0x4d9   : > { %2885 = vmatpush2.msra.mxu0 %v2758_v58  ;;  %2956 = vmatpush2.msra.mxu1 %v2760_v62 }
 0x4da   : > { %3116 = vmatprep.subr.mxu0 %v3049_v52  ;;  %3187 = vmatprep.subr.mxu1 %v3051_v63 }
 0x537   : > { %v2351_v2 = vpop.f32.mrf.mxu0  ;;  %v2422_v29 = vpop.f32.mrf.mxu1 }
 0x538   : > { %v2352_v16 = vadd.f32 %v2351_v2, %v8767_v28  ;;  %v2423_v35 = vadd.f32 %v2422_v29, %v8774_v17 }
 0x539   : > { %v2353_v12 = vpop.f32.mrf.mxu0  ;;  %v2424_v38 = vpop.f32.mrf.mxu1 }
 0x53a   : > { %v2354_v15 = vadd.f32 %v2353_v12, %v8764_v34  ;;  %v7730_v24 = vmul.f32 -1.442695, %v2352_v16 }
 0x53c   : > { %v7731_v61 = vmul.f32 -1.442695, %v2354_v15 }
 0x53e   : > { %7981 = vpow2.f32 %v7731_v61 }
 0x53f   : > { %7983 = vpow2.f32 %v7730_v24 }
 0x54b   : > { %v7982_v42 = vpop.eup %7981 }
 0x54c   : > { %v7984_v49 = vpop.eup %7983  ;;  %v2436_v3 = vadd.f32 1.0, %v7982_v42 }
 0x54d   : > { %v2430_v57 = vadd.f32 1.0, %v7984_v49 }
 0x558   : > { %v2590_v1 = vpop.f32.mrf.mxu0  ;;  %v2661_v32 = vpop.f32.mrf.mxu1 }
 0x559   : > { %v2666_v56 = vadd.f32 %v2590_v1, %v8681_v6  ;;  %v2425_v6 = vadd.f32 %v2424_v38, %v8777_v19  ;;  %v2668_v58 = vadd.f32 %v2661_v32, %v8639_v39 }
 0x55a   : > { %v2592_v27 = vpop.f32.mrf.mxu0  ;;  %v2663_v44 = vpop.f32.mrf.mxu1 }
 0x55b   : > { %v7733_v23 = vmul.f32 -1.442695, %v2666_v56  ;;  %v2667_v30 = vadd.f32 %v2592_v27, %v8687_v10  ;;  %v2669_v53 = vadd.f32 %v2663_v44, %v8642_v41  ;;  %v7732_v52 = vmul.f32 -1.442695, %v2425_v6  ;;  %v3050_v6 = vld [vmem:[#allocation10 + $0x1f0] sm:$0xff] }
 0x55d   : > { %7985 = vpow2.f32 %v7733_v23  ;;  %v7734_v37 = vmul.f32 -1.442695, %v2667_v30  ;;  %v7735_v62 = vmul.f32 -1.442695, %v2669_v53 }
 0x55f   : > { %7987 = vpow2.f32 %v7734_v37 }
 0x560   : > { %7989 = vrcp.f32 %v2436_v3 }
 0x561   : > { %7991 = vrcp.f32 %v2430_v57 }
 0x562   : > { %7993 = vtanh.f32 %v2423_v35  ;;  %v3048_v35 = vld [vmem:[#allocation10 + $0x1e0] sm:$0xff] }
 0x563   : > { %7995 = vtanh.f32 %v2668_v58  ;;  %v3047_v58 = vld [vmem:[#allocation10 + $0x1d8] sm:$0xff] }
 0x564   : > { %7997 = vpow2.f32 %v7735_v62  ;;  %v3044_v62 = vld [vmem:[#allocation10 + $0x1c0] sm:$0xff] }
 0x56a   : > { %v7986_v10 = vpop.eup %7985 }
 0x56b   : > { %v2673_v63 = vadd.f32 1.0, %v7986_v10  ;;  %v3046_v10 = vld [vmem:[#allocation10 + $0x1d0] sm:$0xff] }
 0x56c   : > { %v7988_v2 = vpop.eup %7987 }
 0x56d   : > { %7999 = vrcp.f32 %v2673_v63  ;;  %v2679_v12 = vadd.f32 1.0, %v7988_v2  ;;  %v7990_v41 = vpop.eup %7989  ;;  %v3043_v63 = vld [vmem:[#allocation10 + $0x1b8] sm:$0xff]  ;;  %v3040_v2 = vld [vmem:[#allocation10 + $0x1a0] sm:$0xff] }
 0x56e   : > { %8001 = vpow2.f32 %v7732_v52  ;;  %v7992_v15 = vpop.eup %7991  ;;  %v2446_v61 = vmul.f32 %v7990_v41, %v8783_v48  ;;  %v3041_v52 = vld [vmem:[#allocation10 + $0x1a8] sm:$0xff] }
 0x56f   : > { %8003 = vrcp.f32 %v2679_v12  ;;  %v7994_v16 = vpop.eup %7993  ;;  %v3042_v12 = vld [vmem:[#allocation10 + $0x1b0] sm:$0xff]  ;;  %v3037_v41 = vld [vmem:[#allocation10 + $0x188] sm:$0xff] }
 0x570   : > { %v7996_v24 = vpop.eup %7995  ;;  %v2447_v29 = vmul.f32 %v7994_v16, %v7992_v15  ;;  %v3039_v15 = vld [vmem:[#allocation10 + $0x198] sm:$0xff]  ;;  %v3036_v16 = vld [vmem:[#allocation10 + $0x180] sm:$0xff] }
 0x571   : > { %v7998_v39 = vpop.eup %7997 }
 0x572   : > { %v8825_v38 = vadd.f32 %v2447_v29, %v2446_v61  ;;  %v2686_v30 = vadd.f32 1.0, %v7998_v39  ;;  %v3038_v61 = vld [vmem:[#allocation10 + $0x190] sm:$0xff]  ;;  %v3035_v39 = vld [vmem:[#allocation10 + $0x178] sm:$0xff]  ;;  %v3032_v29 = vld [vmem:[#allocation10 + $0x160] sm:$0xff] }
 0x574   : > { %8005 = vtanh.f32 %v8825_v38 }
 0x575   : > { %8007 = vrcp.f32 %v2686_v30  ;;  %v3030_v30 = vld [vmem:[#allocation10 + $0x150] sm:$0xff] }
 0x57a   : > { %v8000_v1 = vpop.eup %7999 }
 0x57b   : > { %v8002_v56 = vpop.eup %8001  ;;  %v2690_v27 = vmul.f32 %v8000_v1, %v7996_v24  ;;  %v3033_v24 = vld [vmem:[#allocation10 + $0x168] sm:$0xff]  ;;  %v3034_v1 = vld [vmem:[#allocation10 + $0x170] sm:$0xff] }
 0x57c   : > { %v8004_v23 = vpop.eup %8003  ;;  %v2443_v37 = vadd.f32 1.0, %v8002_v56  ;;  %v3029_v56 = vld [vmem:[#allocation10 + $0x148] sm:$0xff] }
 0x57d   : > { %v2689_v32 = vmul.f32 %v8004_v23, %v8786_v20  ;;  %v3045_v20 = vld [vmem:[#allocation10 + $0x1c8] sm:$0xff]  ;;  %v3028_v23 = vld [vmem:[#allocation10 + $0x140] sm:$0xff] }
 0x57f   : > { %v8828_v42 = vadd.f32 %v2690_v27, %v2689_v32  ;;  %v3031_v27 = vld [vmem:[#allocation10 + $0x158] sm:$0xff]  ;;  %v3025_v32 = vld [vmem:[#allocation10 + $0x128] sm:$0xff] }
 0x581   : > { %8009 = vtanh.f32 %v8828_v42  ;;  %v8006_v48 = vpop.eup %8005 }
 0x582   : > { %8011 = vrcp.f32 %v2443_v37  ;;  %v8008_v44 = vpop.eup %8007  ;;  %v3027_v37 = vld [vmem:[#allocation10 + $0x138] sm:$0xff] }
 0x58e   : > { %v8010_v49 = vpop.eup %8009 }
 0x58f   : > { %v8012_v3 = vpop.eup %8011  ;;  %v8832_v53 = vmul.f32 %v8010_v49, %v8008_v44  ;;  %v3026_v44 = vld [vmem:[#allocation10 + $0x130] sm:$0xff]  ;;  %v3021_v49 = vld [vmem:[#allocation10 + $0x108] sm:$0xff] }
 0x590   : > { %v8834_v57 = vmul.f32 %v8012_v3, %v8006_v48  ;;  %v3024_v48 = vld [vmem:[#allocation10 + $0x120] sm:$0xff]  ;;  %v3023_v3 = vld [vmem:[#allocation10 + $0x118] sm:$0xff] }
 0x591   : > { %2887 = vmatmul.mubr.f32.vlgmr.msra.gmra.mxu0 %v8832_v53  ;;  %2958 = vmatmul.mubr.f32.vlgmr.msra.gmra.mxu1 %v8832_v53 }
 0x592   : > { %3180 = vmatprep.mubr.f32.mxu0 %v8834_v57  ;;  %3251 = vmatprep.mubr.f32.mxu1 %v8834_v57 }
 0x593   : > { %3117 = vmatpush1.msra.mxu0 %v3048_v35  ;;  %3188 = vmatpush1.msra.mxu1 %v3050_v6  ;;  %v3020_v35 = vld [vmem:[#allocation10 + $0x100] sm:$0xff]  ;;  %v3022_v6 = vld [vmem:[#allocation10 + $0x110] sm:$0xff] }
 0x594   : > { %3118 = vmatprep.subr.mxu0 %v3045_v20  ;;  %3189 = vmatprep.subr.mxu1 %v3047_v58  ;;  %v3017_v20 = vld [vmem:[#allocation10 + $0xe8] sm:$0xff]  ;;  %v3019_v58 = vld [vmem:[#allocation10 + $0xf8] sm:$0xff] }
 0x595   : > { %3119 = vmatpush1.msra.mxu0 %v3044_v62  ;;  %3190 = vmatpush1.msra.mxu1 %v3046_v10  ;;  %v3016_v62 = vld [vmem:[#allocation10 + $0xe0] sm:$0xff]  ;;  %v3018_v10 = vld [vmem:[#allocation10 + $0xf0] sm:$0xff] }
 0x596   : > { %3120 = vmatprep.subr.mxu0 %v3041_v52  ;;  %3191 = vmatprep.subr.mxu1 %v3043_v63  ;;  %v3013_v52 = vld [vmem:[#allocation10 + $0xc8] sm:$0xff]  ;;  %v3015_v63 = vld [vmem:[#allocation10 + $0xd8] sm:$0xff] }
 0x597   : > { %3121 = vmatpush1.msra.mxu0 %v3040_v2  ;;  %3192 = vmatpush1.msra.mxu1 %v3042_v12  ;;  %v3012_v2 = vld [vmem:[#allocation10 + $0xc0] sm:$0xff]  ;;  %v3014_v12 = vld [vmem:[#allocation10 + $0xd0] sm:$0xff] }
 0x598   : > { %3122 = vmatprep.subr.mxu0 %v3037_v41  ;;  %3193 = vmatprep.subr.mxu1 %v3039_v15  ;;  %v3009_v41 = vld [vmem:[#allocation10 + $0xa8] sm:$0xff]  ;;  %v3011_v15 = vld [vmem:[#allocation10 + $0xb8] sm:$0xff] }
 0x599   : > { %3123 = vmatpush1.msra.mxu0 %v3036_v16  ;;  %3194 = vmatpush1.msra.mxu1 %v3038_v61  ;;  %v3008_v16 = vld [vmem:[#allocation10 + $0xa0] sm:$0xff]  ;;  %v3010_v61 = vld [vmem:[#allocation10 + $0xb0] sm:$0xff] }
 0x59a   : > { %3124 = vmatprep.subr.mxu0 %v3033_v24  ;;  %3195 = vmatprep.subr.mxu1 %v3035_v39  ;;  %v3005_v24 = vld [vmem:[#allocation10 + $0x88] sm:$0xff]  ;;  %v3007_v39 = vld [vmem:[#allocation10 + $0x98] sm:$0xff] }
 0x59b   : > { %3125 = vmatpush1.msra.mxu0 %v3032_v29  ;;  %3196 = vmatpush1.msra.mxu1 %v3034_v1  ;;  %v3004_v29 = vld [vmem:[#allocation10 + $0x80] sm:$0xff]  ;;  %v3006_v1 = vld [vmem:[#allocation10 + $0x90] sm:$0xff] }
 0x59c   : > { %3126 = vmatprep.subr.mxu0 %v3029_v56  ;;  %3197 = vmatprep.subr.mxu1 %v3031_v27  ;;  %v3001_v56 = vld [vmem:[#allocation10 + $0x68] sm:$0xff]  ;;  %v3003_v27 = vld [vmem:[#allocation10 + $0x78] sm:$0xff] }
 0x59d   : > { %3127 = vmatpush1.msra.mxu0 %v3028_v23  ;;  %3198 = vmatpush1.msra.mxu1 %v3030_v30  ;;  %v3000_v23 = vld [vmem:[#allocation10 + $0x60] sm:$0xff]  ;;  %v3002_v30 = vld [vmem:[#allocation10 + $0x70] sm:$0xff] }
 0x59e   : > { %3128 = vmatprep.subr.mxu0 %v3025_v32  ;;  %3199 = vmatprep.subr.mxu1 %v3027_v37  ;;  %v2997_v32 = vld [vmem:[#allocation10 + $0x48] sm:$0xff]  ;;  %v2999_v37 = vld [vmem:[#allocation10 + $0x58] sm:$0xff] }
 0x59f   : > { %3129 = vmatpush1.msra.mxu0 %v3024_v48  ;;  %3200 = vmatpush1.msra.mxu1 %v3026_v44  ;;  %v2996_v48 = vld [vmem:[#allocation10 + $0x40] sm:$0xff]  ;;  %v2998_v44 = vld [vmem:[#allocation10 + $0x50] sm:$0xff] }
 0x5a0   : > { %3130 = vmatprep.subr.mxu0 %v3021_v49  ;;  %3201 = vmatprep.subr.mxu1 %v3023_v3  ;;  %v2993_v49 = vld [vmem:[#allocation10 + $0x28] sm:$0xff]  ;;  %v2995_v3 = vld [vmem:[#allocation10 + $0x38] sm:$0xff] }
 0x5a1   : > { %3131 = vmatpush1.msra.mxu0 %v3020_v35  ;;  %3202 = vmatpush1.msra.mxu1 %v3022_v6  ;;  %v2992_v35 = vld [vmem:[#allocation10 + $0x20] sm:$0xff]  ;;  %v2994_v6 = vld [vmem:[#allocation10 + $0x30] sm:$0xff] }
 0x5a2   : > { %3132 = vmatprep.subr.mxu0 %v3017_v20  ;;  %3203 = vmatprep.subr.mxu1 %v3019_v58  ;;  %v2989_v20 = vld [vmem:[#allocation10 + $0x8] sm:$0xff]  ;;  %v2991_v58 = vld [vmem:[#allocation10 + $0x18] sm:$0xff] }
 0x5a3   : > { %3133 = vmatpush1.msra.mxu0 %v3016_v62  ;;  %3204 = vmatpush1.msra.mxu1 %v3018_v10  ;;  %v2988_v62 = vld [vmem:[#allocation10] sm:$0xff]  ;;  %v2990_v10 = vld [vmem:[#allocation10 + $0x10] sm:$0xff] }
 0x5a4   : > { %3134 = vmatprep.subr.mxu0 %v3013_v52  ;;  %3205 = vmatprep.subr.mxu1 %v3015_v63  ;;  %v3113_v52 = vld [vmem:[#allocation10 + $0x3e8] sm:$0xff]  ;;  %v3115_v63 = vld [vmem:[#allocation10 + $0x3f8] sm:$0xff] }
 0x5a5   : > { %3135 = vmatpush1.msra.mxu0 %v3012_v2  ;;  %3206 = vmatpush1.msra.mxu1 %v3014_v12  ;;  %v3112_v2 = vld [vmem:[#allocation10 + $0x3e0] sm:$0xff]  ;;  %v3114_v12 = vld [vmem:[#allocation10 + $0x3f0] sm:$0xff] }
 0x5a6   : > { %3136 = vmatprep.subr.mxu0 %v3009_v41  ;;  %3207 = vmatprep.subr.mxu1 %v3011_v15  ;;  %v3109_v41 = vld [vmem:[#allocation10 + $0x3c8] sm:$0xff]  ;;  %v3111_v15 = vld [vmem:[#allocation10 + $0x3d8] sm:$0xff] }
 0x5a7   : > { %3137 = vmatpush1.msra.mxu0 %v3008_v16  ;;  %3208 = vmatpush1.msra.mxu1 %v3010_v61  ;;  %v3108_v16 = vld [vmem:[#allocation10 + $0x3c0] sm:$0xff]  ;;  %v3110_v61 = vld [vmem:[#allocation10 + $0x3d0] sm:$0xff] }
 0x5a8   : > { %3138 = vmatprep.subr.mxu0 %v3005_v24  ;;  %3209 = vmatprep.subr.mxu1 %v3007_v39  ;;  %v3105_v24 = vld [vmem:[#allocation10 + $0x3a8] sm:$0xff]  ;;  %v3107_v39 = vld [vmem:[#allocation10 + $0x3b8] sm:$0xff] }
 0x5a9   : > { %3139 = vmatpush1.msra.mxu0 %v3004_v29  ;;  %3210 = vmatpush1.msra.mxu1 %v3006_v1  ;;  %v3104_v29 = vld [vmem:[#allocation10 + $0x3a0] sm:$0xff]  ;;  %v3106_v1 = vld [vmem:[#allocation10 + $0x3b0] sm:$0xff] }
 0x5aa   : > { %3140 = vmatprep.subr.mxu0 %v3001_v56  ;;  %3211 = vmatprep.subr.mxu1 %v3003_v27  ;;  %v3101_v56 = vld [vmem:[#allocation10 + $0x388] sm:$0xff]  ;;  %v3103_v27 = vld [vmem:[#allocation10 + $0x398] sm:$0xff] }
 0x5ab   : > { %3141 = vmatpush1.msra.mxu0 %v3000_v23  ;;  %3212 = vmatpush1.msra.mxu1 %v3002_v30  ;;  %v3100_v23 = vld [vmem:[#allocation10 + $0x380] sm:$0xff]  ;;  %v3102_v30 = vld [vmem:[#allocation10 + $0x390] sm:$0xff] }
 0x5ac   : > { %3142 = vmatprep.subr.mxu0 %v2997_v32  ;;  %3213 = vmatprep.subr.mxu1 %v2999_v37  ;;  %v3097_v32 = vld [vmem:[#allocation10 + $0x368] sm:$0xff]  ;;  %v3099_v37 = vld [vmem:[#allocation10 + $0x378] sm:$0xff] }
 0x5ad   : > { %3143 = vmatpush1.msra.mxu0 %v2996_v48  ;;  %3214 = vmatpush1.msra.mxu1 %v2998_v44  ;;  %v3096_v48 = vld [vmem:[#allocation10 + $0x360] sm:$0xff]  ;;  %v3098_v44 = vld [vmem:[#allocation10 + $0x370] sm:$0xff] }
 0x5ae   : > { %3144 = vmatprep.subr.mxu0 %v2993_v49  ;;  %3215 = vmatprep.subr.mxu1 %v2995_v3  ;;  %v3093_v49 = vld [vmem:[#allocation10 + $0x348] sm:$0xff]  ;;  %v3095_v3 = vld [vmem:[#allocation10 + $0x358] sm:$0xff] }
 0x5af   : > { %3145 = vmatpush1.msra.mxu0 %v2992_v35  ;;  %3216 = vmatpush1.msra.mxu1 %v2994_v6  ;;  %v3092_v35 = vld [vmem:[#allocation10 + $0x340] sm:$0xff]  ;;  %v3094_v6 = vld [vmem:[#allocation10 + $0x350] sm:$0xff] }
 0x5b0   : > { %3146 = vmatprep.subr.mxu0 %v2989_v20  ;;  %3217 = vmatprep.subr.mxu1 %v2991_v58  ;;  %v3089_v20 = vld [vmem:[#allocation10 + $0x328] sm:$0xff]  ;;  %v3091_v58 = vld [vmem:[#allocation10 + $0x338] sm:$0xff] }
 0x5b1   : > { %3147 = vmatpush1.msra.mxu0 %v2988_v62  ;;  %3218 = vmatpush1.msra.mxu1 %v2990_v10  ;;  %v3088_v62 = vld [vmem:[#allocation10 + $0x320] sm:$0xff]  ;;  %v3090_v10 = vld [vmem:[#allocation10 + $0x330] sm:$0xff] }
 0x5b2   : > { %3148 = vmatprep.subr.mxu0 %v3113_v52  ;;  %3219 = vmatprep.subr.mxu1 %v3115_v63  ;;  %v3085_v52 = vld [vmem:[#allocation10 + $0x308] sm:$0xff]  ;;  %v3087_v63 = vld [vmem:[#allocation10 + $0x318] sm:$0xff] }
 0x5b3   : > { %3149 = vmatpush2.msra.mxu0 %v3112_v2  ;;  %3220 = vmatpush2.msra.mxu1 %v3114_v12  ;;  %v3084_v2 = vld [vmem:[#allocation10 + $0x300] sm:$0xff]  ;;  %v3086_v12 = vld [vmem:[#allocation10 + $0x310] sm:$0xff] }
 0x5b4   : > { %3150 = vmatprep.subr.mxu0 %v3109_v41  ;;  %3221 = vmatprep.subr.mxu1 %v3111_v15  ;;  %v3081_v41 = vld [vmem:[#allocation10 + $0x2e8] sm:$0xff]  ;;  %v3083_v15 = vld [vmem:[#allocation10 + $0x2f8] sm:$0xff] }
 0x5b5   : > { %3151 = vmatpush2.msra.mxu0 %v3108_v16  ;;  %3222 = vmatpush2.msra.mxu1 %v3110_v61  ;;  %v3080_v16 = vld [vmem:[#allocation10 + $0x2e0] sm:$0xff]  ;;  %v3082_v61 = vld [vmem:[#allocation10 + $0x2f0] sm:$0xff] }
 0x5b6   : > { %3152 = vmatprep.subr.mxu0 %v3105_v24  ;;  %3223 = vmatprep.subr.mxu1 %v3107_v39  ;;  %v3077_v24 = vld [vmem:[#allocation10 + $0x2c8] sm:$0xff]  ;;  %v3079_v39 = vld [vmem:[#allocation10 + $0x2d8] sm:$0xff] }
 0x5b7   : > { %3153 = vmatpush2.msra.mxu0 %v3104_v29  ;;  %3224 = vmatpush2.msra.mxu1 %v3106_v1  ;;  %v3076_v29 = vld [vmem:[#allocation10 + $0x2c0] sm:$0xff]  ;;  %v3078_v1 = vld [vmem:[#allocation10 + $0x2d0] sm:$0xff] }
 0x5b8   : > { %3154 = vmatprep.subr.mxu0 %v3101_v56  ;;  %3225 = vmatprep.subr.mxu1 %v3103_v27  ;;  %v3073_v56 = vld [vmem:[#allocation10 + $0x2a8] sm:$0xff]  ;;  %v3075_v27 = vld [vmem:[#allocation10 + $0x2b8] sm:$0xff] }
 0x5b9   : > { %3155 = vmatpush2.msra.mxu0 %v3100_v23  ;;  %3226 = vmatpush2.msra.mxu1 %v3102_v30  ;;  %v3072_v23 = vld [vmem:[#allocation10 + $0x2a0] sm:$0xff]  ;;  %v3074_v30 = vld [vmem:[#allocation10 + $0x2b0] sm:$0xff] }
 0x5ba   : > { %3156 = vmatprep.subr.mxu0 %v3097_v32  ;;  %3227 = vmatprep.subr.mxu1 %v3099_v37  ;;  %v3069_v32 = vld [vmem:[#allocation10 + $0x288] sm:$0xff]  ;;  %v3071_v37 = vld [vmem:[#allocation10 + $0x298] sm:$0xff] }
 0x5bb   : > { %3157 = vmatpush2.msra.mxu0 %v3096_v48  ;;  %3228 = vmatpush2.msra.mxu1 %v3098_v44  ;;  %v3068_v48 = vld [vmem:[#allocation10 + $0x280] sm:$0xff]  ;;  %v3070_v44 = vld [vmem:[#allocation10 + $0x290] sm:$0xff] }
 0x5bc   : > { %3158 = vmatprep.subr.mxu0 %v3093_v49  ;;  %3229 = vmatprep.subr.mxu1 %v3095_v3  ;;  %v3065_v49 = vld [vmem:[#allocation10 + $0x268] sm:$0xff]  ;;  %v3067_v3 = vld [vmem:[#allocation10 + $0x278] sm:$0xff] }
 0x5bd   : > { %3159 = vmatpush2.msra.mxu0 %v3092_v35  ;;  %3230 = vmatpush2.msra.mxu1 %v3094_v6  ;;  %v3064_v35 = vld [vmem:[#allocation10 + $0x260] sm:$0xff]  ;;  %v3066_v6 = vld [vmem:[#allocation10 + $0x270] sm:$0xff] }
 0x5be   : > { %3160 = vmatprep.subr.mxu0 %v3089_v20  ;;  %3231 = vmatprep.subr.mxu1 %v3091_v58  ;;  %v3061_v20 = vld [vmem:[#allocation10 + $0x248] sm:$0xff]  ;;  %v3063_v58 = vld [vmem:[#allocation10 + $0x258] sm:$0xff] }
 0x5bf   : > { %3161 = vmatpush2.msra.mxu0 %v3088_v62  ;;  %3232 = vmatpush2.msra.mxu1 %v3090_v10  ;;  %v3060_v62 = vld [vmem:[#allocation10 + $0x240] sm:$0xff]  ;;  %v3062_v10 = vld [vmem:[#allocation10 + $0x250] sm:$0xff] }
 0x5c0   : > { %3162 = vmatprep.subr.mxu0 %v3085_v52  ;;  %3233 = vmatprep.subr.mxu1 %v3087_v63  ;;  %v3057_v52 = vld [vmem:[#allocation10 + $0x228] sm:$0xff]  ;;  %v3059_v63 = vld [vmem:[#allocation10 + $0x238] sm:$0xff] }
 0x5c1   : > { %3163 = vmatpush2.msra.mxu0 %v3084_v2  ;;  %3234 = vmatpush2.msra.mxu1 %v3086_v12  ;;  %v3056_v2 = vld [vmem:[#allocation10 + $0x220] sm:$0xff]  ;;  %v3058_v12 = vld [vmem:[#allocation10 + $0x230] sm:$0xff] }
 0x5c2   : > { %3164 = vmatprep.subr.mxu0 %v3081_v41  ;;  %3235 = vmatprep.subr.mxu1 %v3083_v15  ;;  %v3053_v41 = vld [vmem:[#allocation10 + $0x208] sm:$0xff]  ;;  %v3055_v15 = vld [vmem:[#allocation10 + $0x218] sm:$0xff] }
 0x5c3   : > { %3165 = vmatpush2.msra.mxu0 %v3080_v16  ;;  %3236 = vmatpush2.msra.mxu1 %v3082_v61  ;;  %v3052_v16 = vld [vmem:[#allocation10 + $0x200] sm:$0xff]  ;;  %v3054_v61 = vld [vmem:[#allocation10 + $0x210] sm:$0xff] }
 0x5c4   : > { %3166 = vmatprep.subr.mxu0 %v3077_v24  ;;  %3237 = vmatprep.subr.mxu1 %v3079_v39  ;;  %v3352_v24 = vld [vmem:[#allocation6 + $0x1e8] sm:$0xff]  ;;  %v3354_v39 = vld [vmem:[#allocation6 + $0x1f8] sm:$0xff] }
 0x5c5   : > { %3167 = vmatpush2.msra.mxu0 %v3076_v29  ;;  %3238 = vmatpush2.msra.mxu1 %v3078_v1 }
 0x5c6   : > { %3168 = vmatprep.subr.mxu0 %v3073_v56  ;;  %3239 = vmatprep.subr.mxu1 %v3075_v27 }
 0x5c7   : > { %3169 = vmatpush2.msra.mxu0 %v3072_v23  ;;  %3240 = vmatpush2.msra.mxu1 %v3074_v30 }
 0x5c8   : > { %3170 = vmatprep.subr.mxu0 %v3069_v32  ;;  %3241 = vmatprep.subr.mxu1 %v3071_v37 }
 0x5c9   : > { %3171 = vmatpush2.msra.mxu0 %v3068_v48  ;;  %3242 = vmatpush2.msra.mxu1 %v3070_v44 }
 0x5ca   : > { %3172 = vmatprep.subr.mxu0 %v3065_v49  ;;  %3243 = vmatprep.subr.mxu1 %v3067_v3 }
 0x5cb   : > { %3173 = vmatpush2.msra.mxu0 %v3064_v35  ;;  %3244 = vmatpush2.msra.mxu1 %v3066_v6 }
 0x5cc   : > { %3174 = vmatprep.subr.mxu0 %v3061_v20  ;;  %3245 = vmatprep.subr.mxu1 %v3063_v58 }
 0x5cd   : > { %3175 = vmatpush2.msra.mxu0 %v3060_v62  ;;  %3246 = vmatpush2.msra.mxu1 %v3062_v10 }
 0x5ce   : > { %3176 = vmatprep.subr.mxu0 %v3057_v52  ;;  %3247 = vmatprep.subr.mxu1 %v3059_v63 }
 0x5cf   : > { %3177 = vmatpush2.msra.mxu0 %v3056_v2  ;;  %3248 = vmatpush2.msra.mxu1 %v3058_v12 }
 0x5d0   : > { %3178 = vmatprep.subr.mxu0 %v3053_v41  ;;  %3249 = vmatprep.subr.mxu1 %v3055_v15 }
 0x5d1   : > { %3179 = vmatpush2.msra.mxu0 %v3052_v16  ;;  %3250 = vmatpush2.msra.mxu1 %v3054_v61 }
 0x5d2   : > { %3355 = vmatprep.subr.mxu0 %v3352_v24  ;;  %3426 = vmatprep.subr.mxu1 %v3354_v39  ;;  %v3351_v24 = vld [vmem:[#allocation6 + $0x1e0] sm:$0xff]  ;;  %v3353_v39 = vld [vmem:[#allocation6 + $0x1f0] sm:$0xff] }
 0x651   : > { %v2888_v29 = vpop.f32.mrf.mxu0  ;;  %v2959_v30 = vpop.f32.mrf.mxu1 }
 0x652   : > { %v2889_v1 = vadd.f32 %v2888_v29, %v8730_v7  ;;  %v2960_v3 = vadd.f32 %v2959_v30, %v8744_v31  ;;  %v3348_v29 = vld [vmem:[#allocation6 + $0x1c8] sm:$0xff]  ;;  %v3343_v30 = vld [vmem:[#allocation6 + $0x1a0] sm:$0xff] }
 0x653   : > { %v2890_v56 = vpop.f32.mrf.mxu0  ;;  %v2961_v37 = vpop.f32.mrf.mxu1 }
 0x654   : > { %v7736_v27 = vmul.f32 -1.442695, %v2889_v1  ;;  %v2891_v23 = vadd.f32 %v2890_v56, %v8735_v11  ;;  %v2962_v48 = vadd.f32 %v2961_v37, %v8740_v21  ;;  %v3350_v1 = vld [vmem:[#allocation6 + $0x1d8] sm:$0xff]  ;;  %v3347_v56 = vld [vmem:[#allocation6 + $0x1c0] sm:$0xff]  ;;  %v3340_v37 = vld [vmem:[#allocation6 + $0x188] sm:$0xff] }
 0x656   : > { %8013 = vpow2.f32 %v7736_v27  ;;  %v7737_v32 = vmul.f32 -1.442695, %v2891_v23  ;;  %v7738_v44 = vmul.f32 -1.442695, %v2962_v48  ;;  %v3349_v27 = vld [vmem:[#allocation6 + $0x1d0] sm:$0xff]  ;;  %v3346_v23 = vld [vmem:[#allocation6 + $0x1b8] sm:$0xff] }
 0x657   : > { %v3342_v48 = vld [vmem:[#allocation6 + $0x198] sm:$0xff] }
 0x658   : > { %8015 = vpow2.f32 %v7737_v32  ;;  %v3345_v32 = vld [vmem:[#allocation6 + $0x1b0] sm:$0xff] }
 0x659   : > { %8017 = vpow2.f32 %v7738_v44  ;;  %v3339_v44 = vld [vmem:[#allocation6 + $0x180] sm:$0xff] }
 0x663   : > { %v8014_v49 = vpop.eup %8013 }
 0x664   : > { %v2967_v35 = vadd.f32 1.0, %v8014_v49  ;;  %v3341_v49 = vld [vmem:[#allocation6 + $0x190] sm:$0xff] }
 0x665   : > { %v8016_v6 = vpop.eup %8015 }
 0x666   : > { %8019 = vrcp.f32 %v2967_v35  ;;  %v2973_v20 = vadd.f32 1.0, %v8016_v6  ;;  %v8018_v58 = vpop.eup %8017  ;;  %v3338_v35 = vld [vmem:[#allocation6 + $0x178] sm:$0xff]  ;;  %v3335_v6 = vld [vmem:[#allocation6 + $0x160] sm:$0xff] }
 0x667   : > { %8021 = vtanh.f32 %v2960_v3  ;;  %v2980_v63 = vadd.f32 1.0, %v8018_v58  ;;  %v3336_v3 = vld [vmem:[#allocation6 + $0x168] sm:$0xff] }
 0x668   : > { %8023 = vrcp.f32 %v2973_v20  ;;  %v3337_v20 = vld [vmem:[#allocation6 + $0x170] sm:$0xff]  ;;  %v3332_v58 = vld [vmem:[#allocation6 + $0x148] sm:$0xff] }
 0x669   : > { %8025 = vrcp.f32 %v2980_v63  ;;  %v3328_v63 = vld [vmem:[#allocation6 + $0x128] sm:$0xff] }
 0x673   : > { %v8020_v62 = vpop.eup %8019 }
 0x674   : > { %v8022_v10 = vpop.eup %8021 }
 0x675   : > { %v8024_v52 = vpop.eup %8023  ;;  %v2984_v2 = vmul.f32 %v8022_v10, %v8020_v62  ;;  %v3334_v62 = vld [vmem:[#allocation6 + $0x158] sm:$0xff]  ;;  %v3331_v10 = vld [vmem:[#allocation6 + $0x140] sm:$0xff] }
 0x676   : > { %v2983_v12 = vmul.f32 %v8024_v52, %v8803_v36  ;;  %v8026_v15 = vpop.eup %8025  ;;  %v3344_v36 = vld [vmem:[#allocation6 + $0x1a8] sm:$0xff]  ;;  %v3333_v52 = vld [vmem:[#allocation6 + $0x150] sm:$0xff] }
 0x678   : > { %v8845_v41 = vadd.f32 %v2984_v2, %v2983_v12  ;;  %v3330_v2 = vld [vmem:[#allocation6 + $0x138] sm:$0xff]  ;;  %v3327_v12 = vld [vmem:[#allocation6 + $0x120] sm:$0xff] }
 0x67a   : > { %8027 = vtanh.f32 %v8845_v41 }
 0x687   : > { %v8028_v16 = vpop.eup %8027 }
 0x688   : > { %v8848_v61 = vmul.f32 %v8028_v16, %v8026_v15  ;;  %v3329_v15 = vld [vmem:[#allocation6 + $0x130] sm:$0xff]  ;;  %v3324_v16 = vld [vmem:[#allocation6 + $0x108] sm:$0xff] }
 0x68a   : > { %3181 = vmatmul.mubr.f32.vlgmr.msra.gmra.mxu0 %v8848_v61  ;;  %3252 = vmatmul.mubr.f32.vlgmr.msra.gmra.mxu1 %v8848_v61 }
 0x68b   : > { %3356 = vmatpush1.msra.mxu0 %v3351_v24  ;;  %3427 = vmatpush1.msra.mxu1 %v3353_v39  ;;  %v3326_v24 = vld [vmem:[#allocation6 + $0x118] sm:$0xff]  ;;  %v3323_v39 = vld [vmem:[#allocation6 + $0x100] sm:$0xff] }
 0x68c   : > { %3357 = vmatprep.subr.mxu0 %v3348_v29  ;;  %3428 = vmatprep.subr.mxu1 %v3350_v1  ;;  %v3325_v29 = vld [vmem:[#allocation6 + $0x110] sm:$0xff]  ;;  %v3320_v1 = vld [vmem:[#allocation6 + $0xe8] sm:$0xff] }
 0x68d   : > { %3358 = vmatpush1.msra.mxu0 %v3347_v56  ;;  %3429 = vmatpush1.msra.mxu1 %v3349_v27  ;;  %v3322_v56 = vld [vmem:[#allocation6 + $0xf8] sm:$0xff]  ;;  %v3319_v27 = vld [vmem:[#allocation6 + $0xe0] sm:$0xff] }
 0x68e   : > { %3359 = vmatprep.subr.mxu0 %v3344_v36  ;;  %3430 = vmatprep.subr.mxu1 %v3346_v23  ;;  %v3321_v36 = vld [vmem:[#allocation6 + $0xf0] sm:$0xff]  ;;  %v3316_v23 = vld [vmem:[#allocation6 + $0xc8] sm:$0xff] }
 0x68f   : > { %3360 = vmatpush1.msra.mxu0 %v3343_v30  ;;  %3431 = vmatpush1.msra.mxu1 %v3345_v32  ;;  %v3318_v30 = vld [vmem:[#allocation6 + $0xd8] sm:$0xff]  ;;  %v3315_v32 = vld [vmem:[#allocation6 + $0xc0] sm:$0xff] }
 0x690   : > { %3361 = vmatprep.subr.mxu0 %v3340_v37  ;;  %3432 = vmatprep.subr.mxu1 %v3342_v48  ;;  %v3317_v37 = vld [vmem:[#allocation6 + $0xd0] sm:$0xff]  ;;  %v3312_v48 = vld [vmem:[#allocation6 + $0xa8] sm:$0xff] }
 0x691   : > { %3362 = vmatpush1.msra.mxu0 %v3339_v44  ;;  %3433 = vmatpush1.msra.mxu1 %v3341_v49  ;;  %v3314_v44 = vld [vmem:[#allocation6 + $0xb8] sm:$0xff]  ;;  %v3311_v49 = vld [vmem:[#allocation6 + $0xa0] sm:$0xff] }
 0x692   : > { %3363 = vmatprep.subr.mxu0 %v3336_v3  ;;  %3434 = vmatprep.subr.mxu1 %v3338_v35  ;;  %v3313_v3 = vld [vmem:[#allocation6 + $0xb0] sm:$0xff]  ;;  %v3308_v35 = vld [vmem:[#allocation6 + $0x88] sm:$0xff] }
 0x693   : > { %3364 = vmatpush1.msra.mxu0 %v3335_v6  ;;  %3435 = vmatpush1.msra.mxu1 %v3337_v20  ;;  %v3310_v6 = vld [vmem:[#allocation6 + $0x98] sm:$0xff]  ;;  %v3307_v20 = vld [vmem:[#allocation6 + $0x80] sm:$0xff] }
 0x694   : > { %3365 = vmatprep.subr.mxu0 %v3332_v58  ;;  %3436 = vmatprep.subr.mxu1 %v3334_v62  ;;  %v3309_v58 = vld [vmem:[#allocation6 + $0x90] sm:$0xff]  ;;  %v3304_v62 = vld [vmem:[#allocation6 + $0x68] sm:$0xff] }
 0x695   : > { %3366 = vmatpush1.msra.mxu0 %v3331_v10  ;;  %3437 = vmatpush1.msra.mxu1 %v3333_v52  ;;  %v3306_v10 = vld [vmem:[#allocation6 + $0x78] sm:$0xff]  ;;  %v3303_v52 = vld [vmem:[#allocation6 + $0x60] sm:$0xff] }
 0x696   : > { %3367 = vmatprep.subr.mxu0 %v3328_v63  ;;  %3438 = vmatprep.subr.mxu1 %v3330_v2  ;;  %v3305_v63 = vld [vmem:[#allocation6 + $0x70] sm:$0xff]  ;;  %v3300_v2 = vld [vmem:[#allocation6 + $0x48] sm:$0xff] }
 0x697   : > { %3368 = vmatpush1.msra.mxu0 %v3327_v12  ;;  %3439 = vmatpush1.msra.mxu1 %v3329_v15  ;;  %v3302_v12 = vld [vmem:[#allocation6 + $0x58] sm:$0xff]  ;;  %v3299_v15 = vld [vmem:[#allocation6 + $0x40] sm:$0xff] }
 0x698   : > { %3369 = vmatprep.subr.mxu0 %v3324_v16  ;;  %3440 = vmatprep.subr.mxu1 %v3326_v24  ;;  %v3301_v16 = vld [vmem:[#allocation6 + $0x50] sm:$0xff]  ;;  %v3296_v24 = vld [vmem:[#allocation6 + $0x28] sm:$0xff] }
 0x699   : > { %3370 = vmatpush1.msra.mxu0 %v3323_v39  ;;  %3441 = vmatpush1.msra.mxu1 %v3325_v29  ;;  %v3298_v39 = vld [vmem:[#allocation6 + $0x38] sm:$0xff]  ;;  %v3295_v29 = vld [vmem:[#allocation6 + $0x20] sm:$0xff] }
 0x69a   : > { %3371 = vmatprep.subr.mxu0 %v3320_v1  ;;  %3442 = vmatprep.subr.mxu1 %v3322_v56  ;;  %v3297_v1 = vld [vmem:[#allocation6 + $0x30] sm:$0xff]  ;;  %v3292_v56 = vld [vmem:[#allocation6 + $0x8] sm:$0xff] }
 0x69b   : > { %3372 = vmatpush1.msra.mxu0 %v3319_v27  ;;  %3443 = vmatpush1.msra.mxu1 %v3321_v36  ;;  %v3294_v27 = vld [vmem:[#allocation6 + $0x18] sm:$0xff]  ;;  %v3291_v36 = vld [vmem:[#allocation6] sm:$0xff] }
 0x69c   : > { %3373 = vmatprep.subr.mxu0 %v3316_v23  ;;  %3444 = vmatprep.subr.mxu1 %v3318_v30  ;;  %v3293_v23 = vld [vmem:[#allocation6 + $0x10] sm:$0xff]  ;;  %v3586_v30 = vld [vmem:[#allocation8 + $0x1e8] sm:$0xff] }
 0x69d   : > { %3374 = vmatpush1.msra.mxu0 %v3315_v32  ;;  %3445 = vmatpush1.msra.mxu1 %v3317_v37  ;;  %v3588_v32 = vld [vmem:[#allocation8 + $0x1f8] sm:$0xff]  ;;  %v3585_v37 = vld [vmem:[#allocation8 + $0x1e0] sm:$0xff] }
 0x69e   : > { %3375 = vmatprep.subr.mxu0 %v3312_v48  ;;  %3446 = vmatprep.subr.mxu1 %v3314_v44  ;;  %v3587_v48 = vld [vmem:[#allocation8 + $0x1f0] sm:$0xff]  ;;  %v3582_v44 = vld [vmem:[#allocation8 + $0x1c8] sm:$0xff] }
 0x69f   : > { %3376 = vmatpush1.msra.mxu0 %v3311_v49  ;;  %3447 = vmatpush1.msra.mxu1 %v3313_v3  ;;  %v3584_v49 = vld [vmem:[#allocation8 + $0x1d8] sm:$0xff]  ;;  %v3581_v3 = vld [vmem:[#allocation8 + $0x1c0] sm:$0xff] }
 0x6a0   : > { %3377 = vmatprep.subr.mxu0 %v3308_v35  ;;  %3448 = vmatprep.subr.mxu1 %v3310_v6  ;;  %v3583_v35 = vld [vmem:[#allocation8 + $0x1d0] sm:$0xff]  ;;  %v3580_v6 = vld [vmem:[#allocation8 + $0x1b8] sm:$0xff] }
 0x6a1   : > { %3378 = vmatpush1.msra.mxu0 %v3307_v20  ;;  %3449 = vmatpush1.msra.mxu1 %v3309_v58  ;;  %v3579_v20 = vld [vmem:[#allocation8 + $0x1b0] sm:$0xff]  ;;  %v3574_v58 = vld [vmem:[#allocation8 + $0x188] sm:$0xff] }
 0x6a2   : > { %3379 = vmatprep.subr.mxu0 %v3304_v62  ;;  %3450 = vmatprep.subr.mxu1 %v3306_v10  ;;  %v3576_v62 = vld [vmem:[#allocation8 + $0x198] sm:$0xff]  ;;  %v3573_v10 = vld [vmem:[#allocation8 + $0x180] sm:$0xff] }
 0x6a3   : > { %3380 = vmatpush1.msra.mxu0 %v3303_v52  ;;  %3451 = vmatpush1.msra.mxu1 %v3305_v63  ;;  %v3575_v52 = vld [vmem:[#allocation8 + $0x190] sm:$0xff]  ;;  %v3570_v63 = vld [vmem:[#allocation8 + $0x168] sm:$0xff] }
 0x6a4   : > { %3381 = vmatprep.subr.mxu0 %v3300_v2  ;;  %3452 = vmatprep.subr.mxu1 %v3302_v12  ;;  %v3572_v2 = vld [vmem:[#allocation8 + $0x178] sm:$0xff]  ;;  %v3569_v12 = vld [vmem:[#allocation8 + $0x160] sm:$0xff] }
 0x6a5   : > { %3382 = vmatpush1.msra.mxu0 %v3299_v15  ;;  %3453 = vmatpush1.msra.mxu1 %v3301_v16  ;;  %v3571_v15 = vld [vmem:[#allocation8 + $0x170] sm:$0xff]  ;;  %v3566_v16 = vld [vmem:[#allocation8 + $0x148] sm:$0xff] }
 0x6a6   : > { %3383 = vmatprep.subr.mxu0 %v3296_v24  ;;  %3454 = vmatprep.subr.mxu1 %v3298_v39  ;;  %v3568_v24 = vld [vmem:[#allocation8 + $0x158] sm:$0xff]  ;;  %v3565_v39 = vld [vmem:[#allocation8 + $0x140] sm:$0xff] }
 0x6a7   : > { %3384 = vmatpush1.msra.mxu0 %v3295_v29  ;;  %3455 = vmatpush1.msra.mxu1 %v3297_v1  ;;  %v3567_v29 = vld [vmem:[#allocation8 + $0x150] sm:$0xff]  ;;  %v3562_v1 = vld [vmem:[#allocation8 + $0x128] sm:$0xff] }
 0x6a8   : > { %3385 = vmatprep.subr.mxu0 %v3292_v56  ;;  %3456 = vmatprep.subr.mxu1 %v3294_v27  ;;  %v3564_v56 = vld [vmem:[#allocation8 + $0x138] sm:$0xff]  ;;  %v3561_v27 = vld [vmem:[#allocation8 + $0x120] sm:$0xff] }
 0x6a9   : > { %3386 = vmatpush1.msra.mxu0 %v3291_v36  ;;  %3419 = vmatprep.mubr.f32.mxu0 %v8385_v5  ;;  %v3563_v36 = vld [vmem:[#allocation8 + $0x130] sm:$0xff] }
 0x6aa   : > { %3457 = vmatpush1.msra.mxu1 %v3293_v23  ;;  %3490 = vmatprep.mubr.f32.mxu1 %v8385_v5  ;;  %v3558_v23 = vld [vmem:[#allocation8 + $0x108] sm:$0xff] }
 0x6ab   : > { %3420 = vmatmul.mubr.f32.vlgmr.msra.gmra.mxu0 %v8832_v53  ;;  %3491 = vmatmul.mubr.f32.vlgmr.msra.gmra.mxu1 %v8832_v53  ;;  %v3578_v53 = vld [vmem:[#allocation8 + $0x1a8] sm:$0xff] }
 0x6ac   : > { %3717 = vmatprep.mubr.f32.mxu0 %v8848_v61  ;;  %3788 = vmatprep.mubr.f32.mxu1 %v8848_v61  ;;  %v3577_v61 = vld [vmem:[#allocation8 + $0x1a0] sm:$0xff] }
 0x6ad   : > { %3653 = vmatprep.subr.mxu0 %v3586_v30  ;;  %3724 = vmatprep.subr.mxu1 %v3588_v32  ;;  %v3560_v30 = vld [vmem:[#allocation8 + $0x118] sm:$0xff]  ;;  %v3557_v32 = vld [vmem:[#allocation8 + $0x100] sm:$0xff] }
 0x6ae   : > { %3654 = vmatpush1.msra.mxu0 %v3585_v37  ;;  %3725 = vmatpush1.msra.mxu1 %v3587_v48  ;;  %v3559_v37 = vld [vmem:[#allocation8 + $0x110] sm:$0xff]  ;;  %v3554_v48 = vld [vmem:[#allocation8 + $0xe8] sm:$0xff] }
 0x6af   : > { %3655 = vmatprep.subr.mxu0 %v3582_v44  ;;  %3726 = vmatprep.subr.mxu1 %v3584_v49  ;;  %v3556_v44 = vld [vmem:[#allocation8 + $0xf8] sm:$0xff]  ;;  %v3553_v49 = vld [vmem:[#allocation8 + $0xe0] sm:$0xff] }
 0x6b0   : > { %3656 = vmatpush1.msra.mxu0 %v3581_v3  ;;  %3727 = vmatpush1.msra.mxu1 %v3583_v35  ;;  %v3555_v3 = vld [vmem:[#allocation8 + $0xf0] sm:$0xff]  ;;  %v3550_v35 = vld [vmem:[#allocation8 + $0xc8] sm:$0xff] }
 0x6b1   : > { %3657 = vmatprep.subr.mxu0 %v3578_v53  ;;  %3728 = vmatprep.subr.mxu1 %v3580_v6  ;;  %v3552_v53 = vld [vmem:[#allocation8 + $0xd8] sm:$0xff]  ;;  %v3549_v6 = vld [vmem:[#allocation8 + $0xc0] sm:$0xff] }
 0x6b2   : > { %3658 = vmatpush1.msra.mxu0 %v3577_v61  ;;  %3729 = vmatpush1.msra.mxu1 %v3579_v20  ;;  %v3551_v61 = vld [vmem:[#allocation8 + $0xd0] sm:$0xff]  ;;  %v3546_v20 = vld [vmem:[#allocation8 + $0xa8] sm:$0xff] }
 0x6b3   : > { %3659 = vmatprep.subr.mxu0 %v3574_v58  ;;  %3730 = vmatprep.subr.mxu1 %v3576_v62  ;;  %v3548_v58 = vld [vmem:[#allocation8 + $0xb8] sm:$0xff]  ;;  %v3545_v62 = vld [vmem:[#allocation8 + $0xa0] sm:$0xff] }
 0x6b4   : > { %3660 = vmatpush1.msra.mxu0 %v3573_v10  ;;  %3731 = vmatpush1.msra.mxu1 %v3575_v52  ;;  %v3547_v10 = vld [vmem:[#allocation8 + $0xb0] sm:$0xff]  ;;  %v3542_v52 = vld [vmem:[#allocation8 + $0x88] sm:$0xff] }
 0x6b5   : > { %3661 = vmatprep.subr.mxu0 %v3570_v63  ;;  %3732 = vmatprep.subr.mxu1 %v3572_v2  ;;  %v3544_v63 = vld [vmem:[#allocation8 + $0x98] sm:$0xff]  ;;  %v3541_v2 = vld [vmem:[#allocation8 + $0x80] sm:$0xff] }
 0x6b6   : > { %3662 = vmatpush1.msra.mxu0 %v3569_v12  ;;  %3733 = vmatpush1.msra.mxu1 %v3571_v15  ;;  %v3543_v12 = vld [vmem:[#allocation8 + $0x90] sm:$0xff]  ;;  %v3538_v15 = vld [vmem:[#allocation8 + $0x68] sm:$0xff] }
 0x6b7   : > { %3663 = vmatprep.subr.mxu0 %v3566_v16  ;;  %3734 = vmatprep.subr.mxu1 %v3568_v24  ;;  %v3540_v16 = vld [vmem:[#allocation8 + $0x78] sm:$0xff]  ;;  %v3537_v24 = vld [vmem:[#allocation8 + $0x60] sm:$0xff] }
 0x6b8   : > { %3664 = vmatpush1.msra.mxu0 %v3565_v39  ;;  %3735 = vmatpush1.msra.mxu1 %v3567_v29  ;;  %v3539_v39 = vld [vmem:[#allocation8 + $0x70] sm:$0xff]  ;;  %v3534_v29 = vld [vmem:[#allocation8 + $0x48] sm:$0xff] }
 0x6b9   : > { %3665 = vmatprep.subr.mxu0 %v3562_v1  ;;  %3736 = vmatprep.subr.mxu1 %v3564_v56  ;;  %v3536_v1 = vld [vmem:[#allocation8 + $0x58] sm:$0xff]  ;;  %v3533_v56 = vld [vmem:[#allocation8 + $0x40] sm:$0xff] }
 0x6ba   : > { %3666 = vmatpush1.msra.mxu0 %v3561_v27  ;;  %3737 = vmatpush1.msra.mxu1 %v3563_v36  ;;  %v3535_v27 = vld [vmem:[#allocation8 + $0x50] sm:$0xff]  ;;  %v3530_v36 = vld [vmem:[#allocation8 + $0x28] sm:$0xff] }
 0x6bb   : > { %3667 = vmatprep.subr.mxu0 %v3558_v23  ;;  %3738 = vmatprep.subr.mxu1 %v3560_v30  ;;  %v3532_v23 = vld [vmem:[#allocation8 + $0x38] sm:$0xff]  ;;  %v3529_v30 = vld [vmem:[#allocation8 + $0x20] sm:$0xff] }
 0x6bc   : > { %3668 = vmatpush1.msra.mxu0 %v3557_v32  ;;  %3739 = vmatpush1.msra.mxu1 %v3559_v37  ;;  %v3531_v32 = vld [vmem:[#allocation8 + $0x30] sm:$0xff]  ;;  %v3526_v37 = vld [vmem:[#allocation8 + $0x8] sm:$0xff] }
 0x6bd   : > { %3669 = vmatprep.subr.mxu0 %v3554_v48  ;;  %3740 = vmatprep.subr.mxu1 %v3556_v44  ;;  %v3528_v48 = vld [vmem:[#allocation8 + $0x18] sm:$0xff]  ;;  %v3525_v44 = vld [vmem:[#allocation8] sm:$0xff] }
 0x6be   : > { %3670 = vmatpush1.msra.mxu0 %v3553_v49  ;;  %3741 = vmatpush1.msra.mxu1 %v3555_v3  ;;  %v3527_v49 = vld [vmem:[#allocation8 + $0x10] sm:$0xff]  ;;  %v3650_v3 = vld [vmem:[#allocation8 + $0x3e8] sm:$0xff] }
 0x6bf   : > { %3671 = vmatprep.subr.mxu0 %v3550_v35  ;;  %3742 = vmatprep.subr.mxu1 %v3552_v53  ;;  %v3652_v35 = vld [vmem:[#allocation8 + $0x3f8] sm:$0xff]  ;;  %v3649_v53 = vld [vmem:[#allocation8 + $0x3e0] sm:$0xff] }
 0x6c0   : > { %3672 = vmatpush1.msra.mxu0 %v3549_v6  ;;  %3743 = vmatpush1.msra.mxu1 %v3551_v61  ;;  %v3651_v6 = vld [vmem:[#allocation8 + $0x3f0] sm:$0xff]  ;;  %v3646_v61 = vld [vmem:[#allocation8 + $0x3c8] sm:$0xff] }
 0x6c1   : > { %3673 = vmatprep.subr.mxu0 %v3546_v20  ;;  %3744 = vmatprep.subr.mxu1 %v3548_v58  ;;  %v3648_v20 = vld [vmem:[#allocation8 + $0x3d8] sm:$0xff]  ;;  %v3645_v58 = vld [vmem:[#allocation8 + $0x3c0] sm:$0xff] }
 0x6c2   : > { %3674 = vmatpush1.msra.mxu0 %v3545_v62  ;;  %3745 = vmatpush1.msra.mxu1 %v3547_v10  ;;  %v3647_v62 = vld [vmem:[#allocation8 + $0x3d0] sm:$0xff]  ;;  %v3642_v10 = vld [vmem:[#allocation8 + $0x3a8] sm:$0xff] }
 0x6c3   : > { %3675 = vmatprep.subr.mxu0 %v3542_v52  ;;  %3746 = vmatprep.subr.mxu1 %v3544_v63  ;;  %v3644_v52 = vld [vmem:[#allocation8 + $0x3b8] sm:$0xff]  ;;  %v3641_v63 = vld [vmem:[#allocation8 + $0x3a0] sm:$0xff] }
 0x6c4   : > { %3676 = vmatpush1.msra.mxu0 %v3541_v2  ;;  %3747 = vmatpush1.msra.mxu1 %v3543_v12  ;;  %v3643_v2 = vld [vmem:[#allocation8 + $0x3b0] sm:$0xff]  ;;  %v3638_v12 = vld [vmem:[#allocation8 + $0x388] sm:$0xff] }
 0x6c5   : > { %3677 = vmatprep.subr.mxu0 %v3538_v15  ;;  %3748 = vmatprep.subr.mxu1 %v3540_v16  ;;  %v3640_v15 = vld [vmem:[#allocation8 + $0x398] sm:$0xff]  ;;  %v3637_v16 = vld [vmem:[#allocation8 + $0x380] sm:$0xff] }
 0x6c6   : > { %3678 = vmatpush1.msra.mxu0 %v3537_v24  ;;  %3749 = vmatpush1.msra.mxu1 %v3539_v39  ;;  %v3639_v24 = vld [vmem:[#allocation8 + $0x390] sm:$0xff]  ;;  %v3634_v39 = vld [vmem:[#allocation8 + $0x368] sm:$0xff] }
 0x6c7   : > { %3679 = vmatprep.subr.mxu0 %v3534_v29  ;;  %3750 = vmatprep.subr.mxu1 %v3536_v1  ;;  %v3636_v29 = vld [vmem:[#allocation8 + $0x378] sm:$0xff]  ;;  %v3633_v1 = vld [vmem:[#allocation8 + $0x360] sm:$0xff] }
 0x6c8   : > { %3680 = vmatpush1.msra.mxu0 %v3533_v56  ;;  %3751 = vmatpush1.msra.mxu1 %v3535_v27  ;;  %v3635_v56 = vld [vmem:[#allocation8 + $0x370] sm:$0xff]  ;;  %v3630_v27 = vld [vmem:[#allocation8 + $0x348] sm:$0xff] }
 0x6c9   : > { %3681 = vmatprep.subr.mxu0 %v3530_v36  ;;  %3752 = vmatprep.subr.mxu1 %v3532_v23  ;;  %v3632_v36 = vld [vmem:[#allocation8 + $0x358] sm:$0xff]  ;;  %v3629_v23 = vld [vmem:[#allocation8 + $0x340] sm:$0xff] }
 0x6ca   : > { %3682 = vmatpush1.msra.mxu0 %v3529_v30  ;;  %3753 = vmatpush1.msra.mxu1 %v3531_v32  ;;  %v3631_v30 = vld [vmem:[#allocation8 + $0x350] sm:$0xff]  ;;  %v3626_v32 = vld [vmem:[#allocation8 + $0x328] sm:$0xff] }
 0x6cb   : > { %3683 = vmatprep.subr.mxu0 %v3526_v37  ;;  %3754 = vmatprep.subr.mxu1 %v3528_v48  ;;  %v3628_v37 = vld [vmem:[#allocation8 + $0x338] sm:$0xff]  ;;  %v3625_v48 = vld [vmem:[#allocation8 + $0x320] sm:$0xff] }
 0x6cc   : > { %3684 = vmatpush1.msra.mxu0 %v3525_v44  ;;  %3755 = vmatpush1.msra.mxu1 %v3527_v49  ;;  %v3627_v44 = vld [vmem:[#allocation8 + $0x330] sm:$0xff]  ;;  %v3622_v49 = vld [vmem:[#allocation8 + $0x308] sm:$0xff] }
 0x6cd   : > { %3685 = vmatprep.subr.mxu0 %v3650_v3  ;;  %3756 = vmatprep.subr.mxu1 %v3652_v35  ;;  %v3624_v3 = vld [vmem:[#allocation8 + $0x318] sm:$0xff]  ;;  %v3621_v35 = vld [vmem:[#allocation8 + $0x300] sm:$0xff] }
 0x6ce   : > { %3686 = vmatpush2.msra.mxu0 %v3649_v53  ;;  %3757 = vmatpush2.msra.mxu1 %v3651_v6  ;;  %v3623_v53 = vld [vmem:[#allocation8 + $0x310] sm:$0xff]  ;;  %v3618_v6 = vld [vmem:[#allocation8 + $0x2e8] sm:$0xff] }
 0x6cf   : > { %3687 = vmatprep.subr.mxu0 %v3646_v61  ;;  %3758 = vmatprep.subr.mxu1 %v3648_v20  ;;  %v3620_v61 = vld [vmem:[#allocation8 + $0x2f8] sm:$0xff]  ;;  %v3617_v20 = vld [vmem:[#allocation8 + $0x2e0] sm:$0xff] }
 0x6d0   : > { %3688 = vmatpush2.msra.mxu0 %v3645_v58  ;;  %3759 = vmatpush2.msra.mxu1 %v3647_v62  ;;  %v3619_v58 = vld [vmem:[#allocation8 + $0x2f0] sm:$0xff]  ;;  %v3614_v62 = vld [vmem:[#allocation8 + $0x2c8] sm:$0xff] }
 0x6d1   : > { %3689 = vmatprep.subr.mxu0 %v3642_v10  ;;  %3760 = vmatprep.subr.mxu1 %v3644_v52  ;;  %v3616_v10 = vld [vmem:[#allocation8 + $0x2d8] sm:$0xff]  ;;  %v3613_v52 = vld [vmem:[#allocation8 + $0x2c0] sm:$0xff] }
 0x6d2   : > { %3690 = vmatpush2.msra.mxu0 %v3641_v63  ;;  %3761 = vmatpush2.msra.mxu1 %v3643_v2  ;;  %v3615_v63 = vld [vmem:[#allocation8 + $0x2d0] sm:$0xff]  ;;  %v3610_v2 = vld [vmem:[#allocation8 + $0x2a8] sm:$0xff] }
 0x6d3   : > { %3691 = vmatprep.subr.mxu0 %v3638_v12  ;;  %3762 = vmatprep.subr.mxu1 %v3640_v15  ;;  %v3612_v12 = vld [vmem:[#allocation8 + $0x2b8] sm:$0xff]  ;;  %v3609_v15 = vld [vmem:[#allocation8 + $0x2a0] sm:$0xff] }
 0x6d4   : > { %3692 = vmatpush2.msra.mxu0 %v3637_v16  ;;  %3763 = vmatpush2.msra.mxu1 %v3639_v24  ;;  %v3611_v16 = vld [vmem:[#allocation8 + $0x2b0] sm:$0xff]  ;;  %v3606_v24 = vld [vmem:[#allocation8 + $0x288] sm:$0xff] }
 0x6d5   : > { %3693 = vmatprep.subr.mxu0 %v3634_v39  ;;  %3764 = vmatprep.subr.mxu1 %v3636_v29  ;;  %v3608_v39 = vld [vmem:[#allocation8 + $0x298] sm:$0xff]  ;;  %v3605_v29 = vld [vmem:[#allocation8 + $0x280] sm:$0xff] }
 0x6d6   : > { %3694 = vmatpush2.msra.mxu0 %v3633_v1  ;;  %3765 = vmatpush2.msra.mxu1 %v3635_v56  ;;  %v3607_v1 = vld [vmem:[#allocation8 + $0x290] sm:$0xff]  ;;  %v3602_v56 = vld [vmem:[#allocation8 + $0x268] sm:$0xff] }
 0x6d7   : > { %3695 = vmatprep.subr.mxu0 %v3630_v27  ;;  %3766 = vmatprep.subr.mxu1 %v3632_v36  ;;  %v3604_v27 = vld [vmem:[#allocation8 + $0x278] sm:$0xff]  ;;  %v3601_v36 = vld [vmem:[#allocation8 + $0x260] sm:$0xff] }
 0x6d8   : > { %3696 = vmatpush2.msra.mxu0 %v3629_v23  ;;  %3767 = vmatpush2.msra.mxu1 %v3631_v30  ;;  %v3603_v23 = vld [vmem:[#allocation8 + $0x270] sm:$0xff]  ;;  %v3598_v30 = vld [vmem:[#allocation8 + $0x248] sm:$0xff] }
 0x6d9   : > { %3697 = vmatprep.subr.mxu0 %v3626_v32  ;;  %3768 = vmatprep.subr.mxu1 %v3628_v37  ;;  %v3600_v32 = vld [vmem:[#allocation8 + $0x258] sm:$0xff]  ;;  %v3597_v37 = vld [vmem:[#allocation8 + $0x240] sm:$0xff] }
 0x6da   : > { %3698 = vmatpush2.msra.mxu0 %v3625_v48  ;;  %3769 = vmatpush2.msra.mxu1 %v3627_v44  ;;  %v3599_v48 = vld [vmem:[#allocation8 + $0x250] sm:$0xff]  ;;  %v3594_v44 = vld [vmem:[#allocation8 + $0x228] sm:$0xff] }
 0x6db   : > { %3699 = vmatprep.subr.mxu0 %v3622_v49  ;;  %3770 = vmatprep.subr.mxu1 %v3624_v3  ;;  %v3596_v49 = vld [vmem:[#allocation8 + $0x238] sm:$0xff]  ;;  %v3593_v3 = vld [vmem:[#allocation8 + $0x220] sm:$0xff] }
 0x6dc   : > { %3700 = vmatpush2.msra.mxu0 %v3621_v35  ;;  %3771 = vmatpush2.msra.mxu1 %v3623_v53  ;;  %v3595_v35 = vld [vmem:[#allocation8 + $0x230] sm:$0xff]  ;;  %v3590_v53 = vld [vmem:[#allocation8 + $0x208] sm:$0xff] }
 0x6dd   : > { %3701 = vmatprep.subr.mxu0 %v3618_v6  ;;  %3772 = vmatprep.subr.mxu1 %v3620_v61  ;;  %v3592_v6 = vld [vmem:[#allocation8 + $0x218] sm:$0xff]  ;;  %v3589_v61 = vld [vmem:[#allocation8 + $0x200] sm:$0xff] }
 0x6de   : > { %3702 = vmatpush2.msra.mxu0 %v3617_v20  ;;  %3773 = vmatpush2.msra.mxu1 %v3619_v58  ;;  %v3591_v20 = vld [vmem:[#allocation8 + $0x210] sm:$0xff]  ;;  %v3880_v58 = vld [vmem:[#allocation10 + $0x1e8] sm:$0xff] }
 0x6df   : > { %3703 = vmatprep.subr.mxu0 %v3614_v62  ;;  %3774 = vmatprep.subr.mxu1 %v3616_v10  ;;  %v3882_v62 = vld [vmem:[#allocation10 + $0x1f8] sm:$0xff] }
 0x6e0   : > { %3704 = vmatpush2.msra.mxu0 %v3613_v52  ;;  %3775 = vmatpush2.msra.mxu1 %v3615_v63 }
 0x6e1   : > { %3705 = vmatprep.subr.mxu0 %v3610_v2  ;;  %3776 = vmatprep.subr.mxu1 %v3612_v12 }
 0x6e2   : > { %3706 = vmatpush2.msra.mxu0 %v3609_v15  ;;  %3777 = vmatpush2.msra.mxu1 %v3611_v16 }
 0x6e3   : > { %3707 = vmatprep.subr.mxu0 %v3606_v24  ;;  %3778 = vmatprep.subr.mxu1 %v3608_v39 }
 0x6e4   : > { %3708 = vmatpush2.msra.mxu0 %v3605_v29  ;;  %3779 = vmatpush2.msra.mxu1 %v3607_v1 }
 0x6e5   : > { %3709 = vmatprep.subr.mxu0 %v3602_v56  ;;  %3780 = vmatprep.subr.mxu1 %v3604_v27 }
 0x6e6   : > { %3710 = vmatpush2.msra.mxu0 %v3601_v36  ;;  %3781 = vmatpush2.msra.mxu1 %v3603_v23 }
 0x6e7   : > { %3711 = vmatprep.subr.mxu0 %v3598_v30  ;;  %3782 = vmatprep.subr.mxu1 %v3600_v32 }
 0x6e8   : > { %3712 = vmatpush2.msra.mxu0 %v3597_v37  ;;  %3783 = vmatpush2.msra.mxu1 %v3599_v48 }
 0x6e9   : > { %3713 = vmatprep.subr.mxu0 %v3594_v44  ;;  %3784 = vmatprep.subr.mxu1 %v3596_v49 }
 0x6ea   : > { %3714 = vmatpush2.msra.mxu0 %v3593_v3  ;;  %3785 = vmatpush2.msra.mxu1 %v3595_v35 }
 0x6eb   : > { %3715 = vmatprep.subr.mxu0 %v3590_v53  ;;  %3786 = vmatprep.subr.mxu1 %v3592_v6 }
 0x6ec   : > { %3716 = vmatpush2.msra.mxu0 %v3589_v61  ;;  %3787 = vmatpush2.msra.mxu1 %v3591_v20 }
 0x6ed   : > { %3947 = vmatprep.subr.mxu0 %v3880_v58  ;;  %4018 = vmatprep.subr.mxu1 %v3882_v62 }
 0x74a   : > { %v3182_v10 = vpop.f32.mrf.mxu0  ;;  %v3253_v16 = vpop.f32.mrf.mxu1 }
 0x74b   : > { %v3183_v2 = vadd.f32 %v3182_v10, %v8767_v28  ;;  %v3254_v3 = vadd.f32 %v3253_v16, %v8774_v17 }
 0x74c   : > { %v3184_v52 = vpop.f32.mrf.mxu0  ;;  %v3255_v1 = vpop.f32.mrf.mxu1 }
 0x74d   : > { %v3185_v63 = vadd.f32 %v3184_v52, %v8764_v34  ;;  %v7739_v15 = vmul.f32 -1.442695, %v3183_v2 }
 0x74f   : > { %v7740_v12 = vmul.f32 -1.442695, %v3185_v63 }
 0x751   : > { %8029 = vpow2.f32 %v7740_v12 }
 0x752   : > { %8031 = vpow2.f32 %v7739_v15 }
 0x75e   : > { %v8030_v30 = vpop.eup %8029 }
 0x75f   : > { %v8032_v37 = vpop.eup %8031  ;;  %v3267_v48 = vadd.f32 1.0, %v8030_v30 }
 0x760   : > { %v3261_v49 = vadd.f32 1.0, %v8032_v37 }
 0x76b   : > { %v3421_v24 = vpop.f32.mrf.mxu0  ;;  %v3492_v36 = vpop.f32.mrf.mxu1 }
 0x76c   : > { %v3497_v39 = vadd.f32 %v3421_v24, %v8692_v14  ;;  %v3256_v14 = vadd.f32 %v3255_v1, %v8777_v19  ;;  %v3499_v35 = vadd.f32 %v3492_v36, %v8645_v43 }
 0x76d   : > { %v3423_v29 = vpop.f32.mrf.mxu0  ;;  %v3494_v32 = vpop.f32.mrf.mxu1 }
 0x76e   : > { %v7742_v56 = vmul.f32 -1.442695, %v3497_v39  ;;  %v3498_v27 = vadd.f32 %v3423_v29, %v8696_v18  ;;  %v3500_v44 = vadd.f32 %v3494_v32, %v8648_v45  ;;  %v7741_v6 = vmul.f32 -1.442695, %v3256_v14  ;;  %v3877_v14 = vld [vmem:[#allocation10 + $0x1d0] sm:$0xff] }
 0x770   : > { %8033 = vpow2.f32 %v7742_v56  ;;  %v7743_v23 = vmul.f32 -1.442695, %v3498_v27  ;;  %v7744_v53 = vmul.f32 -1.442695, %v3500_v44  ;;  %v3881_v44 = vld [vmem:[#allocation10 + $0x1f0] sm:$0xff] }
 0x772   : > { %8035 = vpow2.f32 %v7743_v23 }
 0x773   : > { %8037 = vrcp.f32 %v3267_v48  ;;  %v3879_v48 = vld [vmem:[#allocation10 + $0x1e0] sm:$0xff] }
 0x774   : > { %8039 = vrcp.f32 %v3261_v49  ;;  %v3878_v49 = vld [vmem:[#allocation10 + $0x1d8] sm:$0xff] }
 0x775   : > { %8041 = vtanh.f32 %v3254_v3  ;;  %v3875_v3 = vld [vmem:[#allocation10 + $0x1c0] sm:$0xff] }
 0x776   : > { %8043 = vtanh.f32 %v3499_v35  ;;  %v3872_v35 = vld [vmem:[#allocation10 + $0x1a8] sm:$0xff] }
 0x777   : > { %8045 = vpow2.f32 %v7744_v53  ;;  %v3874_v53 = vld [vmem:[#allocation10 + $0x1b8] sm:$0xff] }
 0x77d   : > { %v8034_v18 = vpop.eup %8033 }
 0x77e   : > { %v3504_v61 = vadd.f32 1.0, %v8034_v18  ;;  %v3871_v18 = vld [vmem:[#allocation10 + $0x1a0] sm:$0xff] }
 0x77f   : > { %v8036_v20 = vpop.eup %8035 }
 0x780   : > { %8047 = vrcp.f32 %v3504_v61  ;;  %v3510_v58 = vadd.f32 1.0, %v8036_v20  ;;  %v8038_v45 = vpop.eup %8037  ;;  %v3868_v61 = vld [vmem:[#allocation10 + $0x188] sm:$0xff]  ;;  %v3870_v20 = vld [vmem:[#allocation10 + $0x198] sm:$0xff] }
 0x781   : > { %8049 = vpow2.f32 %v7741_v6  ;;  %v8040_v62 = vpop.eup %8039  ;;  %v3277_v52 = vmul.f32 %v8038_v45, %v8825_v38  ;;  %v3873_v6 = vld [vmem:[#allocation10 + $0x1b0] sm:$0xff] }
 0x782   : > { %8051 = vrcp.f32 %v3510_v58  ;;  %v8042_v10 = vpop.eup %8041  ;;  %v3867_v58 = vld [vmem:[#allocation10 + $0x180] sm:$0xff]  ;;  %v3869_v45 = vld [vmem:[#allocation10 + $0x190] sm:$0xff] }
 0x783   : > { %v8044_v63 = vpop.eup %8043  ;;  %v3278_v2 = vmul.f32 %v8042_v10, %v8040_v62  ;;  %v3864_v62 = vld [vmem:[#allocation10 + $0x168] sm:$0xff]  ;;  %v3866_v10 = vld [vmem:[#allocation10 + $0x178] sm:$0xff] }
 0x784   : > { %v8046_v43 = vpop.eup %8045 }
 0x785   : > { %v8867_v24 = vadd.f32 %v3278_v2, %v3277_v52  ;;  %v3517_v29 = vadd.f32 1.0, %v8046_v43  ;;  %v3863_v52 = vld [vmem:[#allocation10 + $0x160] sm:$0xff]  ;;  %v3860_v43 = vld [vmem:[#allocation10 + $0x148] sm:$0xff]  ;;  %v3862_v2 = vld [vmem:[#allocation10 + $0x158] sm:$0xff] }
 0x787   : > { %8053 = vtanh.f32 %v8867_v24 }
 0x788   : > { %8055 = vrcp.f32 %v3517_v29  ;;  %v3855_v29 = vld [vmem:[#allocation10 + $0x120] sm:$0xff] }
 0x78d   : > { %v8048_v12 = vpop.eup %8047 }
 0x78e   : > { %v8050_v15 = vpop.eup %8049  ;;  %v3521_v16 = vmul.f32 %v8048_v12, %v8044_v63  ;;  %v3865_v63 = vld [vmem:[#allocation10 + $0x170] sm:$0xff]  ;;  %v3859_v12 = vld [vmem:[#allocation10 + $0x140] sm:$0xff] }
 0x78f   : > { %v8052_v39 = vpop.eup %8051  ;;  %v3274_v56 = vadd.f32 1.0, %v8050_v15  ;;  %v3861_v15 = vld [vmem:[#allocation10 + $0x150] sm:$0xff] }
 0x790   : > { %v3520_v1 = vmul.f32 %v8052_v39, %v8828_v42  ;;  %v3876_v42 = vld [vmem:[#allocation10 + $0x1c8] sm:$0xff]  ;;  %v3858_v39 = vld [vmem:[#allocation10 + $0x138] sm:$0xff] }
 0x792   : > { %v8870_v27 = vadd.f32 %v3521_v16, %v3520_v1  ;;  %v3856_v16 = vld [vmem:[#allocation10 + $0x128] sm:$0xff]  ;;  %v3857_v1 = vld [vmem:[#allocation10 + $0x130] sm:$0xff] }
 0x794   : > { %8057 = vtanh.f32 %v8870_v27  ;;  %v8054_v38 = vpop.eup %8053 }
 0x795   : > { %8059 = vrcp.f32 %v3274_v56  ;;  %v8056_v36 = vpop.eup %8055  ;;  %v3852_v56 = vld [vmem:[#allocation10 + $0x108] sm:$0xff] }
 0x7a1   : > { %v8058_v23 = vpop.eup %8057 }
 0x7a2   : > { %v8060_v30 = vpop.eup %8059  ;;  %v8874_v32 = vmul.f32 %v8058_v23, %v8056_v36  ;;  %v3851_v36 = vld [vmem:[#allocation10 + $0x100] sm:$0xff]  ;;  %v3853_v23 = vld [vmem:[#allocation10 + $0x110] sm:$0xff] }
 0x7a3   : > { %v8876_v37 = vmul.f32 %v8060_v30, %v8054_v38  ;;  %v3854_v38 = vld [vmem:[#allocation10 + $0x118] sm:$0xff]  ;;  %v3848_v30 = vld [vmem:[#allocation10 + $0xe8] sm:$0xff] }
 0x7a4   : > { %3718 = vmatmul.mubr.f32.vlgmr.msra.gmra.mxu0 %v8874_v32  ;;  %3789 = vmatmul.mubr.f32.vlgmr.msra.gmra.mxu1 %v8874_v32 }
 0x7a5   : > { %4011 = vmatprep.mubr.f32.mxu0 %v8876_v37  ;;  %4082 = vmatprep.mubr.f32.mxu1 %v8876_v37 }
 0x7a6   : > { %3948 = vmatpush1.msra.mxu0 %v3879_v48  ;;  %4019 = vmatpush1.msra.mxu1 %v3881_v44  ;;  %v3850_v48 = vld [vmem:[#allocation10 + $0xf8] sm:$0xff]  ;;  %v3847_v44 = vld [vmem:[#allocation10 + $0xe0] sm:$0xff] }
 0x7a7   : > { %3949 = vmatprep.subr.mxu0 %v3876_v42  ;;  %4020 = vmatprep.subr.mxu1 %v3878_v49  ;;  %v3849_v42 = vld [vmem:[#allocation10 + $0xf0] sm:$0xff]  ;;  %v3844_v49 = vld [vmem:[#allocation10 + $0xc8] sm:$0xff] }
 0x7a8   : > { %3950 = vmatpush1.msra.mxu0 %v3875_v3  ;;  %4021 = vmatpush1.msra.mxu1 %v3877_v14  ;;  %v3846_v3 = vld [vmem:[#allocation10 + $0xd8] sm:$0xff]  ;;  %v3843_v14 = vld [vmem:[#allocation10 + $0xc0] sm:$0xff] }
 0x7a9   : > { %3951 = vmatprep.subr.mxu0 %v3872_v35  ;;  %4022 = vmatprep.subr.mxu1 %v3874_v53  ;;  %v3845_v35 = vld [vmem:[#allocation10 + $0xd0] sm:$0xff]  ;;  %v3840_v53 = vld [vmem:[#allocation10 + $0xa8] sm:$0xff] }
 0x7aa   : > { %3952 = vmatpush1.msra.mxu0 %v3871_v18  ;;  %4023 = vmatpush1.msra.mxu1 %v3873_v6  ;;  %v3842_v18 = vld [vmem:[#allocation10 + $0xb8] sm:$0xff]  ;;  %v3839_v6 = vld [vmem:[#allocation10 + $0xa0] sm:$0xff] }
 0x7ab   : > { %3953 = vmatprep.subr.mxu0 %v3868_v61  ;;  %4024 = vmatprep.subr.mxu1 %v3870_v20  ;;  %v3841_v61 = vld [vmem:[#allocation10 + $0xb0] sm:$0xff]  ;;  %v3836_v20 = vld [vmem:[#allocation10 + $0x88] sm:$0xff] }
 0x7ac   : > { %3954 = vmatpush1.msra.mxu0 %v3867_v58  ;;  %4025 = vmatpush1.msra.mxu1 %v3869_v45  ;;  %v3838_v58 = vld [vmem:[#allocation10 + $0x98] sm:$0xff]  ;;  %v3835_v45 = vld [vmem:[#allocation10 + $0x80] sm:$0xff] }
 0x7ad   : > { %3955 = vmatprep.subr.mxu0 %v3864_v62  ;;  %4026 = vmatprep.subr.mxu1 %v3866_v10  ;;  %v3837_v62 = vld [vmem:[#allocation10 + $0x90] sm:$0xff]  ;;  %v3832_v10 = vld [vmem:[#allocation10 + $0x68] sm:$0xff] }
 0x7ae   : > { %3956 = vmatpush1.msra.mxu0 %v3863_v52  ;;  %4027 = vmatpush1.msra.mxu1 %v3865_v63  ;;  %v3834_v52 = vld [vmem:[#allocation10 + $0x78] sm:$0xff]  ;;  %v3831_v63 = vld [vmem:[#allocation10 + $0x60] sm:$0xff] }
 0x7af   : > { %3957 = vmatprep.subr.mxu0 %v3860_v43  ;;  %4028 = vmatprep.subr.mxu1 %v3862_v2  ;;  %v3833_v43 = vld [vmem:[#allocation10 + $0x70] sm:$0xff]  ;;  %v3828_v2 = vld [vmem:[#allocation10 + $0x48] sm:$0xff] }
 0x7b0   : > { %3958 = vmatpush1.msra.mxu0 %v3859_v12  ;;  %4029 = vmatpush1.msra.mxu1 %v3861_v15  ;;  %v3830_v12 = vld [vmem:[#allocation10 + $0x58] sm:$0xff]  ;;  %v3827_v15 = vld [vmem:[#allocation10 + $0x40] sm:$0xff] }
 0x7b1   : > { %3959 = vmatprep.subr.mxu0 %v3856_v16  ;;  %4030 = vmatprep.subr.mxu1 %v3858_v39  ;;  %v3829_v16 = vld [vmem:[#allocation10 + $0x50] sm:$0xff]  ;;  %v3824_v39 = vld [vmem:[#allocation10 + $0x28] sm:$0xff] }
 0x7b2   : > { %3960 = vmatpush1.msra.mxu0 %v3855_v29  ;;  %4031 = vmatpush1.msra.mxu1 %v3857_v1  ;;  %v3826_v29 = vld [vmem:[#allocation10 + $0x38] sm:$0xff]  ;;  %v3823_v1 = vld [vmem:[#allocation10 + $0x20] sm:$0xff] }
 0x7b3   : > { %3961 = vmatprep.subr.mxu0 %v3852_v56  ;;  %4032 = vmatprep.subr.mxu1 %v3854_v38  ;;  %v3825_v56 = vld [vmem:[#allocation10 + $0x30] sm:$0xff]  ;;  %v3820_v38 = vld [vmem:[#allocation10 + $0x8] sm:$0xff] }
 0x7b4   : > { %3962 = vmatpush1.msra.mxu0 %v3851_v36  ;;  %4033 = vmatpush1.msra.mxu1 %v3853_v23  ;;  %v3822_v36 = vld [vmem:[#allocation10 + $0x18] sm:$0xff]  ;;  %v3819_v23 = vld [vmem:[#allocation10] sm:$0xff] }
 0x7b5   : > { %3963 = vmatprep.subr.mxu0 %v3848_v30  ;;  %4034 = vmatprep.subr.mxu1 %v3850_v48  ;;  %v3821_v30 = vld [vmem:[#allocation10 + $0x10] sm:$0xff]  ;;  %v3944_v48 = vld [vmem:[#allocation10 + $0x3e8] sm:$0xff] }
 0x7b6   : > { %3964 = vmatpush1.msra.mxu0 %v3847_v44  ;;  %4035 = vmatpush1.msra.mxu1 %v3849_v42  ;;  %v3946_v44 = vld [vmem:[#allocation10 + $0x3f8] sm:$0xff]  ;;  %v3943_v42 = vld [vmem:[#allocation10 + $0x3e0] sm:$0xff] }
 0x7b7   : > { %3965 = vmatprep.subr.mxu0 %v3844_v49  ;;  %4036 = vmatprep.subr.mxu1 %v3846_v3  ;;  %v3945_v49 = vld [vmem:[#allocation10 + $0x3f0] sm:$0xff]  ;;  %v3940_v3 = vld [vmem:[#allocation10 + $0x3c8] sm:$0xff] }
 0x7b8   : > { %3966 = vmatpush1.msra.mxu0 %v3843_v14  ;;  %4037 = vmatpush1.msra.mxu1 %v3845_v35  ;;  %v3942_v14 = vld [vmem:[#allocation10 + $0x3d8] sm:$0xff]  ;;  %v3939_v35 = vld [vmem:[#allocation10 + $0x3c0] sm:$0xff] }
 0x7b9   : > { %3967 = vmatprep.subr.mxu0 %v3840_v53  ;;  %4038 = vmatprep.subr.mxu1 %v3842_v18  ;;  %v3941_v53 = vld [vmem:[#allocation10 + $0x3d0] sm:$0xff]  ;;  %v3936_v18 = vld [vmem:[#allocation10 + $0x3a8] sm:$0xff] }
 0x7ba   : > { %3968 = vmatpush1.msra.mxu0 %v3839_v6  ;;  %4039 = vmatpush1.msra.mxu1 %v3841_v61  ;;  %v3938_v6 = vld [vmem:[#allocation10 + $0x3b8] sm:$0xff]  ;;  %v3935_v61 = vld [vmem:[#allocation10 + $0x3a0] sm:$0xff] }
 0x7bb   : > { %3969 = vmatprep.subr.mxu0 %v3836_v20  ;;  %4040 = vmatprep.subr.mxu1 %v3838_v58  ;;  %v3937_v20 = vld [vmem:[#allocation10 + $0x3b0] sm:$0xff]  ;;  %v3932_v58 = vld [vmem:[#allocation10 + $0x388] sm:$0xff] }
 0x7bc   : > { %3970 = vmatpush1.msra.mxu0 %v3835_v45  ;;  %4041 = vmatpush1.msra.mxu1 %v3837_v62  ;;  %v3934_v45 = vld [vmem:[#allocation10 + $0x398] sm:$0xff]  ;;  %v3931_v62 = vld [vmem:[#allocation10 + $0x380] sm:$0xff] }
 0x7bd   : > { %3971 = vmatprep.subr.mxu0 %v3832_v10  ;;  %4042 = vmatprep.subr.mxu1 %v3834_v52  ;;  %v3933_v10 = vld [vmem:[#allocation10 + $0x390] sm:$0xff]  ;;  %v3928_v52 = vld [vmem:[#allocation10 + $0x368] sm:$0xff] }
 0x7be   : > { %3972 = vmatpush1.msra.mxu0 %v3831_v63  ;;  %4043 = vmatpush1.msra.mxu1 %v3833_v43  ;;  %v3930_v63 = vld [vmem:[#allocation10 + $0x378] sm:$0xff]  ;;  %v3927_v43 = vld [vmem:[#allocation10 + $0x360] sm:$0xff] }
 0x7bf   : > { %3973 = vmatprep.subr.mxu0 %v3828_v2  ;;  %4044 = vmatprep.subr.mxu1 %v3830_v12  ;;  %v3929_v2 = vld [vmem:[#allocation10 + $0x370] sm:$0xff]  ;;  %v3924_v12 = vld [vmem:[#allocation10 + $0x348] sm:$0xff] }
 0x7c0   : > { %3974 = vmatpush1.msra.mxu0 %v3827_v15  ;;  %4045 = vmatpush1.msra.mxu1 %v3829_v16  ;;  %v3926_v15 = vld [vmem:[#allocation10 + $0x358] sm:$0xff]  ;;  %v3923_v16 = vld [vmem:[#allocation10 + $0x340] sm:$0xff] }
 0x7c1   : > { %3975 = vmatprep.subr.mxu0 %v3824_v39  ;;  %4046 = vmatprep.subr.mxu1 %v3826_v29  ;;  %v3925_v39 = vld [vmem:[#allocation10 + $0x350] sm:$0xff]  ;;  %v3920_v29 = vld [vmem:[#allocation10 + $0x328] sm:$0xff] }
 0x7c2   : > { %3976 = vmatpush1.msra.mxu0 %v3823_v1  ;;  %4047 = vmatpush1.msra.mxu1 %v3825_v56  ;;  %v3922_v1 = vld [vmem:[#allocation10 + $0x338] sm:$0xff]  ;;  %v3919_v56 = vld [vmem:[#allocation10 + $0x320] sm:$0xff] }
 0x7c3   : > { %3977 = vmatprep.subr.mxu0 %v3820_v38  ;;  %4048 = vmatprep.subr.mxu1 %v3822_v36  ;;  %v3921_v38 = vld [vmem:[#allocation10 + $0x330] sm:$0xff]  ;;  %v3916_v36 = vld [vmem:[#allocation10 + $0x308] sm:$0xff] }
 0x7c4   : > { %3978 = vmatpush1.msra.mxu0 %v3819_v23  ;;  %4049 = vmatpush1.msra.mxu1 %v3821_v30  ;;  %v3918_v23 = vld [vmem:[#allocation10 + $0x318] sm:$0xff]  ;;  %v3915_v30 = vld [vmem:[#allocation10 + $0x300] sm:$0xff] }
 0x7c5   : > { %3979 = vmatprep.subr.mxu0 %v3944_v48  ;;  %4050 = vmatprep.subr.mxu1 %v3946_v44  ;;  %v3917_v48 = vld [vmem:[#allocation10 + $0x310] sm:$0xff]  ;;  %v3912_v44 = vld [vmem:[#allocation10 + $0x2e8] sm:$0xff] }
 0x7c6   : > { %3980 = vmatpush2.msra.mxu0 %v3943_v42  ;;  %4051 = vmatpush2.msra.mxu1 %v3945_v49  ;;  %v3914_v42 = vld [vmem:[#allocation10 + $0x2f8] sm:$0xff]  ;;  %v3911_v49 = vld [vmem:[#allocation10 + $0x2e0] sm:$0xff] }
 0x7c7   : > { %3981 = vmatprep.subr.mxu0 %v3940_v3  ;;  %4052 = vmatprep.subr.mxu1 %v3942_v14  ;;  %v3913_v3 = vld [vmem:[#allocation10 + $0x2f0] sm:$0xff]  ;;  %v3908_v14 = vld [vmem:[#allocation10 + $0x2c8] sm:$0xff] }
 0x7c8   : > { %3982 = vmatpush2.msra.mxu0 %v3939_v35  ;;  %4053 = vmatpush2.msra.mxu1 %v3941_v53  ;;  %v3910_v35 = vld [vmem:[#allocation10 + $0x2d8] sm:$0xff]  ;;  %v3907_v53 = vld [vmem:[#allocation10 + $0x2c0] sm:$0xff] }
 0x7c9   : > { %3983 = vmatprep.subr.mxu0 %v3936_v18  ;;  %4054 = vmatprep.subr.mxu1 %v3938_v6  ;;  %v3909_v18 = vld [vmem:[#allocation10 + $0x2d0] sm:$0xff]  ;;  %v3904_v6 = vld [vmem:[#allocation10 + $0x2a8] sm:$0xff] }
 0x7ca   : > { %3984 = vmatpush2.msra.mxu0 %v3935_v61  ;;  %4055 = vmatpush2.msra.mxu1 %v3937_v20  ;;  %v3906_v61 = vld [vmem:[#allocation10 + $0x2b8] sm:$0xff]  ;;  %v3903_v20 = vld [vmem:[#allocation10 + $0x2a0] sm:$0xff] }
 0x7cb   : > { %3985 = vmatprep.subr.mxu0 %v3932_v58  ;;  %4056 = vmatprep.subr.mxu1 %v3934_v45  ;;  %v3905_v58 = vld [vmem:[#allocation10 + $0x2b0] sm:$0xff]  ;;  %v3900_v45 = vld [vmem:[#allocation10 + $0x288] sm:$0xff] }
 0x7cc   : > { %3986 = vmatpush2.msra.mxu0 %v3931_v62  ;;  %4057 = vmatpush2.msra.mxu1 %v3933_v10  ;;  %v3902_v62 = vld [vmem:[#allocation10 + $0x298] sm:$0xff]  ;;  %v3899_v10 = vld [vmem:[#allocation10 + $0x280] sm:$0xff] }
 0x7cd   : > { %3987 = vmatprep.subr.mxu0 %v3928_v52  ;;  %4058 = vmatprep.subr.mxu1 %v3930_v63  ;;  %v3901_v52 = vld [vmem:[#allocation10 + $0x290] sm:$0xff]  ;;  %v3896_v63 = vld [vmem:[#allocation10 + $0x268] sm:$0xff] }
 0x7ce   : > { %3988 = vmatpush2.msra.mxu0 %v3927_v43  ;;  %4059 = vmatpush2.msra.mxu1 %v3929_v2  ;;  %v3898_v43 = vld [vmem:[#allocation10 + $0x278] sm:$0xff]  ;;  %v3895_v2 = vld [vmem:[#allocation10 + $0x260] sm:$0xff] }
 0x7cf   : > { %3989 = vmatprep.subr.mxu0 %v3924_v12  ;;  %4060 = vmatprep.subr.mxu1 %v3926_v15  ;;  %v3897_v12 = vld [vmem:[#allocation10 + $0x270] sm:$0xff]  ;;  %v3892_v15 = vld [vmem:[#allocation10 + $0x248] sm:$0xff] }
 0x7d0   : > { %3990 = vmatpush2.msra.mxu0 %v3923_v16  ;;  %4061 = vmatpush2.msra.mxu1 %v3925_v39  ;;  %v3894_v16 = vld [vmem:[#allocation10 + $0x258] sm:$0xff]  ;;  %v3891_v39 = vld [vmem:[#allocation10 + $0x240] sm:$0xff] }
 0x7d1   : > { %3991 = vmatprep.subr.mxu0 %v3920_v29  ;;  %4062 = vmatprep.subr.mxu1 %v3922_v1  ;;  %v3893_v29 = vld [vmem:[#allocation10 + $0x250] sm:$0xff]  ;;  %v3888_v1 = vld [vmem:[#allocation10 + $0x228] sm:$0xff] }
 0x7d2   : > { %3992 = vmatpush2.msra.mxu0 %v3919_v56  ;;  %4063 = vmatpush2.msra.mxu1 %v3921_v38  ;;  %v3890_v56 = vld [vmem:[#allocation10 + $0x238] sm:$0xff]  ;;  %v3887_v38 = vld [vmem:[#allocation10 + $0x220] sm:$0xff] }
 0x7d3   : > { %3993 = vmatprep.subr.mxu0 %v3916_v36  ;;  %4064 = vmatprep.subr.mxu1 %v3918_v23  ;;  %v3889_v36 = vld [vmem:[#allocation10 + $0x230] sm:$0xff]  ;;  %v3884_v23 = vld [vmem:[#allocation10 + $0x208] sm:$0xff] }
 0x7d4   : > { %3994 = vmatpush2.msra.mxu0 %v3915_v30  ;;  %4065 = vmatpush2.msra.mxu1 %v3917_v48  ;;  %v3886_v30 = vld [vmem:[#allocation10 + $0x218] sm:$0xff]  ;;  %v3883_v48 = vld [vmem:[#allocation10 + $0x200] sm:$0xff] }
 0x7d5   : > { %3995 = vmatprep.subr.mxu0 %v3912_v44  ;;  %4066 = vmatprep.subr.mxu1 %v3914_v42  ;;  %v3885_v44 = vld [vmem:[#allocation10 + $0x210] sm:$0xff]  ;;  %v4183_v42 = vld [vmem:[#allocation6 + $0x1e8] sm:$0xff] }
 0x7d6   : > { %3996 = vmatpush2.msra.mxu0 %v3911_v49  ;;  %4067 = vmatpush2.msra.mxu1 %v3913_v3  ;;  %v4185_v49 = vld [vmem:[#allocation6 + $0x1f8] sm:$0xff] }
 0x7d7   : > { %3997 = vmatprep.subr.mxu0 %v3908_v14  ;;  %4068 = vmatprep.subr.mxu1 %v3910_v35 }
 0x7d8   : > { %3998 = vmatpush2.msra.mxu0 %v3907_v53  ;;  %4069 = vmatpush2.msra.mxu1 %v3909_v18 }
 0x7d9   : > { %3999 = vmatprep.subr.mxu0 %v3904_v6  ;;  %4070 = vmatprep.subr.mxu1 %v3906_v61 }
 0x7da   : > { %4000 = vmatpush2.msra.mxu0 %v3903_v20  ;;  %4071 = vmatpush2.msra.mxu1 %v3905_v58 }
 0x7db   : > { %4001 = vmatprep.subr.mxu0 %v3900_v45  ;;  %4072 = vmatprep.subr.mxu1 %v3902_v62 }
 0x7dc   : > { %4002 = vmatpush2.msra.mxu0 %v3899_v10  ;;  %4073 = vmatpush2.msra.mxu1 %v3901_v52 }
 0x7dd   : > { %4003 = vmatprep.subr.mxu0 %v3896_v63  ;;  %4074 = vmatprep.subr.mxu1 %v3898_v43 }
 0x7de   : > { %4004 = vmatpush2.msra.mxu0 %v3895_v2  ;;  %4075 = vmatpush2.msra.mxu1 %v3897_v12 }
 0x7df   : > { %4005 = vmatprep.subr.mxu0 %v3892_v15  ;;  %4076 = vmatprep.subr.mxu1 %v3894_v16 }
 0x7e0   : > { %4006 = vmatpush2.msra.mxu0 %v3891_v39  ;;  %4077 = vmatpush2.msra.mxu1 %v3893_v29 }
 0x7e1   : > { %4007 = vmatprep.subr.mxu0 %v3888_v1  ;;  %4078 = vmatprep.subr.mxu1 %v3890_v56 }
 0x7e2   : > { %4008 = vmatpush2.msra.mxu0 %v3887_v38  ;;  %4079 = vmatpush2.msra.mxu1 %v3889_v36 }
 0x7e3   : > { %4009 = vmatprep.subr.mxu0 %v3884_v23  ;;  %4080 = vmatprep.subr.mxu1 %v3886_v30  ;;  %v4182_v30 = vld [vmem:[#allocation6 + $0x1e0] sm:$0xff] }
 0x7e4   : > { %4010 = vmatpush2.msra.mxu0 %v3883_v48  ;;  %4081 = vmatpush2.msra.mxu1 %v3885_v44  ;;  %v4184_v48 = vld [vmem:[#allocation6 + $0x1f0] sm:$0xff]  ;;  %v4179_v44 = vld [vmem:[#allocation6 + $0x1c8] sm:$0xff] }
 0x7e5   : > { %4186 = vmatprep.subr.mxu0 %v4183_v42  ;;  %4257 = vmatprep.subr.mxu1 %v4185_v49  ;;  %v4181_v42 = vld [vmem:[#allocation6 + $0x1d8] sm:$0xff]  ;;  %v4178_v49 = vld [vmem:[#allocation6 + $0x1c0] sm:$0xff] }
 0x864   : > { %v3719_v3 = vpop.f32.mrf.mxu0  ;;  %v3790_v6 = vpop.f32.mrf.mxu1 }
 0x865   : > { %v3720_v14 = vadd.f32 %v3719_v3, %v8730_v7  ;;  %v3791_v10 = vadd.f32 %v3790_v6, %v8744_v31  ;;  %v4180_v3 = vld [vmem:[#allocation6 + $0x1d0] sm:$0xff]  ;;  %v4173_v6 = vld [vmem:[#allocation6 + $0x198] sm:$0xff] }
 0x866   : > { %v3721_v35 = vpop.f32.mrf.mxu0  ;;  %v3792_v20 = vpop.f32.mrf.mxu1 }
 0x867   : > { %v7745_v53 = vmul.f32 -1.442695, %v3720_v14  ;;  %v3722_v18 = vadd.f32 %v3721_v35, %v8735_v11  ;;  %v3793_v58 = vadd.f32 %v3792_v20, %v8740_v21  ;;  %v4177_v14 = vld [vmem:[#allocation6 + $0x1b8] sm:$0xff]  ;;  %v4174_v35 = vld [vmem:[#allocation6 + $0x1a0] sm:$0xff]  ;;  %v4172_v20 = vld [vmem:[#allocation6 + $0x190] sm:$0xff] }
 0x869   : > { %8061 = vpow2.f32 %v7745_v53  ;;  %v7746_v61 = vmul.f32 -1.442695, %v3722_v18  ;;  %v7747_v45 = vmul.f32 -1.442695, %v3793_v58  ;;  %v4176_v53 = vld [vmem:[#allocation6 + $0x1b0] sm:$0xff]  ;;  %v4171_v18 = vld [vmem:[#allocation6 + $0x188] sm:$0xff] }
 0x86a   : > { %v4167_v58 = vld [vmem:[#allocation6 + $0x168] sm:$0xff] }
 0x86b   : > { %8063 = vpow2.f32 %v7746_v61  ;;  %v4170_v61 = vld [vmem:[#allocation6 + $0x180] sm:$0xff] }
 0x86c   : > { %8065 = vpow2.f32 %v7747_v45  ;;  %v4169_v45 = vld [vmem:[#allocation6 + $0x178] sm:$0xff] }
 0x876   : > { %v8062_v62 = vpop.eup %8061 }
 0x877   : > { %v3798_v52 = vadd.f32 1.0, %v8062_v62  ;;  %v4166_v62 = vld [vmem:[#allocation6 + $0x160] sm:$0xff] }
 0x878   : > { %v8064_v63 = vpop.eup %8063 }
 0x879   : > { %8067 = vrcp.f32 %v3798_v52  ;;  %v3804_v43 = vadd.f32 1.0, %v8064_v63  ;;  %v8066_v2 = vpop.eup %8065  ;;  %v4163_v52 = vld [vmem:[#allocation6 + $0x148] sm:$0xff]  ;;  %v4165_v63 = vld [vmem:[#allocation6 + $0x158] sm:$0xff] }
 0x87a   : > { %8069 = vtanh.f32 %v3791_v10  ;;  %v3811_v39 = vadd.f32 1.0, %v8066_v2  ;;  %v4168_v10 = vld [vmem:[#allocation6 + $0x170] sm:$0xff] }
 0x87b   : > { %8071 = vrcp.f32 %v3804_v43  ;;  %v4162_v43 = vld [vmem:[#allocation6 + $0x140] sm:$0xff]  ;;  %v4164_v2 = vld [vmem:[#allocation6 + $0x150] sm:$0xff] }
 0x87c   : > { %8073 = vrcp.f32 %v3811_v39  ;;  %v4160_v39 = vld [vmem:[#allocation6 + $0x130] sm:$0xff] }
 0x886   : > { %v8068_v12 = vpop.eup %8067 }
 0x887   : > { %v8070_v15 = vpop.eup %8069 }
 0x888   : > { %v8072_v16 = vpop.eup %8071  ;;  %v3815_v29 = vmul.f32 %v8070_v15, %v8068_v12  ;;  %v4159_v12 = vld [vmem:[#allocation6 + $0x128] sm:$0xff]  ;;  %v4161_v15 = vld [vmem:[#allocation6 + $0x138] sm:$0xff] }
 0x889   : > { %v3814_v1 = vmul.f32 %v8072_v16, %v8845_v41  ;;  %v8074_v38 = vpop.eup %8073  ;;  %v4175_v41 = vld [vmem:[#allocation6 + $0x1a8] sm:$0xff]  ;;  %v4158_v16 = vld [vmem:[#allocation6 + $0x120] sm:$0xff] }
 0x88b   : > { %v8887_v56 = vadd.f32 %v3815_v29, %v3814_v1  ;;  %v4155_v29 = vld [vmem:[#allocation6 + $0x108] sm:$0xff]  ;;  %v4157_v1 = vld [vmem:[#allocation6 + $0x118] sm:$0xff] }
 0x88d   : > { %8075 = vtanh.f32 %v8887_v56 }
 0x89a   : > { %v8076_v36 = vpop.eup %8075 }
 0x89b   : > { %v8890_v23 = vmul.f32 %v8076_v36, %v8074_v38  ;;  %v4154_v38 = vld [vmem:[#allocation6 + $0x100] sm:$0xff]  ;;  %v4156_v36 = vld [vmem:[#allocation6 + $0x110] sm:$0xff] }
 0x89d   : > { %4012 = vmatmul.mubr.f32.vlgmr.msra.gmra.mxu0 %v8890_v23  ;;  %4083 = vmatmul.mubr.f32.vlgmr.msra.gmra.mxu1 %v8890_v23 }
 0x89e   : > { %4187 = vmatpush1.msra.mxu0 %v4182_v30  ;;  %4258 = vmatpush1.msra.mxu1 %v4184_v48  ;;  %v4151_v30 = vld [vmem:[#allocation6 + $0xe8] sm:$0xff]  ;;  %v4153_v48 = vld [vmem:[#allocation6 + $0xf8] sm:$0xff] }
 0x89f   : > { %4188 = vmatprep.subr.mxu0 %v4179_v44  ;;  %4259 = vmatprep.subr.mxu1 %v4181_v42  ;;  %v4150_v44 = vld [vmem:[#allocation6 + $0xe0] sm:$0xff]  ;;  %v4152_v42 = vld [vmem:[#allocation6 + $0xf0] sm:$0xff] }
 0x8a0   : > { %4189 = vmatpush1.msra.mxu0 %v4178_v49  ;;  %4260 = vmatpush1.msra.mxu1 %v4180_v3  ;;  %v4147_v49 = vld [vmem:[#allocation6 + $0xc8] sm:$0xff]  ;;  %v4149_v3 = vld [vmem:[#allocation6 + $0xd8] sm:$0xff] }
 0x8a1   : > { %4190 = vmatprep.subr.mxu0 %v4175_v41  ;;  %4261 = vmatprep.subr.mxu1 %v4177_v14  ;;  %v4146_v41 = vld [vmem:[#allocation6 + $0xc0] sm:$0xff]  ;;  %v4148_v14 = vld [vmem:[#allocation6 + $0xd0] sm:$0xff] }
 0x8a2   : > { %4191 = vmatpush1.msra.mxu0 %v4174_v35  ;;  %4262 = vmatpush1.msra.mxu1 %v4176_v53  ;;  %v4143_v35 = vld [vmem:[#allocation6 + $0xa8] sm:$0xff]  ;;  %v4145_v53 = vld [vmem:[#allocation6 + $0xb8] sm:$0xff] }
 0x8a3   : > { %4192 = vmatprep.subr.mxu0 %v4171_v18  ;;  %4263 = vmatprep.subr.mxu1 %v4173_v6  ;;  %v4142_v18 = vld [vmem:[#allocation6 + $0xa0] sm:$0xff]  ;;  %v4144_v6 = vld [vmem:[#allocation6 + $0xb0] sm:$0xff] }
 0x8a4   : > { %4193 = vmatpush1.msra.mxu0 %v4170_v61  ;;  %4264 = vmatpush1.msra.mxu1 %v4172_v20  ;;  %v4139_v61 = vld [vmem:[#allocation6 + $0x88] sm:$0xff]  ;;  %v4141_v20 = vld [vmem:[#allocation6 + $0x98] sm:$0xff] }
 0x8a5   : > { %4194 = vmatprep.subr.mxu0 %v4167_v58  ;;  %4265 = vmatprep.subr.mxu1 %v4169_v45  ;;  %v4138_v58 = vld [vmem:[#allocation6 + $0x80] sm:$0xff]  ;;  %v4140_v45 = vld [vmem:[#allocation6 + $0x90] sm:$0xff] }
 0x8a6   : > { %4195 = vmatpush1.msra.mxu0 %v4166_v62  ;;  %4266 = vmatpush1.msra.mxu1 %v4168_v10  ;;  %v4135_v62 = vld [vmem:[#allocation6 + $0x68] sm:$0xff]  ;;  %v4137_v10 = vld [vmem:[#allocation6 + $0x78] sm:$0xff] }
 0x8a7   : > { %4196 = vmatprep.subr.mxu0 %v4163_v52  ;;  %4267 = vmatprep.subr.mxu1 %v4165_v63  ;;  %v4134_v52 = vld [vmem:[#allocation6 + $0x60] sm:$0xff]  ;;  %v4136_v63 = vld [vmem:[#allocation6 + $0x70] sm:$0xff] }
 0x8a8   : > { %4197 = vmatpush1.msra.mxu0 %v4162_v43  ;;  %4268 = vmatpush1.msra.mxu1 %v4164_v2  ;;  %v4131_v43 = vld [vmem:[#allocation6 + $0x48] sm:$0xff]  ;;  %v4133_v2 = vld [vmem:[#allocation6 + $0x58] sm:$0xff] }
 0x8a9   : > { %4198 = vmatprep.subr.mxu0 %v4159_v12  ;;  %4269 = vmatprep.subr.mxu1 %v4161_v15  ;;  %v4130_v12 = vld [vmem:[#allocation6 + $0x40] sm:$0xff]  ;;  %v4132_v15 = vld [vmem:[#allocation6 + $0x50] sm:$0xff] }
 0x8aa   : > { %4199 = vmatpush1.msra.mxu0 %v4158_v16  ;;  %4270 = vmatpush1.msra.mxu1 %v4160_v39  ;;  %v4127_v16 = vld [vmem:[#allocation6 + $0x28] sm:$0xff]  ;;  %v4129_v39 = vld [vmem:[#allocation6 + $0x38] sm:$0xff] }
 0x8ab   : > { %4200 = vmatprep.subr.mxu0 %v4155_v29  ;;  %4271 = vmatprep.subr.mxu1 %v4157_v1  ;;  %v4126_v29 = vld [vmem:[#allocation6 + $0x20] sm:$0xff]  ;;  %v4128_v1 = vld [vmem:[#allocation6 + $0x30] sm:$0xff] }
 0x8ac   : > { %4201 = vmatpush1.msra.mxu0 %v4154_v38  ;;  %4272 = vmatpush1.msra.mxu1 %v4156_v36  ;;  %v4123_v38 = vld [vmem:[#allocation6 + $0x8] sm:$0xff]  ;;  %v4125_v36 = vld [vmem:[#allocation6 + $0x18] sm:$0xff] }
 0x8ad   : > { %4202 = vmatprep.subr.mxu0 %v4151_v30  ;;  %4273 = vmatprep.subr.mxu1 %v4153_v48  ;;  %v4122_v30 = vld [vmem:[#allocation6] sm:$0xff]  ;;  %v4124_v48 = vld [vmem:[#allocation6 + $0x10] sm:$0xff] }
 0x8ae   : > { %4203 = vmatpush1.msra.mxu0 %v4150_v44  ;;  %4274 = vmatpush1.msra.mxu1 %v4152_v42  ;;  %v4417_v44 = vld [vmem:[#allocation8 + $0x1e8] sm:$0xff]  ;;  %v4419_v42 = vld [vmem:[#allocation8 + $0x1f8] sm:$0xff] }
 0x8af   : > { %4204 = vmatprep.subr.mxu0 %v4147_v49  ;;  %4275 = vmatprep.subr.mxu1 %v4149_v3  ;;  %v4416_v49 = vld [vmem:[#allocation8 + $0x1e0] sm:$0xff]  ;;  %v4418_v3 = vld [vmem:[#allocation8 + $0x1f0] sm:$0xff] }
 0x8b0   : > { %4205 = vmatpush1.msra.mxu0 %v4146_v41  ;;  %4276 = vmatpush1.msra.mxu1 %v4148_v14  ;;  %v4413_v41 = vld [vmem:[#allocation8 + $0x1c8] sm:$0xff]  ;;  %v4415_v14 = vld [vmem:[#allocation8 + $0x1d8] sm:$0xff] }
 0x8b1   : > { %4206 = vmatprep.subr.mxu0 %v4143_v35  ;;  %4277 = vmatprep.subr.mxu1 %v4145_v53  ;;  %v4412_v35 = vld [vmem:[#allocation8 + $0x1c0] sm:$0xff]  ;;  %v4414_v53 = vld [vmem:[#allocation8 + $0x1d0] sm:$0xff] }
 0x8b2   : > { %4207 = vmatpush1.msra.mxu0 %v4142_v18  ;;  %4278 = vmatpush1.msra.mxu1 %v4144_v6  ;;  %v4411_v18 = vld [vmem:[#allocation8 + $0x1b8] sm:$0xff]  ;;  %v4410_v6 = vld [vmem:[#allocation8 + $0x1b0] sm:$0xff] }
 0x8b3   : > { %4208 = vmatprep.subr.mxu0 %v4139_v61  ;;  %4279 = vmatprep.subr.mxu1 %v4141_v20  ;;  %v4405_v61 = vld [vmem:[#allocation8 + $0x188] sm:$0xff]  ;;  %v4407_v20 = vld [vmem:[#allocation8 + $0x198] sm:$0xff] }
 0x8b4   : > { %4209 = vmatpush1.msra.mxu0 %v4138_v58  ;;  %4280 = vmatpush1.msra.mxu1 %v4140_v45  ;;  %v4404_v58 = vld [vmem:[#allocation8 + $0x180] sm:$0xff]  ;;  %v4406_v45 = vld [vmem:[#allocation8 + $0x190] sm:$0xff] }
 0x8b5   : > { %4210 = vmatprep.subr.mxu0 %v4135_v62  ;;  %4281 = vmatprep.subr.mxu1 %v4137_v10  ;;  %v4401_v62 = vld [vmem:[#allocation8 + $0x168] sm:$0xff]  ;;  %v4403_v10 = vld [vmem:[#allocation8 + $0x178] sm:$0xff] }
 0x8b6   : > { %4211 = vmatpush1.msra.mxu0 %v4134_v52  ;;  %4282 = vmatpush1.msra.mxu1 %v4136_v63  ;;  %v4400_v52 = vld [vmem:[#allocation8 + $0x160] sm:$0xff]  ;;  %v4402_v63 = vld [vmem:[#allocation8 + $0x170] sm:$0xff] }
 0x8b7   : > { %4212 = vmatprep.subr.mxu0 %v4131_v43  ;;  %4283 = vmatprep.subr.mxu1 %v4133_v2  ;;  %v4397_v43 = vld [vmem:[#allocation8 + $0x148] sm:$0xff]  ;;  %v4399_v2 = vld [vmem:[#allocation8 + $0x158] sm:$0xff] }
 0x8b8   : > { %4213 = vmatpush1.msra.mxu0 %v4130_v12  ;;  %4284 = vmatpush1.msra.mxu1 %v4132_v15  ;;  %v4396_v12 = vld [vmem:[#allocation8 + $0x140] sm:$0xff]  ;;  %v4398_v15 = vld [vmem:[#allocation8 + $0x150] sm:$0xff] }
 0x8b9   : > { %4214 = vmatprep.subr.mxu0 %v4127_v16  ;;  %4285 = vmatprep.subr.mxu1 %v4129_v39  ;;  %v4393_v16 = vld [vmem:[#allocation8 + $0x128] sm:$0xff]  ;;  %v4395_v39 = vld [vmem:[#allocation8 + $0x138] sm:$0xff] }
 0x8ba   : > { %4215 = vmatpush1.msra.mxu0 %v4126_v29  ;;  %4286 = vmatpush1.msra.mxu1 %v4128_v1  ;;  %v4392_v29 = vld [vmem:[#allocation8 + $0x120] sm:$0xff]  ;;  %v4394_v1 = vld [vmem:[#allocation8 + $0x130] sm:$0xff] }
 0x8bb   : > { %4216 = vmatprep.subr.mxu0 %v4123_v38  ;;  %4287 = vmatprep.subr.mxu1 %v4125_v36  ;;  %v4389_v38 = vld [vmem:[#allocation8 + $0x108] sm:$0xff]  ;;  %v4391_v36 = vld [vmem:[#allocation8 + $0x118] sm:$0xff] }
 0x8bc   : > { %4217 = vmatpush1.msra.mxu0 %v4122_v30  ;;  %4250 = vmatprep.mubr.f32.mxu0 %v8385_v5  ;;  %v4388_v30 = vld [vmem:[#allocation8 + $0x100] sm:$0xff] }
 0x8bd   : > { %4288 = vmatpush1.msra.mxu1 %v4124_v48  ;;  %4321 = vmatprep.mubr.f32.mxu1 %v8385_v5  ;;  %v4390_v48 = vld [vmem:[#allocation8 + $0x110] sm:$0xff] }
 0x8be   : > { %4251 = vmatmul.mubr.f32.vlgmr.msra.gmra.mxu0 %v8874_v32  ;;  %4322 = vmatmul.mubr.f32.vlgmr.msra.gmra.mxu1 %v8874_v32  ;;  %v4409_v32 = vld [vmem:[#allocation8 + $0x1a8] sm:$0xff] }
 0x8bf   : > { %4548 = vmatprep.mubr.f32.mxu0 %v8890_v23  ;;  %4619 = vmatprep.mubr.f32.mxu1 %v8890_v23  ;;  %v4408_v23 = vld [vmem:[#allocation8 + $0x1a0] sm:$0xff] }
 0x8c0   : > { %4484 = vmatprep.subr.mxu0 %v4417_v44  ;;  %4555 = vmatprep.subr.mxu1 %v4419_v42  ;;  %v4385_v44 = vld [vmem:[#allocation8 + $0xe8] sm:$0xff]  ;;  %v4387_v42 = vld [vmem:[#allocation8 + $0xf8] sm:$0xff] }
 0x8c1   : > { %4485 = vmatpush1.msra.mxu0 %v4416_v49  ;;  %4556 = vmatpush1.msra.mxu1 %v4418_v3  ;;  %v4384_v49 = vld [vmem:[#allocation8 + $0xe0] sm:$0xff]  ;;  %v4386_v3 = vld [vmem:[#allocation8 + $0xf0] sm:$0xff] }
 0x8c2   : > { %4486 = vmatprep.subr.mxu0 %v4413_v41  ;;  %4557 = vmatprep.subr.mxu1 %v4415_v14  ;;  %v4381_v41 = vld [vmem:[#allocation8 + $0xc8] sm:$0xff]  ;;  %v4383_v14 = vld [vmem:[#allocation8 + $0xd8] sm:$0xff] }
 0x8c3   : > { %4487 = vmatpush1.msra.mxu0 %v4412_v35  ;;  %4558 = vmatpush1.msra.mxu1 %v4414_v53  ;;  %v4380_v35 = vld [vmem:[#allocation8 + $0xc0] sm:$0xff]  ;;  %v4382_v53 = vld [vmem:[#allocation8 + $0xd0] sm:$0xff] }
 0x8c4   : > { %4488 = vmatprep.subr.mxu0 %v4409_v32  ;;  %4559 = vmatprep.subr.mxu1 %v4411_v18  ;;  %v4377_v32 = vld [vmem:[#allocation8 + $0xa8] sm:$0xff]  ;;  %v4379_v18 = vld [vmem:[#allocation8 + $0xb8] sm:$0xff] }
 0x8c5   : > { %4489 = vmatpush1.msra.mxu0 %v4408_v23  ;;  %4560 = vmatpush1.msra.mxu1 %v4410_v6  ;;  %v4376_v23 = vld [vmem:[#allocation8 + $0xa0] sm:$0xff]  ;;  %v4378_v6 = vld [vmem:[#allocation8 + $0xb0] sm:$0xff] }
 0x8c6   : > { %4490 = vmatprep.subr.mxu0 %v4405_v61  ;;  %4561 = vmatprep.subr.mxu1 %v4407_v20  ;;  %v4373_v61 = vld [vmem:[#allocation8 + $0x88] sm:$0xff]  ;;  %v4375_v20 = vld [vmem:[#allocation8 + $0x98] sm:$0xff] }
 0x8c7   : > { %4491 = vmatpush1.msra.mxu0 %v4404_v58  ;;  %4562 = vmatpush1.msra.mxu1 %v4406_v45  ;;  %v4372_v58 = vld [vmem:[#allocation8 + $0x80] sm:$0xff]  ;;  %v4374_v45 = vld [vmem:[#allocation8 + $0x90] sm:$0xff] }
 0x8c8   : > { %4492 = vmatprep.subr.mxu0 %v4401_v62  ;;  %4563 = vmatprep.subr.mxu1 %v4403_v10  ;;  %v4369_v62 = vld [vmem:[#allocation8 + $0x68] sm:$0xff]  ;;  %v4371_v10 = vld [vmem:[#allocation8 + $0x78] sm:$0xff] }
 0x8c9   : > { %4493 = vmatpush1.msra.mxu0 %v4400_v52  ;;  %4564 = vmatpush1.msra.mxu1 %v4402_v63  ;;  %v4368_v52 = vld [vmem:[#allocation8 + $0x60] sm:$0xff]  ;;  %v4370_v63 = vld [vmem:[#allocation8 + $0x70] sm:$0xff] }
 0x8ca   : > { %4494 = vmatprep.subr.mxu0 %v4397_v43  ;;  %4565 = vmatprep.subr.mxu1 %v4399_v2  ;;  %v4365_v43 = vld [vmem:[#allocation8 + $0x48] sm:$0xff]  ;;  %v4367_v2 = vld [vmem:[#allocation8 + $0x58] sm:$0xff] }
 0x8cb   : > { %4495 = vmatpush1.msra.mxu0 %v4396_v12  ;;  %4566 = vmatpush1.msra.mxu1 %v4398_v15  ;;  %v4364_v12 = vld [vmem:[#allocation8 + $0x40] sm:$0xff]  ;;  %v4366_v15 = vld [vmem:[#allocation8 + $0x50] sm:$0xff] }
 0x8cc   : > { %4496 = vmatprep.subr.mxu0 %v4393_v16  ;;  %4567 = vmatprep.subr.mxu1 %v4395_v39  ;;  %v4361_v16 = vld [vmem:[#allocation8 + $0x28] sm:$0xff]  ;;  %v4363_v39 = vld [vmem:[#allocation8 + $0x38] sm:$0xff] }
 0x8cd   : > { %4497 = vmatpush1.msra.mxu0 %v4392_v29  ;;  %4568 = vmatpush1.msra.mxu1 %v4394_v1  ;;  %v4360_v29 = vld [vmem:[#allocation8 + $0x20] sm:$0xff]  ;;  %v4362_v1 = vld [vmem:[#allocation8 + $0x30] sm:$0xff] }
 0x8ce   : > { %4498 = vmatprep.subr.mxu0 %v4389_v38  ;;  %4569 = vmatprep.subr.mxu1 %v4391_v36  ;;  %v4357_v38 = vld [vmem:[#allocation8 + $0x8] sm:$0xff]  ;;  %v4359_v36 = vld [vmem:[#allocation8 + $0x18] sm:$0xff] }
 0x8cf   : > { %4499 = vmatpush1.msra.mxu0 %v4388_v30  ;;  %4570 = vmatpush1.msra.mxu1 %v4390_v48  ;;  %v4356_v30 = vld [vmem:[#allocation8] sm:$0xff]  ;;  %v4358_v48 = vld [vmem:[#allocation8 + $0x10] sm:$0xff] }
 0x8d0   : > { %4500 = vmatprep.subr.mxu0 %v4385_v44  ;;  %4571 = vmatprep.subr.mxu1 %v4387_v42  ;;  %v4481_v44 = vld [vmem:[#allocation8 + $0x3e8] sm:$0xff]  ;;  %v4483_v42 = vld [vmem:[#allocation8 + $0x3f8] sm:$0xff] }
 0x8d1   : > { %4501 = vmatpush1.msra.mxu0 %v4384_v49  ;;  %4572 = vmatpush1.msra.mxu1 %v4386_v3  ;;  %v4480_v49 = vld [vmem:[#allocation8 + $0x3e0] sm:$0xff]  ;;  %v4482_v3 = vld [vmem:[#allocation8 + $0x3f0] sm:$0xff] }
 0x8d2   : > { %4502 = vmatprep.subr.mxu0 %v4381_v41  ;;  %4573 = vmatprep.subr.mxu1 %v4383_v14  ;;  %v4477_v41 = vld [vmem:[#allocation8 + $0x3c8] sm:$0xff]  ;;  %v4479_v14 = vld [vmem:[#allocation8 + $0x3d8] sm:$0xff] }
 0x8d3   : > { %4503 = vmatpush1.msra.mxu0 %v4380_v35  ;;  %4574 = vmatpush1.msra.mxu1 %v4382_v53  ;;  %v4476_v35 = vld [vmem:[#allocation8 + $0x3c0] sm:$0xff]  ;;  %v4478_v53 = vld [vmem:[#allocation8 + $0x3d0] sm:$0xff] }
 0x8d4   : > { %4504 = vmatprep.subr.mxu0 %v4377_v32  ;;  %4575 = vmatprep.subr.mxu1 %v4379_v18  ;;  %v4473_v32 = vld [vmem:[#allocation8 + $0x3a8] sm:$0xff]  ;;  %v4475_v18 = vld [vmem:[#allocation8 + $0x3b8] sm:$0xff] }
 0x8d5   : > { %4505 = vmatpush1.msra.mxu0 %v4376_v23  ;;  %4576 = vmatpush1.msra.mxu1 %v4378_v6  ;;  %v4472_v23 = vld [vmem:[#allocation8 + $0x3a0] sm:$0xff]  ;;  %v4474_v6 = vld [vmem:[#allocation8 + $0x3b0] sm:$0xff] }
 0x8d6   : > { %4506 = vmatprep.subr.mxu0 %v4373_v61  ;;  %4577 = vmatprep.subr.mxu1 %v4375_v20  ;;  %v4469_v61 = vld [vmem:[#allocation8 + $0x388] sm:$0xff]  ;;  %v4471_v20 = vld [vmem:[#allocation8 + $0x398] sm:$0xff] }
 0x8d7   : > { %4507 = vmatpush1.msra.mxu0 %v4372_v58  ;;  %4578 = vmatpush1.msra.mxu1 %v4374_v45  ;;  %v4468_v58 = vld [vmem:[#allocation8 + $0x380] sm:$0xff]  ;;  %v4470_v45 = vld [vmem:[#allocation8 + $0x390] sm:$0xff] }
 0x8d8   : > { %4508 = vmatprep.subr.mxu0 %v4369_v62  ;;  %4579 = vmatprep.subr.mxu1 %v4371_v10  ;;  %v4465_v62 = vld [vmem:[#allocation8 + $0x368] sm:$0xff]  ;;  %v4467_v10 = vld [vmem:[#allocation8 + $0x378] sm:$0xff] }
 0x8d9   : > { %4509 = vmatpush1.msra.mxu0 %v4368_v52  ;;  %4580 = vmatpush1.msra.mxu1 %v4370_v63  ;;  %v4464_v52 = vld [vmem:[#allocation8 + $0x360] sm:$0xff]  ;;  %v4466_v63 = vld [vmem:[#allocation8 + $0x370] sm:$0xff] }
 0x8da   : > { %4510 = vmatprep.subr.mxu0 %v4365_v43  ;;  %4581 = vmatprep.subr.mxu1 %v4367_v2  ;;  %v4461_v43 = vld [vmem:[#allocation8 + $0x348] sm:$0xff]  ;;  %v4463_v2 = vld [vmem:[#allocation8 + $0x358] sm:$0xff] }
 0x8db   : > { %4511 = vmatpush1.msra.mxu0 %v4364_v12  ;;  %4582 = vmatpush1.msra.mxu1 %v4366_v15  ;;  %v4460_v12 = vld [vmem:[#allocation8 + $0x340] sm:$0xff]  ;;  %v4462_v15 = vld [vmem:[#allocation8 + $0x350] sm:$0xff] }
 0x8dc   : > { %4512 = vmatprep.subr.mxu0 %v4361_v16  ;;  %4583 = vmatprep.subr.mxu1 %v4363_v39  ;;  %v4457_v16 = vld [vmem:[#allocation8 + $0x328] sm:$0xff]  ;;  %v4459_v39 = vld [vmem:[#allocation8 + $0x338] sm:$0xff] }
 0x8dd   : > { %4513 = vmatpush1.msra.mxu0 %v4360_v29  ;;  %4584 = vmatpush1.msra.mxu1 %v4362_v1  ;;  %v4456_v29 = vld [vmem:[#allocation8 + $0x320] sm:$0xff]  ;;  %v4458_v1 = vld [vmem:[#allocation8 + $0x330] sm:$0xff] }
 0x8de   : > { %4514 = vmatprep.subr.mxu0 %v4357_v38  ;;  %4585 = vmatprep.subr.mxu1 %v4359_v36  ;;  %v4453_v38 = vld [vmem:[#allocation8 + $0x308] sm:$0xff]  ;;  %v4455_v36 = vld [vmem:[#allocation8 + $0x318] sm:$0xff] }
 0x8df   : > { %4515 = vmatpush1.msra.mxu0 %v4356_v30  ;;  %4586 = vmatpush1.msra.mxu1 %v4358_v48  ;;  %v4452_v30 = vld [vmem:[#allocation8 + $0x300] sm:$0xff]  ;;  %v4454_v48 = vld [vmem:[#allocation8 + $0x310] sm:$0xff] }
 0x8e0   : > { %4516 = vmatprep.subr.mxu0 %v4481_v44  ;;  %4587 = vmatprep.subr.mxu1 %v4483_v42  ;;  %v4449_v44 = vld [vmem:[#allocation8 + $0x2e8] sm:$0xff]  ;;  %v4451_v42 = vld [vmem:[#allocation8 + $0x2f8] sm:$0xff] }
 0x8e1   : > { %4517 = vmatpush2.msra.mxu0 %v4480_v49  ;;  %4588 = vmatpush2.msra.mxu1 %v4482_v3  ;;  %v4448_v49 = vld [vmem:[#allocation8 + $0x2e0] sm:$0xff]  ;;  %v4450_v3 = vld [vmem:[#allocation8 + $0x2f0] sm:$0xff] }
 0x8e2   : > { %4518 = vmatprep.subr.mxu0 %v4477_v41  ;;  %4589 = vmatprep.subr.mxu1 %v4479_v14  ;;  %v4445_v41 = vld [vmem:[#allocation8 + $0x2c8] sm:$0xff]  ;;  %v4447_v14 = vld [vmem:[#allocation8 + $0x2d8] sm:$0xff] }
 0x8e3   : > { %4519 = vmatpush2.msra.mxu0 %v4476_v35  ;;  %4590 = vmatpush2.msra.mxu1 %v4478_v53  ;;  %v4444_v35 = vld [vmem:[#allocation8 + $0x2c0] sm:$0xff]  ;;  %v4446_v53 = vld [vmem:[#allocation8 + $0x2d0] sm:$0xff] }
 0x8e4   : > { %4520 = vmatprep.subr.mxu0 %v4473_v32  ;;  %4591 = vmatprep.subr.mxu1 %v4475_v18  ;;  %v4441_v32 = vld [vmem:[#allocation8 + $0x2a8] sm:$0xff]  ;;  %v4443_v18 = vld [vmem:[#allocation8 + $0x2b8] sm:$0xff] }
 0x8e5   : > { %4521 = vmatpush2.msra.mxu0 %v4472_v23  ;;  %4592 = vmatpush2.msra.mxu1 %v4474_v6  ;;  %v4440_v23 = vld [vmem:[#allocation8 + $0x2a0] sm:$0xff]  ;;  %v4442_v6 = vld [vmem:[#allocation8 + $0x2b0] sm:$0xff] }
 0x8e6   : > { %4522 = vmatprep.subr.mxu0 %v4469_v61  ;;  %4593 = vmatprep.subr.mxu1 %v4471_v20  ;;  %v4437_v61 = vld [vmem:[#allocation8 + $0x288] sm:$0xff]  ;;  %v4439_v20 = vld [vmem:[#allocation8 + $0x298] sm:$0xff] }
 0x8e7   : > { %4523 = vmatpush2.msra.mxu0 %v4468_v58  ;;  %4594 = vmatpush2.msra.mxu1 %v4470_v45  ;;  %v4436_v58 = vld [vmem:[#allocation8 + $0x280] sm:$0xff]  ;;  %v4438_v45 = vld [vmem:[#allocation8 + $0x290] sm:$0xff] }
 0x8e8   : > { %4524 = vmatprep.subr.mxu0 %v4465_v62  ;;  %4595 = vmatprep.subr.mxu1 %v4467_v10  ;;  %v4433_v62 = vld [vmem:[#allocation8 + $0x268] sm:$0xff]  ;;  %v4435_v10 = vld [vmem:[#allocation8 + $0x278] sm:$0xff] }
 0x8e9   : > { %4525 = vmatpush2.msra.mxu0 %v4464_v52  ;;  %4596 = vmatpush2.msra.mxu1 %v4466_v63  ;;  %v4432_v52 = vld [vmem:[#allocation8 + $0x260] sm:$0xff]  ;;  %v4434_v63 = vld [vmem:[#allocation8 + $0x270] sm:$0xff] }
 0x8ea   : > { %4526 = vmatprep.subr.mxu0 %v4461_v43  ;;  %4597 = vmatprep.subr.mxu1 %v4463_v2  ;;  %v4429_v43 = vld [vmem:[#allocation8 + $0x248] sm:$0xff]  ;;  %v4431_v2 = vld [vmem:[#allocation8 + $0x258] sm:$0xff] }
 0x8eb   : > { %4527 = vmatpush2.msra.mxu0 %v4460_v12  ;;  %4598 = vmatpush2.msra.mxu1 %v4462_v15  ;;  %v4428_v12 = vld [vmem:[#allocation8 + $0x240] sm:$0xff]  ;;  %v4430_v15 = vld [vmem:[#allocation8 + $0x250] sm:$0xff] }
 0x8ec   : > { %4528 = vmatprep.subr.mxu0 %v4457_v16  ;;  %4599 = vmatprep.subr.mxu1 %v4459_v39  ;;  %v4425_v16 = vld [vmem:[#allocation8 + $0x228] sm:$0xff]  ;;  %v4427_v39 = vld [vmem:[#allocation8 + $0x238] sm:$0xff] }
 0x8ed   : > { %4529 = vmatpush2.msra.mxu0 %v4456_v29  ;;  %4600 = vmatpush2.msra.mxu1 %v4458_v1  ;;  %v4424_v29 = vld [vmem:[#allocation8 + $0x220] sm:$0xff]  ;;  %v4426_v1 = vld [vmem:[#allocation8 + $0x230] sm:$0xff] }
 0x8ee   : > { %4530 = vmatprep.subr.mxu0 %v4453_v38  ;;  %4601 = vmatprep.subr.mxu1 %v4455_v36  ;;  %v4421_v38 = vld [vmem:[#allocation8 + $0x208] sm:$0xff]  ;;  %v4423_v36 = vld [vmem:[#allocation8 + $0x218] sm:$0xff] }
 0x8ef   : > { %4531 = vmatpush2.msra.mxu0 %v4452_v30  ;;  %4602 = vmatpush2.msra.mxu1 %v4454_v48  ;;  %v4420_v30 = vld [vmem:[#allocation8 + $0x200] sm:$0xff]  ;;  %v4422_v48 = vld [vmem:[#allocation8 + $0x210] sm:$0xff] }
 0x8f0   : > { %4532 = vmatprep.subr.mxu0 %v4449_v44  ;;  %4603 = vmatprep.subr.mxu1 %v4451_v42  ;;  %v4711_v44 = vld [vmem:[#allocation10 + $0x1e8] sm:$0xff]  ;;  %v4713_v42 = vld [vmem:[#allocation10 + $0x1f8] sm:$0xff] }
 0x8f1   : > { %4533 = vmatpush2.msra.mxu0 %v4448_v49  ;;  %4604 = vmatpush2.msra.mxu1 %v4450_v3 }
 0x8f2   : > { %4534 = vmatprep.subr.mxu0 %v4445_v41  ;;  %4605 = vmatprep.subr.mxu1 %v4447_v14 }
 0x8f3   : > { %4535 = vmatpush2.msra.mxu0 %v4444_v35  ;;  %4606 = vmatpush2.msra.mxu1 %v4446_v53 }
 0x8f4   : > { %4536 = vmatprep.subr.mxu0 %v4441_v32  ;;  %4607 = vmatprep.subr.mxu1 %v4443_v18 }
 0x8f5   : > { %4537 = vmatpush2.msra.mxu0 %v4440_v23  ;;  %4608 = vmatpush2.msra.mxu1 %v4442_v6 }
 0x8f6   : > { %4538 = vmatprep.subr.mxu0 %v4437_v61  ;;  %4609 = vmatprep.subr.mxu1 %v4439_v20 }
 0x8f7   : > { %4539 = vmatpush2.msra.mxu0 %v4436_v58  ;;  %4610 = vmatpush2.msra.mxu1 %v4438_v45 }
 0x8f8   : > { %4540 = vmatprep.subr.mxu0 %v4433_v62  ;;  %4611 = vmatprep.subr.mxu1 %v4435_v10 }
 0x8f9   : > { %4541 = vmatpush2.msra.mxu0 %v4432_v52  ;;  %4612 = vmatpush2.msra.mxu1 %v4434_v63 }
 0x8fa   : > { %4542 = vmatprep.subr.mxu0 %v4429_v43  ;;  %4613 = vmatprep.subr.mxu1 %v4431_v2 }
 0x8fb   : > { %4543 = vmatpush2.msra.mxu0 %v4428_v12  ;;  %4614 = vmatpush2.msra.mxu1 %v4430_v15 }
 0x8fc   : > { %4544 = vmatprep.subr.mxu0 %v4425_v16  ;;  %4615 = vmatprep.subr.mxu1 %v4427_v39 }
 0x8fd   : > { %4545 = vmatpush2.msra.mxu0 %v4424_v29  ;;  %4616 = vmatpush2.msra.mxu1 %v4426_v1 }
 0x8fe   : > { %4546 = vmatprep.subr.mxu0 %v4421_v38  ;;  %4617 = vmatprep.subr.mxu1 %v4423_v36 }
 0x8ff   : > { %4547 = vmatpush2.msra.mxu0 %v4420_v30  ;;  %4618 = vmatpush2.msra.mxu1 %v4422_v48 }
 0x900   : > { %4778 = vmatprep.subr.mxu0 %v4711_v44  ;;  %4849 = vmatprep.subr.mxu1 %v4713_v42 }
 0x95d   : > { %v4013_v49 = vpop.f32.mrf.mxu0  ;;  %v4084_v32 = vpop.f32.mrf.mxu1 }
 0x95e   : > { %v4014_v14 = vadd.f32 %v4013_v49, %v8767_v28  ;;  %v4085_v15 = vadd.f32 %v4084_v32, %v8774_v17 }
 0x95f   : > { %v4015_v3 = vpop.f32.mrf.mxu0  ;;  %v4086_v61 = vpop.f32.mrf.mxu1 }
 0x960   : > { %v4016_v41 = vadd.f32 %v4015_v3, %v8764_v34  ;;  %v7748_v53 = vmul.f32 -1.442695, %v4014_v14 }
 0x962   : > { %v7749_v35 = vmul.f32 -1.442695, %v4016_v41 }
 0x964   : > { %8077 = vpow2.f32 %v7749_v35 }
 0x965   : > { %8079 = vpow2.f32 %v7748_v53 }
 0x971   : > { %v8078_v10 = vpop.eup %8077 }
 0x972   : > { %v8080_v63 = vpop.eup %8079  ;;  %v4098_v43 = vadd.f32 1.0, %v8078_v10  ;;  %v4710_v10 = vld [vmem:[#allocation10 + $0x1e0] sm:$0xff] }
 0x973   : > { %v4092_v12 = vadd.f32 1.0, %v8080_v63  ;;  %v4709_v63 = vld [vmem:[#allocation10 + $0x1d8] sm:$0xff] }
 0x97e   : > { %v4252_v18 = vpop.f32.mrf.mxu0  ;;  %v4323_v45 = vpop.f32.mrf.mxu1 }
 0x97f   : > { %v4328_v23 = vadd.f32 %v4252_v18, %v8698_v22  ;;  %v4087_v22 = vadd.f32 %v4086_v61, %v8777_v19  ;;  %v4330_v16 = vadd.f32 %v4323_v45, %v8651_v47 }
 0x980   : > { %v4254_v6 = vpop.f32.mrf.mxu0  ;;  %v4325_v52 = vpop.f32.mrf.mxu1 }
 0x981   : > { %v7751_v20 = vmul.f32 -1.442695, %v4328_v23  ;;  %v4329_v58 = vadd.f32 %v4254_v6, %v8701_v25  ;;  %v4331_v2 = vadd.f32 %v4325_v52, %v8656_v51  ;;  %v7750_v29 = vmul.f32 -1.442695, %v4087_v22  ;;  %v4712_v52 = vld [vmem:[#allocation10 + $0x1f0] sm:$0xff]  ;;  %v4702_v22 = vld [vmem:[#allocation10 + $0x1a0] sm:$0xff] }
 0x983   : > { %8081 = vpow2.f32 %v7751_v20  ;;  %v7752_v62 = vmul.f32 -1.442695, %v4329_v58  ;;  %v7753_v39 = vmul.f32 -1.442695, %v4331_v2  ;;  %v4708_v2 = vld [vmem:[#allocation10 + $0x1d0] sm:$0xff] }
 0x985   : > { %8083 = vpow2.f32 %v7752_v62 }
 0x986   : > { %8085 = vrcp.f32 %v4098_v43  ;;  %v4706_v43 = vld [vmem:[#allocation10 + $0x1c0] sm:$0xff] }
 0x987   : > { %8087 = vrcp.f32 %v4092_v12  ;;  %v4703_v12 = vld [vmem:[#allocation10 + $0x1a8] sm:$0xff] }
 0x988   : > { %8089 = vtanh.f32 %v4085_v15  ;;  %v4705_v15 = vld [vmem:[#allocation10 + $0x1b8] sm:$0xff] }
 0x989   : > { %8091 = vtanh.f32 %v4330_v16  ;;  %v4704_v16 = vld [vmem:[#allocation10 + $0x1b0] sm:$0xff] }
 0x98a   : > { %8093 = vpow2.f32 %v7753_v39  ;;  %v4699_v39 = vld [vmem:[#allocation10 + $0x188] sm:$0xff] }
 0x990   : > { %v8082_v25 = vpop.eup %8081 }
 0x991   : > { %v4335_v1 = vadd.f32 1.0, %v8082_v25  ;;  %v4701_v25 = vld [vmem:[#allocation10 + $0x198] sm:$0xff] }
 0x992   : > { %v8084_v38 = vpop.eup %8083 }
 0x993   : > { %8095 = vrcp.f32 %v4335_v1  ;;  %v4341_v36 = vadd.f32 1.0, %v8084_v38  ;;  %v8086_v51 = vpop.eup %8085  ;;  %v4700_v1 = vld [vmem:[#allocation10 + $0x190] sm:$0xff]  ;;  %v4695_v38 = vld [vmem:[#allocation10 + $0x168] sm:$0xff] }
 0x994   : > { %8097 = vpow2.f32 %v7750_v29  ;;  %v8088_v30 = vpop.eup %8087  ;;  %v4108_v44 = vmul.f32 %v8086_v51, %v8867_v24  ;;  %v4698_v29 = vld [vmem:[#allocation10 + $0x180] sm:$0xff] }
 0x995   : > { %8099 = vrcp.f32 %v4341_v36  ;;  %v8090_v48 = vpop.eup %8089  ;;  %v4697_v36 = vld [vmem:[#allocation10 + $0x178] sm:$0xff]  ;;  %v4694_v51 = vld [vmem:[#allocation10 + $0x160] sm:$0xff] }
 0x996   : > { %v8092_v42 = vpop.eup %8091  ;;  %v4109_v49 = vmul.f32 %v8090_v48, %v8088_v30  ;;  %v4696_v30 = vld [vmem:[#allocation10 + $0x170] sm:$0xff]  ;;  %v4691_v48 = vld [vmem:[#allocation10 + $0x148] sm:$0xff] }
 0x997   : > { %v8094_v47 = vpop.eup %8093 }
 0x998   : > { %v8909_v35 = vadd.f32 %v4109_v49, %v4108_v44  ;;  %v4348_v32 = vadd.f32 1.0, %v8094_v47  ;;  %v4693_v44 = vld [vmem:[#allocation10 + $0x158] sm:$0xff]  ;;  %v4692_v47 = vld [vmem:[#allocation10 + $0x150] sm:$0xff]  ;;  %v4687_v49 = vld [vmem:[#allocation10 + $0x128] sm:$0xff] }
 0x99a   : > { %8101 = vtanh.f32 %v8909_v35 }
 0x99b   : > { %8103 = vrcp.f32 %v4348_v32  ;;  %v4685_v32 = vld [vmem:[#allocation10 + $0x118] sm:$0xff] }
 0x9a0   : > { %v8096_v3 = vpop.eup %8095 }
 0x9a1   : > { %v8098_v41 = vpop.eup %8097  ;;  %v4352_v14 = vmul.f32 %v8096_v3, %v8092_v42  ;;  %v4690_v42 = vld [vmem:[#allocation10 + $0x140] sm:$0xff]  ;;  %v4689_v3 = vld [vmem:[#allocation10 + $0x138] sm:$0xff] }
 0x9a2   : > { %v8100_v53 = vpop.eup %8099  ;;  %v4105_v23 = vadd.f32 1.0, %v8098_v41  ;;  %v4686_v41 = vld [vmem:[#allocation10 + $0x120] sm:$0xff] }
 0x9a3   : > { %v4351_v18 = vmul.f32 %v8100_v53, %v8870_v27  ;;  %v4707_v27 = vld [vmem:[#allocation10 + $0x1c8] sm:$0xff] }
 0x9a4   : > { %v4683_v53 = vld [vmem:[#allocation10 + $0x108] sm:$0xff] }
 0x9a5   : > { %v8912_v6 = vadd.f32 %v4352_v14, %v4351_v18  ;;  %v4688_v14 = vld [vmem:[#allocation10 + $0x130] sm:$0xff]  ;;  %v4682_v18 = vld [vmem:[#allocation10 + $0x100] sm:$0xff] }
 0x9a7   : > { %8105 = vtanh.f32 %v8912_v6  ;;  %v8102_v24 = vpop.eup %8101 }
 0x9a8   : > { %8107 = vrcp.f32 %v4105_v23  ;;  %v8104_v61 = vpop.eup %8103  ;;  %v4684_v23 = vld [vmem:[#allocation10 + $0x110] sm:$0xff] }
 0x9b4   : > { %v8106_v20 = vpop.eup %8105 }
 0x9b5   : > { %v8108_v58 = vpop.eup %8107  ;;  %v8916_v45 = vmul.f32 %v8106_v20, %v8104_v61  ;;  %v4681_v61 = vld [vmem:[#allocation10 + $0xf8] sm:$0xff]  ;;  %v4678_v20 = vld [vmem:[#allocation10 + $0xe0] sm:$0xff] }
 0x9b6   : > { %v8918_v62 = vmul.f32 %v8108_v58, %v8102_v24  ;;  %v4679_v24 = vld [vmem:[#allocation10 + $0xe8] sm:$0xff]  ;;  %v4680_v58 = vld [vmem:[#allocation10 + $0xf0] sm:$0xff] }
 0x9b7   : > { %4549 = vmatmul.mubr.f32.vlgmr.msra.gmra.mxu0 %v8916_v45  ;;  %4620 = vmatmul.mubr.f32.vlgmr.msra.gmra.mxu1 %v8916_v45 }
 0x9b8   : > { %4842 = vmatprep.mubr.f32.mxu0 %v8918_v62  ;;  %4913 = vmatprep.mubr.f32.mxu1 %v8918_v62 }
 0x9b9   : > { %4779 = vmatpush1.msra.mxu0 %v4710_v10  ;;  %4850 = vmatpush1.msra.mxu1 %v4712_v52  ;;  %v4675_v10 = vld [vmem:[#allocation10 + $0xc8] sm:$0xff]  ;;  %v4677_v52 = vld [vmem:[#allocation10 + $0xd8] sm:$0xff] }
 0x9ba   : > { %4780 = vmatprep.subr.mxu0 %v4707_v27  ;;  %4851 = vmatprep.subr.mxu1 %v4709_v63  ;;  %v4674_v27 = vld [vmem:[#allocation10 + $0xc0] sm:$0xff]  ;;  %v4676_v63 = vld [vmem:[#allocation10 + $0xd0] sm:$0xff] }
 0x9bb   : > { %4781 = vmatpush1.msra.mxu0 %v4706_v43  ;;  %4852 = vmatpush1.msra.mxu1 %v4708_v2  ;;  %v4671_v43 = vld [vmem:[#allocation10 + $0xa8] sm:$0xff]  ;;  %v4673_v2 = vld [vmem:[#allocation10 + $0xb8] sm:$0xff] }
 0x9bc   : > { %4782 = vmatprep.subr.mxu0 %v4703_v12  ;;  %4853 = vmatprep.subr.mxu1 %v4705_v15  ;;  %v4670_v12 = vld [vmem:[#allocation10 + $0xa0] sm:$0xff]  ;;  %v4672_v15 = vld [vmem:[#allocation10 + $0xb0] sm:$0xff] }
 0x9bd   : > { %4783 = vmatpush1.msra.mxu0 %v4702_v22  ;;  %4854 = vmatpush1.msra.mxu1 %v4704_v16  ;;  %v4667_v22 = vld [vmem:[#allocation10 + $0x88] sm:$0xff]  ;;  %v4669_v16 = vld [vmem:[#allocation10 + $0x98] sm:$0xff] }
 0x9be   : > { %4784 = vmatprep.subr.mxu0 %v4699_v39  ;;  %4855 = vmatprep.subr.mxu1 %v4701_v25  ;;  %v4666_v39 = vld [vmem:[#allocation10 + $0x80] sm:$0xff]  ;;  %v4668_v25 = vld [vmem:[#allocation10 + $0x90] sm:$0xff] }
 0x9bf   : > { %4785 = vmatpush1.msra.mxu0 %v4698_v29  ;;  %4856 = vmatpush1.msra.mxu1 %v4700_v1  ;;  %v4663_v29 = vld [vmem:[#allocation10 + $0x68] sm:$0xff]  ;;  %v4665_v1 = vld [vmem:[#allocation10 + $0x78] sm:$0xff] }
 0x9c0   : > { %4786 = vmatprep.subr.mxu0 %v4695_v38  ;;  %4857 = vmatprep.subr.mxu1 %v4697_v36  ;;  %v4662_v38 = vld [vmem:[#allocation10 + $0x60] sm:$0xff]  ;;  %v4664_v36 = vld [vmem:[#allocation10 + $0x70] sm:$0xff] }
 0x9c1   : > { %4787 = vmatpush1.msra.mxu0 %v4694_v51  ;;  %4858 = vmatpush1.msra.mxu1 %v4696_v30  ;;  %v4659_v51 = vld [vmem:[#allocation10 + $0x48] sm:$0xff]  ;;  %v4661_v30 = vld [vmem:[#allocation10 + $0x58] sm:$0xff] }
 0x9c2   : > { %4788 = vmatprep.subr.mxu0 %v4691_v48  ;;  %4859 = vmatprep.subr.mxu1 %v4693_v44  ;;  %v4658_v48 = vld [vmem:[#allocation10 + $0x40] sm:$0xff]  ;;  %v4660_v44 = vld [vmem:[#allocation10 + $0x50] sm:$0xff] }
 0x9c3   : > { %4789 = vmatpush1.msra.mxu0 %v4690_v42  ;;  %4860 = vmatpush1.msra.mxu1 %v4692_v47  ;;  %v4655_v42 = vld [vmem:[#allocation10 + $0x28] sm:$0xff]  ;;  %v4657_v47 = vld [vmem:[#allocation10 + $0x38] sm:$0xff] }
 0x9c4   : > { %4790 = vmatprep.subr.mxu0 %v4687_v49  ;;  %4861 = vmatprep.subr.mxu1 %v4689_v3  ;;  %v4654_v49 = vld [vmem:[#allocation10 + $0x20] sm:$0xff]  ;;  %v4656_v3 = vld [vmem:[#allocation10 + $0x30] sm:$0xff] }
 0x9c5   : > { %4791 = vmatpush1.msra.mxu0 %v4686_v41  ;;  %4862 = vmatpush1.msra.mxu1 %v4688_v14  ;;  %v4651_v41 = vld [vmem:[#allocation10 + $0x8] sm:$0xff]  ;;  %v4653_v14 = vld [vmem:[#allocation10 + $0x18] sm:$0xff] }
 0x9c6   : > { %4792 = vmatprep.subr.mxu0 %v4683_v53  ;;  %4863 = vmatprep.subr.mxu1 %v4685_v32  ;;  %v4650_v53 = vld [vmem:[#allocation10] sm:$0xff]  ;;  %v4652_v32 = vld [vmem:[#allocation10 + $0x10] sm:$0xff] }
 0x9c7   : > { %4793 = vmatpush1.msra.mxu0 %v4682_v18  ;;  %4864 = vmatpush1.msra.mxu1 %v4684_v23  ;;  %v4775_v18 = vld [vmem:[#allocation10 + $0x3e8] sm:$0xff]  ;;  %v4777_v23 = vld [vmem:[#allocation10 + $0x3f8] sm:$0xff] }
 0x9c8   : > { %4794 = vmatprep.subr.mxu0 %v4679_v24  ;;  %4865 = vmatprep.subr.mxu1 %v4681_v61  ;;  %v4774_v24 = vld [vmem:[#allocation10 + $0x3e0] sm:$0xff]  ;;  %v4776_v61 = vld [vmem:[#allocation10 + $0x3f0] sm:$0xff] }
 0x9c9   : > { %4795 = vmatpush1.msra.mxu0 %v4678_v20  ;;  %4866 = vmatpush1.msra.mxu1 %v4680_v58  ;;  %v4771_v20 = vld [vmem:[#allocation10 + $0x3c8] sm:$0xff]  ;;  %v4773_v58 = vld [vmem:[#allocation10 + $0x3d8] sm:$0xff] }
 0x9ca   : > { %4796 = vmatprep.subr.mxu0 %v4675_v10  ;;  %4867 = vmatprep.subr.mxu1 %v4677_v52  ;;  %v4770_v10 = vld [vmem:[#allocation10 + $0x3c0] sm:$0xff]  ;;  %v4772_v52 = vld [vmem:[#allocation10 + $0x3d0] sm:$0xff] }
 0x9cb   : > { %4797 = vmatpush1.msra.mxu0 %v4674_v27  ;;  %4868 = vmatpush1.msra.mxu1 %v4676_v63  ;;  %v4767_v27 = vld [vmem:[#allocation10 + $0x3a8] sm:$0xff]  ;;  %v4769_v63 = vld [vmem:[#allocation10 + $0x3b8] sm:$0xff] }
 0x9cc   : > { %4798 = vmatprep.subr.mxu0 %v4671_v43  ;;  %4869 = vmatprep.subr.mxu1 %v4673_v2  ;;  %v4766_v43 = vld [vmem:[#allocation10 + $0x3a0] sm:$0xff]  ;;  %v4768_v2 = vld [vmem:[#allocation10 + $0x3b0] sm:$0xff] }
 0x9cd   : > { %4799 = vmatpush1.msra.mxu0 %v4670_v12  ;;  %4870 = vmatpush1.msra.mxu1 %v4672_v15  ;;  %v4763_v12 = vld [vmem:[#allocation10 + $0x388] sm:$0xff]  ;;  %v4765_v15 = vld [vmem:[#allocation10 + $0x398] sm:$0xff] }
 0x9ce   : > { %4800 = vmatprep.subr.mxu0 %v4667_v22  ;;  %4871 = vmatprep.subr.mxu1 %v4669_v16  ;;  %v4762_v22 = vld [vmem:[#allocation10 + $0x380] sm:$0xff]  ;;  %v4764_v16 = vld [vmem:[#allocation10 + $0x390] sm:$0xff] }
 0x9cf   : > { %4801 = vmatpush1.msra.mxu0 %v4666_v39  ;;  %4872 = vmatpush1.msra.mxu1 %v4668_v25  ;;  %v4759_v39 = vld [vmem:[#allocation10 + $0x368] sm:$0xff]  ;;  %v4761_v25 = vld [vmem:[#allocation10 + $0x378] sm:$0xff] }
 0x9d0   : > { %4802 = vmatprep.subr.mxu0 %v4663_v29  ;;  %4873 = vmatprep.subr.mxu1 %v4665_v1  ;;  %v4758_v29 = vld [vmem:[#allocation10 + $0x360] sm:$0xff]  ;;  %v4760_v1 = vld [vmem:[#allocation10 + $0x370] sm:$0xff] }
 0x9d1   : > { %4803 = vmatpush1.msra.mxu0 %v4662_v38  ;;  %4874 = vmatpush1.msra.mxu1 %v4664_v36  ;;  %v4755_v38 = vld [vmem:[#allocation10 + $0x348] sm:$0xff]  ;;  %v4757_v36 = vld [vmem:[#allocation10 + $0x358] sm:$0xff] }
 0x9d2   : > { %4804 = vmatprep.subr.mxu0 %v4659_v51  ;;  %4875 = vmatprep.subr.mxu1 %v4661_v30  ;;  %v4754_v51 = vld [vmem:[#allocation10 + $0x340] sm:$0xff]  ;;  %v4756_v30 = vld [vmem:[#allocation10 + $0x350] sm:$0xff] }
 0x9d3   : > { %4805 = vmatpush1.msra.mxu0 %v4658_v48  ;;  %4876 = vmatpush1.msra.mxu1 %v4660_v44  ;;  %v4751_v48 = vld [vmem:[#allocation10 + $0x328] sm:$0xff]  ;;  %v4753_v44 = vld [vmem:[#allocation10 + $0x338] sm:$0xff] }
 0x9d4   : > { %4806 = vmatprep.subr.mxu0 %v4655_v42  ;;  %4877 = vmatprep.subr.mxu1 %v4657_v47  ;;  %v4750_v42 = vld [vmem:[#allocation10 + $0x320] sm:$0xff]  ;;  %v4752_v47 = vld [vmem:[#allocation10 + $0x330] sm:$0xff] }
 0x9d5   : > { %4807 = vmatpush1.msra.mxu0 %v4654_v49  ;;  %4878 = vmatpush1.msra.mxu1 %v4656_v3  ;;  %v4747_v49 = vld [vmem:[#allocation10 + $0x308] sm:$0xff]  ;;  %v4749_v3 = vld [vmem:[#allocation10 + $0x318] sm:$0xff] }
 0x9d6   : > { %4808 = vmatprep.subr.mxu0 %v4651_v41  ;;  %4879 = vmatprep.subr.mxu1 %v4653_v14  ;;  %v4746_v41 = vld [vmem:[#allocation10 + $0x300] sm:$0xff]  ;;  %v4748_v14 = vld [vmem:[#allocation10 + $0x310] sm:$0xff] }
 0x9d7   : > { %4809 = vmatpush1.msra.mxu0 %v4650_v53  ;;  %4880 = vmatpush1.msra.mxu1 %v4652_v32  ;;  %v4743_v53 = vld [vmem:[#allocation10 + $0x2e8] sm:$0xff]  ;;  %v4745_v32 = vld [vmem:[#allocation10 + $0x2f8] sm:$0xff] }
 0x9d8   : > { %4810 = vmatprep.subr.mxu0 %v4775_v18  ;;  %4881 = vmatprep.subr.mxu1 %v4777_v23  ;;  %v4742_v18 = vld [vmem:[#allocation10 + $0x2e0] sm:$0xff]  ;;  %v4744_v23 = vld [vmem:[#allocation10 + $0x2f0] sm:$0xff] }
 0x9d9   : > { %4811 = vmatpush2.msra.mxu0 %v4774_v24  ;;  %4882 = vmatpush2.msra.mxu1 %v4776_v61  ;;  %v4739_v24 = vld [vmem:[#allocation10 + $0x2c8] sm:$0xff]  ;;  %v4741_v61 = vld [vmem:[#allocation10 + $0x2d8] sm:$0xff] }
 0x9da   : > { %4812 = vmatprep.subr.mxu0 %v4771_v20  ;;  %4883 = vmatprep.subr.mxu1 %v4773_v58  ;;  %v4738_v20 = vld [vmem:[#allocation10 + $0x2c0] sm:$0xff]  ;;  %v4740_v58 = vld [vmem:[#allocation10 + $0x2d0] sm:$0xff] }
 0x9db   : > { %4813 = vmatpush2.msra.mxu0 %v4770_v10  ;;  %4884 = vmatpush2.msra.mxu1 %v4772_v52  ;;  %v4735_v10 = vld [vmem:[#allocation10 + $0x2a8] sm:$0xff]  ;;  %v4737_v52 = vld [vmem:[#allocation10 + $0x2b8] sm:$0xff] }
 0x9dc   : > { %4814 = vmatprep.subr.mxu0 %v4767_v27  ;;  %4885 = vmatprep.subr.mxu1 %v4769_v63  ;;  %v4734_v27 = vld [vmem:[#allocation10 + $0x2a0] sm:$0xff]  ;;  %v4736_v63 = vld [vmem:[#allocation10 + $0x2b0] sm:$0xff] }
 0x9dd   : > { %4815 = vmatpush2.msra.mxu0 %v4766_v43  ;;  %4886 = vmatpush2.msra.mxu1 %v4768_v2  ;;  %v4731_v43 = vld [vmem:[#allocation10 + $0x288] sm:$0xff]  ;;  %v4733_v2 = vld [vmem:[#allocation10 + $0x298] sm:$0xff] }
 0x9de   : > { %4816 = vmatprep.subr.mxu0 %v4763_v12  ;;  %4887 = vmatprep.subr.mxu1 %v4765_v15  ;;  %v4730_v12 = vld [vmem:[#allocation10 + $0x280] sm:$0xff]  ;;  %v4732_v15 = vld [vmem:[#allocation10 + $0x290] sm:$0xff] }
 0x9df   : > { %4817 = vmatpush2.msra.mxu0 %v4762_v22  ;;  %4888 = vmatpush2.msra.mxu1 %v4764_v16  ;;  %v4727_v22 = vld [vmem:[#allocation10 + $0x268] sm:$0xff]  ;;  %v4729_v16 = vld [vmem:[#allocation10 + $0x278] sm:$0xff] }
 0x9e0   : > { %4818 = vmatprep.subr.mxu0 %v4759_v39  ;;  %4889 = vmatprep.subr.mxu1 %v4761_v25  ;;  %v4726_v39 = vld [vmem:[#allocation10 + $0x260] sm:$0xff]  ;;  %v4728_v25 = vld [vmem:[#allocation10 + $0x270] sm:$0xff] }
 0x9e1   : > { %4819 = vmatpush2.msra.mxu0 %v4758_v29  ;;  %4890 = vmatpush2.msra.mxu1 %v4760_v1  ;;  %v4723_v29 = vld [vmem:[#allocation10 + $0x248] sm:$0xff]  ;;  %v4725_v1 = vld [vmem:[#allocation10 + $0x258] sm:$0xff] }
 0x9e2   : > { %4820 = vmatprep.subr.mxu0 %v4755_v38  ;;  %4891 = vmatprep.subr.mxu1 %v4757_v36  ;;  %v4722_v38 = vld [vmem:[#allocation10 + $0x240] sm:$0xff]  ;;  %v4724_v36 = vld [vmem:[#allocation10 + $0x250] sm:$0xff] }
 0x9e3   : > { %4821 = vmatpush2.msra.mxu0 %v4754_v51  ;;  %4892 = vmatpush2.msra.mxu1 %v4756_v30  ;;  %v4719_v51 = vld [vmem:[#allocation10 + $0x228] sm:$0xff]  ;;  %v4721_v30 = vld [vmem:[#allocation10 + $0x238] sm:$0xff] }
 0x9e4   : > { %4822 = vmatprep.subr.mxu0 %v4751_v48  ;;  %4893 = vmatprep.subr.mxu1 %v4753_v44  ;;  %v4718_v48 = vld [vmem:[#allocation10 + $0x220] sm:$0xff]  ;;  %v4720_v44 = vld [vmem:[#allocation10 + $0x230] sm:$0xff] }
 0x9e5   : > { %4823 = vmatpush2.msra.mxu0 %v4750_v42  ;;  %4894 = vmatpush2.msra.mxu1 %v4752_v47  ;;  %v4715_v42 = vld [vmem:[#allocation10 + $0x208] sm:$0xff]  ;;  %v4717_v47 = vld [vmem:[#allocation10 + $0x218] sm:$0xff] }
 0x9e6   : > { %4824 = vmatprep.subr.mxu0 %v4747_v49  ;;  %4895 = vmatprep.subr.mxu1 %v4749_v3  ;;  %v4714_v49 = vld [vmem:[#allocation10 + $0x200] sm:$0xff]  ;;  %v4716_v3 = vld [vmem:[#allocation10 + $0x210] sm:$0xff] }
 0x9e7   : > { %4825 = vmatpush2.msra.mxu0 %v4746_v41  ;;  %4896 = vmatpush2.msra.mxu1 %v4748_v14  ;;  %v5014_v41 = vld [vmem:[#allocation6 + $0x1e8] sm:$0xff]  ;;  %v5016_v14 = vld [vmem:[#allocation6 + $0x1f8] sm:$0xff] }
 0x9e8   : > { %4826 = vmatprep.subr.mxu0 %v4743_v53  ;;  %4897 = vmatprep.subr.mxu1 %v4745_v32 }
 0x9e9   : > { %4827 = vmatpush2.msra.mxu0 %v4742_v18  ;;  %4898 = vmatpush2.msra.mxu1 %v4744_v23 }
 0x9ea   : > { %4828 = vmatprep.subr.mxu0 %v4739_v24  ;;  %4899 = vmatprep.subr.mxu1 %v4741_v61 }
 0x9eb   : > { %4829 = vmatpush2.msra.mxu0 %v4738_v20  ;;  %4900 = vmatpush2.msra.mxu1 %v4740_v58 }
 0x9ec   : > { %4830 = vmatprep.subr.mxu0 %v4735_v10  ;;  %4901 = vmatprep.subr.mxu1 %v4737_v52 }
 0x9ed   : > { %4831 = vmatpush2.msra.mxu0 %v4734_v27  ;;  %4902 = vmatpush2.msra.mxu1 %v4736_v63 }
 0x9ee   : > { %4832 = vmatprep.subr.mxu0 %v4731_v43  ;;  %4903 = vmatprep.subr.mxu1 %v4733_v2 }
 0x9ef   : > { %4833 = vmatpush2.msra.mxu0 %v4730_v12  ;;  %4904 = vmatpush2.msra.mxu1 %v4732_v15 }
 0x9f0   : > { %4834 = vmatprep.subr.mxu0 %v4727_v22  ;;  %4905 = vmatprep.subr.mxu1 %v4729_v16 }
 0x9f1   : > { %4835 = vmatpush2.msra.mxu0 %v4726_v39  ;;  %4906 = vmatpush2.msra.mxu1 %v4728_v25 }
 0x9f2   : > { %4836 = vmatprep.subr.mxu0 %v4723_v29  ;;  %4907 = vmatprep.subr.mxu1 %v4725_v1 }
 0x9f3   : > { %4837 = vmatpush2.msra.mxu0 %v4722_v38  ;;  %4908 = vmatpush2.msra.mxu1 %v4724_v36 }
 0x9f4   : > { %4838 = vmatprep.subr.mxu0 %v4719_v51  ;;  %4909 = vmatprep.subr.mxu1 %v4721_v30 }
 0x9f5   : > { %4839 = vmatpush2.msra.mxu0 %v4718_v48  ;;  %4910 = vmatpush2.msra.mxu1 %v4720_v44  ;;  %v5013_v48 = vld [vmem:[#allocation6 + $0x1e0] sm:$0xff]  ;;  %v5015_v44 = vld [vmem:[#allocation6 + $0x1f0] sm:$0xff] }
 0x9f6   : > { %4840 = vmatprep.subr.mxu0 %v4715_v42  ;;  %4911 = vmatprep.subr.mxu1 %v4717_v47  ;;  %v5010_v42 = vld [vmem:[#allocation6 + $0x1c8] sm:$0xff]  ;;  %v5012_v47 = vld [vmem:[#allocation6 + $0x1d8] sm:$0xff] }
 0x9f7   : > { %4841 = vmatpush2.msra.mxu0 %v4714_v49  ;;  %4912 = vmatpush2.msra.mxu1 %v4716_v3  ;;  %v5009_v49 = vld [vmem:[#allocation6 + $0x1c0] sm:$0xff]  ;;  %v5011_v3 = vld [vmem:[#allocation6 + $0x1d0] sm:$0xff] }
 0x9f8   : > { %5017 = vmatprep.subr.mxu0 %v5014_v41  ;;  %5088 = vmatprep.subr.mxu1 %v5016_v14  ;;  %v5008_v41 = vld [vmem:[#allocation6 + $0x1b8] sm:$0xff]  ;;  %v5005_v14 = vld [vmem:[#allocation6 + $0x1a0] sm:$0xff] }
 0xa77   : > { %v4550_v53 = vpop.f32.mrf.mxu0  ;;  %v4621_v61 = vpop.f32.mrf.mxu1 }
 0xa78   : > { %v4551_v32 = vadd.f32 %v4550_v53, %v8730_v7  ;;  %v4622_v63 = vadd.f32 %v4621_v61, %v8744_v31  ;;  %v5007_v53 = vld [vmem:[#allocation6 + $0x1b0] sm:$0xff]  ;;  %v4998_v61 = vld [vmem:[#allocation6 + $0x168] sm:$0xff] }
 0xa79   : > { %v4552_v18 = vpop.f32.mrf.mxu0  ;;  %v4623_v58 = vpop.f32.mrf.mxu1 }
 0xa7a   : > { %v7754_v23 = vmul.f32 -1.442695, %v4551_v32  ;;  %v4553_v24 = vadd.f32 %v4552_v18, %v8735_v11  ;;  %v4624_v10 = vadd.f32 %v4623_v58, %v8740_v21  ;;  %v5002_v32 = vld [vmem:[#allocation6 + $0x188] sm:$0xff]  ;;  %v5004_v18 = vld [vmem:[#allocation6 + $0x198] sm:$0xff]  ;;  %v4997_v58 = vld [vmem:[#allocation6 + $0x160] sm:$0xff] }
 0xa7c   : > { %8109 = vpow2.f32 %v7754_v23  ;;  %v7755_v20 = vmul.f32 -1.442695, %v4553_v24  ;;  %v7756_v52 = vmul.f32 -1.442695, %v4624_v10  ;;  %v5001_v23 = vld [vmem:[#allocation6 + $0x180] sm:$0xff]  ;;  %v5003_v24 = vld [vmem:[#allocation6 + $0x190] sm:$0xff] }
 0xa7d   : > { %v4999_v10 = vld [vmem:[#allocation6 + $0x170] sm:$0xff] }
 0xa7e   : > { %8111 = vpow2.f32 %v7755_v20  ;;  %v5000_v20 = vld [vmem:[#allocation6 + $0x178] sm:$0xff] }
 0xa7f   : > { %8113 = vpow2.f32 %v7756_v52  ;;  %v4994_v52 = vld [vmem:[#allocation6 + $0x148] sm:$0xff] }
 0xa89   : > { %v8110_v27 = vpop.eup %8109 }
 0xa8a   : > { %v4629_v43 = vadd.f32 1.0, %v8110_v27  ;;  %v4996_v27 = vld [vmem:[#allocation6 + $0x158] sm:$0xff] }
 0xa8b   : > { %v8112_v2 = vpop.eup %8111 }
 0xa8c   : > { %8115 = vrcp.f32 %v4629_v43  ;;  %v4635_v12 = vadd.f32 1.0, %v8112_v2  ;;  %v8114_v15 = vpop.eup %8113  ;;  %v4995_v43 = vld [vmem:[#allocation6 + $0x150] sm:$0xff]  ;;  %v4990_v2 = vld [vmem:[#allocation6 + $0x128] sm:$0xff] }
 0xa8d   : > { %8117 = vtanh.f32 %v4622_v63  ;;  %v4642_v25 = vadd.f32 1.0, %v8114_v15  ;;  %v4993_v63 = vld [vmem:[#allocation6 + $0x140] sm:$0xff] }
 0xa8e   : > { %8119 = vrcp.f32 %v4635_v12  ;;  %v4992_v12 = vld [vmem:[#allocation6 + $0x138] sm:$0xff]  ;;  %v4989_v15 = vld [vmem:[#allocation6 + $0x120] sm:$0xff] }
 0xa8f   : > { %8121 = vrcp.f32 %v4642_v25  ;;  %v4985_v25 = vld [vmem:[#allocation6 + $0x100] sm:$0xff] }
 0xa99   : > { %v8116_v22 = vpop.eup %8115 }
 0xa9a   : > { %v8118_v16 = vpop.eup %8117 }
 0xa9b   : > { %v8120_v39 = vpop.eup %8119  ;;  %v4646_v29 = vmul.f32 %v8118_v16, %v8116_v22  ;;  %v4991_v22 = vld [vmem:[#allocation6 + $0x130] sm:$0xff]  ;;  %v4986_v16 = vld [vmem:[#allocation6 + $0x108] sm:$0xff] }
 0xa9c   : > { %v4645_v1 = vmul.f32 %v8120_v39, %v8887_v56  ;;  %v8122_v36 = vpop.eup %8121  ;;  %v5006_v56 = vld [vmem:[#allocation6 + $0x1a8] sm:$0xff]  ;;  %v4988_v39 = vld [vmem:[#allocation6 + $0x118] sm:$0xff] }
 0xa9e   : > { %v8929_v38 = vadd.f32 %v4646_v29, %v4645_v1  ;;  %v4987_v29 = vld [vmem:[#allocation6 + $0x110] sm:$0xff]  ;;  %v4982_v1 = vld [vmem:[#allocation6 + $0xe8] sm:$0xff] }
 0xaa0   : > { %8123 = vtanh.f32 %v8929_v38 }
 0xaad   : > { %v8124_v51 = vpop.eup %8123 }
 0xaae   : > { %v8932_v30 = vmul.f32 %v8124_v51, %v8122_v36  ;;  %v4984_v36 = vld [vmem:[#allocation6 + $0xf8] sm:$0xff]  ;;  %v4981_v51 = vld [vmem:[#allocation6 + $0xe0] sm:$0xff] }
 0xab0   : > { %4843 = vmatmul.mubr.f32.vlgmr.msra.gmra.mxu0 %v8932_v30  ;;  %4914 = vmatmul.mubr.f32.vlgmr.msra.gmra.mxu1 %v8932_v30 }
 0xab1   : > { %5018 = vmatpush1.msra.mxu0 %v5013_v48  ;;  %5089 = vmatpush1.msra.mxu1 %v5015_v44  ;;  %v4983_v48 = vld [vmem:[#allocation6 + $0xf0] sm:$0xff]  ;;  %v4978_v44 = vld [vmem:[#allocation6 + $0xc8] sm:$0xff] }
 0xab2   : > { %5019 = vmatprep.subr.mxu0 %v5010_v42  ;;  %5090 = vmatprep.subr.mxu1 %v5012_v47  ;;  %v4980_v42 = vld [vmem:[#allocation6 + $0xd8] sm:$0xff]  ;;  %v4977_v47 = vld [vmem:[#allocation6 + $0xc0] sm:$0xff] }
 0xab3   : > { %5020 = vmatpush1.msra.mxu0 %v5009_v49  ;;  %5091 = vmatpush1.msra.mxu1 %v5011_v3  ;;  %v4979_v49 = vld [vmem:[#allocation6 + $0xd0] sm:$0xff]  ;;  %v4974_v3 = vld [vmem:[#allocation6 + $0xa8] sm:$0xff] }
 0xab4   : > { %5021 = vmatprep.subr.mxu0 %v5006_v56  ;;  %5092 = vmatprep.subr.mxu1 %v5008_v41  ;;  %v4976_v56 = vld [vmem:[#allocation6 + $0xb8] sm:$0xff]  ;;  %v4973_v41 = vld [vmem:[#allocation6 + $0xa0] sm:$0xff] }
 0xab5   : > { %5022 = vmatpush1.msra.mxu0 %v5005_v14  ;;  %5093 = vmatpush1.msra.mxu1 %v5007_v53  ;;  %v4975_v14 = vld [vmem:[#allocation6 + $0xb0] sm:$0xff]  ;;  %v4970_v53 = vld [vmem:[#allocation6 + $0x88] sm:$0xff] }
 0xab6   : > { %5023 = vmatprep.subr.mxu0 %v5002_v32  ;;  %5094 = vmatprep.subr.mxu1 %v5004_v18  ;;  %v4972_v32 = vld [vmem:[#allocation6 + $0x98] sm:$0xff]  ;;  %v4969_v18 = vld [vmem:[#allocation6 + $0x80] sm:$0xff] }
 0xab7   : > { %5024 = vmatpush1.msra.mxu0 %v5001_v23  ;;  %5095 = vmatpush1.msra.mxu1 %v5003_v24  ;;  %v4971_v23 = vld [vmem:[#allocation6 + $0x90] sm:$0xff]  ;;  %v4966_v24 = vld [vmem:[#allocation6 + $0x68] sm:$0xff] }
 0xab8   : > { %5025 = vmatprep.subr.mxu0 %v4998_v61  ;;  %5096 = vmatprep.subr.mxu1 %v5000_v20  ;;  %v4968_v61 = vld [vmem:[#allocation6 + $0x78] sm:$0xff]  ;;  %v4965_v20 = vld [vmem:[#allocation6 + $0x60] sm:$0xff] }
 0xab9   : > { %5026 = vmatpush1.msra.mxu0 %v4997_v58  ;;  %5097 = vmatpush1.msra.mxu1 %v4999_v10  ;;  %v4967_v58 = vld [vmem:[#allocation6 + $0x70] sm:$0xff]  ;;  %v4962_v10 = vld [vmem:[#allocation6 + $0x48] sm:$0xff] }
 0xaba   : > { %5027 = vmatprep.subr.mxu0 %v4994_v52  ;;  %5098 = vmatprep.subr.mxu1 %v4996_v27  ;;  %v4964_v52 = vld [vmem:[#allocation6 + $0x58] sm:$0xff]  ;;  %v4961_v27 = vld [vmem:[#allocation6 + $0x40] sm:$0xff] }
 0xabb   : > { %5028 = vmatpush1.msra.mxu0 %v4993_v63  ;;  %5099 = vmatpush1.msra.mxu1 %v4995_v43  ;;  %v4963_v63 = vld [vmem:[#allocation6 + $0x50] sm:$0xff]  ;;  %v4958_v43 = vld [vmem:[#allocation6 + $0x28] sm:$0xff] }
 0xabc   : > { %5029 = vmatprep.subr.mxu0 %v4990_v2  ;;  %5100 = vmatprep.subr.mxu1 %v4992_v12  ;;  %v4960_v2 = vld [vmem:[#allocation6 + $0x38] sm:$0xff]  ;;  %v4957_v12 = vld [vmem:[#allocation6 + $0x20] sm:$0xff] }
 0xabd   : > { %5030 = vmatpush1.msra.mxu0 %v4989_v15  ;;  %5101 = vmatpush1.msra.mxu1 %v4991_v22  ;;  %v4959_v15 = vld [vmem:[#allocation6 + $0x30] sm:$0xff]  ;;  %v4954_v22 = vld [vmem:[#allocation6 + $0x8] sm:$0xff] }
 0xabe   : > { %5031 = vmatprep.subr.mxu0 %v4986_v16  ;;  %5102 = vmatprep.subr.mxu1 %v4988_v39  ;;  %v4956_v16 = vld [vmem:[#allocation6 + $0x18] sm:$0xff]  ;;  %v4953_v39 = vld [vmem:[#allocation6] sm:$0xff] }
 0xabf   : > { %5032 = vmatpush1.msra.mxu0 %v4985_v25  ;;  %5103 = vmatpush1.msra.mxu1 %v4987_v29  ;;  %v4955_v25 = vld [vmem:[#allocation6 + $0x10] sm:$0xff]  ;;  %v5248_v29 = vld [vmem:[#allocation8 + $0x1e8] sm:$0xff] }
 0xac0   : > { %5033 = vmatprep.subr.mxu0 %v4982_v1  ;;  %5104 = vmatprep.subr.mxu1 %v4984_v36  ;;  %v5250_v1 = vld [vmem:[#allocation8 + $0x1f8] sm:$0xff]  ;;  %v5247_v36 = vld [vmem:[#allocation8 + $0x1e0] sm:$0xff] }
 0xac1   : > { %5034 = vmatpush1.msra.mxu0 %v4981_v51  ;;  %5105 = vmatpush1.msra.mxu1 %v4983_v48  ;;  %v5249_v51 = vld [vmem:[#allocation8 + $0x1f0] sm:$0xff]  ;;  %v5244_v48 = vld [vmem:[#allocation8 + $0x1c8] sm:$0xff] }
 0xac2   : > { %5035 = vmatprep.subr.mxu0 %v4978_v44  ;;  %5106 = vmatprep.subr.mxu1 %v4980_v42  ;;  %v5246_v44 = vld [vmem:[#allocation8 + $0x1d8] sm:$0xff]  ;;  %v5243_v42 = vld [vmem:[#allocation8 + $0x1c0] sm:$0xff] }
 0xac3   : > { %5036 = vmatpush1.msra.mxu0 %v4977_v47  ;;  %5107 = vmatpush1.msra.mxu1 %v4979_v49  ;;  %v5245_v47 = vld [vmem:[#allocation8 + $0x1d0] sm:$0xff]  ;;  %v5242_v49 = vld [vmem:[#allocation8 + $0x1b8] sm:$0xff] }
 0xac4   : > { %5037 = vmatprep.subr.mxu0 %v4974_v3  ;;  %5108 = vmatprep.subr.mxu1 %v4976_v56  ;;  %v5241_v3 = vld [vmem:[#allocation8 + $0x1b0] sm:$0xff]  ;;  %v5236_v56 = vld [vmem:[#allocation8 + $0x188] sm:$0xff] }
 0xac5   : > { %5038 = vmatpush1.msra.mxu0 %v4973_v41  ;;  %5109 = vmatpush1.msra.mxu1 %v4975_v14  ;;  %v5238_v41 = vld [vmem:[#allocation8 + $0x198] sm:$0xff]  ;;  %v5235_v14 = vld [vmem:[#allocation8 + $0x180] sm:$0xff] }
 0xac6   : > { %5039 = vmatprep.subr.mxu0 %v4970_v53  ;;  %5110 = vmatprep.subr.mxu1 %v4972_v32  ;;  %v5237_v53 = vld [vmem:[#allocation8 + $0x190] sm:$0xff]  ;;  %v5232_v32 = vld [vmem:[#allocation8 + $0x168] sm:$0xff] }
 0xac7   : > { %5040 = vmatpush1.msra.mxu0 %v4969_v18  ;;  %5111 = vmatpush1.msra.mxu1 %v4971_v23  ;;  %v5234_v18 = vld [vmem:[#allocation8 + $0x178] sm:$0xff]  ;;  %v5231_v23 = vld [vmem:[#allocation8 + $0x160] sm:$0xff] }
 0xac8   : > { %5041 = vmatprep.subr.mxu0 %v4966_v24  ;;  %5112 = vmatprep.subr.mxu1 %v4968_v61  ;;  %v5233_v24 = vld [vmem:[#allocation8 + $0x170] sm:$0xff]  ;;  %v5228_v61 = vld [vmem:[#allocation8 + $0x148] sm:$0xff] }
 0xac9   : > { %5042 = vmatpush1.msra.mxu0 %v4965_v20  ;;  %5113 = vmatpush1.msra.mxu1 %v4967_v58  ;;  %v5230_v20 = vld [vmem:[#allocation8 + $0x158] sm:$0xff]  ;;  %v5227_v58 = vld [vmem:[#allocation8 + $0x140] sm:$0xff] }
 0xaca   : > { %5043 = vmatprep.subr.mxu0 %v4962_v10  ;;  %5114 = vmatprep.subr.mxu1 %v4964_v52  ;;  %v5229_v10 = vld [vmem:[#allocation8 + $0x150] sm:$0xff]  ;;  %v5224_v52 = vld [vmem:[#allocation8 + $0x128] sm:$0xff] }
 0xacb   : > { %5044 = vmatpush1.msra.mxu0 %v4961_v27  ;;  %5115 = vmatpush1.msra.mxu1 %v4963_v63  ;;  %v5226_v27 = vld [vmem:[#allocation8 + $0x138] sm:$0xff]  ;;  %v5223_v63 = vld [vmem:[#allocation8 + $0x120] sm:$0xff] }
 0xacc   : > { %5045 = vmatprep.subr.mxu0 %v4958_v43  ;;  %5116 = vmatprep.subr.mxu1 %v4960_v2  ;;  %v5225_v43 = vld [vmem:[#allocation8 + $0x130] sm:$0xff]  ;;  %v5220_v2 = vld [vmem:[#allocation8 + $0x108] sm:$0xff] }
 0xacd   : > { %5046 = vmatpush1.msra.mxu0 %v4957_v12  ;;  %5117 = vmatpush1.msra.mxu1 %v4959_v15  ;;  %v5222_v12 = vld [vmem:[#allocation8 + $0x118] sm:$0xff]  ;;  %v5219_v15 = vld [vmem:[#allocation8 + $0x100] sm:$0xff] }
 0xace   : > { %5047 = vmatprep.subr.mxu0 %v4954_v22  ;;  %5118 = vmatprep.subr.mxu1 %v4956_v16  ;;  %v5221_v22 = vld [vmem:[#allocation8 + $0x110] sm:$0xff]  ;;  %v5216_v16 = vld [vmem:[#allocation8 + $0xe8] sm:$0xff] }
 0xacf   : > { %5048 = vmatpush1.msra.mxu0 %v4953_v39  ;;  %5081 = vmatprep.mubr.f32.mxu0 %v8385_v5  ;;  %v5218_v39 = vld [vmem:[#allocation8 + $0xf8] sm:$0xff] }
 0xad0   : > { %5119 = vmatpush1.msra.mxu1 %v4955_v25  ;;  %5152 = vmatprep.mubr.f32.mxu1 %v8385_v5  ;;  %v5215_v25 = vld [vmem:[#allocation8 + $0xe0] sm:$0xff] }
 0xad1   : > { %5082 = vmatmul.mubr.f32.vlgmr.msra.gmra.mxu0 %v8916_v45  ;;  %5153 = vmatmul.mubr.f32.vlgmr.msra.gmra.mxu1 %v8916_v45  ;;  %v5240_v45 = vld [vmem:[#allocation8 + $0x1a8] sm:$0xff] }
 0xad2   : > { %5379 = vmatprep.mubr.f32.mxu0 %v8932_v30  ;;  %5450 = vmatprep.mubr.f32.mxu1 %v8932_v30  ;;  %v5239_v30 = vld [vmem:[#allocation8 + $0x1a0] sm:$0xff] }
 0xad3   : > { %5315 = vmatprep.subr.mxu0 %v5248_v29  ;;  %5386 = vmatprep.subr.mxu1 %v5250_v1  ;;  %v5217_v29 = vld [vmem:[#allocation8 + $0xf0] sm:$0xff]  ;;  %v5212_v1 = vld [vmem:[#allocation8 + $0xc8] sm:$0xff] }
 0xad4   : > { %5316 = vmatpush1.msra.mxu0 %v5247_v36  ;;  %5387 = vmatpush1.msra.mxu1 %v5249_v51  ;;  %v5214_v36 = vld [vmem:[#allocation8 + $0xd8] sm:$0xff]  ;;  %v5211_v51 = vld [vmem:[#allocation8 + $0xc0] sm:$0xff] }
 0xad5   : > { %5317 = vmatprep.subr.mxu0 %v5244_v48  ;;  %5388 = vmatprep.subr.mxu1 %v5246_v44  ;;  %v5213_v48 = vld [vmem:[#allocation8 + $0xd0] sm:$0xff]  ;;  %v5208_v44 = vld [vmem:[#allocation8 + $0xa8] sm:$0xff] }
 0xad6   : > { %5318 = vmatpush1.msra.mxu0 %v5243_v42  ;;  %5389 = vmatpush1.msra.mxu1 %v5245_v47  ;;  %v5210_v42 = vld [vmem:[#allocation8 + $0xb8] sm:$0xff]  ;;  %v5207_v47 = vld [vmem:[#allocation8 + $0xa0] sm:$0xff] }
 0xad7   : > { %5319 = vmatprep.subr.mxu0 %v5240_v45  ;;  %5390 = vmatprep.subr.mxu1 %v5242_v49  ;;  %v5209_v45 = vld [vmem:[#allocation8 + $0xb0] sm:$0xff]  ;;  %v5204_v49 = vld [vmem:[#allocation8 + $0x88] sm:$0xff] }
 0xad8   : > { %5320 = vmatpush1.msra.mxu0 %v5239_v30  ;;  %5391 = vmatpush1.msra.mxu1 %v5241_v3  ;;  %v5206_v30 = vld [vmem:[#allocation8 + $0x98] sm:$0xff]  ;;  %v5203_v3 = vld [vmem:[#allocation8 + $0x80] sm:$0xff] }
 0xad9   : > { %5321 = vmatprep.subr.mxu0 %v5236_v56  ;;  %5392 = vmatprep.subr.mxu1 %v5238_v41  ;;  %v5205_v56 = vld [vmem:[#allocation8 + $0x90] sm:$0xff]  ;;  %v5200_v41 = vld [vmem:[#allocation8 + $0x68] sm:$0xff] }
 0xada   : > { %5322 = vmatpush1.msra.mxu0 %v5235_v14  ;;  %5393 = vmatpush1.msra.mxu1 %v5237_v53  ;;  %v5202_v14 = vld [vmem:[#allocation8 + $0x78] sm:$0xff]  ;;  %v5199_v53 = vld [vmem:[#allocation8 + $0x60] sm:$0xff] }
 0xadb   : > { %5323 = vmatprep.subr.mxu0 %v5232_v32  ;;  %5394 = vmatprep.subr.mxu1 %v5234_v18  ;;  %v5201_v32 = vld [vmem:[#allocation8 + $0x70] sm:$0xff]  ;;  %v5196_v18 = vld [vmem:[#allocation8 + $0x48] sm:$0xff] }
 0xadc   : > { %5324 = vmatpush1.msra.mxu0 %v5231_v23  ;;  %5395 = vmatpush1.msra.mxu1 %v5233_v24  ;;  %v5198_v23 = vld [vmem:[#allocation8 + $0x58] sm:$0xff]  ;;  %v5195_v24 = vld [vmem:[#allocation8 + $0x40] sm:$0xff] }
 0xadd   : > { %5325 = vmatprep.subr.mxu0 %v5228_v61  ;;  %5396 = vmatprep.subr.mxu1 %v5230_v20  ;;  %v5197_v61 = vld [vmem:[#allocation8 + $0x50] sm:$0xff]  ;;  %v5192_v20 = vld [vmem:[#allocation8 + $0x28] sm:$0xff] }
 0xade   : > { %5326 = vmatpush1.msra.mxu0 %v5227_v58  ;;  %5397 = vmatpush1.msra.mxu1 %v5229_v10  ;;  %v5194_v58 = vld [vmem:[#allocation8 + $0x38] sm:$0xff]  ;;  %v5191_v10 = vld [vmem:[#allocation8 + $0x20] sm:$0xff] }
 0xadf   : > { %5327 = vmatprep.subr.mxu0 %v5224_v52  ;;  %5398 = vmatprep.subr.mxu1 %v5226_v27  ;;  %v5193_v52 = vld [vmem:[#allocation8 + $0x30] sm:$0xff]  ;;  %v5188_v27 = vld [vmem:[#allocation8 + $0x8] sm:$0xff] }
 0xae0   : > { %5328 = vmatpush1.msra.mxu0 %v5223_v63  ;;  %5399 = vmatpush1.msra.mxu1 %v5225_v43  ;;  %v5190_v63 = vld [vmem:[#allocation8 + $0x18] sm:$0xff]  ;;  %v5187_v43 = vld [vmem:[#allocation8] sm:$0xff] }
 0xae1   : > { %5329 = vmatprep.subr.mxu0 %v5220_v2  ;;  %5400 = vmatprep.subr.mxu1 %v5222_v12  ;;  %v5189_v2 = vld [vmem:[#allocation8 + $0x10] sm:$0xff]  ;;  %v5312_v12 = vld [vmem:[#allocation8 + $0x3e8] sm:$0xff] }
 0xae2   : > { %5330 = vmatpush1.msra.mxu0 %v5219_v15  ;;  %5401 = vmatpush1.msra.mxu1 %v5221_v22  ;;  %v5314_v15 = vld [vmem:[#allocation8 + $0x3f8] sm:$0xff]  ;;  %v5311_v22 = vld [vmem:[#allocation8 + $0x3e0] sm:$0xff] }
 0xae3   : > { %5331 = vmatprep.subr.mxu0 %v5216_v16  ;;  %5402 = vmatprep.subr.mxu1 %v5218_v39  ;;  %v5313_v16 = vld [vmem:[#allocation8 + $0x3f0] sm:$0xff]  ;;  %v5308_v39 = vld [vmem:[#allocation8 + $0x3c8] sm:$0xff] }
 0xae4   : > { %5332 = vmatpush1.msra.mxu0 %v5215_v25  ;;  %5403 = vmatpush1.msra.mxu1 %v5217_v29  ;;  %v5310_v25 = vld [vmem:[#allocation8 + $0x3d8] sm:$0xff]  ;;  %v5307_v29 = vld [vmem:[#allocation8 + $0x3c0] sm:$0xff] }
 0xae5   : > { %5333 = vmatprep.subr.mxu0 %v5212_v1  ;;  %5404 = vmatprep.subr.mxu1 %v5214_v36  ;;  %v5309_v1 = vld [vmem:[#allocation8 + $0x3d0] sm:$0xff]  ;;  %v5304_v36 = vld [vmem:[#allocation8 + $0x3a8] sm:$0xff] }
 0xae6   : > { %5334 = vmatpush1.msra.mxu0 %v5211_v51  ;;  %5405 = vmatpush1.msra.mxu1 %v5213_v48  ;;  %v5306_v51 = vld [vmem:[#allocation8 + $0x3b8] sm:$0xff]  ;;  %v5303_v48 = vld [vmem:[#allocation8 + $0x3a0] sm:$0xff] }
 0xae7   : > { %5335 = vmatprep.subr.mxu0 %v5208_v44  ;;  %5406 = vmatprep.subr.mxu1 %v5210_v42  ;;  %v5305_v44 = vld [vmem:[#allocation8 + $0x3b0] sm:$0xff]  ;;  %v5300_v42 = vld [vmem:[#allocation8 + $0x388] sm:$0xff] }
 0xae8   : > { %5336 = vmatpush1.msra.mxu0 %v5207_v47  ;;  %5407 = vmatpush1.msra.mxu1 %v5209_v45  ;;  %v5302_v47 = vld [vmem:[#allocation8 + $0x398] sm:$0xff]  ;;  %v5299_v45 = vld [vmem:[#allocation8 + $0x380] sm:$0xff] }
 0xae9   : > { %5337 = vmatprep.subr.mxu0 %v5204_v49  ;;  %5408 = vmatprep.subr.mxu1 %v5206_v30  ;;  %v5301_v49 = vld [vmem:[#allocation8 + $0x390] sm:$0xff]  ;;  %v5296_v30 = vld [vmem:[#allocation8 + $0x368] sm:$0xff] }
 0xaea   : > { %5338 = vmatpush1.msra.mxu0 %v5203_v3  ;;  %5409 = vmatpush1.msra.mxu1 %v5205_v56  ;;  %v5298_v3 = vld [vmem:[#allocation8 + $0x378] sm:$0xff]  ;;  %v5295_v56 = vld [vmem:[#allocation8 + $0x360] sm:$0xff] }
 0xaeb   : > { %5339 = vmatprep.subr.mxu0 %v5200_v41  ;;  %5410 = vmatprep.subr.mxu1 %v5202_v14  ;;  %v5297_v41 = vld [vmem:[#allocation8 + $0x370] sm:$0xff]  ;;  %v5292_v14 = vld [vmem:[#allocation8 + $0x348] sm:$0xff] }
 0xaec   : > { %5340 = vmatpush1.msra.mxu0 %v5199_v53  ;;  %5411 = vmatpush1.msra.mxu1 %v5201_v32  ;;  %v5294_v53 = vld [vmem:[#allocation8 + $0x358] sm:$0xff]  ;;  %v5291_v32 = vld [vmem:[#allocation8 + $0x340] sm:$0xff] }
 0xaed   : > { %5341 = vmatprep.subr.mxu0 %v5196_v18  ;;  %5412 = vmatprep.subr.mxu1 %v5198_v23  ;;  %v5293_v18 = vld [vmem:[#allocation8 + $0x350] sm:$0xff]  ;;  %v5288_v23 = vld [vmem:[#allocation8 + $0x328] sm:$0xff] }
 0xaee   : > { %5342 = vmatpush1.msra.mxu0 %v5195_v24  ;;  %5413 = vmatpush1.msra.mxu1 %v5197_v61  ;;  %v5290_v24 = vld [vmem:[#allocation8 + $0x338] sm:$0xff]  ;;  %v5287_v61 = vld [vmem:[#allocation8 + $0x320] sm:$0xff] }
 0xaef   : > { %5343 = vmatprep.subr.mxu0 %v5192_v20  ;;  %5414 = vmatprep.subr.mxu1 %v5194_v58  ;;  %v5289_v20 = vld [vmem:[#allocation8 + $0x330] sm:$0xff]  ;;  %v5284_v58 = vld [vmem:[#allocation8 + $0x308] sm:$0xff] }
 0xaf0   : > { %5344 = vmatpush1.msra.mxu0 %v5191_v10  ;;  %5415 = vmatpush1.msra.mxu1 %v5193_v52  ;;  %v5286_v10 = vld [vmem:[#allocation8 + $0x318] sm:$0xff]  ;;  %v5283_v52 = vld [vmem:[#allocation8 + $0x300] sm:$0xff] }
 0xaf1   : > { %5345 = vmatprep.subr.mxu0 %v5188_v27  ;;  %5416 = vmatprep.subr.mxu1 %v5190_v63  ;;  %v5285_v27 = vld [vmem:[#allocation8 + $0x310] sm:$0xff]  ;;  %v5280_v63 = vld [vmem:[#allocation8 + $0x2e8] sm:$0xff] }
 0xaf2   : > { %5346 = vmatpush1.msra.mxu0 %v5187_v43  ;;  %5417 = vmatpush1.msra.mxu1 %v5189_v2  ;;  %v5282_v43 = vld [vmem:[#allocation8 + $0x2f8] sm:$0xff]  ;;  %v5279_v2 = vld [vmem:[#allocation8 + $0x2e0] sm:$0xff] }
 0xaf3   : > { %5347 = vmatprep.subr.mxu0 %v5312_v12  ;;  %5418 = vmatprep.subr.mxu1 %v5314_v15  ;;  %v5281_v12 = vld [vmem:[#allocation8 + $0x2f0] sm:$0xff]  ;;  %v5276_v15 = vld [vmem:[#allocation8 + $0x2c8] sm:$0xff] }
 0xaf4   : > { %5348 = vmatpush2.msra.mxu0 %v5311_v22  ;;  %5419 = vmatpush2.msra.mxu1 %v5313_v16  ;;  %v5278_v22 = vld [vmem:[#allocation8 + $0x2d8] sm:$0xff]  ;;  %v5275_v16 = vld [vmem:[#allocation8 + $0x2c0] sm:$0xff] }
 0xaf5   : > { %5349 = vmatprep.subr.mxu0 %v5308_v39  ;;  %5420 = vmatprep.subr.mxu1 %v5310_v25  ;;  %v5277_v39 = vld [vmem:[#allocation8 + $0x2d0] sm:$0xff]  ;;  %v5272_v25 = vld [vmem:[#allocation8 + $0x2a8] sm:$0xff] }
 0xaf6   : > { %5350 = vmatpush2.msra.mxu0 %v5307_v29  ;;  %5421 = vmatpush2.msra.mxu1 %v5309_v1  ;;  %v5274_v29 = vld [vmem:[#allocation8 + $0x2b8] sm:$0xff]  ;;  %v5271_v1 = vld [vmem:[#allocation8 + $0x2a0] sm:$0xff] }
 0xaf7   : > { %5351 = vmatprep.subr.mxu0 %v5304_v36  ;;  %5422 = vmatprep.subr.mxu1 %v5306_v51  ;;  %v5273_v36 = vld [vmem:[#allocation8 + $0x2b0] sm:$0xff]  ;;  %v5268_v51 = vld [vmem:[#allocation8 + $0x288] sm:$0xff] }
 0xaf8   : > { %5352 = vmatpush2.msra.mxu0 %v5303_v48  ;;  %5423 = vmatpush2.msra.mxu1 %v5305_v44  ;;  %v5270_v48 = vld [vmem:[#allocation8 + $0x298] sm:$0xff]  ;;  %v5267_v44 = vld [vmem:[#allocation8 + $0x280] sm:$0xff] }
 0xaf9   : > { %5353 = vmatprep.subr.mxu0 %v5300_v42  ;;  %5424 = vmatprep.subr.mxu1 %v5302_v47  ;;  %v5269_v42 = vld [vmem:[#allocation8 + $0x290] sm:$0xff]  ;;  %v5264_v47 = vld [vmem:[#allocation8 + $0x268] sm:$0xff] }
 0xafa   : > { %5354 = vmatpush2.msra.mxu0 %v5299_v45  ;;  %5425 = vmatpush2.msra.mxu1 %v5301_v49  ;;  %v5266_v45 = vld [vmem:[#allocation8 + $0x278] sm:$0xff]  ;;  %v5263_v49 = vld [vmem:[#allocation8 + $0x260] sm:$0xff] }
 0xafb   : > { %5355 = vmatprep.subr.mxu0 %v5296_v30  ;;  %5426 = vmatprep.subr.mxu1 %v5298_v3  ;;  %v5265_v30 = vld [vmem:[#allocation8 + $0x270] sm:$0xff]  ;;  %v5260_v3 = vld [vmem:[#allocation8 + $0x248] sm:$0xff] }
 0xafc   : > { %5356 = vmatpush2.msra.mxu0 %v5295_v56  ;;  %5427 = vmatpush2.msra.mxu1 %v5297_v41  ;;  %v5262_v56 = vld [vmem:[#allocation8 + $0x258] sm:$0xff]  ;;  %v5259_v41 = vld [vmem:[#allocation8 + $0x240] sm:$0xff] }
 0xafd   : > { %5357 = vmatprep.subr.mxu0 %v5292_v14  ;;  %5428 = vmatprep.subr.mxu1 %v5294_v53  ;;  %v5261_v14 = vld [vmem:[#allocation8 + $0x250] sm:$0xff]  ;;  %v5256_v53 = vld [vmem:[#allocation8 + $0x228] sm:$0xff] }
 0xafe   : > { %5358 = vmatpush2.msra.mxu0 %v5291_v32  ;;  %5429 = vmatpush2.msra.mxu1 %v5293_v18  ;;  %v5258_v32 = vld [vmem:[#allocation8 + $0x238] sm:$0xff]  ;;  %v5255_v18 = vld [vmem:[#allocation8 + $0x220] sm:$0xff] }
 0xaff   : > { %5359 = vmatprep.subr.mxu0 %v5288_v23  ;;  %5430 = vmatprep.subr.mxu1 %v5290_v24  ;;  %v5257_v23 = vld [vmem:[#allocation8 + $0x230] sm:$0xff]  ;;  %v5252_v24 = vld [vmem:[#allocation8 + $0x208] sm:$0xff] }
 0xb00   : > { %5360 = vmatpush2.msra.mxu0 %v5287_v61  ;;  %5431 = vmatpush2.msra.mxu1 %v5289_v20  ;;  %v5254_v61 = vld [vmem:[#allocation8 + $0x218] sm:$0xff]  ;;  %v5251_v20 = vld [vmem:[#allocation8 + $0x200] sm:$0xff] }
 0xb01   : > { %5361 = vmatprep.subr.mxu0 %v5284_v58  ;;  %5432 = vmatprep.subr.mxu1 %v5286_v10  ;;  %v5253_v58 = vld [vmem:[#allocation8 + $0x210] sm:$0xff]  ;;  %v5542_v10 = vld [vmem:[#allocation10 + $0x1e8] sm:$0xff] }
 0xb02   : > { %5362 = vmatpush2.msra.mxu0 %v5283_v52  ;;  %5433 = vmatpush2.msra.mxu1 %v5285_v27  ;;  %v5544_v52 = vld [vmem:[#allocation10 + $0x1f8] sm:$0xff] }
 0xb03   : > { %5363 = vmatprep.subr.mxu0 %v5280_v63  ;;  %5434 = vmatprep.subr.mxu1 %v5282_v43 }
 0xb04   : > { %5364 = vmatpush2.msra.mxu0 %v5279_v2  ;;  %5435 = vmatpush2.msra.mxu1 %v5281_v12 }
 0xb05   : > { %5365 = vmatprep.subr.mxu0 %v5276_v15  ;;  %5436 = vmatprep.subr.mxu1 %v5278_v22 }
 0xb06   : > { %5366 = vmatpush2.msra.mxu0 %v5275_v16  ;;  %5437 = vmatpush2.msra.mxu1 %v5277_v39 }
 0xb07   : > { %5367 = vmatprep.subr.mxu0 %v5272_v25  ;;  %5438 = vmatprep.subr.mxu1 %v5274_v29 }
 0xb08   : > { %5368 = vmatpush2.msra.mxu0 %v5271_v1  ;;  %5439 = vmatpush2.msra.mxu1 %v5273_v36 }
 0xb09   : > { %5369 = vmatprep.subr.mxu0 %v5268_v51  ;;  %5440 = vmatprep.subr.mxu1 %v5270_v48 }
 0xb0a   : > { %5370 = vmatpush2.msra.mxu0 %v5267_v44  ;;  %5441 = vmatpush2.msra.mxu1 %v5269_v42 }
 0xb0b   : > { %5371 = vmatprep.subr.mxu0 %v5264_v47  ;;  %5442 = vmatprep.subr.mxu1 %v5266_v45 }
 0xb0c   : > { %5372 = vmatpush2.msra.mxu0 %v5263_v49  ;;  %5443 = vmatpush2.msra.mxu1 %v5265_v30 }
 0xb0d   : > { %5373 = vmatprep.subr.mxu0 %v5260_v3  ;;  %5444 = vmatprep.subr.mxu1 %v5262_v56 }
 0xb0e   : > { %5374 = vmatpush2.msra.mxu0 %v5259_v41  ;;  %5445 = vmatpush2.msra.mxu1 %v5261_v14 }
 0xb0f   : > { %5375 = vmatprep.subr.mxu0 %v5256_v53  ;;  %5446 = vmatprep.subr.mxu1 %v5258_v32 }
 0xb10   : > { %5376 = vmatpush2.msra.mxu0 %v5255_v18  ;;  %5447 = vmatpush2.msra.mxu1 %v5257_v23 }
 0xb11   : > { %5377 = vmatprep.subr.mxu0 %v5252_v24  ;;  %5448 = vmatprep.subr.mxu1 %v5254_v61 }
 0xb12   : > { %5378 = vmatpush2.msra.mxu0 %v5251_v20  ;;  %5449 = vmatpush2.msra.mxu1 %v5253_v58 }
 0xb13   : > { %5609 = vmatprep.subr.mxu0 %v5542_v10  ;;  %5680 = vmatprep.subr.mxu1 %v5544_v52 }
 0xb70   : > { %v4844_v27 = vpop.f32.mrf.mxu0  ;;  %v4915_v22 = vpop.f32.mrf.mxu1 }
 0xb71   : > { %v4845_v2 = vadd.f32 %v4844_v27, %v8767_v28  ;;  %v4916_v3 = vadd.f32 %v4915_v22, %v8774_v17 }
 0xb72   : > { %v4846_v63 = vpop.f32.mrf.mxu0  ;;  %v4917_v29 = vpop.f32.mrf.mxu1 }
 0xb73   : > { %v4847_v43 = vadd.f32 %v4846_v63, %v8764_v34  ;;  %v7757_v15 = vmul.f32 -1.442695, %v4845_v2 }
 0xb75   : > { %v7758_v12 = vmul.f32 -1.442695, %v4847_v43 }
 0xb77   : > { %8125 = vpow2.f32 %v7758_v12 }
 0xb78   : > { %8127 = vpow2.f32 %v7757_v15 }
 0xb84   : > { %v8126_v44 = vpop.eup %8125 }
 0xb85   : > { %v8128_v47 = vpop.eup %8127  ;;  %v4929_v45 = vadd.f32 1.0, %v8126_v44  ;;  %v5537_v44 = vld [vmem:[#allocation10 + $0x1c0] sm:$0xff] }
 0xb86   : > { %v4923_v30 = vadd.f32 1.0, %v8128_v47  ;;  %v5534_v47 = vld [vmem:[#allocation10 + $0x1a8] sm:$0xff] }
 0xb91   : > { %v5083_v16 = vpop.f32.mrf.mxu0  ;;  %v5154_v51 = vpop.f32.mrf.mxu1 }
 0xb92   : > { %v5159_v39 = vadd.f32 %v5083_v16, %v8703_v33  ;;  %v4918_v33 = vadd.f32 %v4917_v29, %v8777_v19  ;;  %v5161_v56 = vadd.f32 %v5154_v51, %v8661_v55  ;;  %v5543_v51 = vld [vmem:[#allocation10 + $0x1f0] sm:$0xff] }
 0xb93   : > { %v5085_v25 = vpop.f32.mrf.mxu0  ;;  %v5156_v42 = vpop.f32.mrf.mxu1 }
 0xb94   : > { %v7760_v1 = vmul.f32 -1.442695, %v5159_v39  ;;  %v5160_v36 = vadd.f32 %v5085_v25, %v8706_v40  ;;  %v5162_v49 = vadd.f32 %v5156_v42, %v8665_v59  ;;  %v7759_v14 = vmul.f32 -1.442695, %v4918_v33  ;;  %v5539_v42 = vld [vmem:[#allocation10 + $0x1d0] sm:$0xff]  ;;  %v5532_v33 = vld [vmem:[#allocation10 + $0x198] sm:$0xff] }
 0xb96   : > { %8129 = vpow2.f32 %v7760_v1  ;;  %v7761_v48 = vmul.f32 -1.442695, %v5160_v36  ;;  %v7762_v41 = vmul.f32 -1.442695, %v5162_v49  ;;  %v5541_v36 = vld [vmem:[#allocation10 + $0x1e0] sm:$0xff] }
 0xb97   : > { %v5533_v49 = vld [vmem:[#allocation10 + $0x1a0] sm:$0xff] }
 0xb98   : > { %8131 = vpow2.f32 %v7761_v48  ;;  %v5540_v48 = vld [vmem:[#allocation10 + $0x1d8] sm:$0xff] }
 0xb99   : > { %8133 = vrcp.f32 %v4929_v45  ;;  %v5536_v45 = vld [vmem:[#allocation10 + $0x1b8] sm:$0xff] }
 0xb9a   : > { %8135 = vrcp.f32 %v4923_v30  ;;  %v5535_v30 = vld [vmem:[#allocation10 + $0x1b0] sm:$0xff] }
 0xb9b   : > { %8137 = vtanh.f32 %v4916_v3  ;;  %v5530_v3 = vld [vmem:[#allocation10 + $0x188] sm:$0xff] }
 0xb9c   : > { %8139 = vtanh.f32 %v5161_v56  ;;  %v5529_v56 = vld [vmem:[#allocation10 + $0x180] sm:$0xff] }
 0xb9d   : > { %8141 = vpow2.f32 %v7762_v41  ;;  %v5531_v41 = vld [vmem:[#allocation10 + $0x190] sm:$0xff] }
 0xba3   : > { %v8130_v40 = vpop.eup %8129 }
 0xba4   : > { %v5166_v53 = vadd.f32 1.0, %v8130_v40  ;;  %v5526_v40 = vld [vmem:[#allocation10 + $0x168] sm:$0xff] }
 0xba5   : > { %v8132_v32 = vpop.eup %8131 }
 0xba6   : > { %8143 = vrcp.f32 %v5166_v53  ;;  %v5172_v18 = vadd.f32 1.0, %v8132_v32  ;;  %v8134_v59 = vpop.eup %8133  ;;  %v5525_v53 = vld [vmem:[#allocation10 + $0x160] sm:$0xff]  ;;  %v5527_v32 = vld [vmem:[#allocation10 + $0x170] sm:$0xff] }
 0xba7   : > { %8145 = vpow2.f32 %v7759_v14  ;;  %v8136_v23 = vpop.eup %8135  ;;  %v4939_v61 = vmul.f32 %v8134_v59, %v8909_v35  ;;  %v5528_v14 = vld [vmem:[#allocation10 + $0x178] sm:$0xff] }
 0xba8   : > { %8147 = vrcp.f32 %v5172_v18  ;;  %v8138_v24 = vpop.eup %8137  ;;  %v5522_v18 = vld [vmem:[#allocation10 + $0x148] sm:$0xff]  ;;  %v5524_v59 = vld [vmem:[#allocation10 + $0x158] sm:$0xff] }
 0xba9   : > { %v8140_v20 = vpop.eup %8139  ;;  %v4940_v58 = vmul.f32 %v8138_v24, %v8136_v23  ;;  %v5521_v23 = vld [vmem:[#allocation10 + $0x140] sm:$0xff]  ;;  %v5523_v24 = vld [vmem:[#allocation10 + $0x150] sm:$0xff] }
 0xbaa   : > { %v8142_v55 = vpop.eup %8141 }
 0xbab   : > { %v8951_v63 = vadd.f32 %v4940_v58, %v4939_v61  ;;  %v5179_v2 = vadd.f32 1.0, %v8142_v55  ;;  %v5518_v61 = vld [vmem:[#allocation10 + $0x128] sm:$0xff]  ;;  %v5517_v55 = vld [vmem:[#allocation10 + $0x120] sm:$0xff]  ;;  %v5519_v58 = vld [vmem:[#allocation10 + $0x130] sm:$0xff] }
 0xbad   : > { %8149 = vtanh.f32 %v8951_v63 }
 0xbae   : > { %8151 = vrcp.f32 %v5179_v2  ;;  %v5510_v2 = vld [vmem:[#allocation10 + $0xe8] sm:$0xff] }
 0xbb3   : > { %v8144_v10 = vpop.eup %8143 }
 0xbb4   : > { %v8146_v52 = vpop.eup %8145  ;;  %v5183_v27 = vmul.f32 %v8144_v10, %v8140_v20  ;;  %v5520_v20 = vld [vmem:[#allocation10 + $0x138] sm:$0xff]  ;;  %v5514_v10 = vld [vmem:[#allocation10 + $0x108] sm:$0xff] }
 0xbb5   : > { %v8148_v43 = vpop.eup %8147  ;;  %v4936_v15 = vadd.f32 1.0, %v8146_v52  ;;  %v5516_v52 = vld [vmem:[#allocation10 + $0x118] sm:$0xff] }
 0xbb6   : > { %v5182_v12 = vmul.f32 %v8148_v43, %v8912_v6  ;;  %v5538_v6 = vld [vmem:[#allocation10 + $0x1c8] sm:$0xff]  ;;  %v5515_v43 = vld [vmem:[#allocation10 + $0x110] sm:$0xff] }
 0xbb8   : > { %v8954_v22 = vadd.f32 %v5183_v27, %v5182_v12  ;;  %v5513_v27 = vld [vmem:[#allocation10 + $0x100] sm:$0xff]  ;;  %v5512_v12 = vld [vmem:[#allocation10 + $0xf8] sm:$0xff] }
 0xbba   : > { %8153 = vtanh.f32 %v8954_v22  ;;  %v8150_v35 = vpop.eup %8149 }
 0xbbb   : > { %8155 = vrcp.f32 %v4936_v15  ;;  %v8152_v16 = vpop.eup %8151  ;;  %v5509_v15 = vld [vmem:[#allocation10 + $0xe0] sm:$0xff] }
 0xbc7   : > { %v8154_v39 = vpop.eup %8153 }
 0xbc8   : > { %v8156_v25 = vpop.eup %8155  ;;  %v8958_v29 = vmul.f32 %v8154_v39, %v8152_v16  ;;  %v5506_v16 = vld [vmem:[#allocation10 + $0xc8] sm:$0xff]  ;;  %v5508_v39 = vld [vmem:[#allocation10 + $0xd8] sm:$0xff] }
 0xbc9   : > { %v8960_v1 = vmul.f32 %v8156_v25, %v8150_v35  ;;  %v5511_v35 = vld [vmem:[#allocation10 + $0xf0] sm:$0xff]  ;;  %v5505_v25 = vld [vmem:[#allocation10 + $0xc0] sm:$0xff] }
 0xbca   : > { %5380 = vmatmul.mubr.f32.vlgmr.msra.gmra.mxu0 %v8958_v29  ;;  %5451 = vmatmul.mubr.f32.vlgmr.msra.gmra.mxu1 %v8958_v29 }
 0xbcb   : > { %5673 = vmatprep.mubr.f32.mxu0 %v8960_v1  ;;  %5744 = vmatprep.mubr.f32.mxu1 %v8960_v1 }
 0xbcc   : > { %5610 = vmatpush1.msra.mxu0 %v5541_v36  ;;  %5681 = vmatpush1.msra.mxu1 %v5543_v51  ;;  %v5507_v36 = vld [vmem:[#allocation10 + $0xd0] sm:$0xff]  ;;  %v5502_v51 = vld [vmem:[#allocation10 + $0xa8] sm:$0xff] }
 0xbcd   : > { %5611 = vmatprep.subr.mxu0 %v5538_v6  ;;  %5682 = vmatprep.subr.mxu1 %v5540_v48  ;;  %v5504_v6 = vld [vmem:[#allocation10 + $0xb8] sm:$0xff]  ;;  %v5501_v48 = vld [vmem:[#allocation10 + $0xa0] sm:$0xff] }
 0xbce   : > { %5612 = vmatpush1.msra.mxu0 %v5537_v44  ;;  %5683 = vmatpush1.msra.mxu1 %v5539_v42  ;;  %v5503_v44 = vld [vmem:[#allocation10 + $0xb0] sm:$0xff]  ;;  %v5498_v42 = vld [vmem:[#allocation10 + $0x88] sm:$0xff] }
 0xbcf   : > { %5613 = vmatprep.subr.mxu0 %v5534_v47  ;;  %5684 = vmatprep.subr.mxu1 %v5536_v45  ;;  %v5500_v47 = vld [vmem:[#allocation10 + $0x98] sm:$0xff]  ;;  %v5497_v45 = vld [vmem:[#allocation10 + $0x80] sm:$0xff] }
 0xbd0   : > { %5614 = vmatpush1.msra.mxu0 %v5533_v49  ;;  %5685 = vmatpush1.msra.mxu1 %v5535_v30  ;;  %v5499_v49 = vld [vmem:[#allocation10 + $0x90] sm:$0xff]  ;;  %v5494_v30 = vld [vmem:[#allocation10 + $0x68] sm:$0xff] }
 0xbd1   : > { %5615 = vmatprep.subr.mxu0 %v5530_v3  ;;  %5686 = vmatprep.subr.mxu1 %v5532_v33  ;;  %v5496_v3 = vld [vmem:[#allocation10 + $0x78] sm:$0xff]  ;;  %v5493_v33 = vld [vmem:[#allocation10 + $0x60] sm:$0xff] }
 0xbd2   : > { %5616 = vmatpush1.msra.mxu0 %v5529_v56  ;;  %5687 = vmatpush1.msra.mxu1 %v5531_v41  ;;  %v5495_v56 = vld [vmem:[#allocation10 + $0x70] sm:$0xff]  ;;  %v5490_v41 = vld [vmem:[#allocation10 + $0x48] sm:$0xff] }
 0xbd3   : > { %5617 = vmatprep.subr.mxu0 %v5526_v40  ;;  %5688 = vmatprep.subr.mxu1 %v5528_v14  ;;  %v5492_v40 = vld [vmem:[#allocation10 + $0x58] sm:$0xff]  ;;  %v5489_v14 = vld [vmem:[#allocation10 + $0x40] sm:$0xff] }
 0xbd4   : > { %5618 = vmatpush1.msra.mxu0 %v5525_v53  ;;  %5689 = vmatpush1.msra.mxu1 %v5527_v32  ;;  %v5491_v53 = vld [vmem:[#allocation10 + $0x50] sm:$0xff]  ;;  %v5486_v32 = vld [vmem:[#allocation10 + $0x28] sm:$0xff] }
 0xbd5   : > { %5619 = vmatprep.subr.mxu0 %v5522_v18  ;;  %5690 = vmatprep.subr.mxu1 %v5524_v59  ;;  %v5488_v18 = vld [vmem:[#allocation10 + $0x38] sm:$0xff]  ;;  %v5485_v59 = vld [vmem:[#allocation10 + $0x20] sm:$0xff] }
 0xbd6   : > { %5620 = vmatpush1.msra.mxu0 %v5521_v23  ;;  %5691 = vmatpush1.msra.mxu1 %v5523_v24  ;;  %v5487_v23 = vld [vmem:[#allocation10 + $0x30] sm:$0xff]  ;;  %v5482_v24 = vld [vmem:[#allocation10 + $0x8] sm:$0xff] }
 0xbd7   : > { %5621 = vmatprep.subr.mxu0 %v5518_v61  ;;  %5692 = vmatprep.subr.mxu1 %v5520_v20  ;;  %v5484_v61 = vld [vmem:[#allocation10 + $0x18] sm:$0xff]  ;;  %v5481_v20 = vld [vmem:[#allocation10] sm:$0xff] }
 0xbd8   : > { %5622 = vmatpush1.msra.mxu0 %v5517_v55  ;;  %5693 = vmatpush1.msra.mxu1 %v5519_v58  ;;  %v5483_v55 = vld [vmem:[#allocation10 + $0x10] sm:$0xff]  ;;  %v5606_v58 = vld [vmem:[#allocation10 + $0x3e8] sm:$0xff] }
 0xbd9   : > { %5623 = vmatprep.subr.mxu0 %v5514_v10  ;;  %5694 = vmatprep.subr.mxu1 %v5516_v52  ;;  %v5608_v10 = vld [vmem:[#allocation10 + $0x3f8] sm:$0xff]  ;;  %v5605_v52 = vld [vmem:[#allocation10 + $0x3e0] sm:$0xff] }
 0xbda   : > { %5624 = vmatpush1.msra.mxu0 %v5513_v27  ;;  %5695 = vmatpush1.msra.mxu1 %v5515_v43  ;;  %v5607_v27 = vld [vmem:[#allocation10 + $0x3f0] sm:$0xff]  ;;  %v5602_v43 = vld [vmem:[#allocation10 + $0x3c8] sm:$0xff] }
 0xbdb   : > { %5625 = vmatprep.subr.mxu0 %v5510_v2  ;;  %5696 = vmatprep.subr.mxu1 %v5512_v12  ;;  %v5604_v2 = vld [vmem:[#allocation10 + $0x3d8] sm:$0xff]  ;;  %v5601_v12 = vld [vmem:[#allocation10 + $0x3c0] sm:$0xff] }
 0xbdc   : > { %5626 = vmatpush1.msra.mxu0 %v5509_v15  ;;  %5697 = vmatpush1.msra.mxu1 %v5511_v35  ;;  %v5603_v15 = vld [vmem:[#allocation10 + $0x3d0] sm:$0xff]  ;;  %v5598_v35 = vld [vmem:[#allocation10 + $0x3a8] sm:$0xff] }
 0xbdd   : > { %5627 = vmatprep.subr.mxu0 %v5506_v16  ;;  %5698 = vmatprep.subr.mxu1 %v5508_v39  ;;  %v5600_v16 = vld [vmem:[#allocation10 + $0x3b8] sm:$0xff]  ;;  %v5597_v39 = vld [vmem:[#allocation10 + $0x3a0] sm:$0xff] }
 0xbde   : > { %5628 = vmatpush1.msra.mxu0 %v5505_v25  ;;  %5699 = vmatpush1.msra.mxu1 %v5507_v36  ;;  %v5599_v25 = vld [vmem:[#allocation10 + $0x3b0] sm:$0xff]  ;;  %v5594_v36 = vld [vmem:[#allocation10 + $0x388] sm:$0xff] }
 0xbdf   : > { %5629 = vmatprep.subr.mxu0 %v5502_v51  ;;  %5700 = vmatprep.subr.mxu1 %v5504_v6  ;;  %v5596_v51 = vld [vmem:[#allocation10 + $0x398] sm:$0xff]  ;;  %v5593_v6 = vld [vmem:[#allocation10 + $0x380] sm:$0xff] }
 0xbe0   : > { %5630 = vmatpush1.msra.mxu0 %v5501_v48  ;;  %5701 = vmatpush1.msra.mxu1 %v5503_v44  ;;  %v5595_v48 = vld [vmem:[#allocation10 + $0x390] sm:$0xff]  ;;  %v5590_v44 = vld [vmem:[#allocation10 + $0x368] sm:$0xff] }
 0xbe1   : > { %5631 = vmatprep.subr.mxu0 %v5498_v42  ;;  %5702 = vmatprep.subr.mxu1 %v5500_v47  ;;  %v5592_v42 = vld [vmem:[#allocation10 + $0x378] sm:$0xff]  ;;  %v5589_v47 = vld [vmem:[#allocation10 + $0x360] sm:$0xff] }
 0xbe2   : > { %5632 = vmatpush1.msra.mxu0 %v5497_v45  ;;  %5703 = vmatpush1.msra.mxu1 %v5499_v49  ;;  %v5591_v45 = vld [vmem:[#allocation10 + $0x370] sm:$0xff]  ;;  %v5586_v49 = vld [vmem:[#allocation10 + $0x348] sm:$0xff] }
 0xbe3   : > { %5633 = vmatprep.subr.mxu0 %v5494_v30  ;;  %5704 = vmatprep.subr.mxu1 %v5496_v3  ;;  %v5588_v30 = vld [vmem:[#allocation10 + $0x358] sm:$0xff]  ;;  %v5585_v3 = vld [vmem:[#allocation10 + $0x340] sm:$0xff] }
 0xbe4   : > { %5634 = vmatpush1.msra.mxu0 %v5493_v33  ;;  %5705 = vmatpush1.msra.mxu1 %v5495_v56  ;;  %v5587_v33 = vld [vmem:[#allocation10 + $0x350] sm:$0xff]  ;;  %v5582_v56 = vld [vmem:[#allocation10 + $0x328] sm:$0xff] }
 0xbe5   : > { %5635 = vmatprep.subr.mxu0 %v5490_v41  ;;  %5706 = vmatprep.subr.mxu1 %v5492_v40  ;;  %v5584_v41 = vld [vmem:[#allocation10 + $0x338] sm:$0xff]  ;;  %v5581_v40 = vld [vmem:[#allocation10 + $0x320] sm:$0xff] }
 0xbe6   : > { %5636 = vmatpush1.msra.mxu0 %v5489_v14  ;;  %5707 = vmatpush1.msra.mxu1 %v5491_v53  ;;  %v5583_v14 = vld [vmem:[#allocation10 + $0x330] sm:$0xff]  ;;  %v5578_v53 = vld [vmem:[#allocation10 + $0x308] sm:$0xff] }
 0xbe7   : > { %5637 = vmatprep.subr.mxu0 %v5486_v32  ;;  %5708 = vmatprep.subr.mxu1 %v5488_v18  ;;  %v5580_v32 = vld [vmem:[#allocation10 + $0x318] sm:$0xff]  ;;  %v5577_v18 = vld [vmem:[#allocation10 + $0x300] sm:$0xff] }
 0xbe8   : > { %5638 = vmatpush1.msra.mxu0 %v5485_v59  ;;  %5709 = vmatpush1.msra.mxu1 %v5487_v23  ;;  %v5579_v59 = vld [vmem:[#allocation10 + $0x310] sm:$0xff]  ;;  %v5574_v23 = vld [vmem:[#allocation10 + $0x2e8] sm:$0xff] }
 0xbe9   : > { %5639 = vmatprep.subr.mxu0 %v5482_v24  ;;  %5710 = vmatprep.subr.mxu1 %v5484_v61  ;;  %v5576_v24 = vld [vmem:[#allocation10 + $0x2f8] sm:$0xff]  ;;  %v5573_v61 = vld [vmem:[#allocation10 + $0x2e0] sm:$0xff] }
 0xbea   : > { %5640 = vmatpush1.msra.mxu0 %v5481_v20  ;;  %5711 = vmatpush1.msra.mxu1 %v5483_v55  ;;  %v5575_v20 = vld [vmem:[#allocation10 + $0x2f0] sm:$0xff]  ;;  %v5570_v55 = vld [vmem:[#allocation10 + $0x2c8] sm:$0xff] }
 0xbeb   : > { %5641 = vmatprep.subr.mxu0 %v5606_v58  ;;  %5712 = vmatprep.subr.mxu1 %v5608_v10  ;;  %v5572_v58 = vld [vmem:[#allocation10 + $0x2d8] sm:$0xff]  ;;  %v5569_v10 = vld [vmem:[#allocation10 + $0x2c0] sm:$0xff] }
 0xbec   : > { %5642 = vmatpush2.msra.mxu0 %v5605_v52  ;;  %5713 = vmatpush2.msra.mxu1 %v5607_v27  ;;  %v5571_v52 = vld [vmem:[#allocation10 + $0x2d0] sm:$0xff]  ;;  %v5566_v27 = vld [vmem:[#allocation10 + $0x2a8] sm:$0xff] }
 0xbed   : > { %5643 = vmatprep.subr.mxu0 %v5602_v43  ;;  %5714 = vmatprep.subr.mxu1 %v5604_v2  ;;  %v5568_v43 = vld [vmem:[#allocation10 + $0x2b8] sm:$0xff]  ;;  %v5565_v2 = vld [vmem:[#allocation10 + $0x2a0] sm:$0xff] }
 0xbee   : > { %5644 = vmatpush2.msra.mxu0 %v5601_v12  ;;  %5715 = vmatpush2.msra.mxu1 %v5603_v15  ;;  %v5567_v12 = vld [vmem:[#allocation10 + $0x2b0] sm:$0xff]  ;;  %v5562_v15 = vld [vmem:[#allocation10 + $0x288] sm:$0xff] }
 0xbef   : > { %5645 = vmatprep.subr.mxu0 %v5598_v35  ;;  %5716 = vmatprep.subr.mxu1 %v5600_v16  ;;  %v5564_v35 = vld [vmem:[#allocation10 + $0x298] sm:$0xff]  ;;  %v5561_v16 = vld [vmem:[#allocation10 + $0x280] sm:$0xff] }
 0xbf0   : > { %5646 = vmatpush2.msra.mxu0 %v5597_v39  ;;  %5717 = vmatpush2.msra.mxu1 %v5599_v25  ;;  %v5563_v39 = vld [vmem:[#allocation10 + $0x290] sm:$0xff]  ;;  %v5558_v25 = vld [vmem:[#allocation10 + $0x268] sm:$0xff] }
 0xbf1   : > { %5647 = vmatprep.subr.mxu0 %v5594_v36  ;;  %5718 = vmatprep.subr.mxu1 %v5596_v51  ;;  %v5560_v36 = vld [vmem:[#allocation10 + $0x278] sm:$0xff]  ;;  %v5557_v51 = vld [vmem:[#allocation10 + $0x260] sm:$0xff] }
 0xbf2   : > { %5648 = vmatpush2.msra.mxu0 %v5593_v6  ;;  %5719 = vmatpush2.msra.mxu1 %v5595_v48  ;;  %v5559_v6 = vld [vmem:[#allocation10 + $0x270] sm:$0xff]  ;;  %v5554_v48 = vld [vmem:[#allocation10 + $0x248] sm:$0xff] }
 0xbf3   : > { %5649 = vmatprep.subr.mxu0 %v5590_v44  ;;  %5720 = vmatprep.subr.mxu1 %v5592_v42  ;;  %v5556_v44 = vld [vmem:[#allocation10 + $0x258] sm:$0xff]  ;;  %v5553_v42 = vld [vmem:[#allocation10 + $0x240] sm:$0xff] }
 0xbf4   : > { %5650 = vmatpush2.msra.mxu0 %v5589_v47  ;;  %5721 = vmatpush2.msra.mxu1 %v5591_v45  ;;  %v5555_v47 = vld [vmem:[#allocation10 + $0x250] sm:$0xff]  ;;  %v5550_v45 = vld [vmem:[#allocation10 + $0x228] sm:$0xff] }
 0xbf5   : > { %5651 = vmatprep.subr.mxu0 %v5586_v49  ;;  %5722 = vmatprep.subr.mxu1 %v5588_v30  ;;  %v5552_v49 = vld [vmem:[#allocation10 + $0x238] sm:$0xff]  ;;  %v5549_v30 = vld [vmem:[#allocation10 + $0x220] sm:$0xff] }
 0xbf6   : > { %5652 = vmatpush2.msra.mxu0 %v5585_v3  ;;  %5723 = vmatpush2.msra.mxu1 %v5587_v33  ;;  %v5551_v3 = vld [vmem:[#allocation10 + $0x230] sm:$0xff]  ;;  %v5546_v33 = vld [vmem:[#allocation10 + $0x208] sm:$0xff] }
 0xbf7   : > { %5653 = vmatprep.subr.mxu0 %v5582_v56  ;;  %5724 = vmatprep.subr.mxu1 %v5584_v41  ;;  %v5548_v56 = vld [vmem:[#allocation10 + $0x218] sm:$0xff]  ;;  %v5545_v41 = vld [vmem:[#allocation10 + $0x200] sm:$0xff] }
 0xbf8   : > { %5654 = vmatpush2.msra.mxu0 %v5581_v40  ;;  %5725 = vmatpush2.msra.mxu1 %v5583_v14  ;;  %v5547_v40 = vld [vmem:[#allocation10 + $0x210] sm:$0xff]  ;;  %v5845_v14 = vld [vmem:[#allocation6 + $0x1e8] sm:$0xff] }
 0xbf9   : > { %5655 = vmatprep.subr.mxu0 %v5578_v53  ;;  %5726 = vmatprep.subr.mxu1 %v5580_v32  ;;  %v5847_v53 = vld [vmem:[#allocation6 + $0x1f8] sm:$0xff] }
 0xbfa   : > { %5656 = vmatpush2.msra.mxu0 %v5577_v18  ;;  %5727 = vmatpush2.msra.mxu1 %v5579_v59 }
 0xbfb   : > { %5657 = vmatprep.subr.mxu0 %v5574_v23  ;;  %5728 = vmatprep.subr.mxu1 %v5576_v24 }
 0xbfc   : > { %5658 = vmatpush2.msra.mxu0 %v5573_v61  ;;  %5729 = vmatpush2.msra.mxu1 %v5575_v20 }
 0xbfd   : > { %5659 = vmatprep.subr.mxu0 %v5570_v55  ;;  %5730 = vmatprep.subr.mxu1 %v5572_v58 }
 0xbfe   : > { %5660 = vmatpush2.msra.mxu0 %v5569_v10  ;;  %5731 = vmatpush2.msra.mxu1 %v5571_v52 }
 0xbff   : > { %5661 = vmatprep.subr.mxu0 %v5566_v27  ;;  %5732 = vmatprep.subr.mxu1 %v5568_v43 }
 0xc00   : > { %5662 = vmatpush2.msra.mxu0 %v5565_v2  ;;  %5733 = vmatpush2.msra.mxu1 %v5567_v12 }
 0xc01   : > { %5663 = vmatprep.subr.mxu0 %v5562_v15  ;;  %5734 = vmatprep.subr.mxu1 %v5564_v35 }
 0xc02   : > { %5664 = vmatpush2.msra.mxu0 %v5561_v16  ;;  %5735 = vmatpush2.msra.mxu1 %v5563_v39 }
 0xc03   : > { %5665 = vmatprep.subr.mxu0 %v5558_v25  ;;  %5736 = vmatprep.subr.mxu1 %v5560_v36 }
 0xc04   : > { %5666 = vmatpush2.msra.mxu0 %v5557_v51  ;;  %5737 = vmatpush2.msra.mxu1 %v5559_v6 }
 0xc05   : > { %5667 = vmatprep.subr.mxu0 %v5554_v48  ;;  %5738 = vmatprep.subr.mxu1 %v5556_v44 }
 0xc06   : > { %5668 = vmatpush2.msra.mxu0 %v5553_v42  ;;  %5739 = vmatpush2.msra.mxu1 %v5555_v47  ;;  %v5844_v47 = vld [vmem:[#allocation6 + $0x1e0] sm:$0xff] }
 0xc07   : > { %5669 = vmatprep.subr.mxu0 %v5550_v45  ;;  %5740 = vmatprep.subr.mxu1 %v5552_v49  ;;  %v5846_v45 = vld [vmem:[#allocation6 + $0x1f0] sm:$0xff]  ;;  %v5841_v49 = vld [vmem:[#allocation6 + $0x1c8] sm:$0xff] }
 0xc08   : > { %5670 = vmatpush2.msra.mxu0 %v5549_v30  ;;  %5741 = vmatpush2.msra.mxu1 %v5551_v3  ;;  %v5843_v30 = vld [vmem:[#allocation6 + $0x1d8] sm:$0xff]  ;;  %v5840_v3 = vld [vmem:[#allocation6 + $0x1c0] sm:$0xff] }
 0xc09   : > { %5671 = vmatprep.subr.mxu0 %v5546_v33  ;;  %5742 = vmatprep.subr.mxu1 %v5548_v56  ;;  %v5842_v33 = vld [vmem:[#allocation6 + $0x1d0] sm:$0xff]  ;;  %v5839_v56 = vld [vmem:[#allocation6 + $0x1b8] sm:$0xff] }
 0xc0a   : > { %5672 = vmatpush2.msra.mxu0 %v5545_v41  ;;  %5743 = vmatpush2.msra.mxu1 %v5547_v40  ;;  %v5836_v41 = vld [vmem:[#allocation6 + $0x1a0] sm:$0xff]  ;;  %v5838_v40 = vld [vmem:[#allocation6 + $0x1b0] sm:$0xff] }
 0xc0b   : > { %5848 = vmatprep.subr.mxu0 %v5845_v14  ;;  %5919 = vmatprep.subr.mxu1 %v5847_v53  ;;  %v5833_v14 = vld [vmem:[#allocation6 + $0x188] sm:$0xff]  ;;  %v5835_v53 = vld [vmem:[#allocation6 + $0x198] sm:$0xff] }
 0xc8a   : > { %v5381_v32 = vpop.f32.mrf.mxu0  ;;  %v5452_v61 = vpop.f32.mrf.mxu1 }
 0xc8b   : > { %v5382_v18 = vadd.f32 %v5381_v32, %v8730_v7  ;;  %v5453_v27 = vadd.f32 %v5452_v61, %v8744_v31  ;;  %v5832_v32 = vld [vmem:[#allocation6 + $0x180] sm:$0xff]  ;;  %v5830_v61 = vld [vmem:[#allocation6 + $0x170] sm:$0xff] }
 0xc8c   : > { %v5383_v59 = vpop.f32.mrf.mxu0  ;;  %v5454_v55 = vpop.f32.mrf.mxu1 }
 0xc8d   : > { %v7763_v23 = vmul.f32 -1.442695, %v5382_v18  ;;  %v5384_v24 = vadd.f32 %v5383_v59, %v8735_v11  ;;  %v5455_v58 = vadd.f32 %v5454_v55, %v8740_v21  ;;  %v5834_v18 = vld [vmem:[#allocation6 + $0x190] sm:$0xff]  ;;  %v5829_v59 = vld [vmem:[#allocation6 + $0x168] sm:$0xff]  ;;  %v5827_v55 = vld [vmem:[#allocation6 + $0x158] sm:$0xff] }
 0xc8f   : > { %8157 = vpow2.f32 %v7763_v23  ;;  %v7764_v20 = vmul.f32 -1.442695, %v5384_v24  ;;  %v7765_v10 = vmul.f32 -1.442695, %v5455_v58  ;;  %v5831_v23 = vld [vmem:[#allocation6 + $0x178] sm:$0xff]  ;;  %v5828_v24 = vld [vmem:[#allocation6 + $0x160] sm:$0xff] }
 0xc90   : > { %v5824_v58 = vld [vmem:[#allocation6 + $0x140] sm:$0xff] }
 0xc91   : > { %8159 = vpow2.f32 %v7764_v20  ;;  %v5825_v20 = vld [vmem:[#allocation6 + $0x148] sm:$0xff] }
 0xc92   : > { %8161 = vpow2.f32 %v7765_v10  ;;  %v5826_v10 = vld [vmem:[#allocation6 + $0x150] sm:$0xff] }
 0xc9c   : > { %v8158_v52 = vpop.eup %8157 }
 0xc9d   : > { %v5460_v43 = vadd.f32 1.0, %v8158_v52  ;;  %v5821_v52 = vld [vmem:[#allocation6 + $0x128] sm:$0xff] }
 0xc9e   : > { %v8160_v2 = vpop.eup %8159 }
 0xc9f   : > { %8163 = vrcp.f32 %v5460_v43  ;;  %v5466_v12 = vadd.f32 1.0, %v8160_v2  ;;  %v8162_v15 = vpop.eup %8161  ;;  %v5820_v43 = vld [vmem:[#allocation6 + $0x120] sm:$0xff]  ;;  %v5822_v2 = vld [vmem:[#allocation6 + $0x130] sm:$0xff] }
 0xca0   : > { %8165 = vtanh.f32 %v5453_v27  ;;  %v5473_v25 = vadd.f32 1.0, %v8162_v15  ;;  %v5823_v27 = vld [vmem:[#allocation6 + $0x138] sm:$0xff] }
 0xca1   : > { %8167 = vrcp.f32 %v5466_v12  ;;  %v5817_v12 = vld [vmem:[#allocation6 + $0x108] sm:$0xff]  ;;  %v5819_v15 = vld [vmem:[#allocation6 + $0x118] sm:$0xff] }
 0xca2   : > { %8169 = vrcp.f32 %v5473_v25  ;;  %v5815_v25 = vld [vmem:[#allocation6 + $0xf8] sm:$0xff] }
 0xcac   : > { %v8164_v35 = vpop.eup %8163 }
 0xcad   : > { %v8166_v16 = vpop.eup %8165 }
 0xcae   : > { %v8168_v39 = vpop.eup %8167  ;;  %v5477_v36 = vmul.f32 %v8166_v16, %v8164_v35  ;;  %v5816_v35 = vld [vmem:[#allocation6 + $0x100] sm:$0xff]  ;;  %v5818_v16 = vld [vmem:[#allocation6 + $0x110] sm:$0xff] }
 0xcaf   : > { %v5476_v51 = vmul.f32 %v8168_v39, %v8929_v38  ;;  %v8170_v48 = vpop.eup %8169  ;;  %v5837_v38 = vld [vmem:[#allocation6 + $0x1a8] sm:$0xff] }
 0xcb0   : > { %v5813_v39 = vld [vmem:[#allocation6 + $0xe8] sm:$0xff] }
 0xcb1   : > { %v8971_v6 = vadd.f32 %v5477_v36, %v5476_v51  ;;  %v5812_v36 = vld [vmem:[#allocation6 + $0xe0] sm:$0xff]  ;;  %v5814_v51 = vld [vmem:[#allocation6 + $0xf0] sm:$0xff] }
 0xcb3   : > { %8171 = vtanh.f32 %v8971_v6 }
 0xcc0   : > { %v8172_v44 = vpop.eup %8171 }
 0xcc1   : > { %v8974_v42 = vmul.f32 %v8172_v44, %v8170_v48  ;;  %v5809_v48 = vld [vmem:[#allocation6 + $0xc8] sm:$0xff]  ;;  %v5811_v44 = vld [vmem:[#allocation6 + $0xd8] sm:$0xff] }
 0xcc3   : > { %5674 = vmatmul.mubr.f32.vlgmr.msra.gmra.mxu0 %v8974_v42  ;;  %5745 = vmatmul.mubr.f32.vlgmr.msra.gmra.mxu1 %v8974_v42 }
 0xcc4   : > { %5849 = vmatpush1.msra.mxu0 %v5844_v47  ;;  %5920 = vmatpush1.msra.mxu1 %v5846_v45  ;;  %v5808_v47 = vld [vmem:[#allocation6 + $0xc0] sm:$0xff]  ;;  %v5810_v45 = vld [vmem:[#allocation6 + $0xd0] sm:$0xff] }
 0xcc5   : > { %5850 = vmatprep.subr.mxu0 %v5841_v49  ;;  %5921 = vmatprep.subr.mxu1 %v5843_v30  ;;  %v5805_v49 = vld [vmem:[#allocation6 + $0xa8] sm:$0xff]  ;;  %v5807_v30 = vld [vmem:[#allocation6 + $0xb8] sm:$0xff] }
 0xcc6   : > { %5851 = vmatpush1.msra.mxu0 %v5840_v3  ;;  %5922 = vmatpush1.msra.mxu1 %v5842_v33  ;;  %v5804_v3 = vld [vmem:[#allocation6 + $0xa0] sm:$0xff]  ;;  %v5806_v33 = vld [vmem:[#allocation6 + $0xb0] sm:$0xff] }
 0xcc7   : > { %5852 = vmatprep.subr.mxu0 %v5837_v38  ;;  %5923 = vmatprep.subr.mxu1 %v5839_v56  ;;  %v5801_v38 = vld [vmem:[#allocation6 + $0x88] sm:$0xff]  ;;  %v5803_v56 = vld [vmem:[#allocation6 + $0x98] sm:$0xff] }
 0xcc8   : > { %5853 = vmatpush1.msra.mxu0 %v5836_v41  ;;  %5924 = vmatpush1.msra.mxu1 %v5838_v40  ;;  %v5800_v41 = vld [vmem:[#allocation6 + $0x80] sm:$0xff]  ;;  %v5802_v40 = vld [vmem:[#allocation6 + $0x90] sm:$0xff] }
 0xcc9   : > { %5854 = vmatprep.subr.mxu0 %v5833_v14  ;;  %5925 = vmatprep.subr.mxu1 %v5835_v53  ;;  %v5797_v14 = vld [vmem:[#allocation6 + $0x68] sm:$0xff]  ;;  %v5799_v53 = vld [vmem:[#allocation6 + $0x78] sm:$0xff] }
 0xcca   : > { %5855 = vmatpush1.msra.mxu0 %v5832_v32  ;;  %5926 = vmatpush1.msra.mxu1 %v5834_v18  ;;  %v5796_v32 = vld [vmem:[#allocation6 + $0x60] sm:$0xff]  ;;  %v5798_v18 = vld [vmem:[#allocation6 + $0x70] sm:$0xff] }
 0xccb   : > { %5856 = vmatprep.subr.mxu0 %v5829_v59  ;;  %5927 = vmatprep.subr.mxu1 %v5831_v23  ;;  %v5793_v59 = vld [vmem:[#allocation6 + $0x48] sm:$0xff]  ;;  %v5795_v23 = vld [vmem:[#allocation6 + $0x58] sm:$0xff] }
 0xccc   : > { %5857 = vmatpush1.msra.mxu0 %v5828_v24  ;;  %5928 = vmatpush1.msra.mxu1 %v5830_v61  ;;  %v5792_v24 = vld [vmem:[#allocation6 + $0x40] sm:$0xff]  ;;  %v5794_v61 = vld [vmem:[#allocation6 + $0x50] sm:$0xff] }
 0xccd   : > { %5858 = vmatprep.subr.mxu0 %v5825_v20  ;;  %5929 = vmatprep.subr.mxu1 %v5827_v55  ;;  %v5789_v20 = vld [vmem:[#allocation6 + $0x28] sm:$0xff]  ;;  %v5791_v55 = vld [vmem:[#allocation6 + $0x38] sm:$0xff] }
 0xcce   : > { %5859 = vmatpush1.msra.mxu0 %v5824_v58  ;;  %5930 = vmatpush1.msra.mxu1 %v5826_v10  ;;  %v5788_v58 = vld [vmem:[#allocation6 + $0x20] sm:$0xff]  ;;  %v5790_v10 = vld [vmem:[#allocation6 + $0x30] sm:$0xff] }
 0xccf   : > { %5860 = vmatprep.subr.mxu0 %v5821_v52  ;;  %5931 = vmatprep.subr.mxu1 %v5823_v27  ;;  %v5785_v52 = vld [vmem:[#allocation6 + $0x8] sm:$0xff]  ;;  %v5787_v27 = vld [vmem:[#allocation6 + $0x18] sm:$0xff] }
 0xcd0   : > { %5861 = vmatpush1.msra.mxu0 %v5820_v43  ;;  %5932 = vmatpush1.msra.mxu1 %v5822_v2  ;;  %v5784_v43 = vld [vmem:[#allocation6] sm:$0xff]  ;;  %v5786_v2 = vld [vmem:[#allocation6 + $0x10] sm:$0xff] }
 0xcd1   : > { %5862 = vmatprep.subr.mxu0 %v5817_v12  ;;  %5933 = vmatprep.subr.mxu1 %v5819_v15  ;;  %v6079_v12 = vld [vmem:[#allocation8 + $0x1e8] sm:$0xff]  ;;  %v6081_v15 = vld [vmem:[#allocation8 + $0x1f8] sm:$0xff] }
 0xcd2   : > { %5863 = vmatpush1.msra.mxu0 %v5816_v35  ;;  %5934 = vmatpush1.msra.mxu1 %v5818_v16  ;;  %v6078_v35 = vld [vmem:[#allocation8 + $0x1e0] sm:$0xff]  ;;  %v6080_v16 = vld [vmem:[#allocation8 + $0x1f0] sm:$0xff] }
 0xcd3   : > { %5864 = vmatprep.subr.mxu0 %v5813_v39  ;;  %5935 = vmatprep.subr.mxu1 %v5815_v25  ;;  %v6075_v39 = vld [vmem:[#allocation8 + $0x1c8] sm:$0xff]  ;;  %v6077_v25 = vld [vmem:[#allocation8 + $0x1d8] sm:$0xff] }
 0xcd4   : > { %5865 = vmatpush1.msra.mxu0 %v5812_v36  ;;  %5936 = vmatpush1.msra.mxu1 %v5814_v51  ;;  %v6074_v36 = vld [vmem:[#allocation8 + $0x1c0] sm:$0xff]  ;;  %v6076_v51 = vld [vmem:[#allocation8 + $0x1d0] sm:$0xff] }
 0xcd5   : > { %5866 = vmatprep.subr.mxu0 %v5809_v48  ;;  %5937 = vmatprep.subr.mxu1 %v5811_v44  ;;  %v6073_v48 = vld [vmem:[#allocation8 + $0x1b8] sm:$0xff]  ;;  %v6072_v44 = vld [vmem:[#allocation8 + $0x1b0] sm:$0xff] }
 0xcd6   : > { %5867 = vmatpush1.msra.mxu0 %v5808_v47  ;;  %5938 = vmatpush1.msra.mxu1 %v5810_v45  ;;  %v6067_v47 = vld [vmem:[#allocation8 + $0x188] sm:$0xff]  ;;  %v6069_v45 = vld [vmem:[#allocation8 + $0x198] sm:$0xff] }
 0xcd7   : > { %5868 = vmatprep.subr.mxu0 %v5805_v49  ;;  %5939 = vmatprep.subr.mxu1 %v5807_v30  ;;  %v6066_v49 = vld [vmem:[#allocation8 + $0x180] sm:$0xff]  ;;  %v6068_v30 = vld [vmem:[#allocation8 + $0x190] sm:$0xff] }
 0xcd8   : > { %5869 = vmatpush1.msra.mxu0 %v5804_v3  ;;  %5940 = vmatpush1.msra.mxu1 %v5806_v33  ;;  %v6063_v3 = vld [vmem:[#allocation8 + $0x168] sm:$0xff]  ;;  %v6065_v33 = vld [vmem:[#allocation8 + $0x178] sm:$0xff] }
 0xcd9   : > { %5870 = vmatprep.subr.mxu0 %v5801_v38  ;;  %5941 = vmatprep.subr.mxu1 %v5803_v56  ;;  %v6062_v38 = vld [vmem:[#allocation8 + $0x160] sm:$0xff]  ;;  %v6064_v56 = vld [vmem:[#allocation8 + $0x170] sm:$0xff] }
 0xcda   : > { %5871 = vmatpush1.msra.mxu0 %v5800_v41  ;;  %5942 = vmatpush1.msra.mxu1 %v5802_v40  ;;  %v6059_v41 = vld [vmem:[#allocation8 + $0x148] sm:$0xff]  ;;  %v6061_v40 = vld [vmem:[#allocation8 + $0x158] sm:$0xff] }
 0xcdb   : > { %5872 = vmatprep.subr.mxu0 %v5797_v14  ;;  %5943 = vmatprep.subr.mxu1 %v5799_v53  ;;  %v6058_v14 = vld [vmem:[#allocation8 + $0x140] sm:$0xff]  ;;  %v6060_v53 = vld [vmem:[#allocation8 + $0x150] sm:$0xff] }
 0xcdc   : > { %5873 = vmatpush1.msra.mxu0 %v5796_v32  ;;  %5944 = vmatpush1.msra.mxu1 %v5798_v18  ;;  %v6055_v32 = vld [vmem:[#allocation8 + $0x128] sm:$0xff]  ;;  %v6057_v18 = vld [vmem:[#allocation8 + $0x138] sm:$0xff] }
 0xcdd   : > { %5874 = vmatprep.subr.mxu0 %v5793_v59  ;;  %5945 = vmatprep.subr.mxu1 %v5795_v23  ;;  %v6054_v59 = vld [vmem:[#allocation8 + $0x120] sm:$0xff]  ;;  %v6056_v23 = vld [vmem:[#allocation8 + $0x130] sm:$0xff] }
 0xcde   : > { %5875 = vmatpush1.msra.mxu0 %v5792_v24  ;;  %5946 = vmatpush1.msra.mxu1 %v5794_v61  ;;  %v6051_v24 = vld [vmem:[#allocation8 + $0x108] sm:$0xff]  ;;  %v6053_v61 = vld [vmem:[#allocation8 + $0x118] sm:$0xff] }
 0xcdf   : > { %5876 = vmatprep.subr.mxu0 %v5789_v20  ;;  %5947 = vmatprep.subr.mxu1 %v5791_v55  ;;  %v6050_v20 = vld [vmem:[#allocation8 + $0x100] sm:$0xff]  ;;  %v6052_v55 = vld [vmem:[#allocation8 + $0x110] sm:$0xff] }
 0xce0   : > { %5877 = vmatpush1.msra.mxu0 %v5788_v58  ;;  %5948 = vmatpush1.msra.mxu1 %v5790_v10  ;;  %v6047_v58 = vld [vmem:[#allocation8 + $0xe8] sm:$0xff]  ;;  %v6049_v10 = vld [vmem:[#allocation8 + $0xf8] sm:$0xff] }
 0xce1   : > { %5878 = vmatprep.subr.mxu0 %v5785_v52  ;;  %5949 = vmatprep.subr.mxu1 %v5787_v27  ;;  %v6046_v52 = vld [vmem:[#allocation8 + $0xe0] sm:$0xff]  ;;  %v6048_v27 = vld [vmem:[#allocation8 + $0xf0] sm:$0xff] }
 0xce2   : > { %5879 = vmatpush1.msra.mxu0 %v5784_v43  ;;  %5912 = vmatprep.mubr.f32.mxu0 %v8385_v5  ;;  %v6043_v43 = vld [vmem:[#allocation8 + $0xc8] sm:$0xff] }
 0xce3   : > { %5950 = vmatpush1.msra.mxu1 %v5786_v2  ;;  %5983 = vmatprep.mubr.f32.mxu1 %v8385_v5  ;;  %v6045_v2 = vld [vmem:[#allocation8 + $0xd8] sm:$0xff] }
 0xce4   : > { %5913 = vmatmul.mubr.f32.vlgmr.msra.gmra.mxu0 %v8958_v29  ;;  %5984 = vmatmul.mubr.f32.vlgmr.msra.gmra.mxu1 %v8958_v29  ;;  %v6071_v29 = vld [vmem:[#allocation8 + $0x1a8] sm:$0xff] }
 0xce5   : > { %6210 = vmatprep.mubr.f32.mxu0 %v8974_v42  ;;  %6281 = vmatprep.mubr.f32.mxu1 %v8974_v42  ;;  %v6070_v42 = vld [vmem:[#allocation8 + $0x1a0] sm:$0xff] }
 0xce6   : > { %6146 = vmatprep.subr.mxu0 %v6079_v12  ;;  %6217 = vmatprep.subr.mxu1 %v6081_v15  ;;  %v6042_v12 = vld [vmem:[#allocation8 + $0xc0] sm:$0xff]  ;;  %v6044_v15 = vld [vmem:[#allocation8 + $0xd0] sm:$0xff] }
 0xce7   : > { %6147 = vmatpush1.msra.mxu0 %v6078_v35  ;;  %6218 = vmatpush1.msra.mxu1 %v6080_v16  ;;  %v6039_v35 = vld [vmem:[#allocation8 + $0xa8] sm:$0xff]  ;;  %v6041_v16 = vld [vmem:[#allocation8 + $0xb8] sm:$0xff] }
 0xce8   : > { %6148 = vmatprep.subr.mxu0 %v6075_v39  ;;  %6219 = vmatprep.subr.mxu1 %v6077_v25  ;;  %v6038_v39 = vld [vmem:[#allocation8 + $0xa0] sm:$0xff]  ;;  %v6040_v25 = vld [vmem:[#allocation8 + $0xb0] sm:$0xff] }
 0xce9   : > { %6149 = vmatpush1.msra.mxu0 %v6074_v36  ;;  %6220 = vmatpush1.msra.mxu1 %v6076_v51  ;;  %v6035_v36 = vld [vmem:[#allocation8 + $0x88] sm:$0xff]  ;;  %v6037_v51 = vld [vmem:[#allocation8 + $0x98] sm:$0xff] }
 0xcea   : > { %6150 = vmatprep.subr.mxu0 %v6071_v29  ;;  %6221 = vmatprep.subr.mxu1 %v6073_v48  ;;  %v6034_v29 = vld [vmem:[#allocation8 + $0x80] sm:$0xff]  ;;  %v6036_v48 = vld [vmem:[#allocation8 + $0x90] sm:$0xff] }
 0xceb   : > { %6151 = vmatpush1.msra.mxu0 %v6070_v42  ;;  %6222 = vmatpush1.msra.mxu1 %v6072_v44  ;;  %v6031_v42 = vld [vmem:[#allocation8 + $0x68] sm:$0xff]  ;;  %v6033_v44 = vld [vmem:[#allocation8 + $0x78] sm:$0xff] }
 0xcec   : > { %6152 = vmatprep.subr.mxu0 %v6067_v47  ;;  %6223 = vmatprep.subr.mxu1 %v6069_v45  ;;  %v6030_v47 = vld [vmem:[#allocation8 + $0x60] sm:$0xff]  ;;  %v6032_v45 = vld [vmem:[#allocation8 + $0x70] sm:$0xff] }
 0xced   : > { %6153 = vmatpush1.msra.mxu0 %v6066_v49  ;;  %6224 = vmatpush1.msra.mxu1 %v6068_v30  ;;  %v6027_v49 = vld [vmem:[#allocation8 + $0x48] sm:$0xff]  ;;  %v6029_v30 = vld [vmem:[#allocation8 + $0x58] sm:$0xff] }
 0xcee   : > { %6154 = vmatprep.subr.mxu0 %v6063_v3  ;;  %6225 = vmatprep.subr.mxu1 %v6065_v33  ;;  %v6026_v3 = vld [vmem:[#allocation8 + $0x40] sm:$0xff]  ;;  %v6028_v33 = vld [vmem:[#allocation8 + $0x50] sm:$0xff] }
 0xcef   : > { %6155 = vmatpush1.msra.mxu0 %v6062_v38  ;;  %6226 = vmatpush1.msra.mxu1 %v6064_v56  ;;  %v6023_v38 = vld [vmem:[#allocation8 + $0x28] sm:$0xff]  ;;  %v6025_v56 = vld [vmem:[#allocation8 + $0x38] sm:$0xff] }
 0xcf0   : > { %6156 = vmatprep.subr.mxu0 %v6059_v41  ;;  %6227 = vmatprep.subr.mxu1 %v6061_v40  ;;  %v6022_v41 = vld [vmem:[#allocation8 + $0x20] sm:$0xff]  ;;  %v6024_v40 = vld [vmem:[#allocation8 + $0x30] sm:$0xff] }
 0xcf1   : > { %6157 = vmatpush1.msra.mxu0 %v6058_v14  ;;  %6228 = vmatpush1.msra.mxu1 %v6060_v53  ;;  %v6019_v14 = vld [vmem:[#allocation8 + $0x8] sm:$0xff]  ;;  %v6021_v53 = vld [vmem:[#allocation8 + $0x18] sm:$0xff] }
 0xcf2   : > { %6158 = vmatprep.subr.mxu0 %v6055_v32  ;;  %6229 = vmatprep.subr.mxu1 %v6057_v18  ;;  %v6018_v32 = vld [vmem:[#allocation8] sm:$0xff]  ;;  %v6020_v18 = vld [vmem:[#allocation8 + $0x10] sm:$0xff] }
 0xcf3   : > { %6159 = vmatpush1.msra.mxu0 %v6054_v59  ;;  %6230 = vmatpush1.msra.mxu1 %v6056_v23  ;;  %v6143_v59 = vld [vmem:[#allocation8 + $0x3e8] sm:$0xff]  ;;  %v6145_v23 = vld [vmem:[#allocation8 + $0x3f8] sm:$0xff] }
 0xcf4   : > { %6160 = vmatprep.subr.mxu0 %v6051_v24  ;;  %6231 = vmatprep.subr.mxu1 %v6053_v61  ;;  %v6142_v24 = vld [vmem:[#allocation8 + $0x3e0] sm:$0xff]  ;;  %v6144_v61 = vld [vmem:[#allocation8 + $0x3f0] sm:$0xff] }
 0xcf5   : > { %6161 = vmatpush1.msra.mxu0 %v6050_v20  ;;  %6232 = vmatpush1.msra.mxu1 %v6052_v55  ;;  %v6139_v20 = vld [vmem:[#allocation8 + $0x3c8] sm:$0xff]  ;;  %v6141_v55 = vld [vmem:[#allocation8 + $0x3d8] sm:$0xff] }
 0xcf6   : > { %6162 = vmatprep.subr.mxu0 %v6047_v58  ;;  %6233 = vmatprep.subr.mxu1 %v6049_v10  ;;  %v6138_v58 = vld [vmem:[#allocation8 + $0x3c0] sm:$0xff]  ;;  %v6140_v10 = vld [vmem:[#allocation8 + $0x3d0] sm:$0xff] }
 0xcf7   : > { %6163 = vmatpush1.msra.mxu0 %v6046_v52  ;;  %6234 = vmatpush1.msra.mxu1 %v6048_v27  ;;  %v6135_v52 = vld [vmem:[#allocation8 + $0x3a8] sm:$0xff]  ;;  %v6137_v27 = vld [vmem:[#allocation8 + $0x3b8] sm:$0xff] }
 0xcf8   : > { %6164 = vmatprep.subr.mxu0 %v6043_v43  ;;  %6235 = vmatprep.subr.mxu1 %v6045_v2  ;;  %v6134_v43 = vld [vmem:[#allocation8 + $0x3a0] sm:$0xff]  ;;  %v6136_v2 = vld [vmem:[#allocation8 + $0x3b0] sm:$0xff] }
 0xcf9   : > { %6165 = vmatpush1.msra.mxu0 %v6042_v12  ;;  %6236 = vmatpush1.msra.mxu1 %v6044_v15  ;;  %v6131_v12 = vld [vmem:[#allocation8 + $0x388] sm:$0xff]  ;;  %v6133_v15 = vld [vmem:[#allocation8 + $0x398] sm:$0xff] }
 0xcfa   : > { %6166 = vmatprep.subr.mxu0 %v6039_v35  ;;  %6237 = vmatprep.subr.mxu1 %v6041_v16  ;;  %v6130_v35 = vld [vmem:[#allocation8 + $0x380] sm:$0xff]  ;;  %v6132_v16 = vld [vmem:[#allocation8 + $0x390] sm:$0xff] }
 0xcfb   : > { %6167 = vmatpush1.msra.mxu0 %v6038_v39  ;;  %6238 = vmatpush1.msra.mxu1 %v6040_v25  ;;  %v6127_v39 = vld [vmem:[#allocation8 + $0x368] sm:$0xff]  ;;  %v6129_v25 = vld [vmem:[#allocation8 + $0x378] sm:$0xff] }
 0xcfc   : > { %6168 = vmatprep.subr.mxu0 %v6035_v36  ;;  %6239 = vmatprep.subr.mxu1 %v6037_v51  ;;  %v6126_v36 = vld [vmem:[#allocation8 + $0x360] sm:$0xff]  ;;  %v6128_v51 = vld [vmem:[#allocation8 + $0x370] sm:$0xff] }
 0xcfd   : > { %6169 = vmatpush1.msra.mxu0 %v6034_v29  ;;  %6240 = vmatpush1.msra.mxu1 %v6036_v48  ;;  %v6123_v29 = vld [vmem:[#allocation8 + $0x348] sm:$0xff]  ;;  %v6125_v48 = vld [vmem:[#allocation8 + $0x358] sm:$0xff] }
 0xcfe   : > { %6170 = vmatprep.subr.mxu0 %v6031_v42  ;;  %6241 = vmatprep.subr.mxu1 %v6033_v44  ;;  %v6122_v42 = vld [vmem:[#allocation8 + $0x340] sm:$0xff]  ;;  %v6124_v44 = vld [vmem:[#allocation8 + $0x350] sm:$0xff] }
 0xcff   : > { %6171 = vmatpush1.msra.mxu0 %v6030_v47  ;;  %6242 = vmatpush1.msra.mxu1 %v6032_v45  ;;  %v6119_v47 = vld [vmem:[#allocation8 + $0x328] sm:$0xff]  ;;  %v6121_v45 = vld [vmem:[#allocation8 + $0x338] sm:$0xff] }
 0xd00   : > { %6172 = vmatprep.subr.mxu0 %v6027_v49  ;;  %6243 = vmatprep.subr.mxu1 %v6029_v30  ;;  %v6118_v49 = vld [vmem:[#allocation8 + $0x320] sm:$0xff]  ;;  %v6120_v30 = vld [vmem:[#allocation8 + $0x330] sm:$0xff] }
 0xd01   : > { %6173 = vmatpush1.msra.mxu0 %v6026_v3  ;;  %6244 = vmatpush1.msra.mxu1 %v6028_v33  ;;  %v6115_v3 = vld [vmem:[#allocation8 + $0x308] sm:$0xff]  ;;  %v6117_v33 = vld [vmem:[#allocation8 + $0x318] sm:$0xff] }
 0xd02   : > { %6174 = vmatprep.subr.mxu0 %v6023_v38  ;;  %6245 = vmatprep.subr.mxu1 %v6025_v56  ;;  %v6114_v38 = vld [vmem:[#allocation8 + $0x300] sm:$0xff]  ;;  %v6116_v56 = vld [vmem:[#allocation8 + $0x310] sm:$0xff] }
 0xd03   : > { %6175 = vmatpush1.msra.mxu0 %v6022_v41  ;;  %6246 = vmatpush1.msra.mxu1 %v6024_v40  ;;  %v6111_v41 = vld [vmem:[#allocation8 + $0x2e8] sm:$0xff]  ;;  %v6113_v40 = vld [vmem:[#allocation8 + $0x2f8] sm:$0xff] }
 0xd04   : > { %6176 = vmatprep.subr.mxu0 %v6019_v14  ;;  %6247 = vmatprep.subr.mxu1 %v6021_v53  ;;  %v6110_v14 = vld [vmem:[#allocation8 + $0x2e0] sm:$0xff]  ;;  %v6112_v53 = vld [vmem:[#allocation8 + $0x2f0] sm:$0xff] }
 0xd05   : > { %6177 = vmatpush1.msra.mxu0 %v6018_v32  ;;  %6248 = vmatpush1.msra.mxu1 %v6020_v18  ;;  %v6107_v32 = vld [vmem:[#allocation8 + $0x2c8] sm:$0xff]  ;;  %v6109_v18 = vld [vmem:[#allocation8 + $0x2d8] sm:$0xff] }
 0xd06   : > { %6178 = vmatprep.subr.mxu0 %v6143_v59  ;;  %6249 = vmatprep.subr.mxu1 %v6145_v23  ;;  %v6106_v59 = vld [vmem:[#allocation8 + $0x2c0] sm:$0xff]  ;;  %v6108_v23 = vld [vmem:[#allocation8 + $0x2d0] sm:$0xff] }
 0xd07   : > { %6179 = vmatpush2.msra.mxu0 %v6142_v24  ;;  %6250 = vmatpush2.msra.mxu1 %v6144_v61  ;;  %v6103_v24 = vld [vmem:[#allocation8 + $0x2a8] sm:$0xff]  ;;  %v6105_v61 = vld [vmem:[#allocation8 + $0x2b8] sm:$0xff] }
 0xd08   : > { %6180 = vmatprep.subr.mxu0 %v6139_v20  ;;  %6251 = vmatprep.subr.mxu1 %v6141_v55  ;;  %v6102_v20 = vld [vmem:[#allocation8 + $0x2a0] sm:$0xff]  ;;  %v6104_v55 = vld [vmem:[#allocation8 + $0x2b0] sm:$0xff] }
 0xd09   : > { %6181 = vmatpush2.msra.mxu0 %v6138_v58  ;;  %6252 = vmatpush2.msra.mxu1 %v6140_v10  ;;  %v6099_v58 = vld [vmem:[#allocation8 + $0x288] sm:$0xff]  ;;  %v6101_v10 = vld [vmem:[#allocation8 + $0x298] sm:$0xff] }
 0xd0a   : > { %6182 = vmatprep.subr.mxu0 %v6135_v52  ;;  %6253 = vmatprep.subr.mxu1 %v6137_v27  ;;  %v6098_v52 = vld [vmem:[#allocation8 + $0x280] sm:$0xff]  ;;  %v6100_v27 = vld [vmem:[#allocation8 + $0x290] sm:$0xff] }
 0xd0b   : > { %6183 = vmatpush2.msra.mxu0 %v6134_v43  ;;  %6254 = vmatpush2.msra.mxu1 %v6136_v2  ;;  %v6095_v43 = vld [vmem:[#allocation8 + $0x268] sm:$0xff]  ;;  %v6097_v2 = vld [vmem:[#allocation8 + $0x278] sm:$0xff] }
 0xd0c   : > { %6184 = vmatprep.subr.mxu0 %v6131_v12  ;;  %6255 = vmatprep.subr.mxu1 %v6133_v15  ;;  %v6094_v12 = vld [vmem:[#allocation8 + $0x260] sm:$0xff]  ;;  %v6096_v15 = vld [vmem:[#allocation8 + $0x270] sm:$0xff] }
 0xd0d   : > { %6185 = vmatpush2.msra.mxu0 %v6130_v35  ;;  %6256 = vmatpush2.msra.mxu1 %v6132_v16  ;;  %v6091_v35 = vld [vmem:[#allocation8 + $0x248] sm:$0xff]  ;;  %v6093_v16 = vld [vmem:[#allocation8 + $0x258] sm:$0xff] }
 0xd0e   : > { %6186 = vmatprep.subr.mxu0 %v6127_v39  ;;  %6257 = vmatprep.subr.mxu1 %v6129_v25  ;;  %v6090_v39 = vld [vmem:[#allocation8 + $0x240] sm:$0xff]  ;;  %v6092_v25 = vld [vmem:[#allocation8 + $0x250] sm:$0xff] }
 0xd0f   : > { %6187 = vmatpush2.msra.mxu0 %v6126_v36  ;;  %6258 = vmatpush2.msra.mxu1 %v6128_v51  ;;  %v6087_v36 = vld [vmem:[#allocation8 + $0x228] sm:$0xff]  ;;  %v6089_v51 = vld [vmem:[#allocation8 + $0x238] sm:$0xff] }
 0xd10   : > { %6188 = vmatprep.subr.mxu0 %v6123_v29  ;;  %6259 = vmatprep.subr.mxu1 %v6125_v48  ;;  %v6086_v29 = vld [vmem:[#allocation8 + $0x220] sm:$0xff]  ;;  %v6088_v48 = vld [vmem:[#allocation8 + $0x230] sm:$0xff] }
 0xd11   : > { %6189 = vmatpush2.msra.mxu0 %v6122_v42  ;;  %6260 = vmatpush2.msra.mxu1 %v6124_v44  ;;  %v6083_v42 = vld [vmem:[#allocation8 + $0x208] sm:$0xff]  ;;  %v6085_v44 = vld [vmem:[#allocation8 + $0x218] sm:$0xff] }
 0xd12   : > { %6190 = vmatprep.subr.mxu0 %v6119_v47  ;;  %6261 = vmatprep.subr.mxu1 %v6121_v45  ;;  %v6082_v47 = vld [vmem:[#allocation8 + $0x200] sm:$0xff]  ;;  %v6084_v45 = vld [vmem:[#allocation8 + $0x210] sm:$0xff] }
 0xd13   : > { %6191 = vmatpush2.msra.mxu0 %v6118_v49  ;;  %6262 = vmatpush2.msra.mxu1 %v6120_v30  ;;  %v6373_v49 = vld [vmem:[#allocation10 + $0x1e8] sm:$0xff]  ;;  %v6375_v30 = vld [vmem:[#allocation10 + $0x1f8] sm:$0xff] }
 0xd14   : > { %6192 = vmatprep.subr.mxu0 %v6115_v3  ;;  %6263 = vmatprep.subr.mxu1 %v6117_v33 }
 0xd15   : > { %6193 = vmatpush2.msra.mxu0 %v6114_v38  ;;  %6264 = vmatpush2.msra.mxu1 %v6116_v56 }
 0xd16   : > { %6194 = vmatprep.subr.mxu0 %v6111_v41  ;;  %6265 = vmatprep.subr.mxu1 %v6113_v40 }
 0xd17   : > { %6195 = vmatpush2.msra.mxu0 %v6110_v14  ;;  %6266 = vmatpush2.msra.mxu1 %v6112_v53 }
 0xd18   : > { %6196 = vmatprep.subr.mxu0 %v6107_v32  ;;  %6267 = vmatprep.subr.mxu1 %v6109_v18 }
 0xd19   : > { %6197 = vmatpush2.msra.mxu0 %v6106_v59  ;;  %6268 = vmatpush2.msra.mxu1 %v6108_v23 }
 0xd1a   : > { %6198 = vmatprep.subr.mxu0 %v6103_v24  ;;  %6269 = vmatprep.subr.mxu1 %v6105_v61 }
 0xd1b   : > { %6199 = vmatpush2.msra.mxu0 %v6102_v20  ;;  %6270 = vmatpush2.msra.mxu1 %v6104_v55 }
 0xd1c   : > { %6200 = vmatprep.subr.mxu0 %v6099_v58  ;;  %6271 = vmatprep.subr.mxu1 %v6101_v10 }
 0xd1d   : > { %6201 = vmatpush2.msra.mxu0 %v6098_v52  ;;  %6272 = vmatpush2.msra.mxu1 %v6100_v27 }
 0xd1e   : > { %6202 = vmatprep.subr.mxu0 %v6095_v43  ;;  %6273 = vmatprep.subr.mxu1 %v6097_v2 }
 0xd1f   : > { %6203 = vmatpush2.msra.mxu0 %v6094_v12  ;;  %6274 = vmatpush2.msra.mxu1 %v6096_v15 }
 0xd20   : > { %6204 = vmatprep.subr.mxu0 %v6091_v35  ;;  %6275 = vmatprep.subr.mxu1 %v6093_v16 }
 0xd21   : > { %6205 = vmatpush2.msra.mxu0 %v6090_v39  ;;  %6276 = vmatpush2.msra.mxu1 %v6092_v25 }
 0xd22   : > { %6206 = vmatprep.subr.mxu0 %v6087_v36  ;;  %6277 = vmatprep.subr.mxu1 %v6089_v51 }
 0xd23   : > { %6207 = vmatpush2.msra.mxu0 %v6086_v29  ;;  %6278 = vmatpush2.msra.mxu1 %v6088_v48 }
 0xd24   : > { %6208 = vmatprep.subr.mxu0 %v6083_v42  ;;  %6279 = vmatprep.subr.mxu1 %v6085_v44 }
 0xd25   : > { %6209 = vmatpush2.msra.mxu0 %v6082_v47  ;;  %6280 = vmatpush2.msra.mxu1 %v6084_v45 }
 0xd26   : > { %6440 = vmatprep.subr.mxu0 %v6373_v49  ;;  %6511 = vmatprep.subr.mxu1 %v6375_v30 }
 0xd83   : > { %v5675_v3 = vpop.f32.mrf.mxu0  ;;  %v5746_v14 = vpop.f32.mrf.mxu1 }
 0xd84   : > { %v5676_v56 = vadd.f32 %v5675_v3, %v8767_v28  ;;  %v5747_v2 = vadd.f32 %v5746_v14, %v8774_v17 }
 0xd85   : > { %v5677_v33 = vpop.f32.mrf.mxu0  ;;  %v5748_v59 = vpop.f32.mrf.mxu1 }
 0xd86   : > { %v5678_v38 = vadd.f32 %v5677_v33, %v8764_v34  ;;  %v7766_v40 = vmul.f32 -1.442695, %v5676_v56 }
 0xd88   : > { %v7767_v41 = vmul.f32 -1.442695, %v5678_v38 }
 0xd8a   : > { %8173 = vpow2.f32 %v7767_v41 }
 0xd8b   : > { %8175 = vpow2.f32 %v7766_v40 }
 0xd97   : > { %v8174_v55 = vpop.eup %8173 }
 0xd98   : > { %v8176_v10 = vpop.eup %8175  ;;  %v5760_v52 = vadd.f32 1.0, %v8174_v55  ;;  %v6367_v55 = vld [vmem:[#allocation10 + $0x1b8] sm:$0xff] }
 0xd99   : > { %v5754_v43 = vadd.f32 1.0, %v8176_v10  ;;  %v6366_v10 = vld [vmem:[#allocation10 + $0x1b0] sm:$0xff] }
 0xda4   : > { %v5914_v53 = vpop.f32.mrf.mxu0  ;;  %v5985_v61 = vpop.f32.mrf.mxu1 }
 0xda5   : > { %v5990_v32 = vadd.f32 %v5914_v53, %v8708_v46  ;;  %v5749_v46 = vadd.f32 %v5748_v59, %v8777_v19  ;;  %v5992_v12 = vadd.f32 %v5985_v61, %v8673_v0  ;;  %v6374_v59 = vld [vmem:[#allocation10 + $0x1f0] sm:$0xff] }
 0xda6   : > { %v5916_v18 = vpop.f32.mrf.mxu0  ;;  %v5987_v58 = vpop.f32.mrf.mxu1  ;;  %v6370_v61 = vld [vmem:[#allocation10 + $0x1d0] sm:$0xff] }
 0xda7   : > { %v7769_v23 = vmul.f32 -1.442695, %v5990_v32  ;;  %v5991_v24 = vadd.f32 %v5916_v18, %v8711_v50  ;;  %v5993_v27 = vadd.f32 %v5987_v58, %v8679_v4  ;;  %v7768_v35 = vmul.f32 -1.442695, %v5749_v46  ;;  %v6372_v18 = vld [vmem:[#allocation10 + $0x1e0] sm:$0xff]  ;;  %v6357_v46 = vld [vmem:[#allocation10 + $0x168] sm:$0xff] }
 0xda8   : > { %v6364_v58 = vld [vmem:[#allocation10 + $0x1a0] sm:$0xff] }
 0xda9   : > { %8177 = vpow2.f32 %v7769_v23  ;;  %v7770_v20 = vmul.f32 -1.442695, %v5991_v24  ;;  %v7771_v15 = vmul.f32 -1.442695, %v5993_v27  ;;  %v6371_v23 = vld [vmem:[#allocation10 + $0x1d8] sm:$0xff]  ;;  %v6368_v24 = vld [vmem:[#allocation10 + $0x1c0] sm:$0xff] }
 0xdaa   : > { %v6363_v27 = vld [vmem:[#allocation10 + $0x198] sm:$0xff] }
 0xdab   : > { %8179 = vpow2.f32 %v7770_v20  ;;  %v6365_v20 = vld [vmem:[#allocation10 + $0x1a8] sm:$0xff] }
 0xdac   : > { %8181 = vrcp.f32 %v5760_v52  ;;  %v6361_v52 = vld [vmem:[#allocation10 + $0x188] sm:$0xff] }
 0xdad   : > { %8183 = vrcp.f32 %v5754_v43  ;;  %v6360_v43 = vld [vmem:[#allocation10 + $0x180] sm:$0xff] }
 0xdae   : > { %8185 = vtanh.f32 %v5747_v2  ;;  %v6362_v2 = vld [vmem:[#allocation10 + $0x190] sm:$0xff] }
 0xdaf   : > { %8187 = vtanh.f32 %v5992_v12  ;;  %v6359_v12 = vld [vmem:[#allocation10 + $0x178] sm:$0xff] }
 0xdb0   : > { %8189 = vpow2.f32 %v7771_v15  ;;  %v6356_v15 = vld [vmem:[#allocation10 + $0x160] sm:$0xff] }
 0xdb6   : > { %v8178_v50 = vpop.eup %8177 }
 0xdb7   : > { %v5997_v16 = vadd.f32 1.0, %v8178_v50  ;;  %v6358_v50 = vld [vmem:[#allocation10 + $0x170] sm:$0xff] }
 0xdb8   : > { %v8180_v39 = vpop.eup %8179 }
 0xdb9   : > { %8191 = vrcp.f32 %v5997_v16  ;;  %v6003_v25 = vadd.f32 1.0, %v8180_v39  ;;  %v8182_v4 = vpop.eup %8181  ;;  %v6355_v16 = vld [vmem:[#allocation10 + $0x158] sm:$0xff]  ;;  %v6352_v39 = vld [vmem:[#allocation10 + $0x140] sm:$0xff] }
 0xdba   : > { %8193 = vpow2.f32 %v7768_v35  ;;  %v8184_v36 = vpop.eup %8183  ;;  %v5770_v29 = vmul.f32 %v8182_v4, %v8951_v63  ;;  %v6353_v35 = vld [vmem:[#allocation10 + $0x148] sm:$0xff] }
 0xdbb   : > { %8195 = vrcp.f32 %v6003_v25  ;;  %v8186_v51 = vpop.eup %8185  ;;  %v6354_v25 = vld [vmem:[#allocation10 + $0x150] sm:$0xff]  ;;  %v6349_v4 = vld [vmem:[#allocation10 + $0x128] sm:$0xff] }
 0xdbc   : > { %v8188_v48 = vpop.eup %8187  ;;  %v5771_v42 = vmul.f32 %v8186_v51, %v8184_v36  ;;  %v6351_v36 = vld [vmem:[#allocation10 + $0x138] sm:$0xff]  ;;  %v6348_v51 = vld [vmem:[#allocation10 + $0x120] sm:$0xff] }
 0xdbd   : > { %v8190_v0 = vpop.eup %8189 }
 0xdbe   : > { %v8993_v49 = vadd.f32 %v5771_v42, %v5770_v29  ;;  %v6010_v3 = vadd.f32 1.0, %v8190_v0  ;;  %v6350_v29 = vld [vmem:[#allocation10 + $0x130] sm:$0xff]  ;;  %v6347_v0 = vld [vmem:[#allocation10 + $0x118] sm:$0xff]  ;;  %v6344_v42 = vld [vmem:[#allocation10 + $0x100] sm:$0xff] }
 0xdc0   : > { %8197 = vtanh.f32 %v8993_v49 }
 0xdc1   : > { %8199 = vrcp.f32 %v6010_v3  ;;  %v6342_v3 = vld [vmem:[#allocation10 + $0xf0] sm:$0xff] }
 0xdc6   : > { %v8192_v44 = vpop.eup %8191 }
 0xdc7   : > { %v8194_v47 = vpop.eup %8193  ;;  %v6014_v45 = vmul.f32 %v8192_v44, %v8188_v48  ;;  %v6345_v48 = vld [vmem:[#allocation10 + $0x108] sm:$0xff]  ;;  %v6346_v44 = vld [vmem:[#allocation10 + $0x110] sm:$0xff] }
 0xdc8   : > { %v8196_v30 = vpop.eup %8195  ;;  %v5767_v38 = vadd.f32 1.0, %v8194_v47  ;;  %v6341_v47 = vld [vmem:[#allocation10 + $0xe8] sm:$0xff] }
 0xdc9   : > { %v6013_v33 = vmul.f32 %v8196_v30, %v8954_v22  ;;  %v6369_v22 = vld [vmem:[#allocation10 + $0x1c8] sm:$0xff]  ;;  %v6340_v30 = vld [vmem:[#allocation10 + $0xe0] sm:$0xff] }
 0xdcb   : > { %v8996_v56 = vadd.f32 %v6014_v45, %v6013_v33  ;;  %v6343_v45 = vld [vmem:[#allocation10 + $0xf8] sm:$0xff]  ;;  %v6337_v33 = vld [vmem:[#allocation10 + $0xc8] sm:$0xff] }
 0xdcd   : > { %8201 = vtanh.f32 %v8996_v56  ;;  %v8198_v63 = vpop.eup %8197 }
 0xdce   : > { %8203 = vrcp.f32 %v5767_v38  ;;  %v8200_v41 = vpop.eup %8199  ;;  %v6339_v38 = vld [vmem:[#allocation10 + $0xd8] sm:$0xff] }
 0xdda   : > { %v8202_v40 = vpop.eup %8201 }
 0xddb   : > { %v8204_v14 = vpop.eup %8203  ;;  %v9000_v53 = vmul.f32 %v8202_v40, %v8200_v41  ;;  %v6338_v41 = vld [vmem:[#allocation10 + $0xd0] sm:$0xff]  ;;  %v6333_v40 = vld [vmem:[#allocation10 + $0xa8] sm:$0xff] }
 0xddc   : > { %v9002_v32 = vmul.f32 %v8204_v14, %v8198_v63  ;;  %v6336_v63 = vld [vmem:[#allocation10 + $0xc0] sm:$0xff]  ;;  %v6335_v14 = vld [vmem:[#allocation10 + $0xb8] sm:$0xff] }
 0xddd   : > { %6211 = vmatmul.mubr.f32.vlgmr.msra.gmra.mxu0 %v9000_v53  ;;  %6282 = vmatmul.mubr.f32.vlgmr.msra.gmra.mxu1 %v9000_v53 }
 0xdde   : > { %6504 = vmatprep.mubr.f32.mxu0 %v9002_v32  ;;  %6575 = vmatprep.mubr.f32.mxu1 %v9002_v32 }
 0xddf   : > { %6441 = vmatpush1.msra.mxu0 %v6372_v18  ;;  %6512 = vmatpush1.msra.mxu1 %v6374_v59  ;;  %v6332_v18 = vld [vmem:[#allocation10 + $0xa0] sm:$0xff]  ;;  %v6334_v59 = vld [vmem:[#allocation10 + $0xb0] sm:$0xff] }
 0xde0   : > { %6442 = vmatprep.subr.mxu0 %v6369_v22  ;;  %6513 = vmatprep.subr.mxu1 %v6371_v23  ;;  %v6329_v22 = vld [vmem:[#allocation10 + $0x88] sm:$0xff]  ;;  %v6331_v23 = vld [vmem:[#allocation10 + $0x98] sm:$0xff] }
 0xde1   : > { %6443 = vmatpush1.msra.mxu0 %v6368_v24  ;;  %6514 = vmatpush1.msra.mxu1 %v6370_v61  ;;  %v6328_v24 = vld [vmem:[#allocation10 + $0x80] sm:$0xff]  ;;  %v6330_v61 = vld [vmem:[#allocation10 + $0x90] sm:$0xff] }
 0xde2   : > { %6444 = vmatprep.subr.mxu0 %v6365_v20  ;;  %6515 = vmatprep.subr.mxu1 %v6367_v55  ;;  %v6325_v20 = vld [vmem:[#allocation10 + $0x68] sm:$0xff]  ;;  %v6327_v55 = vld [vmem:[#allocation10 + $0x78] sm:$0xff] }
 0xde3   : > { %6445 = vmatpush1.msra.mxu0 %v6364_v58  ;;  %6516 = vmatpush1.msra.mxu1 %v6366_v10  ;;  %v6324_v58 = vld [vmem:[#allocation10 + $0x60] sm:$0xff]  ;;  %v6326_v10 = vld [vmem:[#allocation10 + $0x70] sm:$0xff] }
 0xde4   : > { %6446 = vmatprep.subr.mxu0 %v6361_v52  ;;  %6517 = vmatprep.subr.mxu1 %v6363_v27  ;;  %v6321_v52 = vld [vmem:[#allocation10 + $0x48] sm:$0xff]  ;;  %v6323_v27 = vld [vmem:[#allocation10 + $0x58] sm:$0xff] }
 0xde5   : > { %6447 = vmatpush1.msra.mxu0 %v6360_v43  ;;  %6518 = vmatpush1.msra.mxu1 %v6362_v2  ;;  %v6320_v43 = vld [vmem:[#allocation10 + $0x40] sm:$0xff]  ;;  %v6322_v2 = vld [vmem:[#allocation10 + $0x50] sm:$0xff] }
 0xde6   : > { %6448 = vmatprep.subr.mxu0 %v6357_v46  ;;  %6519 = vmatprep.subr.mxu1 %v6359_v12  ;;  %v6317_v46 = vld [vmem:[#allocation10 + $0x28] sm:$0xff]  ;;  %v6319_v12 = vld [vmem:[#allocation10 + $0x38] sm:$0xff] }
 0xde7   : > { %6449 = vmatpush1.msra.mxu0 %v6356_v15  ;;  %6520 = vmatpush1.msra.mxu1 %v6358_v50  ;;  %v6316_v15 = vld [vmem:[#allocation10 + $0x20] sm:$0xff]  ;;  %v6318_v50 = vld [vmem:[#allocation10 + $0x30] sm:$0xff] }
 0xde8   : > { %6450 = vmatprep.subr.mxu0 %v6353_v35  ;;  %6521 = vmatprep.subr.mxu1 %v6355_v16  ;;  %v6313_v35 = vld [vmem:[#allocation10 + $0x8] sm:$0xff]  ;;  %v6315_v16 = vld [vmem:[#allocation10 + $0x18] sm:$0xff] }
 0xde9   : > { %6451 = vmatpush1.msra.mxu0 %v6352_v39  ;;  %6522 = vmatpush1.msra.mxu1 %v6354_v25  ;;  %v6312_v39 = vld [vmem:[#allocation10] sm:$0xff]  ;;  %v6314_v25 = vld [vmem:[#allocation10 + $0x10] sm:$0xff] }
 0xdea   : > { %6452 = vmatprep.subr.mxu0 %v6349_v4  ;;  %6523 = vmatprep.subr.mxu1 %v6351_v36  ;;  %v6437_v4 = vld [vmem:[#allocation10 + $0x3e8] sm:$0xff]  ;;  %v6439_v36 = vld [vmem:[#allocation10 + $0x3f8] sm:$0xff] }
 0xdeb   : > { %6453 = vmatpush1.msra.mxu0 %v6348_v51  ;;  %6524 = vmatpush1.msra.mxu1 %v6350_v29  ;;  %v6436_v51 = vld [vmem:[#allocation10 + $0x3e0] sm:$0xff]  ;;  %v6438_v29 = vld [vmem:[#allocation10 + $0x3f0] sm:$0xff] }
 0xdec   : > { %6454 = vmatprep.subr.mxu0 %v6345_v48  ;;  %6525 = vmatprep.subr.mxu1 %v6347_v0  ;;  %v6433_v48 = vld [vmem:[#allocation10 + $0x3c8] sm:$0xff]  ;;  %v6435_v0 = vld [vmem:[#allocation10 + $0x3d8] sm:$0xff] }
 0xded   : > { %6455 = vmatpush1.msra.mxu0 %v6344_v42  ;;  %6526 = vmatpush1.msra.mxu1 %v6346_v44  ;;  %v6432_v42 = vld [vmem:[#allocation10 + $0x3c0] sm:$0xff]  ;;  %v6434_v44 = vld [vmem:[#allocation10 + $0x3d0] sm:$0xff] }
 0xdee   : > { %6456 = vmatprep.subr.mxu0 %v6341_v47  ;;  %6527 = vmatprep.subr.mxu1 %v6343_v45  ;;  %v6429_v47 = vld [vmem:[#allocation10 + $0x3a8] sm:$0xff]  ;;  %v6431_v45 = vld [vmem:[#allocation10 + $0x3b8] sm:$0xff] }
 0xdef   : > { %6457 = vmatpush1.msra.mxu0 %v6340_v30  ;;  %6528 = vmatpush1.msra.mxu1 %v6342_v3  ;;  %v6428_v30 = vld [vmem:[#allocation10 + $0x3a0] sm:$0xff]  ;;  %v6430_v3 = vld [vmem:[#allocation10 + $0x3b0] sm:$0xff] }
 0xdf0   : > { %6458 = vmatprep.subr.mxu0 %v6337_v33  ;;  %6529 = vmatprep.subr.mxu1 %v6339_v38  ;;  %v6425_v33 = vld [vmem:[#allocation10 + $0x388] sm:$0xff]  ;;  %v6427_v38 = vld [vmem:[#allocation10 + $0x398] sm:$0xff] }
 0xdf1   : > { %6459 = vmatpush1.msra.mxu0 %v6336_v63  ;;  %6530 = vmatpush1.msra.mxu1 %v6338_v41  ;;  %v6424_v63 = vld [vmem:[#allocation10 + $0x380] sm:$0xff]  ;;  %v6426_v41 = vld [vmem:[#allocation10 + $0x390] sm:$0xff] }
 0xdf2   : > { %6460 = vmatprep.subr.mxu0 %v6333_v40  ;;  %6531 = vmatprep.subr.mxu1 %v6335_v14  ;;  %v6421_v40 = vld [vmem:[#allocation10 + $0x368] sm:$0xff]  ;;  %v6423_v14 = vld [vmem:[#allocation10 + $0x378] sm:$0xff] }
 0xdf3   : > { %6461 = vmatpush1.msra.mxu0 %v6332_v18  ;;  %6532 = vmatpush1.msra.mxu1 %v6334_v59  ;;  %v6420_v18 = vld [vmem:[#allocation10 + $0x360] sm:$0xff]  ;;  %v6422_v59 = vld [vmem:[#allocation10 + $0x370] sm:$0xff] }
 0xdf4   : > { %6462 = vmatprep.subr.mxu0 %v6329_v22  ;;  %6533 = vmatprep.subr.mxu1 %v6331_v23  ;;  %v6417_v22 = vld [vmem:[#allocation10 + $0x348] sm:$0xff]  ;;  %v6419_v23 = vld [vmem:[#allocation10 + $0x358] sm:$0xff] }
 0xdf5   : > { %6463 = vmatpush1.msra.mxu0 %v6328_v24  ;;  %6534 = vmatpush1.msra.mxu1 %v6330_v61  ;;  %v6416_v24 = vld [vmem:[#allocation10 + $0x340] sm:$0xff]  ;;  %v6418_v61 = vld [vmem:[#allocation10 + $0x350] sm:$0xff] }
 0xdf6   : > { %6464 = vmatprep.subr.mxu0 %v6325_v20  ;;  %6535 = vmatprep.subr.mxu1 %v6327_v55  ;;  %v6413_v20 = vld [vmem:[#allocation10 + $0x328] sm:$0xff]  ;;  %v6415_v55 = vld [vmem:[#allocation10 + $0x338] sm:$0xff] }
 0xdf7   : > { %6465 = vmatpush1.msra.mxu0 %v6324_v58  ;;  %6536 = vmatpush1.msra.mxu1 %v6326_v10  ;;  %v6412_v58 = vld [vmem:[#allocation10 + $0x320] sm:$0xff]  ;;  %v6414_v10 = vld [vmem:[#allocation10 + $0x330] sm:$0xff] }
 0xdf8   : > { %6466 = vmatprep.subr.mxu0 %v6321_v52  ;;  %6537 = vmatprep.subr.mxu1 %v6323_v27  ;;  %v6409_v52 = vld [vmem:[#allocation10 + $0x308] sm:$0xff]  ;;  %v6411_v27 = vld [vmem:[#allocation10 + $0x318] sm:$0xff] }
 0xdf9   : > { %6467 = vmatpush1.msra.mxu0 %v6320_v43  ;;  %6538 = vmatpush1.msra.mxu1 %v6322_v2  ;;  %v6408_v43 = vld [vmem:[#allocation10 + $0x300] sm:$0xff]  ;;  %v6410_v2 = vld [vmem:[#allocation10 + $0x310] sm:$0xff] }
 0xdfa   : > { %6468 = vmatprep.subr.mxu0 %v6317_v46  ;;  %6539 = vmatprep.subr.mxu1 %v6319_v12  ;;  %v6405_v46 = vld [vmem:[#allocation10 + $0x2e8] sm:$0xff]  ;;  %v6407_v12 = vld [vmem:[#allocation10 + $0x2f8] sm:$0xff] }
 0xdfb   : > { %6469 = vmatpush1.msra.mxu0 %v6316_v15  ;;  %6540 = vmatpush1.msra.mxu1 %v6318_v50  ;;  %v6404_v15 = vld [vmem:[#allocation10 + $0x2e0] sm:$0xff]  ;;  %v6406_v50 = vld [vmem:[#allocation10 + $0x2f0] sm:$0xff] }
 0xdfc   : > { %6470 = vmatprep.subr.mxu0 %v6313_v35  ;;  %6541 = vmatprep.subr.mxu1 %v6315_v16  ;;  %v6401_v35 = vld [vmem:[#allocation10 + $0x2c8] sm:$0xff]  ;;  %v6403_v16 = vld [vmem:[#allocation10 + $0x2d8] sm:$0xff] }
 0xdfd   : > { %6471 = vmatpush1.msra.mxu0 %v6312_v39  ;;  %6542 = vmatpush1.msra.mxu1 %v6314_v25  ;;  %v6400_v39 = vld [vmem:[#allocation10 + $0x2c0] sm:$0xff]  ;;  %v6402_v25 = vld [vmem:[#allocation10 + $0x2d0] sm:$0xff] }
 0xdfe   : > { %6472 = vmatprep.subr.mxu0 %v6437_v4  ;;  %6543 = vmatprep.subr.mxu1 %v6439_v36  ;;  %v6397_v4 = vld [vmem:[#allocation10 + $0x2a8] sm:$0xff]  ;;  %v6399_v36 = vld [vmem:[#allocation10 + $0x2b8] sm:$0xff] }
 0xdff   : > { %6473 = vmatpush2.msra.mxu0 %v6436_v51  ;;  %6544 = vmatpush2.msra.mxu1 %v6438_v29  ;;  %v6396_v51 = vld [vmem:[#allocation10 + $0x2a0] sm:$0xff]  ;;  %v6398_v29 = vld [vmem:[#allocation10 + $0x2b0] sm:$0xff] }
 0xe00   : > { %6474 = vmatprep.subr.mxu0 %v6433_v48  ;;  %6545 = vmatprep.subr.mxu1 %v6435_v0  ;;  %v6393_v48 = vld [vmem:[#allocation10 + $0x288] sm:$0xff]  ;;  %v6395_v0 = vld [vmem:[#allocation10 + $0x298] sm:$0xff] }
 0xe01   : > { %6475 = vmatpush2.msra.mxu0 %v6432_v42  ;;  %6546 = vmatpush2.msra.mxu1 %v6434_v44  ;;  %v6392_v42 = vld [vmem:[#allocation10 + $0x280] sm:$0xff]  ;;  %v6394_v44 = vld [vmem:[#allocation10 + $0x290] sm:$0xff] }
 0xe02   : > { %6476 = vmatprep.subr.mxu0 %v6429_v47  ;;  %6547 = vmatprep.subr.mxu1 %v6431_v45  ;;  %v6389_v47 = vld [vmem:[#allocation10 + $0x268] sm:$0xff]  ;;  %v6391_v45 = vld [vmem:[#allocation10 + $0x278] sm:$0xff] }
 0xe03   : > { %6477 = vmatpush2.msra.mxu0 %v6428_v30  ;;  %6548 = vmatpush2.msra.mxu1 %v6430_v3  ;;  %v6388_v30 = vld [vmem:[#allocation10 + $0x260] sm:$0xff]  ;;  %v6390_v3 = vld [vmem:[#allocation10 + $0x270] sm:$0xff] }
 0xe04   : > { %6478 = vmatprep.subr.mxu0 %v6425_v33  ;;  %6549 = vmatprep.subr.mxu1 %v6427_v38  ;;  %v6385_v33 = vld [vmem:[#allocation10 + $0x248] sm:$0xff]  ;;  %v6387_v38 = vld [vmem:[#allocation10 + $0x258] sm:$0xff] }
 0xe05   : > { %6479 = vmatpush2.msra.mxu0 %v6424_v63  ;;  %6550 = vmatpush2.msra.mxu1 %v6426_v41  ;;  %v6384_v63 = vld [vmem:[#allocation10 + $0x240] sm:$0xff]  ;;  %v6386_v41 = vld [vmem:[#allocation10 + $0x250] sm:$0xff] }
 0xe06   : > { %6480 = vmatprep.subr.mxu0 %v6421_v40  ;;  %6551 = vmatprep.subr.mxu1 %v6423_v14  ;;  %v6381_v40 = vld [vmem:[#allocation10 + $0x228] sm:$0xff]  ;;  %v6383_v14 = vld [vmem:[#allocation10 + $0x238] sm:$0xff] }
 0xe07   : > { %6481 = vmatpush2.msra.mxu0 %v6420_v18  ;;  %6552 = vmatpush2.msra.mxu1 %v6422_v59  ;;  %v6380_v18 = vld [vmem:[#allocation10 + $0x220] sm:$0xff]  ;;  %v6382_v59 = vld [vmem:[#allocation10 + $0x230] sm:$0xff] }
 0xe08   : > { %6482 = vmatprep.subr.mxu0 %v6417_v22  ;;  %6553 = vmatprep.subr.mxu1 %v6419_v23  ;;  %v6377_v22 = vld [vmem:[#allocation10 + $0x208] sm:$0xff]  ;;  %v6379_v23 = vld [vmem:[#allocation10 + $0x218] sm:$0xff] }
 0xe09   : > { %6483 = vmatpush2.msra.mxu0 %v6416_v24  ;;  %6554 = vmatpush2.msra.mxu1 %v6418_v61  ;;  %v6376_v24 = vld [vmem:[#allocation10 + $0x200] sm:$0xff]  ;;  %v6378_v61 = vld [vmem:[#allocation10 + $0x210] sm:$0xff] }
 0xe0a   : > { %6484 = vmatprep.subr.mxu0 %v6413_v20  ;;  %6555 = vmatprep.subr.mxu1 %v6415_v55  ;;  %v6676_v20 = vld [vmem:[#allocation6 + $0x1e8] sm:$0xff]  ;;  %v6678_v55 = vld [vmem:[#allocation6 + $0x1f8] sm:$0xff] }
 0xe0b   : > { %6485 = vmatpush2.msra.mxu0 %v6412_v58  ;;  %6556 = vmatpush2.msra.mxu1 %v6414_v10 }
 0xe0c   : > { %6486 = vmatprep.subr.mxu0 %v6409_v52  ;;  %6557 = vmatprep.subr.mxu1 %v6411_v27 }
 0xe0d   : > { %6487 = vmatpush2.msra.mxu0 %v6408_v43  ;;  %6558 = vmatpush2.msra.mxu1 %v6410_v2 }
 0xe0e   : > { %6488 = vmatprep.subr.mxu0 %v6405_v46  ;;  %6559 = vmatprep.subr.mxu1 %v6407_v12 }
 0xe0f   : > { %6489 = vmatpush2.msra.mxu0 %v6404_v15  ;;  %6560 = vmatpush2.msra.mxu1 %v6406_v50 }
 0xe10   : > { %6490 = vmatprep.subr.mxu0 %v6401_v35  ;;  %6561 = vmatprep.subr.mxu1 %v6403_v16 }
 0xe11   : > { %6491 = vmatpush2.msra.mxu0 %v6400_v39  ;;  %6562 = vmatpush2.msra.mxu1 %v6402_v25 }
 0xe12   : > { %6492 = vmatprep.subr.mxu0 %v6397_v4  ;;  %6563 = vmatprep.subr.mxu1 %v6399_v36 }
 0xe13   : > { %6493 = vmatpush2.msra.mxu0 %v6396_v51  ;;  %6564 = vmatpush2.msra.mxu1 %v6398_v29 }
 0xe14   : > { %6494 = vmatprep.subr.mxu0 %v6393_v48  ;;  %6565 = vmatprep.subr.mxu1 %v6395_v0 }
 0xe15   : > { %6495 = vmatpush2.msra.mxu0 %v6392_v42  ;;  %6566 = vmatpush2.msra.mxu1 %v6394_v44 }
 0xe16   : > { %6496 = vmatprep.subr.mxu0 %v6389_v47  ;;  %6567 = vmatprep.subr.mxu1 %v6391_v45 }
 0xe17   : > { %6497 = vmatpush2.msra.mxu0 %v6388_v30  ;;  %6568 = vmatpush2.msra.mxu1 %v6390_v3 }
 0xe18   : > { %6498 = vmatprep.subr.mxu0 %v6385_v33  ;;  %6569 = vmatprep.subr.mxu1 %v6387_v38  ;;  %v6675_v33 = vld [vmem:[#allocation6 + $0x1e0] sm:$0xff]  ;;  %v6677_v38 = vld [vmem:[#allocation6 + $0x1f0] sm:$0xff] }
 0xe19   : > { %6499 = vmatpush2.msra.mxu0 %v6384_v63  ;;  %6570 = vmatpush2.msra.mxu1 %v6386_v41  ;;  %v6672_v63 = vld [vmem:[#allocation6 + $0x1c8] sm:$0xff]  ;;  %v6674_v41 = vld [vmem:[#allocation6 + $0x1d8] sm:$0xff] }
 0xe1a   : > { %6500 = vmatprep.subr.mxu0 %v6381_v40  ;;  %6571 = vmatprep.subr.mxu1 %v6383_v14  ;;  %v6671_v40 = vld [vmem:[#allocation6 + $0x1c0] sm:$0xff]  ;;  %v6673_v14 = vld [vmem:[#allocation6 + $0x1d0] sm:$0xff] }
 0xe1b   : > { %6501 = vmatpush2.msra.mxu0 %v6380_v18  ;;  %6572 = vmatpush2.msra.mxu1 %v6382_v59  ;;  %v6670_v18 = vld [vmem:[#allocation6 + $0x1b8] sm:$0xff]  ;;  %v6667_v59 = vld [vmem:[#allocation6 + $0x1a0] sm:$0xff] }
 0xe1c   : > { %6502 = vmatprep.subr.mxu0 %v6377_v22  ;;  %6573 = vmatprep.subr.mxu1 %v6379_v23  ;;  %v6669_v22 = vld [vmem:[#allocation6 + $0x1b0] sm:$0xff]  ;;  %v6664_v23 = vld [vmem:[#allocation6 + $0x188] sm:$0xff] }
 0xe1d   : > { %6503 = vmatpush2.msra.mxu0 %v6376_v24  ;;  %6574 = vmatpush2.msra.mxu1 %v6378_v61  ;;  %v6666_v24 = vld [vmem:[#allocation6 + $0x198] sm:$0xff]  ;;  %v6663_v61 = vld [vmem:[#allocation6 + $0x180] sm:$0xff] }
 0xe1e   : > { %6679 = vmatprep.subr.mxu0 %v6676_v20  ;;  %6750 = vmatprep.subr.mxu1 %v6678_v55  ;;  %v6665_v20 = vld [vmem:[#allocation6 + $0x190] sm:$0xff]  ;;  %v6660_v55 = vld [vmem:[#allocation6 + $0x168] sm:$0xff] }
 0xe9d   : > { %v6212_v58 = vpop.f32.mrf.mxu0  ;;  %v6283_v2 = vpop.f32.mrf.mxu1 }
 0xe9e   : > { %v6213_v10 = vadd.f32 %v6212_v58, %v8730_v7  ;;  %v6284_v16 = vadd.f32 %v6283_v2, %v8744_v31  ;;  %v6662_v58 = vld [vmem:[#allocation6 + $0x178] sm:$0xff]  ;;  %v6655_v2 = vld [vmem:[#allocation6 + $0x140] sm:$0xff] }
 0xe9f   : > { %v6214_v52 = vpop.f32.mrf.mxu0  ;;  %v6285_v12 = vpop.f32.mrf.mxu1 }
 0xea0   : > { %v7772_v27 = vmul.f32 -1.442695, %v6213_v10  ;;  %v6215_v43 = vadd.f32 %v6214_v52, %v8735_v11  ;;  %v6286_v15 = vadd.f32 %v6285_v12, %v8740_v21  ;;  %v6659_v10 = vld [vmem:[#allocation6 + $0x160] sm:$0xff]  ;;  %v6661_v52 = vld [vmem:[#allocation6 + $0x170] sm:$0xff]  ;;  %v6652_v12 = vld [vmem:[#allocation6 + $0x128] sm:$0xff] }
 0xea2   : > { %8205 = vpow2.f32 %v7772_v27  ;;  %v7773_v46 = vmul.f32 -1.442695, %v6215_v43  ;;  %v7774_v50 = vmul.f32 -1.442695, %v6286_v15  ;;  %v6656_v27 = vld [vmem:[#allocation6 + $0x148] sm:$0xff]  ;;  %v6658_v43 = vld [vmem:[#allocation6 + $0x158] sm:$0xff] }
 0xea3   : > { %v6654_v15 = vld [vmem:[#allocation6 + $0x138] sm:$0xff] }
 0xea4   : > { %8207 = vpow2.f32 %v7773_v46  ;;  %v6657_v46 = vld [vmem:[#allocation6 + $0x150] sm:$0xff] }
 0xea5   : > { %8209 = vpow2.f32 %v7774_v50  ;;  %v6651_v50 = vld [vmem:[#allocation6 + $0x120] sm:$0xff] }
 0xeaf   : > { %v8206_v35 = vpop.eup %8205 }
 0xeb0   : > { %v6291_v39 = vadd.f32 1.0, %v8206_v35  ;;  %v6653_v35 = vld [vmem:[#allocation6 + $0x130] sm:$0xff] }
 0xeb1   : > { %v8208_v25 = vpop.eup %8207 }
 0xeb2   : > { %8211 = vrcp.f32 %v6291_v39  ;;  %v6297_v4 = vadd.f32 1.0, %v8208_v25  ;;  %v8210_v36 = vpop.eup %8209  ;;  %v6650_v39 = vld [vmem:[#allocation6 + $0x118] sm:$0xff]  ;;  %v6647_v25 = vld [vmem:[#allocation6 + $0x100] sm:$0xff] }
 0xeb3   : > { %8213 = vtanh.f32 %v6284_v16  ;;  %v6304_v0 = vadd.f32 1.0, %v8210_v36  ;;  %v6648_v16 = vld [vmem:[#allocation6 + $0x108] sm:$0xff] }
 0xeb4   : > { %8215 = vrcp.f32 %v6297_v4  ;;  %v6649_v4 = vld [vmem:[#allocation6 + $0x110] sm:$0xff]  ;;  %v6644_v36 = vld [vmem:[#allocation6 + $0xe8] sm:$0xff] }
 0xeb5   : > { %8217 = vrcp.f32 %v6304_v0  ;;  %v6640_v0 = vld [vmem:[#allocation6 + $0xc8] sm:$0xff] }
 0xebf   : > { %v8212_v51 = vpop.eup %8211 }
 0xec0   : > { %v8214_v29 = vpop.eup %8213 }
 0xec1   : > { %v8216_v48 = vpop.eup %8215  ;;  %v6308_v42 = vmul.f32 %v8214_v29, %v8212_v51  ;;  %v6646_v51 = vld [vmem:[#allocation6 + $0xf8] sm:$0xff]  ;;  %v6643_v29 = vld [vmem:[#allocation6 + $0xe0] sm:$0xff] }
 0xec2   : > { %v6307_v44 = vmul.f32 %v8216_v48, %v8971_v6  ;;  %v8218_v45 = vpop.eup %8217  ;;  %v6668_v6 = vld [vmem:[#allocation6 + $0x1a8] sm:$0xff]  ;;  %v6645_v48 = vld [vmem:[#allocation6 + $0xf0] sm:$0xff] }
 0xec4   : > { %v9013_v47 = vadd.f32 %v6308_v42, %v6307_v44  ;;  %v6642_v42 = vld [vmem:[#allocation6 + $0xd8] sm:$0xff]  ;;  %v6639_v44 = vld [vmem:[#allocation6 + $0xc0] sm:$0xff] }
 0xec6   : > { %8219 = vtanh.f32 %v9013_v47 }
 0xed3   : > { %v8220_v30 = vpop.eup %8219 }
 0xed4   : > { %v9016_v3 = vmul.f32 %v8220_v30, %v8218_v45  ;;  %v6641_v45 = vld [vmem:[#allocation6 + $0xd0] sm:$0xff]  ;;  %v6636_v30 = vld [vmem:[#allocation6 + $0xa8] sm:$0xff] }
 0xed6   : > { %6505 = vmatmul.mubr.f32.vlgmr.msra.gmra.mxu0 %v9016_v3  ;;  %6576 = vmatmul.mubr.f32.vlgmr.msra.gmra.mxu1 %v9016_v3 }
 0xed7   : > { %6680 = vmatpush1.msra.mxu0 %v6675_v33  ;;  %6751 = vmatpush1.msra.mxu1 %v6677_v38  ;;  %v6638_v33 = vld [vmem:[#allocation6 + $0xb8] sm:$0xff]  ;;  %v6635_v38 = vld [vmem:[#allocation6 + $0xa0] sm:$0xff] }
 0xed8   : > { %6681 = vmatprep.subr.mxu0 %v6672_v63  ;;  %6752 = vmatprep.subr.mxu1 %v6674_v41  ;;  %v6637_v63 = vld [vmem:[#allocation6 + $0xb0] sm:$0xff]  ;;  %v6632_v41 = vld [vmem:[#allocation6 + $0x88] sm:$0xff] }
 0xed9   : > { %6682 = vmatpush1.msra.mxu0 %v6671_v40  ;;  %6753 = vmatpush1.msra.mxu1 %v6673_v14  ;;  %v6634_v40 = vld [vmem:[#allocation6 + $0x98] sm:$0xff]  ;;  %v6631_v14 = vld [vmem:[#allocation6 + $0x80] sm:$0xff] }
 0xeda   : > { %6683 = vmatprep.subr.mxu0 %v6668_v6  ;;  %6754 = vmatprep.subr.mxu1 %v6670_v18  ;;  %v6633_v6 = vld [vmem:[#allocation6 + $0x90] sm:$0xff]  ;;  %v6628_v18 = vld [vmem:[#allocation6 + $0x68] sm:$0xff] }
 0xedb   : > { %6684 = vmatpush1.msra.mxu0 %v6667_v59  ;;  %6755 = vmatpush1.msra.mxu1 %v6669_v22  ;;  %v6630_v59 = vld [vmem:[#allocation6 + $0x78] sm:$0xff]  ;;  %v6627_v22 = vld [vmem:[#allocation6 + $0x60] sm:$0xff] }
 0xedc   : > { %6685 = vmatprep.subr.mxu0 %v6664_v23  ;;  %6756 = vmatprep.subr.mxu1 %v6666_v24  ;;  %v6629_v23 = vld [vmem:[#allocation6 + $0x70] sm:$0xff]  ;;  %v6624_v24 = vld [vmem:[#allocation6 + $0x48] sm:$0xff] }
 0xedd   : > { %6686 = vmatpush1.msra.mxu0 %v6663_v61  ;;  %6757 = vmatpush1.msra.mxu1 %v6665_v20  ;;  %v6626_v61 = vld [vmem:[#allocation6 + $0x58] sm:$0xff]  ;;  %v6623_v20 = vld [vmem:[#allocation6 + $0x40] sm:$0xff] }
 0xede   : > { %6687 = vmatprep.subr.mxu0 %v6660_v55  ;;  %6758 = vmatprep.subr.mxu1 %v6662_v58  ;;  %v6625_v55 = vld [vmem:[#allocation6 + $0x50] sm:$0xff]  ;;  %v6620_v58 = vld [vmem:[#allocation6 + $0x28] sm:$0xff] }
 0xedf   : > { %6688 = vmatpush1.msra.mxu0 %v6659_v10  ;;  %6759 = vmatpush1.msra.mxu1 %v6661_v52  ;;  %v6622_v10 = vld [vmem:[#allocation6 + $0x38] sm:$0xff]  ;;  %v6619_v52 = vld [vmem:[#allocation6 + $0x20] sm:$0xff] }
 0xee0   : > { %6689 = vmatprep.subr.mxu0 %v6656_v27  ;;  %6760 = vmatprep.subr.mxu1 %v6658_v43  ;;  %v6621_v27 = vld [vmem:[#allocation6 + $0x30] sm:$0xff]  ;;  %v6616_v43 = vld [vmem:[#allocation6 + $0x8] sm:$0xff] }
 0xee1   : > { %6690 = vmatpush1.msra.mxu0 %v6655_v2  ;;  %6761 = vmatpush1.msra.mxu1 %v6657_v46  ;;  %v6618_v2 = vld [vmem:[#allocation6 + $0x18] sm:$0xff]  ;;  %v6615_v46 = vld [vmem:[#allocation6] sm:$0xff] }
 0xee2   : > { %6691 = vmatprep.subr.mxu0 %v6652_v12  ;;  %6762 = vmatprep.subr.mxu1 %v6654_v15  ;;  %v6617_v12 = vld [vmem:[#allocation6 + $0x10] sm:$0xff]  ;;  %v6910_v15 = vld [vmem:[#allocation8 + $0x1e8] sm:$0xff] }
 0xee3   : > { %6692 = vmatpush1.msra.mxu0 %v6651_v50  ;;  %6763 = vmatpush1.msra.mxu1 %v6653_v35  ;;  %v6912_v50 = vld [vmem:[#allocation8 + $0x1f8] sm:$0xff]  ;;  %v6909_v35 = vld [vmem:[#allocation8 + $0x1e0] sm:$0xff] }
 0xee4   : > { %6693 = vmatprep.subr.mxu0 %v6648_v16  ;;  %6764 = vmatprep.subr.mxu1 %v6650_v39  ;;  %v6911_v16 = vld [vmem:[#allocation8 + $0x1f0] sm:$0xff]  ;;  %v6906_v39 = vld [vmem:[#allocation8 + $0x1c8] sm:$0xff] }
 0xee5   : > { %6694 = vmatpush1.msra.mxu0 %v6647_v25  ;;  %6765 = vmatpush1.msra.mxu1 %v6649_v4  ;;  %v6908_v25 = vld [vmem:[#allocation8 + $0x1d8] sm:$0xff]  ;;  %v6907_v4 = vld [vmem:[#allocation8 + $0x1d0] sm:$0xff] }
 0xee6   : > { %6695 = vmatprep.subr.mxu0 %v6644_v36  ;;  %6766 = vmatprep.subr.mxu1 %v6646_v51  ;;  %v6904_v36 = vld [vmem:[#allocation8 + $0x1b8] sm:$0xff]  ;;  %v6903_v51 = vld [vmem:[#allocation8 + $0x1b0] sm:$0xff] }
 0xee7   : > { %6696 = vmatpush1.msra.mxu0 %v6643_v29  ;;  %6767 = vmatpush1.msra.mxu1 %v6645_v48  ;;  %v6898_v29 = vld [vmem:[#allocation8 + $0x188] sm:$0xff]  ;;  %v6900_v48 = vld [vmem:[#allocation8 + $0x198] sm:$0xff] }
 0xee8   : > { %6697 = vmatprep.subr.mxu0 %v6640_v0  ;;  %6768 = vmatprep.subr.mxu1 %v6642_v42  ;;  %v6897_v0 = vld [vmem:[#allocation8 + $0x180] sm:$0xff]  ;;  %v6899_v42 = vld [vmem:[#allocation8 + $0x190] sm:$0xff] }
 0xee9   : > { %6698 = vmatpush1.msra.mxu0 %v6639_v44  ;;  %6769 = vmatpush1.msra.mxu1 %v6641_v45  ;;  %v6894_v44 = vld [vmem:[#allocation8 + $0x168] sm:$0xff]  ;;  %v6896_v45 = vld [vmem:[#allocation8 + $0x178] sm:$0xff] }
 0xeea   : > { %6699 = vmatprep.subr.mxu0 %v6636_v30  ;;  %6770 = vmatprep.subr.mxu1 %v6638_v33  ;;  %v6893_v30 = vld [vmem:[#allocation8 + $0x160] sm:$0xff]  ;;  %v6895_v33 = vld [vmem:[#allocation8 + $0x170] sm:$0xff] }
 0xeeb   : > { %6700 = vmatpush1.msra.mxu0 %v6635_v38  ;;  %6771 = vmatpush1.msra.mxu1 %v6637_v63  ;;  %v6890_v38 = vld [vmem:[#allocation8 + $0x148] sm:$0xff]  ;;  %v6892_v63 = vld [vmem:[#allocation8 + $0x158] sm:$0xff] }
 0xeec   : > { %6701 = vmatprep.subr.mxu0 %v6632_v41  ;;  %6772 = vmatprep.subr.mxu1 %v6634_v40  ;;  %v6889_v41 = vld [vmem:[#allocation8 + $0x140] sm:$0xff]  ;;  %v6891_v40 = vld [vmem:[#allocation8 + $0x150] sm:$0xff] }
 0xeed   : > { %6702 = vmatpush1.msra.mxu0 %v6631_v14  ;;  %6773 = vmatpush1.msra.mxu1 %v6633_v6  ;;  %v6886_v14 = vld [vmem:[#allocation8 + $0x128] sm:$0xff]  ;;  %v6888_v6 = vld [vmem:[#allocation8 + $0x138] sm:$0xff] }
 0xeee   : > { %6703 = vmatprep.subr.mxu0 %v6628_v18  ;;  %6774 = vmatprep.subr.mxu1 %v6630_v59  ;;  %v6885_v18 = vld [vmem:[#allocation8 + $0x120] sm:$0xff]  ;;  %v6887_v59 = vld [vmem:[#allocation8 + $0x130] sm:$0xff] }
 0xeef   : > { %6704 = vmatpush1.msra.mxu0 %v6627_v22  ;;  %6775 = vmatpush1.msra.mxu1 %v6629_v23  ;;  %v6882_v22 = vld [vmem:[#allocation8 + $0x108] sm:$0xff]  ;;  %v6884_v23 = vld [vmem:[#allocation8 + $0x118] sm:$0xff] }
 0xef0   : > { %6705 = vmatprep.subr.mxu0 %v6624_v24  ;;  %6776 = vmatprep.subr.mxu1 %v6626_v61  ;;  %v6881_v24 = vld [vmem:[#allocation8 + $0x100] sm:$0xff]  ;;  %v6883_v61 = vld [vmem:[#allocation8 + $0x110] sm:$0xff] }
 0xef1   : > { %6706 = vmatpush1.msra.mxu0 %v6623_v20  ;;  %6777 = vmatpush1.msra.mxu1 %v6625_v55  ;;  %v6878_v20 = vld [vmem:[#allocation8 + $0xe8] sm:$0xff]  ;;  %v6880_v55 = vld [vmem:[#allocation8 + $0xf8] sm:$0xff] }
 0xef2   : > { %6707 = vmatprep.subr.mxu0 %v6620_v58  ;;  %6778 = vmatprep.subr.mxu1 %v6622_v10  ;;  %v6877_v58 = vld [vmem:[#allocation8 + $0xe0] sm:$0xff]  ;;  %v6879_v10 = vld [vmem:[#allocation8 + $0xf0] sm:$0xff] }
 0xef3   : > { %6708 = vmatpush1.msra.mxu0 %v6619_v52  ;;  %6779 = vmatpush1.msra.mxu1 %v6621_v27  ;;  %v6874_v52 = vld [vmem:[#allocation8 + $0xc8] sm:$0xff]  ;;  %v6876_v27 = vld [vmem:[#allocation8 + $0xd8] sm:$0xff] }
 0xef4   : > { %6709 = vmatprep.subr.mxu0 %v6616_v43  ;;  %6780 = vmatprep.subr.mxu1 %v6618_v2  ;;  %v6873_v43 = vld [vmem:[#allocation8 + $0xc0] sm:$0xff]  ;;  %v6875_v2 = vld [vmem:[#allocation8 + $0xd0] sm:$0xff] }
 0xef5   : > { %6710 = vmatpush1.msra.mxu0 %v6615_v46  ;;  %6743 = vmatprep.mubr.f32.mxu0 %v8385_v5  ;;  %v6870_v46 = vld [vmem:[#allocation8 + $0xa8] sm:$0xff] }
 0xef6   : > { %6781 = vmatpush1.msra.mxu1 %v6617_v12  ;;  %6814 = vmatprep.mubr.f32.mxu1 %v8385_v5  ;;  %v6905_v5 = vld [vmem:[#allocation8 + $0x1c0] sm:$0xff]  ;;  %v6872_v12 = vld [vmem:[#allocation8 + $0xb8] sm:$0xff] }
 0xef7   : > { %6744 = vmatmul.mubr.f32.vlgmr.msra.gmra.mxu0 %v9000_v53  ;;  %6815 = vmatmul.mubr.f32.vlgmr.msra.gmra.mxu1 %v9000_v53  ;;  %v6902_v53 = vld [vmem:[#allocation8 + $0x1a8] sm:$0xff] }
 0xef8   : > { %7041 = vmatprep.mubr.f32.mxu0 %v9016_v3  ;;  %7112 = vmatprep.mubr.f32.mxu1 %v9016_v3  ;;  %v6901_v3 = vld [vmem:[#allocation8 + $0x1a0] sm:$0xff] }
 0xef9   : > { %6977 = vmatprep.subr.mxu0 %v6910_v15  ;;  %7048 = vmatprep.subr.mxu1 %v6912_v50  ;;  %v6869_v15 = vld [vmem:[#allocation8 + $0xa0] sm:$0xff]  ;;  %v6871_v50 = vld [vmem:[#allocation8 + $0xb0] sm:$0xff] }
 0xefa   : > { %6978 = vmatpush1.msra.mxu0 %v6909_v35  ;;  %7049 = vmatpush1.msra.mxu1 %v6911_v16  ;;  %v6866_v35 = vld [vmem:[#allocation8 + $0x88] sm:$0xff]  ;;  %v6868_v16 = vld [vmem:[#allocation8 + $0x98] sm:$0xff] }
 0xefb   : > { %6979 = vmatprep.subr.mxu0 %v6906_v39  ;;  %7050 = vmatprep.subr.mxu1 %v6908_v25  ;;  %v6865_v39 = vld [vmem:[#allocation8 + $0x80] sm:$0xff]  ;;  %v6867_v25 = vld [vmem:[#allocation8 + $0x90] sm:$0xff] }
 0xefc   : > { %6980 = vmatpush1.msra.mxu0 %v6905_v5  ;;  %7051 = vmatpush1.msra.mxu1 %v6907_v4  ;;  %v6862_v5 = vld [vmem:[#allocation8 + $0x68] sm:$0xff]  ;;  %v6864_v4 = vld [vmem:[#allocation8 + $0x78] sm:$0xff] }
 0xefd   : > { %6981 = vmatprep.subr.mxu0 %v6902_v53  ;;  %7052 = vmatprep.subr.mxu1 %v6904_v36  ;;  %v6861_v53 = vld [vmem:[#allocation8 + $0x60] sm:$0xff]  ;;  %v6863_v36 = vld [vmem:[#allocation8 + $0x70] sm:$0xff] }
 0xefe   : > { %6982 = vmatpush1.msra.mxu0 %v6901_v3  ;;  %7053 = vmatpush1.msra.mxu1 %v6903_v51  ;;  %v6858_v3 = vld [vmem:[#allocation8 + $0x48] sm:$0xff]  ;;  %v6860_v51 = vld [vmem:[#allocation8 + $0x58] sm:$0xff] }
 0xeff   : > { %6983 = vmatprep.subr.mxu0 %v6898_v29  ;;  %7054 = vmatprep.subr.mxu1 %v6900_v48  ;;  %v6857_v29 = vld [vmem:[#allocation8 + $0x40] sm:$0xff]  ;;  %v6859_v48 = vld [vmem:[#allocation8 + $0x50] sm:$0xff] }
 0xf00   : > { %6984 = vmatpush1.msra.mxu0 %v6897_v0  ;;  %7055 = vmatpush1.msra.mxu1 %v6899_v42  ;;  %v6854_v0 = vld [vmem:[#allocation8 + $0x28] sm:$0xff]  ;;  %v6856_v42 = vld [vmem:[#allocation8 + $0x38] sm:$0xff] }
 0xf01   : > { %6985 = vmatprep.subr.mxu0 %v6894_v44  ;;  %7056 = vmatprep.subr.mxu1 %v6896_v45  ;;  %v6853_v44 = vld [vmem:[#allocation8 + $0x20] sm:$0xff]  ;;  %v6855_v45 = vld [vmem:[#allocation8 + $0x30] sm:$0xff] }
 0xf02   : > { %6986 = vmatpush1.msra.mxu0 %v6893_v30  ;;  %7057 = vmatpush1.msra.mxu1 %v6895_v33  ;;  %v6850_v30 = vld [vmem:[#allocation8 + $0x8] sm:$0xff]  ;;  %v6852_v33 = vld [vmem:[#allocation8 + $0x18] sm:$0xff] }
 0xf03   : > { %6987 = vmatprep.subr.mxu0 %v6890_v38  ;;  %7058 = vmatprep.subr.mxu1 %v6892_v63  ;;  %v6849_v38 = vld [vmem:[#allocation8] sm:$0xff]  ;;  %v6851_v63 = vld [vmem:[#allocation8 + $0x10] sm:$0xff] }
 0xf04   : > { %6988 = vmatpush1.msra.mxu0 %v6889_v41  ;;  %7059 = vmatpush1.msra.mxu1 %v6891_v40  ;;  %v6974_v41 = vld [vmem:[#allocation8 + $0x3e8] sm:$0xff]  ;;  %v6976_v40 = vld [vmem:[#allocation8 + $0x3f8] sm:$0xff] }
 0xf05   : > { %6989 = vmatprep.subr.mxu0 %v6886_v14  ;;  %7060 = vmatprep.subr.mxu1 %v6888_v6  ;;  %v6973_v14 = vld [vmem:[#allocation8 + $0x3e0] sm:$0xff]  ;;  %v6975_v6 = vld [vmem:[#allocation8 + $0x3f0] sm:$0xff] }
 0xf06   : > { %6990 = vmatpush1.msra.mxu0 %v6885_v18  ;;  %7061 = vmatpush1.msra.mxu1 %v6887_v59  ;;  %v6970_v18 = vld [vmem:[#allocation8 + $0x3c8] sm:$0xff]  ;;  %v6972_v59 = vld [vmem:[#allocation8 + $0x3d8] sm:$0xff] }
 0xf07   : > { %6991 = vmatprep.subr.mxu0 %v6882_v22  ;;  %7062 = vmatprep.subr.mxu1 %v6884_v23  ;;  %v6969_v22 = vld [vmem:[#allocation8 + $0x3c0] sm:$0xff]  ;;  %v6971_v23 = vld [vmem:[#allocation8 + $0x3d0] sm:$0xff] }
 0xf08   : > { %6992 = vmatpush1.msra.mxu0 %v6881_v24  ;;  %7063 = vmatpush1.msra.mxu1 %v6883_v61  ;;  %v6966_v24 = vld [vmem:[#allocation8 + $0x3a8] sm:$0xff]  ;;  %v6968_v61 = vld [vmem:[#allocation8 + $0x3b8] sm:$0xff] }
 0xf09   : > { %6993 = vmatprep.subr.mxu0 %v6878_v20  ;;  %7064 = vmatprep.subr.mxu1 %v6880_v55  ;;  %v6965_v20 = vld [vmem:[#allocation8 + $0x3a0] sm:$0xff]  ;;  %v6967_v55 = vld [vmem:[#allocation8 + $0x3b0] sm:$0xff] }
 0xf0a   : > { %6994 = vmatpush1.msra.mxu0 %v6877_v58  ;;  %7065 = vmatpush1.msra.mxu1 %v6879_v10  ;;  %v6962_v58 = vld [vmem:[#allocation8 + $0x388] sm:$0xff]  ;;  %v6964_v10 = vld [vmem:[#allocation8 + $0x398] sm:$0xff] }
 0xf0b   : > { %6995 = vmatprep.subr.mxu0 %v6874_v52  ;;  %7066 = vmatprep.subr.mxu1 %v6876_v27  ;;  %v6961_v52 = vld [vmem:[#allocation8 + $0x380] sm:$0xff]  ;;  %v6963_v27 = vld [vmem:[#allocation8 + $0x390] sm:$0xff] }
 0xf0c   : > { %6996 = vmatpush1.msra.mxu0 %v6873_v43  ;;  %7067 = vmatpush1.msra.mxu1 %v6875_v2  ;;  %v6958_v43 = vld [vmem:[#allocation8 + $0x368] sm:$0xff]  ;;  %v6960_v2 = vld [vmem:[#allocation8 + $0x378] sm:$0xff] }
 0xf0d   : > { %6997 = vmatprep.subr.mxu0 %v6870_v46  ;;  %7068 = vmatprep.subr.mxu1 %v6872_v12  ;;  %v6957_v46 = vld [vmem:[#allocation8 + $0x360] sm:$0xff]  ;;  %v6959_v12 = vld [vmem:[#allocation8 + $0x370] sm:$0xff] }
 0xf0e   : > { %6998 = vmatpush1.msra.mxu0 %v6869_v15  ;;  %7069 = vmatpush1.msra.mxu1 %v6871_v50  ;;  %v6954_v15 = vld [vmem:[#allocation8 + $0x348] sm:$0xff]  ;;  %v6956_v50 = vld [vmem:[#allocation8 + $0x358] sm:$0xff] }
 0xf0f   : > { %6999 = vmatprep.subr.mxu0 %v6866_v35  ;;  %7070 = vmatprep.subr.mxu1 %v6868_v16  ;;  %v6953_v35 = vld [vmem:[#allocation8 + $0x340] sm:$0xff]  ;;  %v6955_v16 = vld [vmem:[#allocation8 + $0x350] sm:$0xff] }
 0xf10   : > { %7000 = vmatpush1.msra.mxu0 %v6865_v39  ;;  %7071 = vmatpush1.msra.mxu1 %v6867_v25  ;;  %v6950_v39 = vld [vmem:[#allocation8 + $0x328] sm:$0xff]  ;;  %v6952_v25 = vld [vmem:[#allocation8 + $0x338] sm:$0xff] }
 0xf11   : > { %7001 = vmatprep.subr.mxu0 %v6862_v5  ;;  %7072 = vmatprep.subr.mxu1 %v6864_v4  ;;  %v6949_v5 = vld [vmem:[#allocation8 + $0x320] sm:$0xff]  ;;  %v6951_v4 = vld [vmem:[#allocation8 + $0x330] sm:$0xff] }
 0xf12   : > { %7002 = vmatpush1.msra.mxu0 %v6861_v53  ;;  %7073 = vmatpush1.msra.mxu1 %v6863_v36  ;;  %v6946_v53 = vld [vmem:[#allocation8 + $0x308] sm:$0xff]  ;;  %v6948_v36 = vld [vmem:[#allocation8 + $0x318] sm:$0xff] }
 0xf13   : > { %7003 = vmatprep.subr.mxu0 %v6858_v3  ;;  %7074 = vmatprep.subr.mxu1 %v6860_v51  ;;  %v6945_v3 = vld [vmem:[#allocation8 + $0x300] sm:$0xff]  ;;  %v6947_v51 = vld [vmem:[#allocation8 + $0x310] sm:$0xff] }
 0xf14   : > { %7004 = vmatpush1.msra.mxu0 %v6857_v29  ;;  %7075 = vmatpush1.msra.mxu1 %v6859_v48  ;;  %v6942_v29 = vld [vmem:[#allocation8 + $0x2e8] sm:$0xff]  ;;  %v6944_v48 = vld [vmem:[#allocation8 + $0x2f8] sm:$0xff] }
 0xf15   : > { %7005 = vmatprep.subr.mxu0 %v6854_v0  ;;  %7076 = vmatprep.subr.mxu1 %v6856_v42  ;;  %v6941_v0 = vld [vmem:[#allocation8 + $0x2e0] sm:$0xff]  ;;  %v6943_v42 = vld [vmem:[#allocation8 + $0x2f0] sm:$0xff] }
 0xf16   : > { %7006 = vmatpush1.msra.mxu0 %v6853_v44  ;;  %7077 = vmatpush1.msra.mxu1 %v6855_v45  ;;  %v6938_v44 = vld [vmem:[#allocation8 + $0x2c8] sm:$0xff]  ;;  %v6940_v45 = vld [vmem:[#allocation8 + $0x2d8] sm:$0xff] }
 0xf17   : > { %7007 = vmatprep.subr.mxu0 %v6850_v30  ;;  %7078 = vmatprep.subr.mxu1 %v6852_v33  ;;  %v6937_v30 = vld [vmem:[#allocation8 + $0x2c0] sm:$0xff]  ;;  %v6939_v33 = vld [vmem:[#allocation8 + $0x2d0] sm:$0xff] }
 0xf18   : > { %7008 = vmatpush1.msra.mxu0 %v6849_v38  ;;  %7079 = vmatpush1.msra.mxu1 %v6851_v63  ;;  %v6934_v38 = vld [vmem:[#allocation8 + $0x2a8] sm:$0xff]  ;;  %v6936_v63 = vld [vmem:[#allocation8 + $0x2b8] sm:$0xff] }
 0xf19   : > { %7009 = vmatprep.subr.mxu0 %v6974_v41  ;;  %7080 = vmatprep.subr.mxu1 %v6976_v40  ;;  %v6933_v41 = vld [vmem:[#allocation8 + $0x2a0] sm:$0xff]  ;;  %v6935_v40 = vld [vmem:[#allocation8 + $0x2b0] sm:$0xff] }
 0xf1a   : > { %7010 = vmatpush2.msra.mxu0 %v6973_v14  ;;  %7081 = vmatpush2.msra.mxu1 %v6975_v6  ;;  %v6930_v14 = vld [vmem:[#allocation8 + $0x288] sm:$0xff]  ;;  %v6932_v6 = vld [vmem:[#allocation8 + $0x298] sm:$0xff] }
 0xf1b   : > { %7011 = vmatprep.subr.mxu0 %v6970_v18  ;;  %7082 = vmatprep.subr.mxu1 %v6972_v59  ;;  %v6929_v18 = vld [vmem:[#allocation8 + $0x280] sm:$0xff]  ;;  %v6931_v59 = vld [vmem:[#allocation8 + $0x290] sm:$0xff] }
 0xf1c   : > { %7012 = vmatpush2.msra.mxu0 %v6969_v22  ;;  %7083 = vmatpush2.msra.mxu1 %v6971_v23  ;;  %v6926_v22 = vld [vmem:[#allocation8 + $0x268] sm:$0xff]  ;;  %v6928_v23 = vld [vmem:[#allocation8 + $0x278] sm:$0xff] }
 0xf1d   : > { %7013 = vmatprep.subr.mxu0 %v6966_v24  ;;  %7084 = vmatprep.subr.mxu1 %v6968_v61  ;;  %v6925_v24 = vld [vmem:[#allocation8 + $0x260] sm:$0xff]  ;;  %v6927_v61 = vld [vmem:[#allocation8 + $0x270] sm:$0xff] }
 0xf1e   : > { %7014 = vmatpush2.msra.mxu0 %v6965_v20  ;;  %7085 = vmatpush2.msra.mxu1 %v6967_v55  ;;  %v6922_v20 = vld [vmem:[#allocation8 + $0x248] sm:$0xff]  ;;  %v6924_v55 = vld [vmem:[#allocation8 + $0x258] sm:$0xff] }
 0xf1f   : > { %7015 = vmatprep.subr.mxu0 %v6962_v58  ;;  %7086 = vmatprep.subr.mxu1 %v6964_v10  ;;  %v6921_v58 = vld [vmem:[#allocation8 + $0x240] sm:$0xff]  ;;  %v6923_v10 = vld [vmem:[#allocation8 + $0x250] sm:$0xff] }
 0xf20   : > { %7016 = vmatpush2.msra.mxu0 %v6961_v52  ;;  %7087 = vmatpush2.msra.mxu1 %v6963_v27  ;;  %v6918_v52 = vld [vmem:[#allocation8 + $0x228] sm:$0xff]  ;;  %v6920_v27 = vld [vmem:[#allocation8 + $0x238] sm:$0xff] }
 0xf21   : > { %7017 = vmatprep.subr.mxu0 %v6958_v43  ;;  %7088 = vmatprep.subr.mxu1 %v6960_v2  ;;  %v6917_v43 = vld [vmem:[#allocation8 + $0x220] sm:$0xff]  ;;  %v6919_v2 = vld [vmem:[#allocation8 + $0x230] sm:$0xff] }
 0xf22   : > { %7018 = vmatpush2.msra.mxu0 %v6957_v46  ;;  %7089 = vmatpush2.msra.mxu1 %v6959_v12  ;;  %v6914_v46 = vld [vmem:[#allocation8 + $0x208] sm:$0xff]  ;;  %v6916_v12 = vld [vmem:[#allocation8 + $0x218] sm:$0xff] }
 0xf23   : > { %7019 = vmatprep.subr.mxu0 %v6954_v15  ;;  %7090 = vmatprep.subr.mxu1 %v6956_v50  ;;  %v6913_v15 = vld [vmem:[#allocation8 + $0x200] sm:$0xff]  ;;  %v6915_v50 = vld [vmem:[#allocation8 + $0x210] sm:$0xff] }
 0xf24   : > { %7020 = vmatpush2.msra.mxu0 %v6953_v35  ;;  %7091 = vmatpush2.msra.mxu1 %v6955_v16  ;;  %v7204_v35 = vld [vmem:[#allocation10 + $0x1e8] sm:$0xff]  ;;  %v7206_v16 = vld [vmem:[#allocation10 + $0x1f8] sm:$0xff] }
 0xf25   : > { %7021 = vmatprep.subr.mxu0 %v6950_v39  ;;  %7092 = vmatprep.subr.mxu1 %v6952_v25 }
 0xf26   : > { %7022 = vmatpush2.msra.mxu0 %v6949_v5  ;;  %7093 = vmatpush2.msra.mxu1 %v6951_v4 }
 0xf27   : > { %7023 = vmatprep.subr.mxu0 %v6946_v53  ;;  %7094 = vmatprep.subr.mxu1 %v6948_v36 }
 0xf28   : > { %7024 = vmatpush2.msra.mxu0 %v6945_v3  ;;  %7095 = vmatpush2.msra.mxu1 %v6947_v51 }
 0xf29   : > { %7025 = vmatprep.subr.mxu0 %v6942_v29  ;;  %7096 = vmatprep.subr.mxu1 %v6944_v48  ;;  %v591_v29 = vadd.f32 %v8732_v8, %v8668_v60 }
 0xf2a   : > { %7026 = vmatpush2.msra.mxu0 %v6941_v0  ;;  %7097 = vmatpush2.msra.mxu1 %v6943_v42 }
 0xf2b   : > { %7027 = vmatprep.subr.mxu0 %v6938_v44  ;;  %7098 = vmatprep.subr.mxu1 %v6940_v45 }
 0xf2c   : > { %7028 = vmatpush2.msra.mxu0 %v6937_v30  ;;  %7099 = vmatpush2.msra.mxu1 %v6939_v33 }
 0xf2d   : > { %7029 = vmatprep.subr.mxu0 %v6934_v38  ;;  %7100 = vmatprep.subr.mxu1 %v6936_v63 }
 0xf2e   : > { %7030 = vmatpush2.msra.mxu0 %v6933_v41  ;;  %7101 = vmatpush2.msra.mxu1 %v6935_v40 }
 0xf2f   : > { %7031 = vmatprep.subr.mxu0 %v6930_v14  ;;  %7102 = vmatprep.subr.mxu1 %v6932_v6 }
 0xf30   : > { %7032 = vmatpush2.msra.mxu0 %v6929_v18  ;;  %7103 = vmatpush2.msra.mxu1 %v6931_v59 }
 0xf31   : > { %7033 = vmatprep.subr.mxu0 %v6926_v22  ;;  %7104 = vmatprep.subr.mxu1 %v6928_v23 }
 0xf32   : > { %7034 = vmatpush2.msra.mxu0 %v6925_v24  ;;  %7105 = vmatpush2.msra.mxu1 %v6927_v61 }
 0xf33   : > { %7035 = vmatprep.subr.mxu0 %v6922_v20  ;;  %7106 = vmatprep.subr.mxu1 %v6924_v55 }
 0xf34   : > { %7036 = vmatpush2.msra.mxu0 %v6921_v58  ;;  %7107 = vmatpush2.msra.mxu1 %v6923_v10 }
 0xf35   : > { %7037 = vmatprep.subr.mxu0 %v6918_v52  ;;  %7108 = vmatprep.subr.mxu1 %v6920_v27 }
 0xf36   : > { %7038 = vmatpush2.msra.mxu0 %v6917_v43  ;;  %7109 = vmatpush2.msra.mxu1 %v6919_v2 }
 0xf37   : > { %7039 = vmatprep.subr.mxu0 %v6914_v46  ;;  %7110 = vmatprep.subr.mxu1 %v6916_v12 }
 0xf38   : > { %7040 = vmatpush2.msra.mxu0 %v6913_v15  ;;  %7111 = vmatpush2.msra.mxu1 %v6915_v50 }
 0xf39   : > { %7271 = vmatprep.subr.mxu0 %v7204_v35  ;;  %7342 = vmatprep.subr.mxu1 %v7206_v16 }
 0xf96   : > { %v6506_v39 = vpop.f32.mrf.mxu0  ;;  %v6577_v3 = vpop.f32.mrf.mxu1 }
 0xf97   : > { %v6507_v4 = vadd.f32 %v6506_v39, %v8767_v28  ;;  %v6578_v18 = vadd.f32 %v6577_v3, %v8774_v17  ;;  %v7205_v3 = vld [vmem:[#allocation10 + $0x1f0] sm:$0xff] }
 0xf98   : > { %v6508_v25 = vpop.f32.mrf.mxu0  ;;  %v6579_v42 = vpop.f32.mrf.mxu1 }
 0xf99   : > { %v6509_v5 = vadd.f32 %v6508_v25, %v8764_v34  ;;  %v7775_v36 = vmul.f32 -1.442695, %v6507_v4  ;;  %v6580_v60 = vadd.f32 %v6579_v42, %v8777_v19  ;;  %v7198_v42 = vld [vmem:[#allocation10 + $0x1b8] sm:$0xff] }
 0xf9b   : > { %v7776_v53 = vmul.f32 -1.442695, %v6509_v5  ;;  %v7777_v22 = vmul.f32 -1.442695, %v6580_v60  ;;  %v7183_v60 = vld [vmem:[#allocation10 + $0x140] sm:$0xff] }
 0xf9d   : > { %8221 = vpow2.f32 %v7776_v53 }
 0xf9e   : > { %8223 = vpow2.f32 %v7775_v36  ;;  %v7203_v36 = vld [vmem:[#allocation10 + $0x1e0] sm:$0xff] }
 0xfaa   : > { %v8222_v38 = vpop.eup %8221 }
 0xfab   : > { %v8224_v41 = vpop.eup %8223  ;;  %v6591_v40 = vadd.f32 1.0, %v8222_v38  ;;  %v7191_v38 = vld [vmem:[#allocation10 + $0x180] sm:$0xff] }
 0xfac   : > { %v6585_v6 = vadd.f32 1.0, %v8224_v41  ;;  %v7193_v41 = vld [vmem:[#allocation10 + $0x190] sm:$0xff] }
 0xfb7   : > { %v6745_v51 = vpop.f32.mrf.mxu0  ;;  %v6816_v30 = vpop.f32.mrf.mxu1 }
 0xfb8   : > { %v6821_v48 = vadd.f32 %v6745_v51, %v8713_v54  ;;  %v6823_v54 = vadd.f32 %v6816_v30, %v8684_v9  ;;  %v7202_v51 = vld [vmem:[#allocation10 + $0x1d8] sm:$0xff]  ;;  %v7192_v30 = vld [vmem:[#allocation10 + $0x188] sm:$0xff] }
 0xfb9   : > { %v6747_v0 = vpop.f32.mrf.mxu0  ;;  %v6818_v63 = vpop.f32.mrf.mxu1 }
 0xfba   : > { %v7778_v44 = vmul.f32 -1.442695, %v6821_v48  ;;  %v6822_v45 = vadd.f32 %v6747_v0, %v591_v29  ;;  %v6824_v14 = vadd.f32 %v6818_v63, %v8690_v13  ;;  %v7199_v29 = vld [vmem:[#allocation10 + $0x1c0] sm:$0xff]  ;;  %v7201_v48 = vld [vmem:[#allocation10 + $0x1d0] sm:$0xff]  ;;  %v7196_v0 = vld [vmem:[#allocation10 + $0x1a8] sm:$0xff] }
 0xfbb   : > { %v7188_v63 = vld [vmem:[#allocation10 + $0x168] sm:$0xff] }
 0xfbc   : > { %8225 = vpow2.f32 %v7778_v44  ;;  %v7779_v33 = vmul.f32 -1.442695, %v6822_v45  ;;  %v7780_v8 = vmul.f32 -1.442695, %v6824_v14  ;;  %v7195_v44 = vld [vmem:[#allocation10 + $0x1a0] sm:$0xff]  ;;  %v7197_v45 = vld [vmem:[#allocation10 + $0x1b0] sm:$0xff] }
 0xfbd   : > { %v7190_v14 = vld [vmem:[#allocation10 + $0x178] sm:$0xff] }
 0xfbe   : > { %8227 = vpow2.f32 %v7779_v33  ;;  %v7194_v33 = vld [vmem:[#allocation10 + $0x198] sm:$0xff] }
 0xfbf   : > { %8229 = vrcp.f32 %v6591_v40  ;;  %v7187_v40 = vld [vmem:[#allocation10 + $0x160] sm:$0xff] }
 0xfc0   : > { %8231 = vrcp.f32 %v6585_v6  ;;  %v7184_v6 = vld [vmem:[#allocation10 + $0x148] sm:$0xff] }
 0xfc1   : > { %8233 = vtanh.f32 %v6578_v18  ;;  %v7189_v18 = vld [vmem:[#allocation10 + $0x170] sm:$0xff] }
 0xfc2   : > { %8235 = vtanh.f32 %v6823_v54  ;;  %v7186_v54 = vld [vmem:[#allocation10 + $0x158] sm:$0xff] }
 0xfc3   : > { %8237 = vpow2.f32 %v7780_v8  ;;  %v7180_v8 = vld [vmem:[#allocation10 + $0x128] sm:$0xff] }
 0xfc9   : > { %v8226_v59 = vpop.eup %8225 }
 0xfca   : > { %v6828_v23 = vadd.f32 1.0, %v8226_v59  ;;  %v7185_v59 = vld [vmem:[#allocation10 + $0x150] sm:$0xff] }
 0xfcb   : > { %v8228_v24 = vpop.eup %8227 }
 0xfcc   : > { %8239 = vrcp.f32 %v6828_v23  ;;  %v6834_v61 = vadd.f32 1.0, %v8228_v24  ;;  %v8230_v13 = vpop.eup %8229  ;;  %v7182_v23 = vld [vmem:[#allocation10 + $0x138] sm:$0xff]  ;;  %v7176_v24 = vld [vmem:[#allocation10 + $0x108] sm:$0xff] }
 0xfcd   : > { %8241 = vpow2.f32 %v7777_v22  ;;  %v8232_v20 = vpop.eup %8231  ;;  %v6601_v58 = vmul.f32 %v8230_v13, %v8993_v49  ;;  %v7179_v22 = vld [vmem:[#allocation10 + $0x120] sm:$0xff] }
 0xfce   : > { %8243 = vrcp.f32 %v6834_v61  ;;  %v8234_v55 = vpop.eup %8233  ;;  %v7181_v61 = vld [vmem:[#allocation10 + $0x130] sm:$0xff]  ;;  %v7175_v13 = vld [vmem:[#allocation10 + $0x100] sm:$0xff] }
 0xfcf   : > { %v8236_v10 = vpop.eup %8235  ;;  %v6602_v52 = vmul.f32 %v8234_v55, %v8232_v20  ;;  %v7178_v20 = vld [vmem:[#allocation10 + $0x118] sm:$0xff]  ;;  %v7172_v55 = vld [vmem:[#allocation10 + $0xe8] sm:$0xff] }
 0xfd0   : > { %v8238_v9 = vpop.eup %8237 }
 0xfd1   : > { %v9036_v46 = vadd.f32 %v6602_v52, %v6601_v58  ;;  %v6841_v15 = vadd.f32 1.0, %v8238_v9  ;;  %v7177_v58 = vld [vmem:[#allocation10 + $0x110] sm:$0xff]  ;;  %v7174_v9 = vld [vmem:[#allocation10 + $0xf8] sm:$0xff]  ;;  %v7168_v52 = vld [vmem:[#allocation10 + $0xc8] sm:$0xff] }
 0xfd3   : > { %8245 = vtanh.f32 %v9036_v46 }
 0xfd4   : > { %8247 = vrcp.f32 %v6841_v15  ;;  %v7169_v15 = vld [vmem:[#allocation10 + $0xd0] sm:$0xff] }
 0xfd9   : > { %v8240_v27 = vpop.eup %8239 }
 0xfda   : > { %v8242_v43 = vpop.eup %8241  ;;  %v6845_v2 = vmul.f32 %v8240_v27, %v8236_v10  ;;  %v7171_v10 = vld [vmem:[#allocation10 + $0xe0] sm:$0xff]  ;;  %v7173_v27 = vld [vmem:[#allocation10 + $0xf0] sm:$0xff] }
 0xfdb   : > { %v8244_v12 = vpop.eup %8243  ;;  %v6598_v35 = vadd.f32 1.0, %v8242_v43  ;;  %v7167_v43 = vld [vmem:[#allocation10 + $0xc0] sm:$0xff] }
 0xfdc   : > { %v6844_v50 = vmul.f32 %v8244_v12, %v8996_v56  ;;  %v7200_v56 = vld [vmem:[#allocation10 + $0x1c8] sm:$0xff] }
 0xfdd   : > { %v7164_v12 = vld [vmem:[#allocation10 + $0xa8] sm:$0xff] }
 0xfde   : > { %v6846_v16 = vadd.f32 %v6845_v2, %v6844_v50  ;;  %v7170_v2 = vld [vmem:[#allocation10 + $0xd8] sm:$0xff]  ;;  %v7163_v50 = vld [vmem:[#allocation10 + $0xa0] sm:$0xff] }
 0xfe0   : > { %7440 = vst [vmem:[#allocation3 + $0x8] sm:$0xff] %v6846_v16  ;;  %8249 = vtanh.f32 %v6846_v16  ;;  %v8246_v49 = vpop.eup %8245  ;;  %v7160_v16 = vld [vmem:[#allocation10 + $0x88] sm:$0xff] }
 0xfe1   : > { %8251 = vrcp.f32 %v6598_v35  ;;  %v8248_v39 = vpop.eup %8247  ;;  %v7166_v35 = vld [vmem:[#allocation10 + $0xb8] sm:$0xff] }
 0xfed   : > { %v8250_v25 = vpop.eup %8249 }
 0xfee   : > { %v8252_v5 = vpop.eup %8251  ;;  %v6848_v4 = vmul.f32 %v8250_v25, %v8248_v39  ;;  %v7159_v39 = vld [vmem:[#allocation10 + $0x80] sm:$0xff]  ;;  %v7162_v25 = vld [vmem:[#allocation10 + $0x98] sm:$0xff] }
 0xfef   : > { %v9040_v53 = vmul.f32 %v8252_v5, %v8246_v49  ;;  %v7165_v49 = vld [vmem:[#allocation10 + $0xb0] sm:$0xff]  ;;  %v7156_v5 = vld [vmem:[#allocation10 + $0x68] sm:$0xff] }
 0xff0   : > { %7042 = vmatmul.mubr.f32.vlgmr.msra.gmra.mxu0 %v6848_v4  ;;  %7439 = vst [vmem:[#allocation2 + $0x10] sm:$0xff] %v6848_v4  ;;  %7113 = vmatmul.mubr.f32.vlgmr.msra.gmra.mxu1 %v6848_v4  ;;  %v7161_v4 = vld [vmem:[#allocation10 + $0x90] sm:$0xff] }
 0xff1   : > { %7335 = vmatprep.mubr.f32.mxu0 %v9040_v53  ;;  %7406 = vmatprep.mubr.f32.mxu1 %v9040_v53 }
 0xff2   : > { %7272 = vmatpush1.msra.mxu0 %v7203_v36  ;;  %7343 = vmatpush1.msra.mxu1 %v7205_v3  ;;  %v7155_v36 = vld [vmem:[#allocation10 + $0x60] sm:$0xff]  ;;  %v7158_v3 = vld [vmem:[#allocation10 + $0x78] sm:$0xff] }
 0xff3   : > { %7273 = vmatprep.subr.mxu0 %v7200_v56  ;;  %7344 = vmatprep.subr.mxu1 %v7202_v51  ;;  %v7152_v56 = vld [vmem:[#allocation10 + $0x48] sm:$0xff]  ;;  %v7157_v51 = vld [vmem:[#allocation10 + $0x70] sm:$0xff] }
 0xff4   : > { %7274 = vmatpush1.msra.mxu0 %v7199_v29  ;;  %7345 = vmatpush1.msra.mxu1 %v7201_v48  ;;  %v7151_v29 = vld [vmem:[#allocation10 + $0x40] sm:$0xff]  ;;  %v7154_v48 = vld [vmem:[#allocation10 + $0x58] sm:$0xff] }
 0xff5   : > { %7275 = vmatprep.subr.mxu0 %v7196_v0  ;;  %7346 = vmatprep.subr.mxu1 %v7198_v42  ;;  %v7148_v0 = vld [vmem:[#allocation10 + $0x28] sm:$0xff]  ;;  %v7153_v42 = vld [vmem:[#allocation10 + $0x50] sm:$0xff] }
 0xff6   : > { %7276 = vmatpush1.msra.mxu0 %v7195_v44  ;;  %7347 = vmatpush1.msra.mxu1 %v7197_v45  ;;  %v7147_v44 = vld [vmem:[#allocation10 + $0x20] sm:$0xff]  ;;  %v7150_v45 = vld [vmem:[#allocation10 + $0x38] sm:$0xff] }
 0xff7   : > { %7277 = vmatprep.subr.mxu0 %v7192_v30  ;;  %7348 = vmatprep.subr.mxu1 %v7194_v33  ;;  %v7144_v30 = vld [vmem:[#allocation10 + $0x8] sm:$0xff]  ;;  %v7149_v33 = vld [vmem:[#allocation10 + $0x30] sm:$0xff] }
 0xff8   : > { %7278 = vmatpush1.msra.mxu0 %v7191_v38  ;;  %7349 = vmatpush1.msra.mxu1 %v7193_v41  ;;  %v7143_v38 = vld [vmem:[#allocation10] sm:$0xff]  ;;  %v7268_v41 = vld [vmem:[#allocation10 + $0x3e8] sm:$0xff] }
 0xff9   : > { %7279 = vmatprep.subr.mxu0 %v7188_v63  ;;  %7350 = vmatprep.subr.mxu1 %v7190_v14  ;;  %v7146_v63 = vld [vmem:[#allocation10 + $0x18] sm:$0xff]  ;;  %v7267_v14 = vld [vmem:[#allocation10 + $0x3e0] sm:$0xff] }
 0xffa   : > { %7280 = vmatpush1.msra.mxu0 %v7187_v40  ;;  %7351 = vmatpush1.msra.mxu1 %v7189_v18  ;;  %v7145_v40 = vld [vmem:[#allocation10 + $0x10] sm:$0xff]  ;;  %v7264_v18 = vld [vmem:[#allocation10 + $0x3c8] sm:$0xff] }
 0xffb   : > { %7281 = vmatprep.subr.mxu0 %v7184_v6  ;;  %7352 = vmatprep.subr.mxu1 %v7186_v54  ;;  %v7270_v6 = vld [vmem:[#allocation10 + $0x3f8] sm:$0xff]  ;;  %v7263_v54 = vld [vmem:[#allocation10 + $0x3c0] sm:$0xff] }
 0xffc   : > { %7282 = vmatpush1.msra.mxu0 %v7183_v60  ;;  %7353 = vmatpush1.msra.mxu1 %v7185_v59  ;;  %v7269_v60 = vld [vmem:[#allocation10 + $0x3f0] sm:$0xff]  ;;  %v7260_v59 = vld [vmem:[#allocation10 + $0x3a8] sm:$0xff] }
 0xffd   : > { %7283 = vmatprep.subr.mxu0 %v7180_v8  ;;  %7354 = vmatprep.subr.mxu1 %v7182_v23  ;;  %v7266_v8 = vld [vmem:[#allocation10 + $0x3d8] sm:$0xff]  ;;  %v7259_v23 = vld [vmem:[#allocation10 + $0x3a0] sm:$0xff] }
 0xffe   : > { %7284 = vmatpush1.msra.mxu0 %v7179_v22  ;;  %7355 = vmatpush1.msra.mxu1 %v7181_v61  ;;  %v7265_v22 = vld [vmem:[#allocation10 + $0x3d0] sm:$0xff]  ;;  %v7256_v61 = vld [vmem:[#allocation10 + $0x388] sm:$0xff] }
 0xfff   : > { %7285 = vmatprep.subr.mxu0 %v7176_v24  ;;  %7356 = vmatprep.subr.mxu1 %v7178_v20  ;;  %v7262_v24 = vld [vmem:[#allocation10 + $0x3b8] sm:$0xff]  ;;  %v7255_v20 = vld [vmem:[#allocation10 + $0x380] sm:$0xff] }
0x1000   : > { %7286 = vmatpush1.msra.mxu0 %v7175_v13  ;;  %7357 = vmatpush1.msra.mxu1 %v7177_v58  ;;  %v7261_v13 = vld [vmem:[#allocation10 + $0x3b0] sm:$0xff]  ;;  %v7252_v58 = vld [vmem:[#allocation10 + $0x368] sm:$0xff] }
0x1001   : > { %7287 = vmatprep.subr.mxu0 %v7172_v55  ;;  %7358 = vmatprep.subr.mxu1 %v7174_v9  ;;  %v7258_v55 = vld [vmem:[#allocation10 + $0x398] sm:$0xff]  ;;  %v7251_v9 = vld [vmem:[#allocation10 + $0x360] sm:$0xff] }
0x1002   : > { %7288 = vmatpush1.msra.mxu0 %v7171_v10  ;;  %7359 = vmatpush1.msra.mxu1 %v7173_v27  ;;  %v7257_v10 = vld [vmem:[#allocation10 + $0x390] sm:$0xff]  ;;  %v7248_v27 = vld [vmem:[#allocation10 + $0x348] sm:$0xff] }
0x1003   : > { %7289 = vmatprep.subr.mxu0 %v7168_v52  ;;  %7360 = vmatprep.subr.mxu1 %v7170_v2  ;;  %v7254_v52 = vld [vmem:[#allocation10 + $0x378] sm:$0xff]  ;;  %v7247_v2 = vld [vmem:[#allocation10 + $0x340] sm:$0xff] }
0x1004   : > { %7290 = vmatpush1.msra.mxu0 %v7167_v43  ;;  %7361 = vmatpush1.msra.mxu1 %v7169_v15  ;;  %v7253_v43 = vld [vmem:[#allocation10 + $0x370] sm:$0xff]  ;;  %v7244_v15 = vld [vmem:[#allocation10 + $0x328] sm:$0xff] }
0x1005   : > { %7291 = vmatprep.subr.mxu0 %v7164_v12  ;;  %7362 = vmatprep.subr.mxu1 %v7166_v35  ;;  %v7250_v12 = vld [vmem:[#allocation10 + $0x358] sm:$0xff]  ;;  %v7243_v35 = vld [vmem:[#allocation10 + $0x320] sm:$0xff] }
0x1006   : > { %7292 = vmatpush1.msra.mxu0 %v7163_v50  ;;  %7363 = vmatpush1.msra.mxu1 %v7165_v49  ;;  %v7249_v50 = vld [vmem:[#allocation10 + $0x350] sm:$0xff]  ;;  %v7240_v49 = vld [vmem:[#allocation10 + $0x308] sm:$0xff] }
0x1007   : > { %7293 = vmatprep.subr.mxu0 %v7160_v16  ;;  %7364 = vmatprep.subr.mxu1 %v7162_v25  ;;  %v7246_v16 = vld [vmem:[#allocation10 + $0x338] sm:$0xff]  ;;  %v7239_v25 = vld [vmem:[#allocation10 + $0x300] sm:$0xff] }
0x1008   : > { %7294 = vmatpush1.msra.mxu0 %v7159_v39  ;;  %7365 = vmatpush1.msra.mxu1 %v7161_v4  ;;  %v7245_v39 = vld [vmem:[#allocation10 + $0x330] sm:$0xff]  ;;  %v7236_v4 = vld [vmem:[#allocation10 + $0x2e8] sm:$0xff] }
0x1009   : > { %7295 = vmatprep.subr.mxu0 %v7156_v5  ;;  %7366 = vmatprep.subr.mxu1 %v7158_v3  ;;  %v7242_v5 = vld [vmem:[#allocation10 + $0x318] sm:$0xff]  ;;  %v7235_v3 = vld [vmem:[#allocation10 + $0x2e0] sm:$0xff] }
0x100a   : > { %7296 = vmatpush1.msra.mxu0 %v7155_v36  ;;  %7367 = vmatpush1.msra.mxu1 %v7157_v51  ;;  %v7241_v36 = vld [vmem:[#allocation10 + $0x310] sm:$0xff]  ;;  %v7232_v51 = vld [vmem:[#allocation10 + $0x2c8] sm:$0xff] }
0x100b   : > { %7297 = vmatprep.subr.mxu0 %v7152_v56  ;;  %7368 = vmatprep.subr.mxu1 %v7154_v48  ;;  %v7238_v56 = vld [vmem:[#allocation10 + $0x2f8] sm:$0xff]  ;;  %v7231_v48 = vld [vmem:[#allocation10 + $0x2c0] sm:$0xff] }
0x100c   : > { %7298 = vmatpush1.msra.mxu0 %v7151_v29  ;;  %7369 = vmatpush1.msra.mxu1 %v7153_v42  ;;  %v7237_v29 = vld [vmem:[#allocation10 + $0x2f0] sm:$0xff]  ;;  %v7228_v42 = vld [vmem:[#allocation10 + $0x2a8] sm:$0xff] }
0x100d   : > { %7299 = vmatprep.subr.mxu0 %v7148_v0  ;;  %7370 = vmatprep.subr.mxu1 %v7150_v45  ;;  %v7234_v0 = vld [vmem:[#allocation10 + $0x2d8] sm:$0xff]  ;;  %v7227_v45 = vld [vmem:[#allocation10 + $0x2a0] sm:$0xff] }
0x100e   : > { %7300 = vmatpush1.msra.mxu0 %v7147_v44  ;;  %7371 = vmatpush1.msra.mxu1 %v7149_v33  ;;  %v7233_v44 = vld [vmem:[#allocation10 + $0x2d0] sm:$0xff]  ;;  %v7224_v33 = vld [vmem:[#allocation10 + $0x288] sm:$0xff] }
0x100f   : > { %7301 = vmatprep.subr.mxu0 %v7144_v30  ;;  %7372 = vmatprep.subr.mxu1 %v7146_v63  ;;  %v7230_v30 = vld [vmem:[#allocation10 + $0x2b8] sm:$0xff]  ;;  %v7223_v63 = vld [vmem:[#allocation10 + $0x280] sm:$0xff] }
0x1010   : > { %7302 = vmatpush1.msra.mxu0 %v7143_v38  ;;  %7373 = vmatpush1.msra.mxu1 %v7145_v40  ;;  %v7229_v38 = vld [vmem:[#allocation10 + $0x2b0] sm:$0xff]  ;;  %v7220_v40 = vld [vmem:[#allocation10 + $0x268] sm:$0xff] }
0x1011   : > { %7303 = vmatprep.subr.mxu0 %v7268_v41  ;;  %7374 = vmatprep.subr.mxu1 %v7270_v6  ;;  %v7226_v41 = vld [vmem:[#allocation10 + $0x298] sm:$0xff]  ;;  %v7219_v6 = vld [vmem:[#allocation10 + $0x260] sm:$0xff] }
0x1012   : > { %7304 = vmatpush2.msra.mxu0 %v7267_v14  ;;  %7375 = vmatpush2.msra.mxu1 %v7269_v60  ;;  %v7225_v14 = vld [vmem:[#allocation10 + $0x290] sm:$0xff]  ;;  %v7216_v60 = vld [vmem:[#allocation10 + $0x248] sm:$0xff] }
0x1013   : > { %7305 = vmatprep.subr.mxu0 %v7264_v18  ;;  %7376 = vmatprep.subr.mxu1 %v7266_v8  ;;  %v7222_v18 = vld [vmem:[#allocation10 + $0x278] sm:$0xff]  ;;  %v7215_v8 = vld [vmem:[#allocation10 + $0x240] sm:$0xff] }
0x1014   : > { %7306 = vmatpush2.msra.mxu0 %v7263_v54  ;;  %7377 = vmatpush2.msra.mxu1 %v7265_v22  ;;  %v7221_v54 = vld [vmem:[#allocation10 + $0x270] sm:$0xff]  ;;  %v7212_v22 = vld [vmem:[#allocation10 + $0x228] sm:$0xff] }
0x1015   : > { %7307 = vmatprep.subr.mxu0 %v7260_v59  ;;  %7378 = vmatprep.subr.mxu1 %v7262_v24  ;;  %v7218_v59 = vld [vmem:[#allocation10 + $0x258] sm:$0xff]  ;;  %v7211_v24 = vld [vmem:[#allocation10 + $0x220] sm:$0xff] }
0x1016   : > { %7308 = vmatpush2.msra.mxu0 %v7259_v23  ;;  %7379 = vmatpush2.msra.mxu1 %v7261_v13  ;;  %v7217_v23 = vld [vmem:[#allocation10 + $0x250] sm:$0xff]  ;;  %v7208_v13 = vld [vmem:[#allocation10 + $0x208] sm:$0xff] }
0x1017   : > { %7309 = vmatprep.subr.mxu0 %v7256_v61  ;;  %7380 = vmatprep.subr.mxu1 %v7258_v55  ;;  %v7214_v61 = vld [vmem:[#allocation10 + $0x238] sm:$0xff]  ;;  %v7207_v55 = vld [vmem:[#allocation10 + $0x200] sm:$0xff] }
0x1018   : > { %7310 = vmatpush2.msra.mxu0 %v7255_v20  ;;  %7381 = vmatpush2.msra.mxu1 %v7257_v10  ;;  %v7213_v20 = vld [vmem:[#allocation10 + $0x230] sm:$0xff] }
0x1019   : > { %7311 = vmatprep.subr.mxu0 %v7252_v58  ;;  %7382 = vmatprep.subr.mxu1 %v7254_v52  ;;  %v7210_v58 = vld [vmem:[#allocation10 + $0x218] sm:$0xff]  ;;  %v7209_v10 = vld [vmem:[#allocation10 + $0x210] sm:$0xff] }
0x101a   : > { %7312 = vmatpush2.msra.mxu0 %v7251_v9  ;;  %7383 = vmatpush2.msra.mxu1 %v7253_v43  ;;  %v7468_v9 = vld [vmem:[%s9131_s8 + $0x78] sm:$0xff] }
0x101b   : > { %7313 = vmatprep.subr.mxu0 %v7248_v27  ;;  %7384 = vmatprep.subr.mxu1 %v7250_v12 }
0x101c   : > { %7314 = vmatpush2.msra.mxu0 %v7247_v2  ;;  %7385 = vmatpush2.msra.mxu1 %v7249_v50 }
0x101d   : > { %7315 = vmatprep.subr.mxu0 %v7244_v15  ;;  %7386 = vmatprep.subr.mxu1 %v7246_v16 }
0x101e   : > { %7316 = vmatpush2.msra.mxu0 %v7243_v35  ;;  %7387 = vmatpush2.msra.mxu1 %v7245_v39 }
0x101f   : > { %7317 = vmatprep.subr.mxu0 %v7240_v49  ;;  %7388 = vmatprep.subr.mxu1 %v7242_v5 }
0x1020   : > { %7318 = vmatpush2.msra.mxu0 %v7239_v25  ;;  %7389 = vmatpush2.msra.mxu1 %v7241_v36 }
0x1021   : > { %7319 = vmatprep.subr.mxu0 %v7236_v4  ;;  %7390 = vmatprep.subr.mxu1 %v7238_v56 }
0x1022   : > { %7320 = vmatpush2.msra.mxu0 %v7235_v3  ;;  %7391 = vmatpush2.msra.mxu1 %v7237_v29 }
0x1023   : > { %7321 = vmatprep.subr.mxu0 %v7232_v51  ;;  %7392 = vmatprep.subr.mxu1 %v7234_v0 }
0x1024   : > { %7322 = vmatpush2.msra.mxu0 %v7231_v48  ;;  %7393 = vmatpush2.msra.mxu1 %v7233_v44  ;;  %v7467_v44 = vld [vmem:[%s9131_s8 + $0x70] sm:$0xff] }
0x1025   : > { %7323 = vmatprep.subr.mxu0 %v7228_v42  ;;  %7394 = vmatprep.subr.mxu1 %v7230_v30  ;;  %v7464_v30 = vld [vmem:[%s9131_s8 + $0x58] sm:$0xff] }
0x1026   : > { %7324 = vmatpush2.msra.mxu0 %v7227_v45  ;;  %7395 = vmatpush2.msra.mxu1 %v7229_v38  ;;  %v7465_v45 = vld [vmem:[%s9131_s8 + $0x60] sm:$0xff] }
0x1027   : > { %7325 = vmatprep.subr.mxu0 %v7224_v33  ;;  %7396 = vmatprep.subr.mxu1 %v7226_v41  ;;  %v7462_v33 = vld [vmem:[%s9131_s8 + $0x48] sm:$0xff]  ;;  %v7461_v38 = vld [vmem:[%s9131_s8 + $0x40] sm:$0xff]  ;;  %v7459_v41 = vld [vmem:[%s9131_s8 + $0x30] sm:$0xff] }
0x1028   : > { %7326 = vmatpush2.msra.mxu0 %v7223_v63  ;;  %7397 = vmatpush2.msra.mxu1 %v7225_v14  ;;  %v7460_v63 = vld [vmem:[%s9131_s8 + $0x38] sm:$0xff]  ;;  %v7457_v14 = vld [vmem:[%s9131_s8 + $0x20] sm:$0xff] }
0x1029   : > { %7327 = vmatprep.subr.mxu0 %v7220_v40  ;;  %7398 = vmatprep.subr.mxu1 %v7222_v18  ;;  %v7458_v40 = vld [vmem:[%s9131_s8 + $0x28] sm:$0xff]  ;;  %v7455_v18 = vld [vmem:[%s9131_s8 + $0x10] sm:$0xff] }
0x102a   : > { %7328 = vmatpush2.msra.mxu0 %v7219_v6  ;;  %7399 = vmatpush2.msra.mxu1 %v7221_v54  ;;  %v7456_v6 = vld [vmem:[%s9131_s8 + $0x18] sm:$0xff]  ;;  %v7453_v54 = vld [vmem:[%s9131_s8] sm:$0xff] }
0x102b   : > { %7329 = vmatprep.subr.mxu0 %v7216_v60  ;;  %7400 = vmatprep.subr.mxu1 %v7218_v59  ;;  %v7454_v60 = vld [vmem:[%s9131_s8 + $0x8] sm:$0xff] }
0x102c   : > { %7330 = vmatpush2.msra.mxu0 %v7215_v8  ;;  %7401 = vmatpush2.msra.mxu1 %v7217_v23 }
0x102d   : > { %7331 = vmatprep.subr.mxu0 %v7212_v22  ;;  %7402 = vmatprep.subr.mxu1 %v7214_v61 }
0x102e   : > { %7332 = vmatpush2.msra.mxu0 %v7211_v24  ;;  %7403 = vmatpush2.msra.mxu1 %v7213_v20 }
0x102f   : > { %7333 = vmatprep.subr.mxu0 %v7208_v13  ;;  %7404 = vmatprep.subr.mxu1 %v7210_v58 }
0x1030   : > { %7334 = vmatpush2.msra.mxu0 %v7207_v55  ;;  %7405 = vmatpush2.msra.mxu1 %v7209_v10 }
0x1031   : > { %7814 = vmatprep.subr.mxu0 %v7468_v9 }
0x10b0   : > { %v7043_v52 = vpop.f32.mrf.mxu0  ;;  %v7114_v15 = vpop.f32.mrf.mxu1 }
0x10b1   : > { %v7044_v27 = vadd.f32 %v7043_v52, %v8730_v7  ;;  %v7115_v25 = vadd.f32 %v7114_v15, %v8744_v31 }
0x10b2   : > { %v7045_v43 = vpop.f32.mrf.mxu0  ;;  %v7116_v35 = vpop.f32.mrf.mxu1 }
0x10b3   : > { %v7781_v2 = vmul.f32 -1.442695, %v7044_v27  ;;  %v7046_v12 = vadd.f32 %v7045_v43, %v8735_v11  ;;  %v7117_v16 = vadd.f32 %v7116_v35, %v8740_v21 }
0x10b5   : > { %8253 = vpow2.f32 %v7781_v2  ;;  %v7782_v50 = vmul.f32 -1.442695, %v7046_v12  ;;  %v7783_v49 = vmul.f32 -1.442695, %v7117_v16 }
0x10b7   : > { %8255 = vpow2.f32 %v7782_v50 }
0x10b8   : > { %8257 = vpow2.f32 %v7783_v49 }
0x10c2   : > { %v8254_v39 = vpop.eup %8253 }
0x10c3   : > { %v7122_v5 = vadd.f32 1.0, %v8254_v39 }
0x10c4   : > { %v8256_v4 = vpop.eup %8255 }
0x10c5   : > { %8259 = vrcp.f32 %v7122_v5  ;;  %v7128_v7 = vadd.f32 1.0, %v8256_v4  ;;  %v8258_v36 = vpop.eup %8257 }
0x10c6   : > { %8261 = vtanh.f32 %v7115_v25  ;;  %v7135_v51 = vadd.f32 1.0, %v8258_v36 }
0x10c7   : > { %8263 = vrcp.f32 %v7128_v7 }
0x10c8   : > { %8265 = vrcp.f32 %v7135_v51 }
0x10d2   : > { %v8260_v11 = vpop.eup %8259 }
0x10d3   : > { %v8262_v3 = vpop.eup %8261 }
0x10d4   : > { %v8264_v56 = vpop.eup %8263  ;;  %v7139_v29 = vmul.f32 %v8262_v3, %v8260_v11 }
0x10d5   : > { %v7138_v48 = vmul.f32 %v8264_v56, %v9013_v47  ;;  %v8266_v31 = vpop.eup %8265  ;;  %v7466_v47 = vld [vmem:[%s9131_s8 + $0x68] sm:$0xff] }
0x10d7   : > { %v7140_v21 = vadd.f32 %v7139_v29, %v7138_v48 }
0x10d9   : > { %7442 = vst [vmem:[#allocation3] sm:$0xff] %v7140_v21  ;;  %8267 = vtanh.f32 %v7140_v21 }
0x10e6   : > { %v8268_v0 = vpop.eup %8267 }
0x10e7   : > { %v7142_v42 = vmul.f32 %v8268_v0, %v8266_v31 }
0x10e9   : > { %7336 = vmatmul.mubr.f32.vlgmr.msra.gmra.mxu0 %v7142_v42  ;;  %7441 = vst [vmem:[#allocation2] sm:$0xff] %v7142_v42  ;;  %7407 = vmatmul.mubr.f32.vlgmr.msra.gmra.mxu1 %v7142_v42 }
0x10ea   : > { %7815 = vmatpush3.msra.mxu0 %v7468_v9  ;;  %7846 = vmatprep.mubr.f32.mxu0 %v8792_v26  ;;  %v7463_v26 = vld [vmem:[%s9131_s8 + $0x50] sm:$0xff] }
0x10eb   : > { %7816 = vmatprep.subr.mxu0 %v7467_v44 }
0x10ec   : > { %7817 = vmatpush3.msra.mxu0 %v7467_v44 }
0x10ed   : > { %7818 = vmatprep.subr.mxu0 %v7466_v47 }
0x10ee   : > { %7819 = vmatpush3.msra.mxu0 %v7466_v47 }
0x10ef   : > { %7820 = vmatprep.subr.mxu0 %v7465_v45 }
0x10f0   : > { %7821 = vmatpush3.msra.mxu0 %v7465_v45 }
0x10f1   : > { %7822 = vmatprep.subr.mxu0 %v7464_v30 }
0x10f2   : > { %7823 = vmatpush3.msra.mxu0 %v7464_v30 }
0x10f3   : > { %7824 = vmatprep.subr.mxu0 %v7463_v26 }
0x10f4   : > { %7825 = vmatpush3.msra.mxu0 %v7463_v26 }
0x10f5   : > { %7826 = vmatprep.subr.mxu0 %v7462_v33 }
0x10f6   : > { %7827 = vmatpush3.msra.mxu0 %v7462_v33 }
0x10f7   : > { %7828 = vmatprep.subr.mxu0 %v7461_v38 }
0x10f8   : > { %7829 = vmatpush3.msra.mxu0 %v7461_v38 }
0x10f9   : > { %7830 = vmatprep.subr.mxu0 %v7460_v63 }
0x10fa   : > { %7831 = vmatpush3.msra.mxu0 %v7460_v63 }
0x10fb   : > { %7832 = vmatprep.subr.mxu0 %v7459_v41 }
0x10fc   : > { %7833 = vmatpush3.msra.mxu0 %v7459_v41 }
0x10fd   : > { %7834 = vmatprep.subr.mxu0 %v7458_v40 }
0x10fe   : > { %7835 = vmatpush3.msra.mxu0 %v7458_v40 }
0x10ff   : > { %7836 = vmatprep.subr.mxu0 %v7457_v14 }
0x1100   : > { %7837 = vmatpush3.msra.mxu0 %v7457_v14 }
0x1101   : > { %7838 = vmatprep.subr.mxu0 %v7456_v6 }
0x1102   : > { %7839 = vmatpush3.msra.mxu0 %v7456_v6 }
0x1103   : > { %7840 = vmatprep.subr.mxu0 %v7455_v18 }
0x1104   : > { %7841 = vmatpush3.msra.mxu0 %v7455_v18 }
0x1105   : > { %7842 = vmatprep.subr.mxu0 %v7454_v60 }
0x1106   : > { %7843 = vmatpush3.msra.mxu0 %v7454_v60 }
0x1107   : > { %7844 = vmatprep.subr.mxu0 %v7453_v54 }
0x1108   : > { %7845 = vmatpush3.msra.mxu0 %v7453_v54 }
0x1109   : > { %7847 = vmatmul.mubr.f32.vlgmr.msra.gmra.mxu0 %v8834_v57 }
0x110a   : > { %7849 = vmatprep.mubr.f32.mxu0 %v8876_v37 }
0x110d   : > { %7850 = vmatmul.mubr.f32.gmra.mxu0 %v8918_v62 }
0x110e   : > { %7852 = vmatprep.mubr.f32.mxu0 %v8960_v1 }
0x1111   : > { %7853 = vmatmul.mubr.f32.gmra.mxu0 %v9002_v32 }
0x1112   : > { %7855 = vmatprep.mubr.f32.mxu0 %v9040_v53 }
0x11a9   : > { %v7337_v8 = vpop.f32.mrf.mxu0  ;;  %v7408_v61 = vpop.f32.mrf.mxu1 }
0x11aa   : > { %v7338_v59 = vadd.f32 %v7337_v8, %v8767_v28  ;;  %v7409_v32 = vadd.f32 %v7408_v61, %v8774_v17 }
0x11ab   : > { %v7339_v22 = vpop.f32.mrf.mxu0  ;;  %v7410_v37 = vpop.f32.mrf.mxu1 }
0x11ac   : > { %v7784_v23 = vmul.f32 -1.442695, %v7338_v59  ;;  %v7340_v24 = vadd.f32 %v7339_v22, %v8764_v34  ;;  %v7411_v62 = vadd.f32 %v7410_v37, %v8777_v19  ;;  %v7787_v34 = vld [vmem:[%s9132_s9] ss:$0 sm:$0xff] }
0x11ae   : > { %8269 = vpow2.f32 %v7784_v23  ;;  %v7785_v57 = vmul.f32 -1.442695, %v7340_v24  ;;  %v7786_v13 = vmul.f32 -1.442695, %v7411_v62 }
0x11b0   : > { %8271 = vpow2.f32 %v7785_v57 }
0x11b1   : > { %8273 = vpow2.f32 %v7786_v13 }
0x11bb   : > { %v8270_v1 = vpop.eup %8269 }
0x11bc   : > { %v7416_v53 = vadd.f32 1.0, %v8270_v1 }
0x11bd   : > { %v8272_v20 = vpop.eup %8271 }
0x11be   : > { %8275 = vrcp.f32 %v7416_v53  ;;  %v7422_v28 = vadd.f32 1.0, %v8272_v20  ;;  %v8274_v19 = vpop.eup %8273 }
0x11bf   : > { %8277 = vtanh.f32 %v7409_v32  ;;  %v7429_v43 = vadd.f32 1.0, %v8274_v19 }
0x11c0   : > { %8279 = vrcp.f32 %v7422_v28 }
0x11c1   : > { %8281 = vrcp.f32 %v7429_v43 }
0x11c9   : > { %v7848_v55 = vpop.f32.mrf.mxu0 }
0x11ca   : > { %v7548_v58 = vadd.f32 %v7848_v55, %v7787_v34 }
0x11cb   : > { %v8276_v10 = vpop.eup %8275  ;;  %v7542_v9 = vpop.f32.mrf.mxu0 }
0x11cc   : > { %v8278_v52 = vpop.eup %8277  ;;  %7582 = vst [vmem:[%s8517_s23 + $0x8] sm:$0xff] %v7548_v58  ;;  %v7543_v17 = vadd.f32 %v7787_v34, %v7542_v9 }
0x11cd   : > { %v8280_v27 = vpop.eup %8279  ;;  %v7851_v2 = vpop.f32.mrf.mxu0  ;;  %v7433_v12 = vmul.f32 %v8278_v52, %v8276_v10 }
0x11ce   : > { %v7432_v15 = vmul.f32 %v8280_v27, %v9036_v46  ;;  %7581 = vst [vmem:[%s8517_s23] sm:$0xff] %v7543_v17  ;;  %v7558_v50 = vadd.f32 %v7851_v2, %v7787_v34  ;;  %v8282_v46 = vpop.eup %8281 }
0x11cf   : > { %v7552_v35 = vpop.f32.mrf.mxu0 }
0x11d0   : > { %7584 = vst [vmem:[%s8517_s23 + $0x18] sm:$0xff] %v7558_v50  ;;  %v7553_v16 = vadd.f32 %v7787_v34, %v7552_v35  ;;  %v7434_v49 = vadd.f32 %v7433_v12, %v7432_v15 }
0x11d1   : > { %v7854_v39 = vpop.f32.mrf.mxu0 }
0x11d2   : > { %7583 = vst [vmem:[%s8517_s23 + $0x10] sm:$0xff] %v7553_v16  ;;  %v7568_v25 = vadd.f32 %v7854_v39, %v7787_v34  ;;  %8283 = vtanh.f32 %v7434_v49  ;;  %7444 = vst [vmem:[#allocation3 + $0x10] sm:$0xff] %v7434_v49 }
0x11d3   : > { %v7562_v5 = vpop.f32.mrf.mxu0 }
0x11d4   : > { %7586 = vst [vmem:[%s8517_s23 + $0x28] sm:$0xff] %v7568_v25  ;;  %v7563_v4 = vadd.f32 %v7787_v34, %v7562_v5 }
0x11d6   : > { %7585 = vst [vmem:[%s8517_s23 + $0x20] sm:$0xff] %v7563_v4 }
0x11df   : > { %v8284_v7 = vpop.eup %8283 }
0x11e0   : > { %v7436_v36 = vmul.f32 %v8284_v7, %v8282_v46 }
0x11e2   : > { %7443 = vst [vmem:[#allocation2 + $0x8] sm:$0xff] %v7436_v36  ;;  %7856 = vmatmul.mubr.f32.gmra.mxu0 %v7436_v36 }
0x12a2   : > { %v7857_v11 = vpop.f32.mrf.mxu0 }
0x12a3   : > { %v7578_v3 = vadd.f32 %v7857_v11, %v7787_v34 }
0x12a4   : > { %v7572_v56 = vpop.f32.mrf.mxu0 }
0x12a5   : > { %7588 = vst [vmem:[%s8517_s23 + $0x38] sm:$0xff] %v7578_v3  ;;  %v7573_v51 = vadd.f32 %v7787_v34, %v7572_v56 }
0x12a7   : > { %7587 = vst [vmem:[%s8517_s23 + $0x30] sm:$0xff] %v7573_v51 }
0x12a8 PF: > { %s22_s13 = sadd.s32 1, %s8377_s13  }
0x12a9   : > { %p19_p3 = scmp.ge.s32.totalorder %s22_s13, 4  }
0x12ab   :  { %21 = sbr.rel (!%p19_p3) target bundleno = 2 (0x2), region = 126 }
0x12b0   :  { %7611 = vsyncpa [#allocation7], 1 }
0x12b1   :  { %7613 = vsyncpa [#allocation7 + $0x1], 1 }
0x12b2   :  { %7614 = vsyncpa [#allocation9], 1 }

</bundles_post_ra>
